<compile_context>
chip_gen: v7x
topology: tpu7x:2x2x1
jax: 0.10.0
libtpu: 0.0.40
codegen_flags: <defaults>
</compile_context>

<pallas_src>
import jax
import jax.numpy as jnp
from jax import lax
from jax.experimental import pallas as pl
from jax.experimental.pallas import tpu as pltpu

H_IN, W_IN = 16, 16
H1, W1 = H_IN, W_IN          # after conv1 (pad=1)
HP, WP = 7, 7                # after maxpool(3, stride 2)
H2, W2 = 5, 5                # after conv2 (valid 3x3)
H3, W3 = 3, 3                # after conv3 (valid 3x3)
N_HEAD = 5                   # 1 cond + 4 offsets (heads fused)


def _im2col_3x3(x, h_out, w_out, cin):
    """x: (B, H, W, Cin) -> (B*h_out*w_out, 9*Cin); column order (ky, kx, cin)
    matches a row-major reshape of an HWIO weight to (9*Cin, Cout)."""
    b = x.shape[0]
    cols = [x[:, ky:ky + h_out, kx:kx + w_out, :].reshape(b * h_out * w_out, cin)
            for ky in range(3) for kx in range(3)]
    return jnp.concatenate(cols, axis=1)


def pnet_kernel(alpha_ref,                 # SMEM (3,) PReLU slopes
                x_ref,                     # (B, 16, 16, 3) NHWC, unpadded
                w1_ref, b1_ref,            # (27, 10), (1, 10)
                w2_ref, b2_ref,            # (90, 16), (1, 16)
                w3_ref, b3_ref,            # (144, 32), (1, 32)
                wh_ref, bh_ref,            # (32, 5), (1, 5)  fused heads
                out_ref,                   # (B, 45) = 9 pixels x [cond, off0..3]
                xpad_ref):                 # VMEM scratch (B, 18, 18, 3)
    a1 = alpha_ref[0]
    a2 = alpha_ref[1]
    a3 = alpha_ref[2]
    b = x_ref.shape[0]

    # ---- conv1 padding=1 fused in-kernel (zero border + interior copy) ----
    xpad_ref[...] = jnp.zeros_like(xpad_ref)
    xpad_ref[:, 1:H1 + 1, 1:W1 + 1, :] = x_ref[...]
    xp = xpad_ref[...]                                     # (B, 18, 18, 3)

    # ---- conv1: im2col (B*256, 27) @ (27, 10) -> PReLU ----
    col1 = _im2col_3x3(xp, H1, W1, 3)
    h1 = jnp.dot(col1, w1_ref[...], preferred_element_type=jnp.float32) + b1_ref[...]
    h1 = jnp.where(h1 > 0, h1, a1 * h1).reshape(b, H1, W1, 10)

    # ---- maxpool 3x3 stride 2 -> (B, 7, 7, 10): slab maxima + stride-2 pick ----
    rowmax = jnp.maximum(jnp.maximum(h1[:, 0:H1 - 2], h1[:, 1:H1 - 1]), h1[:, 2:H1])
    rows = jnp.concatenate([rowmax[:, 2 * i:2 * i + 1] for i in range(HP)], axis=1)
    colmax = jnp.maximum(jnp.maximum(rows[:, :, 0:W1 - 2], rows[:, :, 1:W1 - 1]),
                         rows[:, :, 2:W1])
    hp = jnp.concatenate([colmax[:, :, 2 * j:2 * j + 1] for j in range(WP)], axis=2)

    # ---- conv2: (B*25, 90) @ (90, 16) -> PReLU ----
    col2 = _im2col_3x3(hp, H2, W2, 10)
    h2 = jnp.dot(col2, w2_ref[...], preferred_element_type=jnp.float32) + b2_ref[...]
    h2 = jnp.where(h2 > 0, h2, a2 * h2).reshape(b, H2, W2, 16)

    # ---- conv3: (B*9, 144) @ (144, 32) -> PReLU ----
    col3 = _im2col_3x3(h2, H3, W3, 16)
    h3 = jnp.dot(col3, w3_ref[...], preferred_element_type=jnp.float32) + b3_ref[...]
    h3 = jnp.where(h3 > 0, h3, a3 * h3)                    # (B*9, 32)

    # ---- fused 1x1 heads: (B*9, 32) @ (32, 5); sigmoid on column 0 only ----
    heads = jnp.dot(h3, wh_ref[...], preferred_element_type=jnp.float32) + bh_ref[...]
    heads = jnp.concatenate([jax.nn.sigmoid(heads[:, 0:1]), heads[:, 1:]], axis=1)
    h5 = heads.reshape(b, H3 * W3, N_HEAD)                 # (B, 9, 5)
    # lane-dense combined store: out[b, 5*p + c]
    out_ref[...] = jnp.concatenate([h5[:, p, :] for p in range(H3 * W3)], axis=1)


def init_params(key):
    ks = jax.random.split(key, 10)
    p = {
        "w1": 0.1 * jax.random.normal(ks[0], (3, 3, 3, 10), jnp.float32),    # HWIO
        "b1": 0.1 * jax.random.normal(ks[1], (10,), jnp.float32),
        "w2": 0.1 * jax.random.normal(ks[2], (3, 3, 10, 16), jnp.float32),
        "b2": 0.1 * jax.random.normal(ks[3], (16,), jnp.float32),
        "w3": 0.1 * jax.random.normal(ks[4], (3, 3, 16, 32), jnp.float32),
        "b3": 0.1 * jax.random.normal(ks[5], (32,), jnp.float32),
        "w41": 0.1 * jax.random.normal(ks[6], (32, 1), jnp.float32),
        "b41": 0.1 * jax.random.normal(ks[7], (1,), jnp.float32),
        "w42": 0.1 * jax.random.normal(ks[8], (32, 4), jnp.float32),
        "b42": 0.1 * jax.random.normal(ks[9], (4,), jnp.float32),
        # nn.PReLU() default: one shared slope, init 0.25
        "a1": jnp.float32(0.25), "a2": jnp.float32(0.25), "a3": jnp.float32(0.25),
    }
    return p


def pnet_forward(x_nchw, params, b_tile=128):
    """x_nchw: (N, 3, 16, 16) float32 -> (cond (N,1,3,3), offset (N,4,3,3))."""
    n = x_nchw.shape[0]

    bt = min(b_tile, n)
    if bt < n:                           # when tiling, keep batch tile a multiple of 8
        bt = max(8, (bt // 8) * 8)
    n_blocks = pl.cdiv(n, bt)
    n_pad = n_blocks * bt

    # Single NCHW->NHWC transpose to keep the PyTorch interface; pad is fused
    # into the kernel, so no wrapper-side jnp.pad HBM round-trip.
    x = jnp.transpose(x_nchw, (0, 2, 3, 1)).astype(jnp.float32)
    if n_pad != n:
        x = jnp.pad(x, ((0, n_pad - n), (0, 0), (0, 0), (0, 0)))

    # Host-side (one-time) weight layout work: HWIO -> (9*Cin, Cout) rows in
    # (ky, kx, cin) order to match im2col columns; heads fused to (32, 5).
    w1 = params["w1"].reshape(9 * 3, 10)
    w2 = params["w2"].reshape(9 * 10, 16)
    w3 = params["w3"].reshape(9 * 16, 32)
    wh = jnp.concatenate([params["w41"], params["w42"]], axis=1)         # (32, 5)
    b1 = params["b1"].reshape(1, 10)
    b2 = params["b2"].reshape(1, 16)
    b3 = params["b3"].reshape(1, 32)
    bh = jnp.concatenate([params["b41"], params["b42"]]).reshape(1, N_HEAD)
    alphas = jnp.stack([params["a1"], params["a2"], params["a3"]]).astype(jnp.float32)

    full = lambda shape: pl.BlockSpec(shape, lambda i: (0,) * len(shape))

    out = pl.pallas_call(
        pnet_kernel,
        out_shape=jax.ShapeDtypeStruct((n_pad, H3 * W3 * N_HEAD), jnp.float32),
        grid=(n_blocks,),
        in_specs=[
            pl.BlockSpec(memory_space=pltpu.MemorySpace.SMEM),            # PReLU slopes
            pl.BlockSpec((bt, H_IN, W_IN, 3), lambda i: (i, 0, 0, 0)),    # batch tile
            full((9 * 3, 10)), full((1, 10)),
            full((9 * 10, 16)), full((1, 16)),
            full((9 * 16, 32)), full((1, 32)),
            full((32, N_HEAD)), full((1, N_HEAD)),
        ],
        out_specs=pl.BlockSpec((bt, H3 * W3 * N_HEAD), lambda i: (i, 0)),
        scratch_shapes=[pltpu.VMEM((bt, H_IN + 2, W_IN + 2, 3), jnp.float32)],
        compiler_params=pltpu.CompilerParams(
            dimension_semantics=("parallel",),
            vmem_limit_bytes=32 * 1024 * 1024),
    )(alphas, x, w1, b1, w2, b2, w3, b3, wh, bh)

    out = out[:n].reshape(n, H3, W3, N_HEAD)
    cond = jnp.transpose(out[..., 0:1], (0, 3, 1, 2))
    offset = jnp.transpose(out[..., 1:], (0, 3, 1, 2))
    return cond, offset


def pnet_reference(x_nchw, p):
    """Plain-JAX reference mirroring the PyTorch forward (NHWC internally)."""
    dn = ("NHWC", "HWIO", "NHWC")
    x = jnp.transpose(x_nchw, (0, 2, 3, 1))
    h = lax.conv_general_dilated(x, p["w1"], (1, 1), ((1, 1), (1, 1)),
                                 dimension_numbers=dn) + p["b1"]
    h = jnp.where(h > 0, h, p["a1"] * h)
    h = lax.reduce_window(h, -jnp.inf, lax.max, (1, 3, 3, 1), (1, 2, 2, 1), "VALID")
    h = lax.conv_general_dilated(h, p["w2"], (1, 1), "VALID",
                                 dimension_numbers=dn) + p["b2"]
    h = jnp.where(h > 0, h, p["a2"] * h)
    h = lax.conv_general_dilated(h, p["w3"], (1, 1), "VALID",
                                 dimension_numbers=dn) + p["b3"]
    h = jnp.where(h > 0, h, p["a3"] * h)
    cond = jax.nn.sigmoid(
        lax.conv_general_dilated(h, p["w41"].reshape(1, 1, 32, 1), (1, 1), "VALID",
                                 dimension_numbers=dn) + p["b41"])
    off = lax.conv_general_dilated(h, p["w42"].reshape(1, 1, 32, 4), (1, 1), "VALID",
                                   dimension_numbers=dn) + p["b42"]
    return jnp.transpose(cond, (0, 3, 1, 2)), jnp.transpose(off, (0, 3, 1, 2))


if __name__ == "__main__":
    key = jax.random.PRNGKey(0)
    k_x, k_p = jax.random.split(key)
    x = jax.random.normal(k_x, (2, 3, H_IN, W_IN), jnp.float32)   # NCHW like PyTorch
    params = init_params(k_p)

    cond, off = pnet_forward(x, params)
    jax.block_until_ready((cond, off))

    cond_ref, off_ref = pnet_reference(x, params)
    assert cond.shape == (2, 1, 3, 3) and off.shape == (2, 4, 3, 3)
    assert jnp.allclose(cond, cond_ref, atol=1e-4, rtol=1e-4)
    assert jnp.allclose(off, off_ref, atol=1e-4, rtol=1e-4)

    print("KERNEL_OK")
</pallas_src>

<mosaic_0001>
module attributes {stable_mosaic.version = 11 : i64} {
  func.func @pnet_kernel(%arg0: i32, %arg1: memref<3xf32, #tpu.memory_space<smem>>, %arg2: memref<2x16x16x3xf32, #tpu.memory_space<vmem>>, %arg3: memref<27x10xf32, #tpu.memory_space<vmem>>, %arg4: memref<1x10xf32, #tpu.memory_space<vmem>>, %arg5: memref<90x16xf32, #tpu.memory_space<vmem>>, %arg6: memref<1x16xf32, #tpu.memory_space<vmem>>, %arg7: memref<144x32xf32, #tpu.memory_space<vmem>>, %arg8: memref<1x32xf32, #tpu.memory_space<vmem>>, %arg9: memref<32x5xf32, #tpu.memory_space<vmem>>, %arg10: memref<1x5xf32, #tpu.memory_space<vmem>>, %arg11: memref<2x45xf32, #tpu.memory_space<vmem>>, %arg12: memref<2x18x18x3xf32, #tpu.memory_space<vmem>>) attributes {dimension_semantics = [#tpu.dimension_semantics<parallel>], iteration_bounds = array<i64: 1>, scalar_prefetch = 0 : i64, scratch_operands = 1 : i64, tpu.core_type = #tpu.core_type<tc>, window_params = [{transform_indices = @transform_0, window_bounds = array<i64: 3>}, {transform_indices = @transform_1, window_bounds = array<i64: 2, 16, 16, 3>}, {pipeline_mode = #tpu.pipeline_mode<synchronous>, transform_indices = @transform_2, window_bounds = array<i64: 27, 10>}, {pipeline_mode = #tpu.pipeline_mode<synchronous>, transform_indices = @transform_3, window_bounds = array<i64: 1, 10>}, {pipeline_mode = #tpu.pipeline_mode<synchronous>, transform_indices = @transform_4, window_bounds = array<i64: 90, 16>}, {pipeline_mode = #tpu.pipeline_mode<synchronous>, transform_indices = @transform_5, window_bounds = array<i64: 1, 16>}, {pipeline_mode = #tpu.pipeline_mode<synchronous>, transform_indices = @transform_6, window_bounds = array<i64: 144, 32>}, {pipeline_mode = #tpu.pipeline_mode<synchronous>, transform_indices = @transform_7, window_bounds = array<i64: 1, 32>}, {pipeline_mode = #tpu.pipeline_mode<synchronous>, transform_indices = @transform_8, window_bounds = array<i64: 32, 5>}, {pipeline_mode = #tpu.pipeline_mode<synchronous>, transform_indices = @transform_9, window_bounds = array<i64: 1, 5>}, {transform_indices = @transform_10, window_bounds = array<i64: 2, 45>}]} {
    %c0 = arith.constant 0 : index
    %0 = memref.load %arg1[%c0] : memref<3xf32, #tpu.memory_space<smem>>
    %c1 = arith.constant 1 : index
    %1 = memref.load %arg1[%c1] : memref<3xf32, #tpu.memory_space<smem>>
    %c2 = arith.constant 2 : index
    %2 = memref.load %arg1[%c2] : memref<3xf32, #tpu.memory_space<smem>>
    %cst = arith.constant 0.000000e+00 : f32
    %3 = vector.broadcast %cst : f32 to vector<2x18x18x3xf32>
    %c0_0 = arith.constant 0 : index
    %c0_1 = arith.constant 0 : index
    %c0_2 = arith.constant 0 : index
    %c0_3 = arith.constant 0 : index
    %4 = vector.load %arg12[%c0_0, %c0_1, %c0_2, %c0_3] : memref<2x18x18x3xf32, #tpu.memory_space<vmem>>, vector<2x18x18x3xf32>
    tpu.vector_store %arg12[%c0_0, %c0_1, %c0_2, %c0_3], %3 {strides = array<i32>} : memref<2x18x18x3xf32, #tpu.memory_space<vmem>>, vector<2x18x18x3xf32>,
    %c0_4 = arith.constant 0 : index
    %c0_5 = arith.constant 0 : index
    %c0_6 = arith.constant 0 : index
    %c0_7 = arith.constant 0 : index
    %5 = vector.load %arg2[%c0_4, %c0_5, %c0_6, %c0_7] : memref<2x16x16x3xf32, #tpu.memory_space<vmem>>, vector<2x16x16x3xf32>
    %c0_8 = arith.constant 0 : index
    %c1_9 = arith.constant 1 : index
    %c1_10 = arith.constant 1 : index
    %c0_11 = arith.constant 0 : index
    %6 = vector.load %arg12[%c0_8, %c1_9, %c1_10, %c0_11] : memref<2x18x18x3xf32, #tpu.memory_space<vmem>>, vector<2x16x16x3xf32>
    tpu.vector_store %arg12[%c0_8, %c1_9, %c1_10, %c0_11], %5 {strides = array<i32>} : memref<2x18x18x3xf32, #tpu.memory_space<vmem>>, vector<2x16x16x3xf32>,
    %c0_12 = arith.constant 0 : index
    %c0_13 = arith.constant 0 : index
    %c0_14 = arith.constant 0 : index
    %c0_15 = arith.constant 0 : index
    %7 = vector.load %arg12[%c0_12, %c0_13, %c0_14, %c0_15] : memref<2x18x18x3xf32, #tpu.memory_space<vmem>>, vector<2x18x18x3xf32>
    %8 = vector.extract_strided_slice %7 {offsets = [0, 0, 0, 0], sizes = [2, 16, 16, 3], strides = [1, 1, 1, 1]} : vector<2x18x18x3xf32> to vector<2x16x16x3xf32>
    %9 = vector.shape_cast %8 : vector<2x16x16x3xf32> to vector<512x3xf32>
    %10 = vector.extract_strided_slice %7 {offsets = [0, 0, 1, 0], sizes = [2, 16, 16, 3], strides = [1, 1, 1, 1]} : vector<2x18x18x3xf32> to vector<2x16x16x3xf32>
    %11 = vector.shape_cast %10 : vector<2x16x16x3xf32> to vector<512x3xf32>
    %12 = vector.extract_strided_slice %7 {offsets = [0, 0, 2, 0], sizes = [2, 16, 16, 3], strides = [1, 1, 1, 1]} : vector<2x18x18x3xf32> to vector<2x16x16x3xf32>
    %13 = vector.shape_cast %12 : vector<2x16x16x3xf32> to vector<512x3xf32>
    %14 = vector.extract_strided_slice %7 {offsets = [0, 1, 0, 0], sizes = [2, 16, 16, 3], strides = [1, 1, 1, 1]} : vector<2x18x18x3xf32> to vector<2x16x16x3xf32>
    %15 = vector.shape_cast %14 : vector<2x16x16x3xf32> to vector<512x3xf32>
    %16 = vector.extract_strided_slice %7 {offsets = [0, 1, 1, 0], sizes = [2, 16, 16, 3], strides = [1, 1, 1, 1]} : vector<2x18x18x3xf32> to vector<2x16x16x3xf32>
    %17 = vector.shape_cast %16 : vector<2x16x16x3xf32> to vector<512x3xf32>
    %18 = vector.extract_strided_slice %7 {offsets = [0, 1, 2, 0], sizes = [2, 16, 16, 3], strides = [1, 1, 1, 1]} : vector<2x18x18x3xf32> to vector<2x16x16x3xf32>
    %19 = vector.shape_cast %18 : vector<2x16x16x3xf32> to vector<512x3xf32>
    %20 = vector.extract_strided_slice %7 {offsets = [0, 2, 0, 0], sizes = [2, 16, 16, 3], strides = [1, 1, 1, 1]} : vector<2x18x18x3xf32> to vector<2x16x16x3xf32>
    %21 = vector.shape_cast %20 : vector<2x16x16x3xf32> to vector<512x3xf32>
    %22 = vector.extract_strided_slice %7 {offsets = [0, 2, 1, 0], sizes = [2, 16, 16, 3], strides = [1, 1, 1, 1]} : vector<2x18x18x3xf32> to vector<2x16x16x3xf32>
    %23 = vector.shape_cast %22 : vector<2x16x16x3xf32> to vector<512x3xf32>
    %24 = vector.extract_strided_slice %7 {offsets = [0, 2, 2, 0], sizes = [2, 16, 16, 3], strides = [1, 1, 1, 1]} : vector<2x18x18x3xf32> to vector<2x16x16x3xf32>
    %25 = vector.shape_cast %24 : vector<2x16x16x3xf32> to vector<512x3xf32>
    %26 = tpu.concatenate %9, %11, %13, %15, %17, %19, %21, %23, %25 in 1 : vector<512x3xf32>, vector<512x3xf32>, vector<512x3xf32>, vector<512x3xf32>, vector<512x3xf32>, vector<512x3xf32>, vector<512x3xf32>, vector<512x3xf32>, vector<512x3xf32> -> vector<512x27xf32>
    %c0_16 = arith.constant 0 : index
    %c0_17 = arith.constant 0 : index
    %27 = vector.load %arg3[%c0_16, %c0_17] : memref<27x10xf32, #tpu.memory_space<vmem>>, vector<27x10xf32>
    %cst_18 = arith.constant dense<0.000000e+00> : vector<512x10xf32>
    %28 = tpu.matmul %26, %27, %cst_18 {dimension_numbers = #tpu.dot_dimension_numbers<[1], [0], [0], [1], [0, 0, 1, 1], [], []>} : vector<512x27xf32>, vector<27x10xf32>, vector<512x10xf32> -> vector<512x10xf32>
    %c0_19 = arith.constant 0 : index
    %c0_20 = arith.constant 0 : index
    %29 = vector.load %arg4[%c0_19, %c0_20] : memref<1x10xf32, #tpu.memory_space<vmem>>, vector<1x10xf32>
    %30 = vector.broadcast %29 : vector<1x10xf32> to vector<512x10xf32>
    %31 = arith.addf %28, %30 : vector<512x10xf32>
    %cst_21 = arith.constant 0.000000e+00 : f32
    %32 = vector.broadcast %cst_21 : f32 to vector<512x10xf32>
    %33 = arith.cmpf ogt, %31, %32 : vector<512x10xf32>
    %34 = vector.broadcast %0 : f32 to vector<512x10xf32>
    %35 = arith.mulf %34, %31 : vector<512x10xf32>
    %36 = arith.select %33, %31, %35 : vector<512x10xi1>, vector<512x10xf32>
    %37 = vector.shape_cast %36 : vector<512x10xf32> to vector<2x16x16x10xf32>
    %38 = vector.extract_strided_slice %37 {offsets = [0, 0, 0, 0], sizes = [2, 14, 16, 10], strides = [1, 1, 1, 1]} : vector<2x16x16x10xf32> to vector<2x14x16x10xf32>
    %39 = vector.extract_strided_slice %37 {offsets = [0, 1, 0, 0], sizes = [2, 14, 16, 10], strides = [1, 1, 1, 1]} : vector<2x16x16x10xf32> to vector<2x14x16x10xf32>
    %40 = arith.maximumf %38, %39 : vector<2x14x16x10xf32>
    %41 = vector.extract_strided_slice %37 {offsets = [0, 2, 0, 0], sizes = [2, 14, 16, 10], strides = [1, 1, 1, 1]} : vector<2x16x16x10xf32> to vector<2x14x16x10xf32>
    %42 = arith.maximumf %40, %41 : vector<2x14x16x10xf32>
    %43 = vector.extract_strided_slice %42 {offsets = [0, 0, 0, 0], sizes = [2, 1, 16, 10], strides = [1, 1, 1, 1]} : vector<2x14x16x10xf32> to vector<2x1x16x10xf32>
    %44 = vector.extract_strided_slice %42 {offsets = [0, 2, 0, 0], sizes = [2, 1, 16, 10], strides = [1, 1, 1, 1]} : vector<2x14x16x10xf32> to vector<2x1x16x10xf32>
    %45 = vector.extract_strided_slice %42 {offsets = [0, 4, 0, 0], sizes = [2, 1, 16, 10], strides = [1, 1, 1, 1]} : vector<2x14x16x10xf32> to vector<2x1x16x10xf32>
    %46 = vector.extract_strided_slice %42 {offsets = [0, 6, 0, 0], sizes = [2, 1, 16, 10], strides = [1, 1, 1, 1]} : vector<2x14x16x10xf32> to vector<2x1x16x10xf32>
    %47 = vector.extract_strided_slice %42 {offsets = [0, 8, 0, 0], sizes = [2, 1, 16, 10], strides = [1, 1, 1, 1]} : vector<2x14x16x10xf32> to vector<2x1x16x10xf32>
    %48 = vector.extract_strided_slice %42 {offsets = [0, 10, 0, 0], sizes = [2, 1, 16, 10], strides = [1, 1, 1, 1]} : vector<2x14x16x10xf32> to vector<2x1x16x10xf32>
    %49 = vector.extract_strided_slice %42 {offsets = [0, 12, 0, 0], sizes = [2, 1, 16, 10], strides = [1, 1, 1, 1]} : vector<2x14x16x10xf32> to vector<2x1x16x10xf32>
    %50 = tpu.concatenate %43, %44, %45, %46, %47, %48, %49 in 1 : vector<2x1x16x10xf32>, vector<2x1x16x10xf32>, vector<2x1x16x10xf32>, vector<2x1x16x10xf32>, vector<2x1x16x10xf32>, vector<2x1x16x10xf32>, vector<2x1x16x10xf32> -> vector<2x7x16x10xf32>
    %51 = vector.extract_strided_slice %50 {offsets = [0, 0, 0, 0], sizes = [2, 7, 14, 10], strides = [1, 1, 1, 1]} : vector<2x7x16x10xf32> to vector<2x7x14x10xf32>
    %52 = vector.extract_strided_slice %50 {offsets = [0, 0, 1, 0], sizes = [2, 7, 14, 10], strides = [1, 1, 1, 1]} : vector<2x7x16x10xf32> to vector<2x7x14x10xf32>
    %53 = arith.maximumf %51, %52 : vector<2x7x14x10xf32>
    %54 = vector.extract_strided_slice %50 {offsets = [0, 0, 2, 0], sizes = [2, 7, 14, 10], strides = [1, 1, 1, 1]} : vector<2x7x16x10xf32> to vector<2x7x14x10xf32>
    %55 = arith.maximumf %53, %54 : vector<2x7x14x10xf32>
    %56 = vector.extract_strided_slice %55 {offsets = [0, 0, 0, 0], sizes = [2, 7, 1, 10], strides = [1, 1, 1, 1]} : vector<2x7x14x10xf32> to vector<2x7x1x10xf32>
    %57 = vector.extract_strided_slice %55 {offsets = [0, 0, 2, 0], sizes = [2, 7, 1, 10], strides = [1, 1, 1, 1]} : vector<2x7x14x10xf32> to vector<2x7x1x10xf32>
    %58 = vector.extract_strided_slice %55 {offsets = [0, 0, 4, 0], sizes = [2, 7, 1, 10], strides = [1, 1, 1, 1]} : vector<2x7x14x10xf32> to vector<2x7x1x10xf32>
    %59 = vector.extract_strided_slice %55 {offsets = [0, 0, 6, 0], sizes = [2, 7, 1, 10], strides = [1, 1, 1, 1]} : vector<2x7x14x10xf32> to vector<2x7x1x10xf32>
    %60 = vector.extract_strided_slice %55 {offsets = [0, 0, 8, 0], sizes = [2, 7, 1, 10], strides = [1, 1, 1, 1]} : vector<2x7x14x10xf32> to vector<2x7x1x10xf32>
    %61 = vector.extract_strided_slice %55 {offsets = [0, 0, 10, 0], sizes = [2, 7, 1, 10], strides = [1, 1, 1, 1]} : vector<2x7x14x10xf32> to vector<2x7x1x10xf32>
    %62 = vector.extract_strided_slice %55 {offsets = [0, 0, 12, 0], sizes = [2, 7, 1, 10], strides = [1, 1, 1, 1]} : vector<2x7x14x10xf32> to vector<2x7x1x10xf32>
    %63 = tpu.concatenate %56, %57, %58, %59, %60, %61, %62 in 2 : vector<2x7x1x10xf32>, vector<2x7x1x10xf32>, vector<2x7x1x10xf32>, vector<2x7x1x10xf32>, vector<2x7x1x10xf32>, vector<2x7x1x10xf32>, vector<2x7x1x10xf32> -> vector<2x7x7x10xf32>
    %64 = vector.extract_strided_slice %63 {offsets = [0, 0, 0, 0], sizes = [2, 5, 5, 10], strides = [1, 1, 1, 1]} : vector<2x7x7x10xf32> to vector<2x5x5x10xf32>
    %65 = vector.shape_cast %64 : vector<2x5x5x10xf32> to vector<50x10xf32>
    %66 = vector.extract_strided_slice %63 {offsets = [0, 0, 1, 0], sizes = [2, 5, 5, 10], strides = [1, 1, 1, 1]} : vector<2x7x7x10xf32> to vector<2x5x5x10xf32>
    %67 = vector.shape_cast %66 : vector<2x5x5x10xf32> to vector<50x10xf32>
    %68 = vector.extract_strided_slice %63 {offsets = [0, 0, 2, 0], sizes = [2, 5, 5, 10], strides = [1, 1, 1, 1]} : vector<2x7x7x10xf32> to vector<2x5x5x10xf32>
    %69 = vector.shape_cast %68 : vector<2x5x5x10xf32> to vector<50x10xf32>
    %70 = vector.extract_strided_slice %63 {offsets = [0, 1, 0, 0], sizes = [2, 5, 5, 10], strides = [1, 1, 1, 1]} : vector<2x7x7x10xf32> to vector<2x5x5x10xf32>
    %71 = vector.shape_cast %70 : vector<2x5x5x10xf32> to vector<50x10xf32>
    %72 = vector.extract_strided_slice %63 {offsets = [0, 1, 1, 0], sizes = [2, 5, 5, 10], strides = [1, 1, 1, 1]} : vector<2x7x7x10xf32> to vector<2x5x5x10xf32>
    %73 = vector.shape_cast %72 : vector<2x5x5x10xf32> to vector<50x10xf32>
    %74 = vector.extract_strided_slice %63 {offsets = [0, 1, 2, 0], sizes = [2, 5, 5, 10], strides = [1, 1, 1, 1]} : vector<2x7x7x10xf32> to vector<2x5x5x10xf32>
    %75 = vector.shape_cast %74 : vector<2x5x5x10xf32> to vector<50x10xf32>
    %76 = vector.extract_strided_slice %63 {offsets = [0, 2, 0, 0], sizes = [2, 5, 5, 10], strides = [1, 1, 1, 1]} : vector<2x7x7x10xf32> to vector<2x5x5x10xf32>
    %77 = vector.shape_cast %76 : vector<2x5x5x10xf32> to vector<50x10xf32>
    %78 = vector.extract_strided_slice %63 {offsets = [0, 2, 1, 0], sizes = [2, 5, 5, 10], strides = [1, 1, 1, 1]} : vector<2x7x7x10xf32> to vector<2x5x5x10xf32>
    %79 = vector.shape_cast %78 : vector<2x5x5x10xf32> to vector<50x10xf32>
    %80 = vector.extract_strided_slice %63 {offsets = [0, 2, 2, 0], sizes = [2, 5, 5, 10], strides = [1, 1, 1, 1]} : vector<2x7x7x10xf32> to vector<2x5x5x10xf32>
    %81 = vector.shape_cast %80 : vector<2x5x5x10xf32> to vector<50x10xf32>
    %82 = tpu.concatenate %65, %67, %69, %71, %73, %75, %77, %79, %81 in 1 : vector<50x10xf32>, vector<50x10xf32>, vector<50x10xf32>, vector<50x10xf32>, vector<50x10xf32>, vector<50x10xf32>, vector<50x10xf32>, vector<50x10xf32>, vector<50x10xf32> -> vector<50x90xf32>
    %c0_22 = arith.constant 0 : index
    %c0_23 = arith.constant 0 : index
    %83 = vector.load %arg5[%c0_22, %c0_23] : memref<90x16xf32, #tpu.memory_space<vmem>>, vector<90x16xf32>
    %cst_24 = arith.constant dense<0.000000e+00> : vector<50x16xf32>
    %84 = tpu.matmul %82, %83, %cst_24 {dimension_numbers = #tpu.dot_dimension_numbers<[1], [0], [0], [1], [0, 0, 1, 1], [], []>} : vector<50x90xf32>, vector<90x16xf32>, vector<50x16xf32> -> vector<50x16xf32>
    %c0_25 = arith.constant 0 : index
    %c0_26 = arith.constant 0 : index
    %85 = vector.load %arg6[%c0_25, %c0_26] : memref<1x16xf32, #tpu.memory_space<vmem>>, vector<1x16xf32>
    %86 = vector.broadcast %85 : vector<1x16xf32> to vector<50x16xf32>
    %87 = arith.addf %84, %86 : vector<50x16xf32>
    %cst_27 = arith.constant 0.000000e+00 : f32
    %88 = vector.broadcast %cst_27 : f32 to vector<50x16xf32>
    %89 = arith.cmpf ogt, %87, %88 : vector<50x16xf32>
    %90 = vector.broadcast %1 : f32 to vector<50x16xf32>
    %91 = arith.mulf %90, %87 : vector<50x16xf32>
    %92 = arith.select %89, %87, %91 : vector<50x16xi1>, vector<50x16xf32>
    %93 = vector.shape_cast %92 : vector<50x16xf32> to vector<2x5x5x16xf32>
    %94 = vector.extract_strided_slice %93 {offsets = [0, 0, 0, 0], sizes = [2, 3, 3, 16], strides = [1, 1, 1, 1]} : vector<2x5x5x16xf32> to vector<2x3x3x16xf32>
    %95 = vector.shape_cast %94 : vector<2x3x3x16xf32> to vector<18x16xf32>
    %96 = vector.extract_strided_slice %93 {offsets = [0, 0, 1, 0], sizes = [2, 3, 3, 16], strides = [1, 1, 1, 1]} : vector<2x5x5x16xf32> to vector<2x3x3x16xf32>
    %97 = vector.shape_cast %96 : vector<2x3x3x16xf32> to vector<18x16xf32>
    %98 = vector.extract_strided_slice %93 {offsets = [0, 0, 2, 0], sizes = [2, 3, 3, 16], strides = [1, 1, 1, 1]} : vector<2x5x5x16xf32> to vector<2x3x3x16xf32>
    %99 = vector.shape_cast %98 : vector<2x3x3x16xf32> to vector<18x16xf32>
    %100 = vector.extract_strided_slice %93 {offsets = [0, 1, 0, 0], sizes = [2, 3, 3, 16], strides = [1, 1, 1, 1]} : vector<2x5x5x16xf32> to vector<2x3x3x16xf32>
    %101 = vector.shape_cast %100 : vector<2x3x3x16xf32> to vector<18x16xf32>
    %102 = vector.extract_strided_slice %93 {offsets = [0, 1, 1, 0], sizes = [2, 3, 3, 16], strides = [1, 1, 1, 1]} : vector<2x5x5x16xf32> to vector<2x3x3x16xf32>
    %103 = vector.shape_cast %102 : vector<2x3x3x16xf32> to vector<18x16xf32>
    %104 = vector.extract_strided_slice %93 {offsets = [0, 1, 2, 0], sizes = [2, 3, 3, 16], strides = [1, 1, 1, 1]} : vector<2x5x5x16xf32> to vector<2x3x3x16xf32>
    %105 = vector.shape_cast %104 : vector<2x3x3x16xf32> to vector<18x16xf32>
    %106 = vector.extract_strided_slice %93 {offsets = [0, 2, 0, 0], sizes = [2, 3, 3, 16], strides = [1, 1, 1, 1]} : vector<2x5x5x16xf32> to vector<2x3x3x16xf32>
    %107 = vector.shape_cast %106 : vector<2x3x3x16xf32> to vector<18x16xf32>
    %108 = vector.extract_strided_slice %93 {offsets = [0, 2, 1, 0], sizes = [2, 3, 3, 16], strides = [1, 1, 1, 1]} : vector<2x5x5x16xf32> to vector<2x3x3x16xf32>
    %109 = vector.shape_cast %108 : vector<2x3x3x16xf32> to vector<18x16xf32>
    %110 = vector.extract_strided_slice %93 {offsets = [0, 2, 2, 0], sizes = [2, 3, 3, 16], strides = [1, 1, 1, 1]} : vector<2x5x5x16xf32> to vector<2x3x3x16xf32>
    %111 = vector.shape_cast %110 : vector<2x3x3x16xf32> to vector<18x16xf32>
    %112 = tpu.concatenate %95, %97, %99, %101, %103, %105, %107, %109, %111 in 1 : vector<18x16xf32>, vector<18x16xf32>, vector<18x16xf32>, vector<18x16xf32>, vector<18x16xf32>, vector<18x16xf32>, vector<18x16xf32>, vector<18x16xf32>, vector<18x16xf32> -> vector<18x144xf32>
    %c0_28 = arith.constant 0 : index
    %c0_29 = arith.constant 0 : index
    %113 = vector.load %arg7[%c0_28, %c0_29] : memref<144x32xf32, #tpu.memory_space<vmem>>, vector<144x32xf32>
    %cst_30 = arith.constant dense<0.000000e+00> : vector<18x32xf32>
    %114 = tpu.matmul %112, %113, %cst_30 {dimension_numbers = #tpu.dot_dimension_numbers<[1], [0], [0], [1], [0, 0, 1, 1], [], []>} : vector<18x144xf32>, vector<144x32xf32>, vector<18x32xf32> -> vector<18x32xf32>
    %c0_31 = arith.constant 0 : index
    %c0_32 = arith.constant 0 : index
    %115 = vector.load %arg8[%c0_31, %c0_32] : memref<1x32xf32, #tpu.memory_space<vmem>>, vector<1x32xf32>
    %116 = vector.broadcast %115 : vector<1x32xf32> to vector<18x32xf32>
    %117 = arith.addf %114, %116 : vector<18x32xf32>
    %cst_33 = arith.constant 0.000000e+00 : f32
    %118 = vector.broadcast %cst_33 : f32 to vector<18x32xf32>
    %119 = arith.cmpf ogt, %117, %118 : vector<18x32xf32>
    %120 = vector.broadcast %2 : f32 to vector<18x32xf32>
    %121 = arith.mulf %120, %117 : vector<18x32xf32>
    %122 = arith.select %119, %117, %121 : vector<18x32xi1>, vector<18x32xf32>
    %c0_34 = arith.constant 0 : index
    %c0_35 = arith.constant 0 : index
    %123 = vector.load %arg9[%c0_34, %c0_35] : memref<32x5xf32, #tpu.memory_space<vmem>>, vector<32x5xf32>
    %cst_36 = arith.constant dense<0.000000e+00> : vector<18x5xf32>
    %124 = tpu.matmul %122, %123, %cst_36 {dimension_numbers = #tpu.dot_dimension_numbers<[1], [0], [0], [1], [0, 0, 1, 1], [], []>} : vector<18x32xf32>, vector<32x5xf32>, vector<18x5xf32> -> vector<18x5xf32>
    %c0_37 = arith.constant 0 : index
    %c0_38 = arith.constant 0 : index
    %125 = vector.load %arg10[%c0_37, %c0_38] : memref<1x5xf32, #tpu.memory_space<vmem>>, vector<1x5xf32>
    %126 = vector.broadcast %125 : vector<1x5xf32> to vector<18x5xf32>
    %127 = arith.addf %124, %126 : vector<18x5xf32>
    %128 = vector.extract_strided_slice %127 {offsets = [0, 0], sizes = [18, 1], strides = [1, 1]} : vector<18x5xf32> to vector<18x1xf32>
    %129 = arith.negf %128 : vector<18x1xf32>
    %130 = math.exp %129 : vector<18x1xf32>
    %cst_39 = arith.constant 1.000000e+00 : f32
    %131 = vector.broadcast %cst_39 : f32 to vector<18x1xf32>
    %132 = arith.addf %131, %130 : vector<18x1xf32>
    %133 = arith.divf %131, %132 : vector<18x1xf32>
    %134 = vector.extract_strided_slice %127 {offsets = [0, 1], sizes = [18, 4], strides = [1, 1]} : vector<18x5xf32> to vector<18x4xf32>
    %135 = tpu.concatenate %133, %134 in 1 : vector<18x1xf32>, vector<18x4xf32> -> vector<18x5xf32>
    %136 = vector.shape_cast %135 : vector<18x5xf32> to vector<2x9x5xf32>
    %137 = vector.extract_strided_slice %136 {offsets = [0, 0, 0], sizes = [2, 1, 5], strides = [1, 1, 1]} : vector<2x9x5xf32> to vector<2x1x5xf32>
    %138 = vector.shape_cast %137 : vector<2x1x5xf32> to vector<2x5xf32>
    %139 = vector.extract_strided_slice %136 {offsets = [0, 1, 0], sizes = [2, 1, 5], strides = [1, 1, 1]} : vector<2x9x5xf32> to vector<2x1x5xf32>
    %140 = vector.shape_cast %139 : vector<2x1x5xf32> to vector<2x5xf32>
    %141 = vector.extract_strided_slice %136 {offsets = [0, 2, 0], sizes = [2, 1, 5], strides = [1, 1, 1]} : vector<2x9x5xf32> to vector<2x1x5xf32>
    %142 = vector.shape_cast %141 : vector<2x1x5xf32> to vector<2x5xf32>
    %143 = vector.extract_strided_slice %136 {offsets = [0, 3, 0], sizes = [2, 1, 5], strides = [1, 1, 1]} : vector<2x9x5xf32> to vector<2x1x5xf32>
    %144 = vector.shape_cast %143 : vector<2x1x5xf32> to vector<2x5xf32>
    %145 = vector.extract_strided_slice %136 {offsets = [0, 4, 0], sizes = [2, 1, 5], strides = [1, 1, 1]} : vector<2x9x5xf32> to vector<2x1x5xf32>
    %146 = vector.shape_cast %145 : vector<2x1x5xf32> to vector<2x5xf32>
    %147 = vector.extract_strided_slice %136 {offsets = [0, 5, 0], sizes = [2, 1, 5], strides = [1, 1, 1]} : vector<2x9x5xf32> to vector<2x1x5xf32>
    %148 = vector.shape_cast %147 : vector<2x1x5xf32> to vector<2x5xf32>
    %149 = vector.extract_strided_slice %136 {offsets = [0, 6, 0], sizes = [2, 1, 5], strides = [1, 1, 1]} : vector<2x9x5xf32> to vector<2x1x5xf32>
    %150 = vector.shape_cast %149 : vector<2x1x5xf32> to vector<2x5xf32>
    %151 = vector.extract_strided_slice %136 {offsets = [0, 7, 0], sizes = [2, 1, 5], strides = [1, 1, 1]} : vector<2x9x5xf32> to vector<2x1x5xf32>
    %152 = vector.shape_cast %151 : vector<2x1x5xf32> to vector<2x5xf32>
    %153 = vector.extract_strided_slice %136 {offsets = [0, 8, 0], sizes = [2, 1, 5], strides = [1, 1, 1]} : vector<2x9x5xf32> to vector<2x1x5xf32>
    %154 = vector.shape_cast %153 : vector<2x1x5xf32> to vector<2x5xf32>
    %155 = tpu.concatenate %138, %140, %142, %144, %146, %148, %150, %152, %154 in 1 : vector<2x5xf32>, vector<2x5xf32>, vector<2x5xf32>, vector<2x5xf32>, vector<2x5xf32>, vector<2x5xf32>, vector<2x5xf32>, vector<2x5xf32>, vector<2x5xf32> -> vector<2x45xf32>
    %c0_40 = arith.constant 0 : index
    %c0_41 = arith.constant 0 : index
    %156 = vector.load %arg11[%c0_40, %c0_41] : memref<2x45xf32, #tpu.memory_space<vmem>>, vector<2x45xf32>
    tpu.vector_store %arg11[%c0_40, %c0_41], %155 {strides = array<i32>} : memref<2x45xf32, #tpu.memory_space<vmem>>, vector<2x45xf32>,
    return
  }
  func.func @transform_0(%arg0: i32) -> i32 {
    %c0_i32 = arith.constant 0 : i32
    %c0_i32_0 = arith.constant 0 : i32
    return %c0_i32 : i32
  }
  func.func @transform_1(%arg0: i32) -> (i32, i32, i32, i32) {
    %c0_i32 = arith.constant 0 : i32
    %c0_i32_0 = arith.constant 0 : i32
    %c0_i32_1 = arith.constant 0 : i32
    %c0_i32_2 = arith.constant 0 : i32
    return %arg0, %c0_i32, %c0_i32_0, %c0_i32_1 : i32, i32, i32, i32
  }
  func.func @transform_2(%arg0: i32) -> (i32, i32) {
    %c0_i32 = arith.constant 0 : i32
    %c0_i32_0 = arith.constant 0 : i32
    %c0_i32_1 = arith.constant 0 : i32
    return %c0_i32, %c0_i32_0 : i32, i32
  }
  func.func @transform_3(%arg0: i32) -> (i32, i32) {
    %c0_i32 = arith.constant 0 : i32
    %c0_i32_0 = arith.constant 0 : i32
    %c0_i32_1 = arith.constant 0 : i32
    return %c0_i32, %c0_i32_0 : i32, i32
  }
  func.func @transform_4(%arg0: i32) -> (i32, i32) {
    %c0_i32 = arith.constant 0 : i32
    %c0_i32_0 = arith.constant 0 : i32
    %c0_i32_1 = arith.constant 0 : i32
    return %c0_i32, %c0_i32_0 : i32, i32
  }
  func.func @transform_5(%arg0: i32) -> (i32, i32) {
    %c0_i32 = arith.constant 0 : i32
    %c0_i32_0 = arith.constant 0 : i32
    %c0_i32_1 = arith.constant 0 : i32
    return %c0_i32, %c0_i32_0 : i32, i32
  }
  func.func @transform_6(%arg0: i32) -> (i32, i32) {
    %c0_i32 = arith.constant 0 : i32
    %c0_i32_0 = arith.constant 0 : i32
    %c0_i32_1 = arith.constant 0 : i32
    return %c0_i32, %c0_i32_0 : i32, i32
  }
  func.func @transform_7(%arg0: i32) -> (i32, i32) {
    %c0_i32 = arith.constant 0 : i32
    %c0_i32_0 = arith.constant 0 : i32
    %c0_i32_1 = arith.constant 0 : i32
    return %c0_i32, %c0_i32_0 : i32, i32
  }
  func.func @transform_8(%arg0: i32) -> (i32, i32) {
    %c0_i32 = arith.constant 0 : i32
    %c0_i32_0 = arith.constant 0 : i32
    %c0_i32_1 = arith.constant 0 : i32
    return %c0_i32, %c0_i32_0 : i32, i32
  }
  func.func @transform_9(%arg0: i32) -> (i32, i32) {
    %c0_i32 = arith.constant 0 : i32
    %c0_i32_0 = arith.constant 0 : i32
    %c0_i32_1 = arith.constant 0 : i32
    return %c0_i32, %c0_i32_0 : i32, i32
  }
  func.func @transform_10(%arg0: i32) -> (i32, i32) {
    %c0_i32 = arith.constant 0 : i32
    %c0_i32_0 = arith.constant 0 : i32
    return %arg0, %c0_i32 : i32, i32
  }
}

</mosaic_0001>

<bundles_post_ra>
// kernel: tpu_custom_call.1
= control target key start
LH: loop header
LB: loop body
LE: loop exit
PB: predicated region body
PF: predicated region fallthrough
CT: control target
= control target key end

     0   :  { %15 = vsyncpa [#allocation5], 0  ;;  %s15661_s0 = inlined_call_operand.vmem [shape: f32[3], index: 0, kind: input, shape index: {}]   ;;  %s15662_s1 = inlined_call_operand.vmem [shape: f32[2,16,16,3], index: 1, kind: input, shape index: {}]   ;;  %s15663_s2 = inlined_call_operand.vmem [shape: f32[27,10], index: 2, kind: input, shape index: {}]   ;;  %s15664_s3 = inlined_call_operand.vmem [shape: f32[1,10], index: 3, kind: input, shape index: {}]   ;;  %s15665_s4 = inlined_call_operand.vmem [shape: f32[90,16], index: 4, kind: input, shape index: {}]   ;;  %s15666_s5 = inlined_call_operand.vmem [shape: f32[1,16], index: 5, kind: input, shape index: {}]   ;;  %s15667_s6 = inlined_call_operand.vmem [shape: f32[144,32], index: 6, kind: input, shape index: {}]   ;;  %s15668_s7 = inlined_call_operand.vmem [shape: f32[1,32], index: 7, kind: input, shape index: {}]   ;;  %s15669_s8 = inlined_call_operand.vmem [shape: f32[32,5], index: 8, kind: input, shape index: {}]   ;;  %s15670_s9 = inlined_call_operand.vmem [shape: f32[1,5], index: 9, kind: input, shape index: {}]   ;;  %s15671_s10 = inlined_call_operand.hbm [shape: f32[2,45], index: 10, kind: output, shape index: {}]  }
   0x1   :  { %16 = vsyncpa [#allocation4], 0  ;;  %s23_s15 = sshll.u32 %s15661_s0, 4  ;;  %s24_s15 = int_to_ptr.vmem [resolvable:$true] %s23_s15 }
   0x2   :  { %s9642_s16 = scalar_lea.vmem %s24_s15, 16  ;;  %p9647_p1 = scmp.lt.s32.totalorder %s24_s15, %s24_s15 }
   0x3   :  { %p9643_p0 = scmp.ne.s32.totalorder %s24_s15, %s9642_s16  ;;  %p9648_p2 = scmp.lt.s32.totalorder %s9642_s16, %s9642_s16 }
   0x5   :  { %p9649_p3 = por %p9648_p2, %p9647_p1 }
   0x7   :  { %p9650_p4 = pnand %p9649_p3, %p9643_p0 }
   0x9   :  { %9653 = shalt.err (!%p9650_p4)
}
   0xa   :  { %s9680_s17 = smov [#allocation3]  }
   0xb   :  { %26 = dma.vmem_to_smem %s24_s15, 16, %s9680_s17, [#allocation5]  }
   0xc   :  { %9676 = dma.done.wait [#allocation5], 16  }
   0xd   :  { %9677 = vsyncadd [#allocation5], 4294967280 }
   0xe   :  { %48 = sfence }
   0xf   :  { %vm52_vm0 = vcmask 23552   ;;  %vm55_vm1 = vcmask 17408   ;;  %v9773_v0 = vld [vmem:[%s15662_s1] sm:$0xff]  ;;  %v9778_v1 = vld [vmem:[%s15662_s1 + $0x8] sm:$0xff]  ;;  %v15675_v2 = vmov 0.0   ;;  %v164_v3 = vld [vmem:[%s15662_s1 + $0x10] sm:$0xff] }
  0x10   :  { %57 = vst.msk [vmem:[#allocation2 + $0x18] sm:$0xff] %vm52_vm0, %v15675_v2  ;;  %58 = vst.msk [vmem:[#allocation2 + $0x20] sm:$0xff] %vm52_vm0, %v15675_v2  ;;  %v165_v4 = vld [vmem:[%s15662_s1 + $0x18] sm:$0xff]  ;;  %v166_v5 = vld [vmem:[%s15662_s1 + $0x20] sm:$0xff]  ;;  %vm656_vm2 = vcmask 1045504   ;;  %vm495_vm3 = vcmask 1046528  }
  0x11   :  { %59 = vst.msk [vmem:[#allocation2 + $0x28] sm:$0x3] %vm55_vm1, %v15675_v2  ;;  %56 = vst.msk [vmem:[#allocation2 + $0x10] sm:$0x3] %vm55_vm1, %v15675_v2  ;;  %v167_v6 = vld [vmem:[%s15662_s1 + $0x28] sm:$0xff]  ;;  %v168_v7 = vld [vmem:[%s15662_s1 + $0x30] sm:$0xff] }
  0x12   :  { %53 = vst.msk [vmem:[#allocation2] sm:$0xff] %vm52_vm0, %v15675_v2  ;;  %54 = vst.msk [vmem:[#allocation2 + $0x8] sm:$0xff] %vm52_vm0, %v15675_v2  ;;  %v169_v8 = vld [vmem:[%s15662_s1 + $0x38] sm:$0xff]  ;;  %v170_v9 = vld [vmem:[%s15662_s1 + $0x40] sm:$0xff]  ;;  %s9682_s17 = smov 9   ;;  %s9683_s18 = smov 6  }
  0x13   :  { %60 = vst.msk [vmem:[#allocation2 + $0x30] sm:$0xff] %vm52_vm0, %v15675_v2  ;;  %61 = vst.msk [vmem:[#allocation2 + $0x38] sm:$0xff] %vm52_vm0, %v15675_v2  ;;  %v171_v10 = vld [vmem:[%s15662_s1 + $0x48] sm:$0xff]  ;;  %s9684_s19 = smov 3   ;;  %s9685_s0 = smov 12   ;;  %v172_v35 = vld [vmem:[%s15662_s1 + $0x50] sm:$0xff] }
  0x14   :  { %62 = vst.msk [vmem:[#allocation2 + $0x40] sm:$0x3] %vm55_vm1, %v15675_v2  ;;  %65 = vst.msk [vmem:[#allocation2 + $0x58] sm:$0x3] %vm55_vm1, %v15675_v2  ;;  %s9686_s22 = smov 15   ;;  %v173_v39 = vld [vmem:[%s15662_s1 + $0x58] sm:$0xff] }
  0x15   :  { %63 = vst.msk [vmem:[#allocation2 + $0x48] sm:$0xff] %vm52_vm0, %v15675_v2  ;;  %64 = vst.msk [vmem:[#allocation2 + $0x50] sm:$0xff] %vm52_vm0, %v15675_v2  ;;  %s9687_s25 = smov 18   ;;  %v2924_v43 = vld [vmem:[%s15663_s2] sm:$0xff]  ;;  %v2925_v44 = vld [vmem:[%s15663_s2 + $0x8] sm:$0xff]  ;;  %vm15728_vm4 = vcmask 1042432  }
  0x16   :  { %66 = vst.msk [vmem:[#allocation2 + $0x60] sm:$0xff] %vm52_vm0, %v15675_v2  ;;  %67 = vst.msk [vmem:[#allocation2 + $0x68] sm:$0xff] %vm52_vm0, %v15675_v2  ;;  %v9455_v45 = vpack.c.bf16 %v2925_v44, %v2924_v43  ;;  %v2926_v48 = vld [vmem:[%s15663_s2 + $0x10] sm:$0xff]  ;;  %v2927_v49 = vld [vmem:[%s15663_s2 + $0x18] sm:$0x7]  ;;  %s9688_s14 = smov 21  }
  0x17   :  { %68 = vst.msk [vmem:[#allocation2 + $0x70] sm:$0x3] %vm55_vm1, %v15675_v2  ;;  %71 = vst.msk [vmem:[#allocation2 + $0x88] sm:$0x3] %vm55_vm1, %v15675_v2  ;;  %v9459_v50 = vpack.c.bf16 %v2927_v49, %v2926_v48  ;;  %vm15672_vm5 = vmmov 1   ;;  %s9690_s2 = smov 24  }
  0x18   :  { %69 = vst.msk [vmem:[#allocation2 + $0x78] sm:$0xff] %vm52_vm0, %v15675_v2  ;;  %70 = vst.msk [vmem:[#allocation2 + $0x80] sm:$0xff] %vm52_vm0, %v15675_v2  ;;  %v293_v13 = vld [vmem:[#allocation2 + $0x10] sm:$0x3]  ;;  %9456 = vmatprep.subr.bf16.mxu0 %v9455_v45  ;;  %9517 = vmatprep.subr.bf16.mxu1 %v9455_v45  ;;  %v174_v58 = vld [vmem:[%s15662_s1 + $0x60] sm:$0xff]  ;;  %vm2469_vm7 = vcmask 48128  }
  0x19   :  { %72 = vst.msk [vmem:[#allocation2 + $0x90] sm:$0xff] %vm52_vm0, %v15675_v2  ;;  %73 = vst.msk [vmem:[#allocation2 + $0x98] sm:$0xff] %vm52_vm0, %v15675_v2  ;;  %v10032_v11 = vld [vmem:[#allocation2] sm:$0xff]  ;;  %v10034_v12 = vld [vmem:[#allocation2 + $0x8] sm:$0xff]  ;;  %v660_v22 = vrot.slane %v293_v13, 2  ;;  %v499_v23 = vrot.slane %v293_v13, 1  ;;  %9458 = vmatpush3.bf16.msra.mxu0 %v9455_v45  ;;  %9519 = vmatpush3.bf16.msra.mxu1 %v9455_v45 }
  0x1a   :  { %74 = vst.msk [vmem:[#allocation2 + $0xa0] sm:$0x3] %vm55_vm1, %v15675_v2  ;;  %77 = vst.msk [vmem:[#allocation2 + $0xb8] sm:$0x3] %vm55_vm1, %v15675_v2  ;;  %v657_v16 = vrot.slane %v10032_v11, 2  ;;  %v658_v17 = vrot.slane %v10034_v12, 2 }
  0x1b   :  { %75 = vst.msk [vmem:[#allocation2 + $0xa8] sm:$0xff] %vm52_vm0, %v15675_v2  ;;  %76 = vst.msk [vmem:[#allocation2 + $0xb0] sm:$0xff] %vm52_vm0, %v15675_v2  ;;  %v496_v18 = vrot.slane %v10032_v11, 1  ;;  %v497_v19 = vrot.slane %v10034_v12, 1  ;;  %v175_v60 = vld [vmem:[%s15662_s1 + $0x68] sm:$0xff]  ;;  %vm2534_vm8 = vcmask 72704  }
  0x1c   :  { %78 = vst.msk [vmem:[#allocation2 + $0xc0] sm:$0xff] %vm52_vm0, %v15675_v2  ;;  %79 = vst.msk [vmem:[#allocation2 + $0xc8] sm:$0xff] %vm52_vm0, %v15675_v2  ;;  %v659_v20 = vsel %vm656_vm2, %v657_v16, %v658_v17  ;;  %v661_v24 = vsel %vm656_vm2, %v658_v17, %v660_v22  ;;  %v177_v16 = vld [vmem:[%s15662_s1 + $0x78] sm:$0xff]  ;;  %vm2599_vm9 = vcmask 97280   ;;  %vm15740_vm10 = vcmask 121856   ;;  %s49_s20 = sld [smem:[#allocation3]] }
  0x1d   :  { %80 = vst.msk [vmem:[#allocation2 + $0xd0] sm:$0x3] %vm55_vm1, %v15675_v2  ;;  %83 = vst.msk [vmem:[#allocation2 + $0xe8] sm:$0x3] %vm55_vm1, %v15675_v2  ;;  %v498_v21 = vsel %vm495_vm3, %v496_v18, %v497_v19  ;;  %v500_v25 = vsel %vm495_vm3, %v497_v19, %v499_v23  ;;  %vm2729_vm11 = vcmask 146432   ;;  %vm2794_vm12 = vcmask 171008  }
  0x1e   :  { %81 = vst.msk [vmem:[#allocation2 + $0xd8] sm:$0xff] %vm52_vm0, %v15675_v2  ;;  %82 = vst.msk [vmem:[#allocation2 + $0xe0] sm:$0xff] %vm52_vm0, %v15675_v2  ;;  %vm2859_vm13 = vcmask 195584   ;;  %vm2935_vm14 = vcmask 220160   ;;  %s9693_s15 = smov 10   ;;  %s9694_s26 = smov 20  }
  0x1f   :  { %84 = vst.msk [vmem:[#allocation2 + $0xf0] sm:$0xff] %vm52_vm0, %v15675_v2  ;;  %85 = vst.msk [vmem:[#allocation2 + $0xf8] sm:$0xff] %vm52_vm0, %v15675_v2  ;;  %s9695_s12 = smov 30   ;;  %s9699_s21 = smov 70  }
  0x20   :  { %86 = vst.msk [vmem:[#allocation2 + $0x100] sm:$0x3] %vm55_vm1, %v15675_v2  ;;  %89 = vst.msk [vmem:[#allocation2 + $0x118] sm:$0x3] %vm55_vm1, %v15675_v2  ;;  %s9700_s23 = smov 80   ;;  %s9703_s24 = smov 32  }
  0x21   :  { %87 = vst.msk [vmem:[#allocation2 + $0x108] sm:$0xff] %vm52_vm0, %v15675_v2  ;;  %88 = vst.msk [vmem:[#allocation2 + $0x110] sm:$0xff] %vm52_vm0, %v15675_v2  ;;  %s9062_s16 = sld [smem:[#allocation3 + $0x2]] }
  0x22   :  { %90 = vst.msk [vmem:[#allocation2 + $0x120] sm:$0xff] %vm52_vm0, %v15675_v2  ;;  %91 = vst.msk [vmem:[#allocation2 + $0x128] sm:$0xff] %vm52_vm0, %v15675_v2 }
  0x23   :  { %92 = vst.msk [vmem:[#allocation2 + $0x130] sm:$0x3] %vm55_vm1, %v15675_v2  ;;  %95 = vst.msk [vmem:[#allocation2 + $0x148] sm:$0x3] %vm55_vm1, %v15675_v2 }
  0x24   :  { %93 = vst.msk [vmem:[#allocation2 + $0x138] sm:$0xff] %vm52_vm0, %v15675_v2  ;;  %94 = vst.msk [vmem:[#allocation2 + $0x140] sm:$0xff] %vm52_vm0, %v15675_v2 }
  0x25   :  { %96 = vst.msk [vmem:[#allocation2 + $0x150] sm:$0xff] %vm52_vm0, %v15675_v2  ;;  %97 = vst.msk [vmem:[#allocation2 + $0x158] sm:$0xff] %vm52_vm0, %v15675_v2 }
  0x26   :  { %98 = vst.msk [vmem:[#allocation2 + $0x160] sm:$0x3] %vm55_vm1, %v15675_v2  ;;  %101 = vst.msk [vmem:[#allocation2 + $0x178] sm:$0x3] %vm55_vm1, %v15675_v2 }
  0x27   :  { %99 = vst.msk [vmem:[#allocation2 + $0x168] sm:$0xff] %vm52_vm0, %v15675_v2  ;;  %100 = vst.msk [vmem:[#allocation2 + $0x170] sm:$0xff] %vm52_vm0, %v15675_v2 }
  0x28   :  { %102 = vst.msk [vmem:[#allocation2 + $0x180] sm:$0xff] %vm52_vm0, %v15675_v2  ;;  %103 = vst.msk [vmem:[#allocation2 + $0x188] sm:$0xff] %vm52_vm0, %v15675_v2 }
  0x29   :  { %104 = vst.msk [vmem:[#allocation2 + $0x190] sm:$0x3] %vm55_vm1, %v15675_v2  ;;  %107 = vst.msk [vmem:[#allocation2 + $0x1a8] sm:$0x3] %vm55_vm1, %v15675_v2 }
  0x2a   :  { %105 = vst.msk [vmem:[#allocation2 + $0x198] sm:$0xff] %vm52_vm0, %v15675_v2  ;;  %106 = vst.msk [vmem:[#allocation2 + $0x1a0] sm:$0xff] %vm52_vm0, %v15675_v2 }
  0x2b   :  { %108 = vst.msk [vmem:[#allocation2 + $0x1b0] sm:$0xff] %vm52_vm0, %v15675_v2  ;;  %109 = vst.msk [vmem:[#allocation2 + $0x1b8] sm:$0xff] %vm52_vm0, %v15675_v2 }
  0x2c   :  { %110 = vst.msk [vmem:[#allocation2 + $0x1c0] sm:$0x3] %vm55_vm1, %v15675_v2  ;;  %113 = vst.msk [vmem:[#allocation2 + $0x1d8] sm:$0x3] %vm55_vm1, %v15675_v2 }
  0x2d   :  { %111 = vst.msk [vmem:[#allocation2 + $0x1c8] sm:$0xff] %vm52_vm0, %v15675_v2  ;;  %112 = vst.msk [vmem:[#allocation2 + $0x1d0] sm:$0xff] %vm52_vm0, %v15675_v2 }
  0x2e   :  { %114 = vst.msk [vmem:[#allocation2 + $0x1e0] sm:$0xff] %vm52_vm0, %v15675_v2  ;;  %115 = vst.msk [vmem:[#allocation2 + $0x1e8] sm:$0xff] %vm52_vm0, %v15675_v2 }
  0x2f   :  { %116 = vst.msk [vmem:[#allocation2 + $0x1f0] sm:$0x3] %vm55_vm1, %v15675_v2  ;;  %119 = vst.msk [vmem:[#allocation2 + $0x208] sm:$0x3] %vm55_vm1, %v15675_v2 }
  0x30   :  { %117 = vst.msk [vmem:[#allocation2 + $0x1f8] sm:$0xff] %vm52_vm0, %v15675_v2  ;;  %118 = vst.msk [vmem:[#allocation2 + $0x200] sm:$0xff] %vm52_vm0, %v15675_v2 }
  0x31   :  { %120 = vst.msk [vmem:[#allocation2 + $0x210] sm:$0xff] %vm52_vm0, %v15675_v2  ;;  %121 = vst.msk [vmem:[#allocation2 + $0x218] sm:$0xff] %vm52_vm0, %v15675_v2 }
  0x32   :  { %122 = vst.msk [vmem:[#allocation2 + $0x220] sm:$0x3] %vm55_vm1, %v15675_v2  ;;  %125 = vst.msk [vmem:[#allocation2 + $0x238] sm:$0x3] %vm55_vm1, %v15675_v2 }
  0x33   :  { %123 = vst.msk [vmem:[#allocation2 + $0x228] sm:$0xff] %vm52_vm0, %v15675_v2  ;;  %124 = vst.msk [vmem:[#allocation2 + $0x230] sm:$0xff] %vm52_vm0, %v15675_v2 }
  0x34   :  { %126 = vst.msk [vmem:[#allocation2 + $0x240] sm:$0xff] %vm52_vm0, %v15675_v2  ;;  %127 = vst.msk [vmem:[#allocation2 + $0x248] sm:$0xff] %vm52_vm0, %v15675_v2 }
  0x35   :  { %128 = vst.msk [vmem:[#allocation2 + $0x250] sm:$0x3] %vm55_vm1, %v15675_v2  ;;  %131 = vst.msk [vmem:[#allocation2 + $0x268] sm:$0x3] %vm55_vm1, %v15675_v2 }
  0x36   :  { %129 = vst.msk [vmem:[#allocation2 + $0x258] sm:$0xff] %vm52_vm0, %v15675_v2  ;;  %130 = vst.msk [vmem:[#allocation2 + $0x260] sm:$0xff] %vm52_vm0, %v15675_v2 }
  0x37   :  { %132 = vst.msk [vmem:[#allocation2 + $0x270] sm:$0xff] %vm52_vm0, %v15675_v2  ;;  %133 = vst.msk [vmem:[#allocation2 + $0x278] sm:$0xff] %vm52_vm0, %v15675_v2 }
  0x38   :  { %134 = vst.msk [vmem:[#allocation2 + $0x280] sm:$0x3] %vm55_vm1, %v15675_v2  ;;  %137 = vst.msk [vmem:[#allocation2 + $0x298] sm:$0x3] %vm55_vm1, %v15675_v2 }
  0x39   :  { %135 = vst.msk [vmem:[#allocation2 + $0x288] sm:$0xff] %vm52_vm0, %v15675_v2  ;;  %136 = vst.msk [vmem:[#allocation2 + $0x290] sm:$0xff] %vm52_vm0, %v15675_v2 }
  0x3a   :  { %138 = vst.msk [vmem:[#allocation2 + $0x2a0] sm:$0xff] %vm52_vm0, %v15675_v2  ;;  %139 = vst.msk [vmem:[#allocation2 + $0x2a8] sm:$0xff] %vm52_vm0, %v15675_v2 }
  0x3b   :  { %140 = vst.msk [vmem:[#allocation2 + $0x2b0] sm:$0x3] %vm55_vm1, %v15675_v2  ;;  %143 = vst.msk [vmem:[#allocation2 + $0x2c8] sm:$0x3] %vm55_vm1, %v15675_v2 }
  0x3c   :  { %141 = vst.msk [vmem:[#allocation2 + $0x2b8] sm:$0xff] %vm52_vm0, %v15675_v2  ;;  %142 = vst.msk [vmem:[#allocation2 + $0x2c0] sm:$0xff] %vm52_vm0, %v15675_v2 }
  0x3d   :  { %144 = vst.msk [vmem:[#allocation2 + $0x2d0] sm:$0xff] %vm52_vm0, %v15675_v2  ;;  %145 = vst.msk [vmem:[#allocation2 + $0x2d8] sm:$0xff] %vm52_vm0, %v15675_v2 }
  0x3e   :  { %146 = vst.msk [vmem:[#allocation2 + $0x2e0] sm:$0x3] %vm55_vm1, %v15675_v2  ;;  %149 = vst.msk [vmem:[#allocation2 + $0x2f8] sm:$0x3] %vm55_vm1, %v15675_v2 }
  0x3f   :  { %147 = vst.msk [vmem:[#allocation2 + $0x2e8] sm:$0xff] %vm52_vm0, %v15675_v2  ;;  %148 = vst.msk [vmem:[#allocation2 + $0x2f0] sm:$0xff] %vm52_vm0, %v15675_v2 }
  0x40   :  { %150 = vst.msk [vmem:[#allocation2 + $0x300] sm:$0xff] %vm52_vm0, %v15675_v2  ;;  %151 = vst.msk [vmem:[#allocation2 + $0x308] sm:$0xff] %vm52_vm0, %v15675_v2 }
  0x41   :  { %152 = vst.msk [vmem:[#allocation2 + $0x310] sm:$0x3] %vm55_vm1, %v15675_v2  ;;  %155 = vst.msk [vmem:[#allocation2 + $0x328] sm:$0x3] %vm55_vm1, %v15675_v2 }
  0x42   :  { %153 = vst.msk [vmem:[#allocation2 + $0x318] sm:$0xff] %vm52_vm0, %v15675_v2  ;;  %154 = vst.msk [vmem:[#allocation2 + $0x320] sm:$0xff] %vm52_vm0, %v15675_v2 }
  0x43   :  { %156 = vst.msk [vmem:[#allocation2 + $0x330] sm:$0xff] %vm52_vm0, %v15675_v2  ;;  %157 = vst.msk [vmem:[#allocation2 + $0x338] sm:$0xff] %vm52_vm0, %v15675_v2 }
  0x44   :  { %158 = vst.msk [vmem:[#allocation2 + $0x340] sm:$0x3] %vm55_vm1, %v15675_v2  ;;  %161 = vst.msk [vmem:[#allocation2 + $0x358] sm:$0x3] %vm55_vm1, %v15675_v2 }
  0x45   :  { %159 = vst.msk [vmem:[#allocation2 + $0x348] sm:$0xff] %vm52_vm0, %v15675_v2  ;;  %160 = vst.msk [vmem:[#allocation2 + $0x350] sm:$0xff] %vm52_vm0, %v15675_v2 }
  0x46   :  { %227 = vst.msk [vmem:[#allocation2 + $0x19] sm:$0xff] %vm52_vm0, %v9773_v0  ;;  %228 = vst.msk [vmem:[#allocation2 + $0x21] sm:$0xff] %vm52_vm0, %v9778_v1 }
  0x47   :  { %229 = vst.msk [vmem:[#allocation2 + $0x31] sm:$0xff] %vm52_vm0, %v164_v3  ;;  %230 = vst.msk [vmem:[#allocation2 + $0x39] sm:$0xff] %vm52_vm0, %v165_v4 }
  0x48   :  { %231 = vst.msk [vmem:[#allocation2 + $0x49] sm:$0xff] %vm52_vm0, %v166_v5  ;;  %232 = vst.msk [vmem:[#allocation2 + $0x51] sm:$0xff] %vm52_vm0, %v167_v6 }
  0x49   :  { %233 = vst.msk [vmem:[#allocation2 + $0x61] sm:$0xff] %vm52_vm0, %v168_v7  ;;  %234 = vst.msk [vmem:[#allocation2 + $0x69] sm:$0xff] %vm52_vm0, %v169_v8 }
  0x4a   :  { %235 = vst.msk [vmem:[#allocation2 + $0x79] sm:$0xff] %vm52_vm0, %v170_v9  ;;  %236 = vst.msk [vmem:[#allocation2 + $0x81] sm:$0xff] %vm52_vm0, %v171_v10  ;;  %v176_v10 = vld [vmem:[%s15662_s1 + $0x70] sm:$0xff] }
  0x4b   :  { %237 = vst.msk [vmem:[#allocation2 + $0x91] sm:$0xff] %vm52_vm0, %v172_v35  ;;  %238 = vst.msk [vmem:[#allocation2 + $0x99] sm:$0xff] %vm52_vm0, %v173_v39 }
  0x4c   :  { %vm9460_vm6 = vmpackc.low %vm15728_vm4, %vm15672_vm5  ;;  %239 = vst.msk [vmem:[#allocation2 + $0xa9] sm:$0xff] %vm52_vm0, %v174_v58 }
  0x4d   :  { %v10036_v14 = vld [vmem:[#allocation2 + $0x20] sm:$0xff]  ;;  %v10038_v15 = vld [vmem:[#allocation2 + $0x18] sm:$0xff]  ;;  %v296_v28 = vld [vmem:[#allocation2 + $0x28] sm:$0x3]  ;;  %9461 = vmatprep.subr.msk.bf16.mxu0 %vm9460_vm6, %v9459_v50  ;;  %9518 = vmatprep.subr.msk.bf16.mxu1 %vm9460_vm6, %v9459_v50  ;;  %240 = vst.msk [vmem:[#allocation2 + $0xb1] sm:$0xff] %vm52_vm0, %v175_v60 }
  0x4e   :  { %1255 = vrot.lane.b32.xlu1 %v10036_v14, %s9682_s17  ;;  %1253 = vrot.lane.b32.xlu0 %v10038_v15, %s9682_s17  ;;  %v501_v26 = vrot.slane %v10038_v15, 1  ;;  %v502_v27 = vrot.slane %v10036_v14, 1  ;;  %v662_v30 = vrot.slane %v10038_v15, 2  ;;  %v663_v31 = vrot.slane %v10036_v14, 2  ;;  %v10073_v37 = vld [vmem:[#allocation2 + $0x30] sm:$0xff]  ;;  %v10079_v40 = vld [vmem:[#allocation2 + $0x38] sm:$0xff] }
  0x4f   :  { %v504_v32 = vrot.slane %v296_v28, 1  ;;  %v665_v36 = vrot.slane %v296_v28, 2  ;;  %v506_v41 = vrot.slane %v10073_v37, 1  ;;  %v507_v42 = vrot.slane %v10079_v40, 1  ;;  %v299_v47 = vld [vmem:[#allocation2 + $0x40] sm:$0x3]  ;;  %9464 = vmatpush3.bf16.msk.msra.mxu0 %vm9460_vm6, %v9459_v50  ;;  %9520 = vmatpush3.bf16.msk.msra.mxu1 %vm9460_vm6, %v9459_v50 }
  0x50   :  { %v503_v29 = vsel %vm495_vm3, %v501_v26, %v502_v27  ;;  %v664_v33 = vsel %vm656_vm2, %v662_v30, %v663_v31  ;;  %v667_v51 = vrot.slane %v10073_v37, 2  ;;  %v668_v52 = vrot.slane %v10079_v40, 2  ;;  %v10128_v59 = vld [vmem:[#allocation2 + $0x48] sm:$0xff]  ;;  %v10133_v61 = vld [vmem:[#allocation2 + $0x50] sm:$0xff]  ;;  %v302_v1 = vld [vmem:[#allocation2 + $0x58] sm:$0x3] }
  0x51   :  { %v505_v34 = vsel %vm495_vm3, %v502_v27, %v504_v32  ;;  %v666_v38 = vsel %vm656_vm2, %v663_v31, %v665_v36  ;;  %v508_v46 = vsel %vm495_vm3, %v506_v41, %v507_v42  ;;  %v509_v53 = vrot.slane %v299_v47, 1  ;;  %241 = vst.msk [vmem:[#allocation2 + $0xc1] sm:$0xff] %vm52_vm0, %v176_v10  ;;  %v10168_v13 = vld [vmem:[#allocation2 + $0x60] sm:$0xff]  ;;  %v10173_v17 = vld [vmem:[#allocation2 + $0x68] sm:$0xff]  ;;  %242 = vst.msk [vmem:[#allocation2 + $0xc9] sm:$0xff] %vm52_vm0, %v177_v16 }
  0x52   :  { %1061 = vrot.lane.b32.xlu1 %v659_v20, %s9683_s18  ;;  %869 = vrot.lane.b32.xlu0 %v498_v21, %s9684_s19  ;;  %v669_v54 = vsel %vm656_vm2, %v667_v51, %v668_v52  ;;  %v670_v56 = vrot.slane %v299_v47, 2  ;;  %v511_v62 = vrot.slane %v10128_v59, 1  ;;  %v512_v63 = vrot.slane %v10133_v61, 1  ;;  %v305_v21 = vld [vmem:[#allocation2 + $0x70] sm:$0x3]  ;;  %v10210_v32 = vld [vmem:[#allocation2 + $0x78] sm:$0xff] }
  0x53   :  { %v510_v55 = vsel %vm495_vm3, %v507_v42, %v509_v53  ;;  %v672_v3 = vrot.slane %v10128_v59, 2  ;;  %v673_v4 = vrot.slane %v10133_v61, 2  ;;  %v514_v5 = vrot.slane %v302_v1, 1  ;;  %v10215_v36 = vld [vmem:[#allocation2 + $0x80] sm:$0xff]  ;;  %v10277_v10 = vld [vmem:[#allocation2 + $0x98] sm:$0xff] }
  0x54   :  { %v671_v57 = vsel %vm656_vm2, %v668_v52, %v670_v56  ;;  %v513_v0 = vsel %vm495_vm3, %v511_v62, %v512_v63  ;;  %v675_v8 = vrot.slane %v302_v1, 2  ;;  %v516_v18 = vrot.slane %v10168_v13, 1  ;;  %v180_v1 = vld [vmem:[%s15662_s1 + $0x90] sm:$0xff] }
  0x55   :  { %v674_v6 = vsel %vm656_vm2, %v672_v3, %v673_v4  ;;  %v515_v7 = vsel %vm495_vm3, %v512_v63, %v514_v5  ;;  %v517_v19 = vrot.slane %v10173_v17, 1  ;;  %v677_v22 = vrot.slane %v10168_v13, 2  ;;  %245 = vst.msk [vmem:[#allocation2 + $0xf1] sm:$0xff] %vm52_vm0, %v180_v1 }
  0x56   :  { %1063 = vrot.lane.b32.xlu1 %v661_v24, %s9683_s18  ;;  %871 = vrot.lane.b32.xlu0 %v500_v25, %s9684_s19  ;;  %v676_v9 = vsel %vm656_vm2, %v673_v4, %v675_v8  ;;  %v678_v23 = vrot.slane %v10173_v17, 2  ;;  %v519_v24 = vrot.slane %v305_v21, 1  ;;  %v680_v27 = vrot.slane %v305_v21, 2 }
  0x57   :  { %v518_v20 = vsel %vm495_vm3, %v516_v18, %v517_v19  ;;  %v522_v39 = vrot.slane %v10215_v36, 1  ;;  %v682_v47 = vrot.slane %v10210_v32, 2  ;;  %v683_v48 = vrot.slane %v10215_v36, 2 }
  0x58   :  { %v679_v25 = vsel %vm656_vm2, %v677_v22, %v678_v23  ;;  %v520_v26 = vsel %vm495_vm3, %v517_v19, %v519_v24  ;;  %v681_v28 = vsel %vm656_vm2, %v678_v23, %v680_v27  ;;  %v527_v22 = vrot.slane %v10277_v10, 1 }
  0x59   :  { %v684_v52 = vsel %vm656_vm2, %v682_v47, %v683_v48 }
  0x5a   :  { %873 = vrot.lane.b32.xlu1 %v503_v29, %s9684_s19  ;;  %1445 = vrot.lane.b32.xlu0 %v503_v29, %s9685_s0  ;;  %v178_v29 = vld [vmem:[%s15662_s1 + $0x80] sm:$0xff] }
  0x5b   :  { %243 = vst.msk [vmem:[#allocation2 + $0xd9] sm:$0xff] %vm52_vm0, %v178_v29 }
  0x5e   :  { %1637 = vrot.lane.b32.xlu1 %v664_v33, %s9686_s22  ;;  %1447 = vrot.lane.b32.xlu0 %v505_v34, %s9685_s0 }
  0x62   :  { %1065 = vrot.lane.b32.xlu1 %v664_v33, %s9683_s18  ;;  %875 = vrot.lane.b32.xlu0 %v505_v34, %s9684_s19  ;;  %v179_v33 = vld [vmem:[%s15662_s1 + $0x88] sm:$0xff] }
  0x63   :  { %244 = vst.msk [vmem:[#allocation2 + $0xe1] sm:$0xff] %vm52_vm0, %v179_v33  ;;  %v311_v33 = vld [vmem:[#allocation2 + $0xa0] sm:$0x3] }
  0x66   :  { %1829 = vrot.lane.b32.xlu1 %v10073_v37, %s9687_s25  ;;  %1639 = vrot.lane.b32.xlu0 %v666_v38, %s9686_s22 }
  0x6a   :  { %1257 = vrot.lane.b32.xlu1 %v10073_v37, %s9682_s17  ;;  %1067 = vrot.lane.b32.xlu0 %v666_v38, %s9683_s18  ;;  %v521_v38 = vrot.slane %v10210_v32, 1 }
  0x6c   :  { %v523_v43 = vsel %vm495_vm3, %v521_v38, %v522_v39 }
  0x6e   :  { %2021 = vrot.lane.b32.xlu1 %v508_v46, %s9688_s14  ;;  %1831 = vrot.lane.b32.xlu0 %v10079_v40, %s9687_s25 }
  0x72   :  { %1449 = vrot.lane.b32.xlu1 %v508_v46, %s9685_s0  ;;  %1259 = vrot.lane.b32.xlu0 %v10079_v40, %s9682_s17 }
  0x76   :  { %2213 = vrot.lane.b32.xlu1 %v669_v54, %s9690_s2  ;;  %2023 = vrot.lane.b32.xlu0 %v510_v55, %s9688_s14 }
  0x7a   :  { %1451 = vrot.lane.b32.xlu1 %v510_v55, %s9685_s0  ;;  %877 = vrot.lane.b32.xlu0 %v508_v46, %s9684_s19  ;;  %v308_v46 = vld [vmem:[#allocation2 + $0x88] sm:$0x3] }
  0x7b   :  { %v524_v49 = vrot.slane %v308_v46, 1  ;;  %v685_v56 = vrot.slane %v308_v46, 2 }
  0x7d   :  { %v525_v53 = vsel %vm495_vm3, %v522_v39, %v524_v49  ;;  %v686_v60 = vsel %vm656_vm2, %v683_v48, %v685_v56 }
  0x7e   :  { %2215 = vrot.lane.b32.xlu1 %v671_v57, %s9690_s2  ;;  %1641 = vrot.lane.b32.xlu0 %v669_v54, %s9686_s22 }
  0x82   :  { %1069 = vrot.lane.b32.xlu1 %v669_v54, %s9683_s18  ;;  %879 = vrot.lane.b32.xlu0 %v510_v55, %s9684_s19 }
  0x86   :  { %1833 = vrot.lane.b32.xlu1 %v10128_v59, %s9687_s25  ;;  %1643 = vrot.lane.b32.xlu0 %v671_v57, %s9686_s22 }
  0x8a   :  { %1261 = vrot.lane.b32.xlu1 %v10128_v59, %s9682_s17  ;;  %1071 = vrot.lane.b32.xlu0 %v671_v57, %s9683_s18 }
  0x8e   :  { %2025 = vrot.lane.b32.xlu1 %v513_v0, %s9688_s14  ;;  %1835 = vrot.lane.b32.xlu0 %v10133_v61, %s9687_s25 }
  0x92   :  { %1453 = vrot.lane.b32.xlu1 %v513_v0, %s9685_s0  ;;  %1263 = vrot.lane.b32.xlu0 %v10133_v61, %s9682_s17 }
  0x96   :  { %2217 = vrot.lane.b32.xlu1 %v674_v6, %s9690_s2  ;;  %2027 = vrot.lane.b32.xlu0 %v515_v7, %s9688_s14 }
  0x9a   :  { %1455 = vrot.lane.b32.xlu1 %v515_v7, %s9685_s0  ;;  %881 = vrot.lane.b32.xlu0 %v513_v0, %s9684_s19 }
  0x9e   :  { %2219 = vrot.lane.b32.xlu1 %v676_v9, %s9690_s2  ;;  %1645 = vrot.lane.b32.xlu0 %v674_v6, %s9686_s22 }
  0xa2   :  { %1073 = vrot.lane.b32.xlu1 %v674_v6, %s9683_s18  ;;  %883 = vrot.lane.b32.xlu0 %v515_v7, %s9684_s19  ;;  %v181_v6 = vld [vmem:[%s15662_s1 + $0x98] sm:$0xff] }
  0xa3   :  { %246 = vst.msk [vmem:[#allocation2 + $0xf9] sm:$0xff] %vm52_vm0, %v181_v6  ;;  %v183_v6 = vld [vmem:[%s15662_s1 + $0xa8] sm:$0xff] }
  0xa4   :  { %248 = vst.msk [vmem:[#allocation2 + $0x111] sm:$0xff] %vm52_vm0, %v183_v6  ;;  %v185_v6 = vld [vmem:[%s15662_s1 + $0xb8] sm:$0xff] }
  0xa5   :  { %250 = vst.msk [vmem:[#allocation2 + $0x129] sm:$0xff] %vm52_vm0, %v185_v6  ;;  %v187_v6 = vld [vmem:[%s15662_s1 + $0xc8] sm:$0xff] }
  0xa6   :  { %1837 = vrot.lane.b32.xlu1 %v10168_v13, %s9687_s25  ;;  %1647 = vrot.lane.b32.xlu0 %v676_v9, %s9686_s22  ;;  %252 = vst.msk [vmem:[#allocation2 + $0x141] sm:$0xff] %vm52_vm0, %v187_v6  ;;  %v189_v6 = vld [vmem:[%s15662_s1 + $0xd8] sm:$0xff] }
  0xa7   :  { %254 = vst.msk [vmem:[#allocation2 + $0x159] sm:$0xff] %vm52_vm0, %v189_v6  ;;  %v191_v6 = vld [vmem:[%s15662_s1 + $0xe8] sm:$0xff] }
  0xa8   :  { %256 = vst.msk [vmem:[#allocation2 + $0x171] sm:$0xff] %vm52_vm0, %v191_v6  ;;  %v193_v6 = vld [vmem:[%s15662_s1 + $0xf8] sm:$0xff] }
  0xa9   :  { %258 = vst.msk [vmem:[#allocation2 + $0x189] sm:$0xff] %vm52_vm0, %v193_v6 }
  0xaa   :  { %1265 = vrot.lane.b32.xlu1 %v10168_v13, %s9682_s17  ;;  %1075 = vrot.lane.b32.xlu0 %v676_v9, %s9683_s18 }
  0xae   :  { %2029 = vrot.lane.b32.xlu1 %v518_v20, %s9688_s14  ;;  %1839 = vrot.lane.b32.xlu0 %v10173_v17, %s9687_s25 }
  0xb2   :  { %1457 = vrot.lane.b32.xlu1 %v518_v20, %s9685_s0  ;;  %1267 = vrot.lane.b32.xlu0 %v10173_v17, %s9682_s17 }
  0xb6   :  { %2221 = vrot.lane.b32.xlu1 %v679_v25, %s9690_s2  ;;  %2031 = vrot.lane.b32.xlu0 %v520_v26, %s9688_s14 }
  0xba   :  { %1459 = vrot.lane.b32.xlu1 %v520_v26, %s9685_s0  ;;  %885 = vrot.lane.b32.xlu0 %v518_v20, %s9684_s19 }
  0xbe   :  { %2223 = vrot.lane.b32.xlu1 %v681_v28, %s9690_s2  ;;  %1649 = vrot.lane.b32.xlu0 %v679_v25, %s9686_s22 }
  0xc0   :  { %v10206_v30 = vpop.permute.xlu1 %1255  ;;  %v1254_v31 = vpop.permute.xlu0 %1253 }
  0xc2   :  { %1077 = vrot.lane.b32.xlu1 %v679_v25, %s9683_s18  ;;  %887 = vrot.lane.b32.xlu0 %v520_v26, %s9684_s19 }
  0xc4   :  { %v1062_v34 = vpop.permute.xlu1 %1061  ;;  %v870_v35 = vpop.permute.xlu0 %869 }
  0xc5   :  { %v2405_v0 = vsel %vm52_vm0, %v10032_v11, %v870_v35  ;;  %v10267_v11 = vld [vmem:[#allocation2 + $0x90] sm:$0xff] }
  0xc6   :  { %1841 = vrot.lane.b32.xlu1 %v10210_v32, %s9687_s25  ;;  %1651 = vrot.lane.b32.xlu0 %v681_v28, %s9686_s22  ;;  %v2470_v5 = vsel %vm2469_vm7, %v2405_v0, %v1062_v34  ;;  %v526_v21 = vrot.slane %v10267_v11, 1  ;;  %v687_v39 = vrot.slane %v10267_v11, 2 }
  0xc7   :  { %v2535_v7 = vsel %vm2534_vm8, %v2470_v5, %v1254_v31  ;;  %v10348_v5 = vld [vmem:[#allocation2 + $0xa8] sm:$0xff] }
  0xc8   :  { %v10223_v41 = vpop.permute.xlu1 %1063  ;;  %v872_v42 = vpop.permute.xlu0 %871  ;;  %v528_v27 = vsel %vm495_vm3, %v526_v21, %v527_v22 }
  0xc9   :  { %v2406_v18 = vsel %vm52_vm0, %v10034_v12, %v872_v42 }
  0xca   :  { %1269 = vrot.lane.b32.xlu1 %v10210_v32, %s9682_s17  ;;  %1079 = vrot.lane.b32.xlu0 %v681_v28, %s9683_s18  ;;  %v2471_v12 = vsel %vm2469_vm7, %v2406_v18, %v10223_v41  ;;  %v529_v41 = vrot.slane %v311_v33, 1 }
  0xcb   :  { %v2536_v28 = vsel %vm2534_vm8, %v2471_v12, %v10206_v30  ;;  %v688_v30 = vrot.slane %v10277_v10, 2 }
  0xcc   :  { %v10229_v44 = vpop.permute.xlu1 %873  ;;  %v1446_v45 = vpop.permute.xlu0 %1445  ;;  %v530_v48 = vsel %vm495_vm3, %v527_v22, %v529_v41 }
  0xcd   :  { %v2600_v16 = vsel %vm2599_vm9, %v2535_v7, %v1446_v45  ;;  %v689_v47 = vsel %vm656_vm2, %v687_v39, %v688_v30 }
  0xce   :  { %2033 = vrot.lane.b32.xlu1 %v523_v43, %s9688_s14  ;;  %1843 = vrot.lane.b32.xlu0 %v10215_v36, %s9687_s25 }
  0xd0   :  { %v1638_v50 = vpop.permute.xlu1 %1637  ;;  %v10236_v51 = vpop.permute.xlu0 %1447 }
  0xd1   :  { %v2665_v19 = vsel %vm15740_vm10, %v2600_v16, %v1638_v50  ;;  %v2601_v34 = vsel %vm2599_vm9, %v2536_v28, %v10236_v51  ;;  %v690_v51 = vrot.slane %v311_v33, 2 }
  0xd2   :  { %1461 = vrot.lane.b32.xlu1 %v523_v43, %s9685_s0  ;;  %1271 = vrot.lane.b32.xlu0 %v10215_v36, %s9682_s17 }
  0xd3   :  { %v691_v56 = vsel %vm656_vm2, %v688_v30, %v690_v51 }
  0xd4   :  { %v10243_v54 = vpop.permute.xlu1 %1065  ;;  %v10245_v55 = vpop.permute.xlu0 %875 }
  0xd6   :  { %2225 = vrot.lane.b32.xlu1 %v684_v52, %s9690_s2  ;;  %2035 = vrot.lane.b32.xlu0 %v525_v53, %s9688_s14 }
  0xd8   :  { %v1830_v57 = vpop.permute.xlu1 %1829  ;;  %v1640_v58 = vpop.permute.xlu0 %1639 }
  0xd9   :  { %v2730_v20 = vsel %vm2729_vm11, %v2665_v19, %v1830_v57  ;;  %v2666_v35 = vsel %vm15740_vm10, %v2601_v34, %v1640_v58  ;;  %v531_v19 = vrot.slane %v10348_v5, 1  ;;  %v692_v34 = vrot.slane %v10348_v5, 2 }
  0xda   :  { %1463 = vrot.lane.b32.xlu1 %v525_v53, %s9685_s0  ;;  %889 = vrot.lane.b32.xlu0 %v523_v43, %s9684_s19 }
  0xdc   :  { %v10252_v62 = vpop.permute.xlu1 %1257  ;;  %v10254_v63 = vpop.permute.xlu0 %1067 }
  0xde   :  { %2227 = vrot.lane.b32.xlu1 %v686_v60, %s9690_s2  ;;  %1653 = vrot.lane.b32.xlu0 %v684_v52, %s9686_s22 }
  0xe0   :  { %v2022_v3 = vpop.permute.xlu1 %2021  ;;  %v1832_v4 = vpop.permute.xlu0 %1831 }
  0xe1   :  { %v2795_v23 = vsel %vm2794_vm12, %v2730_v20, %v2022_v3  ;;  %v2731_v38 = vsel %vm2729_vm11, %v2666_v35, %v1832_v4  ;;  %v2407_v3 = vsel %vm52_vm0, %v10038_v15, %v10229_v44  ;;  %v10359_v15 = vld [vmem:[#allocation2 + $0xb0] sm:$0xff] }
  0xe2   :  { %1081 = vrot.lane.b32.xlu1 %v684_v52, %s9683_s18  ;;  %891 = vrot.lane.b32.xlu0 %v525_v53, %s9684_s19  ;;  %v2472_v4 = vsel %vm2469_vm7, %v2407_v3, %v10243_v54  ;;  %v532_v20 = vrot.slane %v10359_v15, 1 }
  0xe3   :  { %v2537_v7 = vsel %vm2534_vm8, %v2472_v4, %v10252_v62  ;;  %v10432_v4 = vld [vmem:[#allocation2 + $0xc0] sm:$0xff] }
  0xe4   :  { %v10273_v8 = vpop.permute.xlu1 %1449  ;;  %v10275_v9 = vpop.permute.xlu0 %1259  ;;  %v533_v12 = vsel %vm495_vm3, %v531_v19, %v532_v20 }
  0xe5   :  { %v2602_v44 = vsel %vm2599_vm9, %v2537_v7, %v10273_v8  ;;  %v2408_v8 = vsel %vm52_vm0, %v10036_v14, %v10245_v55  ;;  %v314_v14 = vld [vmem:[#allocation2 + $0xb8] sm:$0x3] }
  0xe6   :  { %1845 = vrot.lane.b32.xlu1 %v10267_v11, %s9687_s25  ;;  %1655 = vrot.lane.b32.xlu0 %v686_v60, %s9686_s22  ;;  %v534_v35 = vrot.slane %v314_v14, 1 }
  0xe8   :  { %v2214_v24 = vpop.permute.xlu1 %2213  ;;  %v2024_v25 = vpop.permute.xlu0 %2023 }
  0xe9   :  { %v2860_v26 = vsel %vm2859_vm13, %v2795_v23, %v2214_v24  ;;  %v2796_v42 = vsel %vm2794_vm12, %v2731_v38, %v2024_v25  ;;  %v2473_v25 = vsel %vm2469_vm7, %v2408_v8, %v10254_v63 }
  0xea   :  { %1273 = vrot.lane.b32.xlu1 %v10267_v11, %s9682_s17  ;;  %1083 = vrot.lane.b32.xlu0 %v686_v60, %s9683_s18  ;;  %v182_v60 = vld [vmem:[%s15662_s1 + $0xa0] sm:$0xff] }
  0xeb   :  { %9297 = vmatprep.mubr.msk.f32.mxu0 %vm2935_vm14, %v2860_v26  ;;  %247 = vst.msk [vmem:[#allocation2 + $0x109] sm:$0xff] %vm52_vm0, %v182_v60  ;;  %v2538_v26 = vsel %vm2534_vm8, %v2473_v25, %v10275_v9  ;;  %v693_v9 = vrot.slane %v10359_v15, 2 }
  0xec   :  { %v10301_v29 = vpop.permute.xlu1 %1451  ;;  %v10303_v31 = vpop.permute.xlu0 %877 }
  0xed   :  { %v2603_v55 = vsel %vm2599_vm9, %v2538_v26, %v10301_v29  ;;  %v694_v41 = vsel %vm656_vm2, %v692_v34, %v693_v9 }
  0xee   :  { %2037 = vrot.lane.b32.xlu1 %v528_v27, %s9688_s14  ;;  %1847 = vrot.lane.b32.xlu0 %v10277_v10, %s9687_s25 }
  0xf0   :  { %v2216_v43 = vpop.permute.xlu1 %2215  ;;  %v1642_v45 = vpop.permute.xlu0 %1641 }
  0xf1   :  { %v2861_v46 = vsel %vm2859_vm13, %v2796_v42, %v2216_v43  ;;  %v2667_v54 = vsel %vm15740_vm10, %v2602_v44, %v1642_v45  ;;  %v535_v42 = vsel %vm495_vm3, %v532_v20, %v534_v35 }
  0xf2   :  { %1465 = vrot.lane.b32.xlu1 %v528_v27, %s9685_s0  ;;  %1275 = vrot.lane.b32.xlu0 %v10277_v10, %s9682_s17 }
  0xf3   :  { %9298 = vmatmul.mubr.msk.f32.vlgmr.msra.gmra.mrb[0].mxu0 %vm2935_vm14, %v2861_v46  ;;  %v695_v46 = vrot.slane %v314_v14, 2 }
  0xf4   :  { %v10322_v49 = vpop.permute.xlu1 %1069  ;;  %v10324_v50 = vpop.permute.xlu0 %879 }
  0xf5   :  { %v696_v51 = vsel %vm656_vm2, %v693_v9, %v695_v46 }
  0xf6   :  { %2229 = vrot.lane.b32.xlu1 %v689_v47, %s9690_s2  ;;  %2039 = vrot.lane.b32.xlu0 %v530_v48, %s9688_s14 }
  0xf8   :  { %v1834_v52 = vpop.permute.xlu1 %1833  ;;  %v1644_v53 = vpop.permute.xlu0 %1643 }
  0xf9   :  { %v2732_v62 = vsel %vm2729_vm11, %v2667_v54, %v1834_v52  ;;  %v2668_v33 = vsel %vm15740_vm10, %v2603_v55, %v1644_v53  ;;  %v697_v55 = vrot.slane %v10432_v4, 2 }
  0xfa   :  { %1467 = vrot.lane.b32.xlu1 %v530_v48, %s9685_s0  ;;  %893 = vrot.lane.b32.xlu0 %v528_v27, %s9684_s19 }
  0xfc   :  { %v10331_v57 = vpop.permute.xlu1 %1261  ;;  %v10333_v58 = vpop.permute.xlu0 %1071 }
  0xfe   :  { %2231 = vrot.lane.b32.xlu1 %v691_v56, %s9690_s2  ;;  %1657 = vrot.lane.b32.xlu0 %v689_v47, %s9686_s22 }
 0x100   :  { %v2026_v0 = vpop.permute.xlu1 %2025  ;;  %v1836_v1 = vpop.permute.xlu0 %1835 }
 0x101   :  { %v2797_v21 = vsel %vm2794_vm12, %v2732_v62, %v2026_v0  ;;  %v2733_v63 = vsel %vm2729_vm11, %v2668_v33, %v1836_v1  ;;  %v2409_v1 = vsel %vm52_vm0, %v10073_v37, %v10303_v31  ;;  %v10443_v37 = vld [vmem:[#allocation2 + $0xc8] sm:$0xff]  ;;  %v536_v62 = vrot.slane %v10432_v4, 1 }
 0x102   :  { %1085 = vrot.lane.b32.xlu1 %v689_v47, %s9683_s18  ;;  %895 = vrot.lane.b32.xlu0 %v530_v48, %s9684_s19  ;;  %v2474_v3 = vsel %vm2469_vm7, %v2409_v1, %v10322_v49  ;;  %v537_v19 = vrot.slane %v10443_v37, 1 }
 0x103   :  { %v2539_v7 = vsel %vm2534_vm8, %v2474_v3, %v10331_v57  ;;  %v10516_v3 = vld [vmem:[#allocation2 + $0xd8] sm:$0xff] }
 0x104   :  { %v10355_v16 = vpop.permute.xlu1 %1453  ;;  %v10357_v18 = vpop.permute.xlu0 %1263  ;;  %v538_v8 = vsel %vm495_vm3, %v536_v62, %v537_v19 }
 0x105   :  { %v2604_v31 = vsel %vm2599_vm9, %v2539_v7, %v10355_v16  ;;  %v2410_v16 = vsel %vm52_vm0, %v10079_v40, %v10324_v50  ;;  %v317_v40 = vld [vmem:[#allocation2 + $0xd0] sm:$0x3] }
 0x106   :  { %1849 = vrot.lane.b32.xlu1 %v10348_v5, %s9687_s25  ;;  %1659 = vrot.lane.b32.xlu0 %v691_v56, %s9686_s22  ;;  %v539_v33 = vrot.slane %v317_v40, 1 }
 0x108   :  { %v2218_v22 = vpop.permute.xlu1 %2217  ;;  %v2028_v23 = vpop.permute.xlu0 %2027 }
 0x109   :  { %v2862_v24 = vsel %vm2859_vm13, %v2797_v21, %v2218_v22  ;;  %v2798_v38 = vsel %vm2794_vm12, %v2733_v63, %v2028_v23 }
 0x10a   :  { %1277 = vrot.lane.b32.xlu1 %v10348_v5, %s9682_s17  ;;  %1087 = vrot.lane.b32.xlu0 %v691_v56, %s9683_s18  ;;  %v184_v56 = vld [vmem:[%s15662_s1 + $0xb0] sm:$0xff] }
 0x10b   :  { %9300 = vmatprep.mubr.msk.f32.mxu0 %vm2935_vm14, %v2862_v24  ;;  %249 = vst.msk [vmem:[#allocation2 + $0x121] sm:$0xff] %vm52_vm0, %v184_v56  ;;  %v2475_v24 = vsel %vm2469_vm7, %v2410_v16, %v10333_v58 }
 0x10c   :  { %v10385_v27 = vpop.permute.xlu1 %1455  ;;  %v10387_v28 = vpop.permute.xlu0 %881  ;;  %v2540_v25 = vsel %vm2534_vm8, %v2475_v24, %v10357_v18  ;;  %v698_v18 = vrot.slane %v10443_v37, 2 }
 0x10d   :  { %v2605_v50 = vsel %vm2599_vm9, %v2540_v25, %v10385_v27 }
 0x10e   :  { %2041 = vrot.lane.b32.xlu1 %v533_v12, %s9688_s14  ;;  %1851 = vrot.lane.b32.xlu0 %v10359_v15, %s9687_s25  ;;  %v699_v35 = vsel %vm656_vm2, %v697_v55, %v698_v18 }
 0x110   :  { %v2220_v39 = vpop.permute.xlu1 %2219  ;;  %v1646_v30 = vpop.permute.xlu0 %1645 }
 0x111   :  { %v2863_v29 = vsel %vm2859_vm13, %v2798_v38, %v2220_v39  ;;  %v2669_v49 = vsel %vm15740_vm10, %v2604_v31, %v1646_v30  ;;  %v540_v38 = vsel %vm495_vm3, %v537_v19, %v539_v33 }
 0x112   :  { %1469 = vrot.lane.b32.xlu1 %v533_v12, %s9685_s0  ;;  %1279 = vrot.lane.b32.xlu0 %v10359_v15, %s9682_s17 }
 0x113   :  { %9301 = vmatmul.mubr.msk.f32.gmra.mrb[2].mxu0 %vm2935_vm14, %v2863_v29  ;;  %v700_v29 = vrot.slane %v317_v40, 2 }
 0x114   :  { %v10406_v43 = vpop.permute.xlu1 %1073  ;;  %v10408_v45 = vpop.permute.xlu0 %883 }
 0x115   :  { %v701_v46 = vsel %vm656_vm2, %v698_v18, %v700_v29 }
 0x116   :  { %2233 = vrot.lane.b32.xlu1 %v694_v41, %s9690_s2  ;;  %2043 = vrot.lane.b32.xlu0 %v535_v42, %s9688_s14 }
 0x118   :  { %v1838_v47 = vpop.permute.xlu1 %1837  ;;  %v1648_v48 = vpop.permute.xlu0 %1647 }
 0x119   :  { %v2734_v57 = vsel %vm2729_vm11, %v2669_v49, %v1838_v47  ;;  %v2670_v14 = vsel %vm15740_vm10, %v2605_v50, %v1648_v48  ;;  %v702_v50 = vrot.slane %v10516_v3, 2 }
 0x11a   :  { %1471 = vrot.lane.b32.xlu1 %v535_v42, %s9685_s0  ;;  %897 = vrot.lane.b32.xlu0 %v533_v12, %s9684_s19 }
 0x11c   :  { %v10415_v52 = vpop.permute.xlu1 %1265  ;;  %v10417_v53 = vpop.permute.xlu0 %1075 }
 0x11e   :  { %2235 = vrot.lane.b32.xlu1 %v696_v51, %s9690_s2  ;;  %1661 = vrot.lane.b32.xlu0 %v694_v41, %s9686_s22 }
 0x120   :  { %v2030_v60 = vpop.permute.xlu1 %2029  ;;  %v1840_v0 = vpop.permute.xlu0 %1839 }
 0x121   :  { %v2799_v20 = vsel %vm2794_vm12, %v2734_v57, %v2030_v60  ;;  %v2735_v58 = vsel %vm2729_vm11, %v2670_v14, %v1840_v0  ;;  %v2411_v0 = vsel %vm52_vm0, %v10128_v59, %v10387_v28  ;;  %v10527_v59 = vld [vmem:[#allocation2 + $0xe0] sm:$0xff]  ;;  %v541_v57 = vrot.slane %v10516_v3, 1 }
 0x122   :  { %1089 = vrot.lane.b32.xlu1 %v694_v41, %s9683_s18  ;;  %899 = vrot.lane.b32.xlu0 %v535_v42, %s9684_s19  ;;  %v2476_v1 = vsel %vm2469_vm7, %v2411_v0, %v10406_v43  ;;  %v542_v62 = vrot.slane %v10527_v59, 1 }
 0x123   :  { %v2541_v7 = vsel %vm2534_vm8, %v2476_v1, %v10415_v52  ;;  %v10600_v1 = vld [vmem:[#allocation2 + $0xf0] sm:$0xff] }
 0x124   :  { %v10439_v44 = vpop.permute.xlu1 %1457  ;;  %v10441_v54 = vpop.permute.xlu0 %1267  ;;  %v543_v16 = vsel %vm495_vm3, %v541_v57, %v542_v62 }
 0x125   :  { %v2606_v28 = vsel %vm2599_vm9, %v2541_v7, %v10439_v44  ;;  %v2412_v44 = vsel %vm52_vm0, %v10133_v61, %v10408_v45  ;;  %v320_v61 = vld [vmem:[#allocation2 + $0xe8] sm:$0x3] }
 0x126   :  { %1853 = vrot.lane.b32.xlu1 %v10432_v4, %s9687_s25  ;;  %1663 = vrot.lane.b32.xlu0 %v696_v51, %s9686_s22  ;;  %v544_v14 = vrot.slane %v320_v61, 1 }
 0x128   :  { %v2222_v21 = vpop.permute.xlu1 %2221  ;;  %v2032_v22 = vpop.permute.xlu0 %2031 }
 0x129   :  { %v2864_v23 = vsel %vm2859_vm13, %v2799_v20, %v2222_v21  ;;  %v2800_v63 = vsel %vm2794_vm12, %v2735_v58, %v2032_v22 }
 0x12a   :  { %1281 = vrot.lane.b32.xlu1 %v10432_v4, %s9682_s17  ;;  %1091 = vrot.lane.b32.xlu0 %v696_v51, %s9683_s18  ;;  %v186_v51 = vld [vmem:[%s15662_s1 + $0xc0] sm:$0xff] }
 0x12b   :  { %9303 = vmatprep.mubr.msk.f32.mxu0 %vm2935_vm14, %v2864_v23  ;;  %251 = vst.msk [vmem:[#allocation2 + $0x139] sm:$0xff] %vm52_vm0, %v186_v51  ;;  %v2477_v23 = vsel %vm2469_vm7, %v2412_v44, %v10417_v53 }
 0x12c   :  { %v10469_v12 = vpop.permute.xlu1 %1459  ;;  %v10471_v26 = vpop.permute.xlu0 %885  ;;  %v2542_v24 = vsel %vm2534_vm8, %v2477_v23, %v10441_v54  ;;  %v703_v54 = vrot.slane %v10527_v59, 2 }
 0x12d   :  { %v2607_v45 = vsel %vm2599_vm9, %v2542_v24, %v10469_v12 }
 0x12e   :  { %2045 = vrot.lane.b32.xlu1 %v538_v8, %s9688_s14  ;;  %1855 = vrot.lane.b32.xlu0 %v10443_v37, %s9687_s25  ;;  %v704_v33 = vsel %vm656_vm2, %v702_v50, %v703_v54 }
 0x130   :  { %v2224_v34 = vpop.permute.xlu1 %2223  ;;  %v1650_v9 = vpop.permute.xlu0 %1649 }
 0x131   :  { %v2865_v27 = vsel %vm2859_vm13, %v2800_v63, %v2224_v34  ;;  %v2671_v43 = vsel %vm15740_vm10, %v2606_v28, %v1650_v9  ;;  %v545_v63 = vsel %vm495_vm3, %v542_v62, %v544_v14 }
 0x132   :  { %1473 = vrot.lane.b32.xlu1 %v538_v8, %s9685_s0  ;;  %1283 = vrot.lane.b32.xlu0 %v10443_v37, %s9682_s17 }
 0x133   :  { %9304 = vmatmul.mubr.msk.f32.gmra.mrb[4].mxu0 %vm2935_vm14, %v2865_v27  ;;  %v705_v27 = vrot.slane %v320_v61, 2 }
 0x134   :  { %v10490_v39 = vpop.permute.xlu1 %1077  ;;  %v10492_v30 = vpop.permute.xlu0 %887 }
 0x135   :  { %v706_v29 = vsel %vm656_vm2, %v703_v54, %v705_v27 }
 0x136   :  { %2237 = vrot.lane.b32.xlu1 %v699_v35, %s9690_s2  ;;  %2047 = vrot.lane.b32.xlu0 %v540_v38, %s9688_s14 }
 0x138   :  { %v1842_v41 = vpop.permute.xlu1 %1841  ;;  %v1652_v42 = vpop.permute.xlu0 %1651 }
 0x139   :  { %v2736_v52 = vsel %vm2729_vm11, %v2671_v43, %v1842_v41  ;;  %v2672_v40 = vsel %vm15740_vm10, %v2607_v45, %v1652_v42  ;;  %v707_v45 = vrot.slane %v10600_v1, 2 }
 0x13a   :  { %1475 = vrot.lane.b32.xlu1 %v540_v38, %s9685_s0  ;;  %901 = vrot.lane.b32.xlu0 %v538_v8, %s9684_s19 }
 0x13c   :  { %v10499_v47 = vpop.permute.xlu1 %1269  ;;  %v10501_v48 = vpop.permute.xlu0 %1079 }
 0x13e   :  { %2239 = vrot.lane.b32.xlu1 %v701_v46, %s9690_s2  ;;  %1665 = vrot.lane.b32.xlu0 %v699_v35, %s9686_s22 }
 0x140   :  { %v2034_v56 = vpop.permute.xlu1 %2033  ;;  %v1844_v60 = vpop.permute.xlu0 %1843 }
 0x141   :  { %v2801_v19 = vsel %vm2794_vm12, %v2736_v52, %v2034_v56  ;;  %v2737_v53 = vsel %vm2729_vm11, %v2672_v40, %v1844_v60  ;;  %v2413_v60 = vsel %vm52_vm0, %v10168_v13, %v10471_v26  ;;  %v10611_v13 = vld [vmem:[#allocation2 + $0xf8] sm:$0xff]  ;;  %v546_v52 = vrot.slane %v10600_v1, 1 }
 0x142   :  { %1093 = vrot.lane.b32.xlu1 %v699_v35, %s9683_s18  ;;  %903 = vrot.lane.b32.xlu0 %v540_v38, %s9684_s19  ;;  %v2478_v0 = vsel %vm2469_vm7, %v2413_v60, %v10490_v39  ;;  %v547_v57 = vrot.slane %v10611_v13, 1 }
 0x143   :  { %v2543_v7 = vsel %vm2534_vm8, %v2478_v0, %v10499_v47  ;;  %v10684_v0 = vld [vmem:[#allocation2 + $0x108] sm:$0xff] }
 0x144   :  { %v10523_v31 = vpop.permute.xlu1 %1461  ;;  %v10525_v49 = vpop.permute.xlu0 %1271  ;;  %v548_v44 = vsel %vm495_vm3, %v546_v52, %v547_v57 }
 0x145   :  { %v2608_v26 = vsel %vm2599_vm9, %v2543_v7, %v10523_v31  ;;  %v2414_v31 = vsel %vm52_vm0, %v10173_v17, %v10492_v30  ;;  %v323_v17 = vld [vmem:[#allocation2 + $0x100] sm:$0x3] }
 0x146   :  { %1857 = vrot.lane.b32.xlu1 %v10516_v3, %s9687_s25  ;;  %1667 = vrot.lane.b32.xlu0 %v701_v46, %s9686_s22  ;;  %v549_v40 = vrot.slane %v323_v17, 1 }
 0x148   :  { %v2226_v20 = vpop.permute.xlu1 %2225  ;;  %v2036_v21 = vpop.permute.xlu0 %2035 }
 0x149   :  { %v2866_v22 = vsel %vm2859_vm13, %v2801_v19, %v2226_v20  ;;  %v2802_v58 = vsel %vm2794_vm12, %v2737_v53, %v2036_v21 }
 0x14a   :  { %1285 = vrot.lane.b32.xlu1 %v10516_v3, %s9682_s17  ;;  %1095 = vrot.lane.b32.xlu0 %v701_v46, %s9683_s18  ;;  %v188_v46 = vld [vmem:[%s15662_s1 + $0xd0] sm:$0xff] }
 0x14b   :  { %9306 = vmatprep.mubr.msk.f32.mxu0 %vm2935_vm14, %v2866_v22  ;;  %253 = vst.msk [vmem:[#allocation2 + $0x151] sm:$0xff] %vm52_vm0, %v188_v46  ;;  %v2479_v22 = vsel %vm2469_vm7, %v2414_v31, %v10501_v48 }
 0x14c   :  { %v10553_v8 = vpop.permute.xlu1 %1463  ;;  %v10555_v25 = vpop.permute.xlu0 %889  ;;  %v2544_v23 = vsel %vm2534_vm8, %v2479_v22, %v10525_v49  ;;  %v708_v49 = vrot.slane %v10611_v13, 2 }
 0x14d   :  { %v2609_v30 = vsel %vm2599_vm9, %v2544_v23, %v10553_v8 }
 0x14e   :  { %2049 = vrot.lane.b32.xlu1 %v543_v16, %s9688_s14  ;;  %1859 = vrot.lane.b32.xlu0 %v10527_v59, %s9687_s25  ;;  %v709_v14 = vsel %vm656_vm2, %v707_v45, %v708_v49 }
 0x150   :  { %v2228_v55 = vpop.permute.xlu1 %2227  ;;  %v1654_v18 = vpop.permute.xlu0 %1653 }
 0x151   :  { %v2867_v12 = vsel %vm2859_vm13, %v2802_v58, %v2228_v55  ;;  %v2673_v39 = vsel %vm15740_vm10, %v2608_v26, %v1654_v18  ;;  %v550_v58 = vsel %vm495_vm3, %v547_v57, %v549_v40 }
 0x152   :  { %1477 = vrot.lane.b32.xlu1 %v543_v16, %s9685_s0  ;;  %1287 = vrot.lane.b32.xlu0 %v10527_v59, %s9682_s17 }
 0x153   :  { %9307 = vmatmul.mubr.msk.f32.gmra.mrb[6].mxu0 %vm2935_vm14, %v2867_v12  ;;  %v710_v12 = vrot.slane %v323_v17, 2 }
 0x154   :  { %v10574_v34 = vpop.permute.xlu1 %1081  ;;  %v10576_v9 = vpop.permute.xlu0 %891 }
 0x155   :  { %v711_v27 = vsel %vm656_vm2, %v708_v49, %v710_v12 }
 0x156   :  { %2241 = vrot.lane.b32.xlu1 %v704_v33, %s9690_s2  ;;  %2051 = vrot.lane.b32.xlu0 %v545_v63, %s9688_s14 }
 0x158   :  { %v1846_v35 = vpop.permute.xlu1 %1845  ;;  %v1656_v38 = vpop.permute.xlu0 %1655 }
 0x159   :  { %v2738_v47 = vsel %vm2729_vm11, %v2673_v39, %v1846_v35  ;;  %v2674_v61 = vsel %vm15740_vm10, %v2609_v30, %v1656_v38  ;;  %v712_v30 = vrot.slane %v10684_v0, 2 }
 0x15a   :  { %1479 = vrot.lane.b32.xlu1 %v545_v63, %s9685_s0  ;;  %905 = vrot.lane.b32.xlu0 %v543_v16, %s9684_s19 }
 0x15c   :  { %v10583_v41 = vpop.permute.xlu1 %1273  ;;  %v10585_v42 = vpop.permute.xlu0 %1083 }
 0x15e   :  { %2243 = vrot.lane.b32.xlu1 %v706_v29, %s9690_s2  ;;  %1669 = vrot.lane.b32.xlu0 %v704_v33, %s9686_s22 }
 0x160   :  { %v2038_v51 = vpop.permute.xlu1 %2037  ;;  %v1848_v56 = vpop.permute.xlu0 %1847 }
 0x161   :  { %v2803_v62 = vsel %vm2794_vm12, %v2738_v47, %v2038_v51  ;;  %v2739_v48 = vsel %vm2729_vm11, %v2674_v61, %v1848_v56  ;;  %v2415_v56 = vsel %vm52_vm0, %v10210_v32, %v10555_v25  ;;  %v325_v32 = vld [vmem:[#allocation2 + $0x110] sm:$0xff] }
 0x162   :  { %1097 = vrot.lane.b32.xlu1 %v704_v33, %s9683_s18  ;;  %907 = vrot.lane.b32.xlu0 %v545_v63, %s9684_s19  ;;  %v2480_v60 = vsel %vm2469_vm7, %v2415_v56, %v10574_v34  ;;  %v552_v52 = vrot.slane %v325_v32, 1  ;;  %v713_v61 = vrot.slane %v325_v32, 2 }
 0x163   :  { %v2545_v7 = vsel %vm2534_vm8, %v2480_v60, %v10583_v41  ;;  %v551_v41 = vrot.slane %v10684_v0, 1  ;;  %v327_v60 = vld [vmem:[#allocation2 + $0x120] sm:$0xff] }
 0x164   :  { %v10607_v28 = vpop.permute.xlu1 %1465  ;;  %v10609_v43 = vpop.permute.xlu0 %1275 }
 0x165   :  { %v2610_v25 = vsel %vm2599_vm9, %v2545_v7, %v10607_v28  ;;  %v2416_v28 = vsel %vm52_vm0, %v10215_v36, %v10576_v9  ;;  %v553_v31 = vsel %vm495_vm3, %v551_v41, %v552_v52  ;;  %v326_v36 = vld [vmem:[#allocation2 + $0x118] sm:$0x3] }
 0x166   :  { %1861 = vrot.lane.b32.xlu1 %v10600_v1, %s9687_s25  ;;  %1671 = vrot.lane.b32.xlu0 %v706_v29, %s9686_s22 }
 0x168   :  { %v2230_v19 = vpop.permute.xlu1 %2229  ;;  %v2040_v20 = vpop.permute.xlu0 %2039 }
 0x169   :  { %v2868_v21 = vsel %vm2859_vm13, %v2803_v62, %v2230_v19  ;;  %v2804_v53 = vsel %vm2794_vm12, %v2739_v48, %v2040_v20 }
 0x16a   :  { %1289 = vrot.lane.b32.xlu1 %v10600_v1, %s9682_s17  ;;  %1099 = vrot.lane.b32.xlu0 %v706_v29, %s9683_s18  ;;  %v190_v29 = vld [vmem:[%s15662_s1 + $0xe0] sm:$0xff] }
 0x16b   :  { %9309 = vmatprep.mubr.msk.f32.mxu0 %vm2935_vm14, %v2868_v21  ;;  %255 = vst.msk [vmem:[#allocation2 + $0x169] sm:$0xff] %vm52_vm0, %v190_v29  ;;  %v2481_v21 = vsel %vm2469_vm7, %v2416_v28, %v10585_v42 }
 0x16c   :  { %v10637_v16 = vpop.permute.xlu1 %1467  ;;  %v10639_v24 = vpop.permute.xlu0 %893  ;;  %v2546_v22 = vsel %vm2534_vm8, %v2481_v21, %v10609_v43  ;;  %v554_v43 = vrot.slane %v326_v36, 1 }
 0x16d   :  { %v2611_v9 = vsel %vm2599_vm9, %v2546_v22, %v10637_v16  ;;  %v714_v16 = vsel %vm656_vm2, %v712_v30, %v713_v61  ;;  %v329_v22 = vld [vmem:[#allocation2 + $0x130] sm:$0x3] }
 0x16e   :  { %2053 = vrot.lane.b32.xlu1 %v548_v44, %s9688_s14  ;;  %1863 = vrot.lane.b32.xlu0 %v10611_v13, %s9687_s25 }
 0x170   :  { %v2232_v50 = vpop.permute.xlu1 %2231  ;;  %v1658_v54 = vpop.permute.xlu0 %1657 }
 0x171   :  { %v2869_v8 = vsel %vm2859_vm13, %v2804_v53, %v2232_v50  ;;  %v2675_v34 = vsel %vm15740_vm10, %v2610_v25, %v1658_v54  ;;  %v555_v53 = vsel %vm495_vm3, %v552_v52, %v554_v43 }
 0x172   :  { %1481 = vrot.lane.b32.xlu1 %v548_v44, %s9685_s0  ;;  %1291 = vrot.lane.b32.xlu0 %v10611_v13, %s9682_s17 }
 0x173   :  { %9310 = vmatmul.mubr.msk.f32.gmra.mrb[8].mxu0 %vm2935_vm14, %v2869_v8  ;;  %v715_v8 = vrot.slane %v326_v36, 2  ;;  %v717_v36 = vrot.slane %v327_v60, 2 }
 0x174   :  { %v10658_v55 = vpop.permute.xlu1 %1085  ;;  %v10660_v18 = vpop.permute.xlu0 %895 }
 0x175   :  { %v716_v12 = vsel %vm656_vm2, %v713_v61, %v715_v8 }
 0x176   :  { %2245 = vrot.lane.b32.xlu1 %v709_v14, %s9690_s2  ;;  %2055 = vrot.lane.b32.xlu0 %v550_v58, %s9688_s14 }
 0x178   :  { %v1850_v33 = vpop.permute.xlu1 %1849  ;;  %v1660_v63 = vpop.permute.xlu0 %1659 }
 0x179   :  { %v2740_v47 = vsel %vm2729_vm11, %v2675_v34, %v1850_v33  ;;  %v2676_v17 = vsel %vm15740_vm10, %v2611_v9, %v1660_v63 }
 0x17a   :  { %1483 = vrot.lane.b32.xlu1 %v550_v58, %s9685_s0  ;;  %909 = vrot.lane.b32.xlu0 %v548_v44, %s9684_s19 }
 0x17c   :  { %v10667_v35 = vpop.permute.xlu1 %1277  ;;  %v10669_v38 = vpop.permute.xlu0 %1087 }
 0x17e   :  { %2247 = vrot.lane.b32.xlu1 %v711_v27, %s9690_s2  ;;  %1673 = vrot.lane.b32.xlu0 %v709_v14, %s9686_s22 }
 0x180   :  { %v2042_v46 = vpop.permute.xlu1 %2041  ;;  %v1852_v51 = vpop.permute.xlu0 %1851 }
 0x181   :  { %v2805_v57 = vsel %vm2794_vm12, %v2740_v47, %v2042_v46  ;;  %v2741_v42 = vsel %vm2729_vm11, %v2676_v17, %v1852_v51  ;;  %v2417_v51 = vsel %vm52_vm0, %v10267_v11, %v10639_v24  ;;  %v328_v11 = vld [vmem:[#allocation2 + $0x128] sm:$0xff]  ;;  %v556_v47 = vrot.slane %v327_v60, 1 }
 0x182   :  { %1101 = vrot.lane.b32.xlu1 %v709_v14, %s9683_s18  ;;  %911 = vrot.lane.b32.xlu0 %v550_v58, %s9684_s19  ;;  %v2482_v56 = vsel %vm2469_vm7, %v2417_v51, %v10658_v55  ;;  %v718_v9 = vrot.slane %v328_v11, 2  ;;  %v559_v17 = vrot.slane %v329_v22, 1  ;;  %v330_v51 = vld [vmem:[#allocation2 + $0x138] sm:$0xff] }
 0x183   :  { %v2547_v7 = vsel %vm2534_vm8, %v2482_v56, %v10667_v35  ;;  %v557_v35 = vrot.slane %v328_v11, 1 }
 0x184   :  { %v10691_v26 = vpop.permute.xlu1 %1469  ;;  %v10693_v39 = vpop.permute.xlu0 %1279 }
 0x185   :  { %v2612_v24 = vsel %vm2599_vm9, %v2547_v7, %v10691_v26  ;;  %v2418_v26 = vsel %vm52_vm0, %v10277_v10, %v10660_v18  ;;  %v560_v43 = vsel %vm495_vm3, %v557_v35, %v559_v17 }
 0x186   :  { %1865 = vrot.lane.b32.xlu1 %v10684_v0, %s9687_s25  ;;  %1675 = vrot.lane.b32.xlu0 %v711_v27, %s9686_s22 }
 0x188   :  { %v2234_v62 = vpop.permute.xlu1 %2233  ;;  %v2044_v19 = vpop.permute.xlu0 %2043 }
 0x189   :  { %v2870_v20 = vsel %vm2859_vm13, %v2805_v57, %v2234_v62  ;;  %v2806_v48 = vsel %vm2794_vm12, %v2741_v42, %v2044_v19  ;;  %v2483_v19 = vsel %vm2469_vm7, %v2418_v26, %v10669_v38 }
 0x18a   :  { %1293 = vrot.lane.b32.xlu1 %v10684_v0, %s9682_s17  ;;  %1103 = vrot.lane.b32.xlu0 %v711_v27, %s9683_s18  ;;  %v192_v27 = vld [vmem:[%s15662_s1 + $0xf0] sm:$0xff]  ;;  %v2548_v28 = vsel %vm2534_vm8, %v2483_v19, %v10693_v39 }
 0x18b   :  { %9312 = vmatprep.mubr.msk.f32.mxu0 %vm2935_vm14, %v2870_v20  ;;  %257 = vst.msk [vmem:[#allocation2 + $0x181] sm:$0xff] %vm52_vm0, %v192_v27  ;;  %v558_v20 = vsel %vm495_vm3, %v556_v47, %v557_v35 }
 0x18c   :  { %v10718_v44 = vpop.permute.xlu1 %1471  ;;  %v10720_v23 = vpop.permute.xlu0 %897 }
 0x18d   :  { %v2613_v10 = vsel %vm2599_vm9, %v2548_v28, %v10718_v44  ;;  %v719_v44 = vsel %vm656_vm2, %v717_v36, %v718_v9  ;;  %v2419_v27 = vsel %vm52_vm0, %v10348_v5, %v10720_v23  ;;  %v331_v23 = vld [vmem:[#allocation2 + $0x140] sm:$0xff]  ;;  %v332_v28 = vld [vmem:[#allocation2 + $0x148] sm:$0x3] }
 0x18e   :  { %2057 = vrot.lane.b32.xlu1 %v553_v31, %s9688_s14  ;;  %1867 = vrot.lane.b32.xlu0 %v325_v32, %s9687_s25 }
 0x190   :  { %v2236_v45 = vpop.permute.xlu1 %2235  ;;  %v1662_v49 = vpop.permute.xlu0 %1661 }
 0x191   :  { %v2871_v40 = vsel %vm2859_vm13, %v2806_v48, %v2236_v45  ;;  %v2677_v55 = vsel %vm15740_vm10, %v2612_v24, %v1662_v49  ;;  %v720_v49 = vrot.slane %v329_v22, 2  ;;  %v722_v22 = vrot.slane %v330_v51, 2 }
 0x192   :  { %1485 = vrot.lane.b32.xlu1 %v553_v31, %s9685_s0  ;;  %1295 = vrot.lane.b32.xlu0 %v325_v32, %s9682_s17 }
 0x193   :  { %9313 = vmatmul.mubr.msk.f32.gmra.mrb[10].mxu0 %vm2935_vm14, %v2871_v40 }
 0x194   :  { %v10736_v50 = vpop.permute.xlu1 %1089  ;;  %v10738_v54 = vpop.permute.xlu0 %899 }
 0x196   :  { %2249 = vrot.lane.b32.xlu1 %v714_v16, %s9690_s2  ;;  %2059 = vrot.lane.b32.xlu0 %v555_v53, %s9688_s14 }
 0x198   :  { %v1854_v14 = vpop.permute.xlu1 %1853  ;;  %v1664_v58 = vpop.permute.xlu0 %1663 }
 0x199   :  { %v2742_v34 = vsel %vm2729_vm11, %v2677_v55, %v1854_v14  ;;  %v2678_v18 = vsel %vm15740_vm10, %v2613_v10, %v1664_v58  ;;  %v562_v55 = vrot.slane %v331_v23, 1  ;;  %v723_v10 = vrot.slane %v331_v23, 2 }
 0x19a   :  { %1487 = vrot.lane.b32.xlu1 %v555_v53, %s9685_s0  ;;  %913 = vrot.lane.b32.xlu0 %v553_v31, %s9684_s19 }
 0x19c   :  { %v10745_v33 = vpop.permute.xlu1 %1281  ;;  %v10747_v63 = vpop.permute.xlu0 %1091 }
 0x19e   :  { %2251 = vrot.lane.b32.xlu1 %v716_v12, %s9690_s2  ;;  %1677 = vrot.lane.b32.xlu0 %v714_v16, %s9686_s22 }
 0x1a0   :  { %v2046_v29 = vpop.permute.xlu1 %2045  ;;  %v1856_v46 = vpop.permute.xlu0 %1855 }
 0x1a1   :  { %v2807_v41 = vsel %vm2794_vm12, %v2742_v34, %v2046_v29  ;;  %v2743_v38 = vsel %vm2729_vm11, %v2678_v18, %v1856_v46  ;;  %v194_v29 = vld [vmem:[%s15662_s1 + $0x100] sm:$0xff]  ;;  %v2484_v46 = vsel %vm2469_vm7, %v2419_v27, %v10736_v50  ;;  %v195_v34 = vld [vmem:[%s15662_s1 + $0x108] sm:$0xff]  ;;  %v564_v18 = vrot.slane %v332_v28, 1 }
 0x1a2   :  { %1105 = vrot.lane.b32.xlu1 %v714_v16, %s9683_s18  ;;  %915 = vrot.lane.b32.xlu0 %v555_v53, %s9684_s19  ;;  %v721_v53 = vsel %vm656_vm2, %v718_v9, %v720_v49  ;;  %259 = vst.msk [vmem:[#allocation2 + $0x1c9] sm:$0xff] %vm52_vm0, %v194_v29  ;;  %v2549_v56 = vsel %vm2534_vm8, %v2484_v46, %v10745_v33  ;;  %v561_v33 = vrot.slane %v330_v51, 1  ;;  %260 = vst.msk [vmem:[#allocation2 + $0x1d1] sm:$0xff] %vm52_vm0, %v195_v34 }
 0x1a3   :  { %v565_v17 = vsel %vm495_vm3, %v562_v55, %v564_v18 }
 0x1a4   :  { %v10767_v32 = vpop.permute.xlu1 %1473  ;;  %v10769_v25 = vpop.permute.xlu0 %1283 }
 0x1a5   :  { %v2614_v6 = vsel %vm2599_vm9, %v2549_v56, %v10767_v32  ;;  %v197_v56 = vld [vmem:[%s15662_s1 + $0x118] sm:$0xff] }
 0x1a6   :  { %1869 = vrot.lane.b32.xlu1 %v327_v60, %s9687_s25  ;;  %1679 = vrot.lane.b32.xlu0 %v716_v12, %s9686_s22  ;;  %262 = vst.msk [vmem:[#allocation2 + $0x1e9] sm:$0xff] %vm52_vm0, %v197_v56 }
 0x1a8   :  { %v2238_v52 = vpop.permute.xlu1 %2237  ;;  %v2048_v57 = vpop.permute.xlu0 %2047 }
 0x1a9   :  { %v2872_v62 = vsel %vm2859_vm13, %v2807_v41, %v2238_v52  ;;  %v2808_v39 = vsel %vm2794_vm12, %v2743_v38, %v2048_v57  ;;  %v2420_v52 = vsel %vm52_vm0, %v10359_v15, %v10738_v54 }
 0x1aa   :  { %1297 = vrot.lane.b32.xlu1 %v327_v60, %s9682_s17  ;;  %1107 = vrot.lane.b32.xlu0 %v716_v12, %s9683_s18  ;;  %v2485_v57 = vsel %vm2469_vm7, %v2420_v52, %v10747_v63 }
 0x1ab   :  { %9315 = vmatprep.mubr.msk.f32.mxu0 %vm2935_vm14, %v2872_v62  ;;  %v563_v62 = vsel %vm495_vm3, %v561_v33, %v562_v55  ;;  %v2550_v26 = vsel %vm2534_vm8, %v2485_v57, %v10769_v25 }
 0x1ac   :  { %v10791_v21 = vpop.permute.xlu1 %1475  ;;  %v10793_v31 = vpop.permute.xlu0 %901 }
 0x1ad   :  { %v2615_v15 = vsel %vm2599_vm9, %v2550_v26, %v10791_v21  ;;  %v724_v21 = vsel %vm656_vm2, %v722_v22, %v723_v10  ;;  %v2421_v27 = vsel %vm52_vm0, %v10432_v4, %v10793_v31  ;;  %v10926_v4 = vstv %s49_s20  ;;  %s9697_s20 = smov 50  }
 0x1ae   :  { %2061 = vrot.lane.b32.xlu1 %v558_v20, %s9688_s14  ;;  %1871 = vrot.lane.b32.xlu0 %v328_v11, %s9687_s25 }
 0x1b0   :  { %v2240_v42 = vpop.permute.xlu1 %2239  ;;  %v1666_v30 = vpop.permute.xlu0 %1665 }
 0x1b1   :  { %v2873_v61 = vsel %vm2859_vm13, %v2808_v39, %v2240_v42  ;;  %v2679_v7 = vsel %vm15740_vm10, %v2614_v6, %v1666_v30  ;;  %v725_v30 = vrot.slane %v332_v28, 2 }
 0x1b2   :  { %1489 = vrot.lane.b32.xlu1 %v558_v20, %s9685_s0  ;;  %1299 = vrot.lane.b32.xlu0 %v328_v11, %s9682_s17 }
 0x1b3   :  { %9316 = vmatmul.mubr.msk.f32.gmra.mrb[12].mxu0 %vm2935_vm14, %v2873_v61 }
 0x1b4   :  { %v10808_v48 = vpop.permute.xlu1 %1093  ;;  %v10810_v45 = vpop.permute.xlu0 %903 }
 0x1b5   :  { %v2486_v29 = vsel %vm2469_vm7, %v2421_v27, %v10808_v48  ;;  %v2422_v28 = vsel %vm52_vm0, %v10443_v37, %v10810_v45 }
 0x1b6   :  { %2253 = vrot.lane.b32.xlu1 %v719_v44, %s9690_s2  ;;  %2063 = vrot.lane.b32.xlu0 %v560_v43, %s9688_s14 }
 0x1b8   :  { %v1858_v40 = vpop.permute.xlu1 %1857  ;;  %v1668_v16 = vpop.permute.xlu0 %1667 }
 0x1b9   :  { %v2744_v50 = vsel %vm2729_vm11, %v2679_v7, %v1858_v40  ;;  %v2680_v54 = vsel %vm15740_vm10, %v2615_v15, %v1668_v16  ;;  %v196_v16 = vld [vmem:[%s15662_s1 + $0x110] sm:$0xff]  ;;  %v10934_v7 = vld [vmem:[#allocation2 + $0x158] sm:$0xff] }
 0x1ba   :  { %1491 = vrot.lane.b32.xlu1 %v560_v43, %s9685_s0  ;;  %917 = vrot.lane.b32.xlu0 %v558_v20, %s9684_s19  ;;  %261 = vst.msk [vmem:[#allocation2 + $0x1e1] sm:$0xff] %vm52_vm0, %v196_v16 }
 0x1bc   :  { %v10817_v8 = vpop.permute.xlu1 %1285  ;;  %v10819_v14 = vpop.permute.xlu0 %1095 }
 0x1be   :  { %2255 = vrot.lane.b32.xlu1 %v721_v53, %s9690_s2  ;;  %1681 = vrot.lane.b32.xlu0 %v719_v44, %s9686_s22 }
 0x1c0   :  { %v2050_v58 = vpop.permute.xlu1 %2049  ;;  %v1860_v12 = vpop.permute.xlu0 %1859 }
 0x1c1   :  { %v2809_v32 = vsel %vm2794_vm12, %v2744_v50, %v2050_v58  ;;  %v2745_v63 = vsel %vm2729_vm11, %v2680_v54, %v1860_v12  ;;  %v2487_v54 = vsel %vm2469_vm7, %v2422_v28, %v10819_v14 }
 0x1c2   :  { %1109 = vrot.lane.b32.xlu1 %v719_v44, %s9683_s18  ;;  %919 = vrot.lane.b32.xlu0 %v560_v43, %s9684_s19  ;;  %v726_v43 = vsel %vm656_vm2, %v723_v10, %v725_v30 }
 0x1c4   :  { %v10836_v60 = vpop.permute.xlu1 %1477  ;;  %v10838_v5 = vpop.permute.xlu0 %1287 }
 0x1c5   :  { %v2552_v45 = vsel %vm2534_vm8, %v2487_v54, %v10838_v5 }
 0x1c6   :  { %v10843_v11 = vpop.f32.mrb[0].mxu0  ;;  %1873 = vrot.lane.b32.xlu1 %v330_v51, %s9687_s25  ;;  %1683 = vrot.lane.b32.xlu0 %v721_v53, %s9686_s22 }
 0x1c7   :  { %v10848_v24 = vpop.f32.mrb[1].mxu0 }
 0x1c8   :  { %v2242_v47 = vpop.permute.xlu1 %2241  ;;  %v2052_v35 = vpop.permute.xlu0 %2051 }
 0x1c9   :  { %v2874_v41 = vsel %vm2859_vm13, %v2809_v32, %v2242_v47  ;;  %v2810_v25 = vsel %vm2794_vm12, %v2745_v63, %v2052_v35  ;;  %v567_v47 = vrot.slane %v10934_v7, 1 }
 0x1ca   :  { %1301 = vrot.lane.b32.xlu1 %v330_v51, %s9682_s17  ;;  %1111 = vrot.lane.b32.xlu0 %v721_v53, %s9683_s18  ;;  %v10908_v53 = vld [vmem:[%s15664_s3] ss:$0 sm:$0xff]  ;;  %v10919_v51 = vld [vmem:[#allocation2 + $0x150] sm:$0xff] }
 0x1cb   :  { %9318 = vmatprep.mubr.msk.f32.mxu0 %vm2935_vm14, %v2874_v41  ;;  %v3204_v46 = vadd.f32 %v10843_v11, %v10908_v53  ;;  %v3199_v31 = vadd.f32 %v10908_v53, %v10848_v24  ;;  %v727_v30 = vrot.slane %v10919_v51, 2 }
 0x1cc   :  { %v10867_v19 = vpop.permute.xlu1 %1479  ;;  %v10869_v20 = vpop.permute.xlu0 %905 }
 0x1cd   :  { %v3575_v24 = vmul.f32 %v10926_v4, %v3204_v46  ;;  %vm3514_vm15 = vcmp.gt.f32.partialorder %v3204_v46, 0.0  ;;  %vm3513_vm1 = vcmp.gt.f32.partialorder %v3199_v31, 0.0 }
 0x1ce   :  { %2065 = vrot.lane.b32.xlu1 %v563_v62, %s9688_s14  ;;  %1875 = vrot.lane.b32.xlu0 %v331_v23, %s9687_s25 }
 0x1cf   :  { %v10963_v63 = vsel %vm3514_vm15, %v3204_v46, %v3575_v24  ;;  %v2423_v24 = vsel %vm52_vm0, %v10516_v3, %v10869_v20  ;;  %v11038_v3 = vld [vmem:[#allocation2 + $0x170] sm:$0xff] }
 0x1d0   :  { %v2244_v38 = vpop.permute.xlu1 %2243  ;;  %v1670_v36 = vpop.permute.xlu0 %1669 }
 0x1d1   :  { %v2875_v9 = vsel %vm2859_vm13, %v2810_v25, %v2244_v38 }
 0x1d2   :  { %1493 = vrot.lane.b32.xlu1 %v563_v62, %s9685_s0  ;;  %1303 = vrot.lane.b32.xlu0 %v331_v23, %s9682_s17  ;;  %v2551_v23 = vsel %vm2534_vm8, %v2486_v29, %v10817_v8  ;;  %v566_v8 = vrot.slane %v10919_v51, 1 }
 0x1d3   :  { %9319 = vmatmul.mubr.msk.f32.gmra.mrb[14].mxu0 %vm2935_vm14, %v2875_v9  ;;  %v2616_v11 = vsel %vm2599_vm9, %v2551_v23, %v10836_v60  ;;  %v3574_v60 = vmul.f32 %v10926_v4, %v3199_v31  ;;  %v2617_v9 = vsel %vm2599_vm9, %v2552_v45, %v10867_v19 }
 0x1d4   :  { %v10884_v39 = vpop.permute.xlu1 %1097  ;;  %v10886_v42 = vpop.permute.xlu0 %907  ;;  %v2681_v50 = vsel %vm15740_vm10, %v2616_v11, %v1670_v36  ;;  %v568_v37 = vsel %vm495_vm3, %v566_v8, %v567_v47  ;;  %v335_v36 = vld [vmem:[#allocation2 + $0x160] sm:$0x3] }
 0x1d5   :  { %v10971_v10 = vsel %vm3513_vm1, %v3199_v31, %v3574_v60  ;;  %vm15729_vm1 = vcmask 1041408  }
 0x1d6   :  { %2257 = vrot.lane.b32.xlu1 %v724_v21, %s9690_s2  ;;  %2067 = vrot.lane.b32.xlu0 %v565_v17, %s9688_s14 }
 0x1d8   :  { %v1862_v61 = vpop.permute.xlu1 %1861  ;;  %v10890_v44 = vpop.permute.xlu0 %1671 }
 0x1d9   :  { %v2746_v55 = vsel %vm2729_vm11, %v2681_v50, %v1862_v61  ;;  %v2682_v5 = vsel %vm15740_vm10, %v2617_v9, %v10890_v44  ;;  %v728_v61 = vrot.slane %v10934_v7, 2  ;;  %v198_v50 = vld [vmem:[%s15662_s1 + $0x120] sm:$0xff] }
 0x1da   :  { %1495 = vrot.lane.b32.xlu1 %v565_v17, %s9685_s0  ;;  %921 = vrot.lane.b32.xlu0 %v563_v62, %s9684_s19  ;;  %263 = vst.msk [vmem:[#allocation2 + $0x1f9] sm:$0xff] %vm52_vm0, %v198_v50 }
 0x1db   :  { %v729_v44 = vsel %vm656_vm2, %v727_v30, %v728_v61 }
 0x1dc   :  { %v10895_v49 = vpop.permute.xlu1 %1289  ;;  %v10897_v40 = vpop.permute.xlu0 %1099 }
 0x1de   :  { %2259 = vrot.lane.b32.xlu1 %v726_v43, %s9690_s2  ;;  %1685 = vrot.lane.b32.xlu0 %v724_v21, %s9686_s22 }
 0x1e0   :  { %v2054_v58 = vpop.permute.xlu1 %2053  ;;  %v1864_v12 = vpop.permute.xlu0 %1863 }
 0x1e1   :  { %v2811_v35 = vsel %vm2794_vm12, %v2746_v55, %v2054_v58  ;;  %v2488_v55 = vsel %vm2469_vm7, %v2423_v24, %v10884_v39 }
 0x1e2   :  { %1113 = vrot.lane.b32.xlu1 %v724_v21, %s9683_s18  ;;  %923 = vrot.lane.b32.xlu0 %v565_v17, %s9684_s19  ;;  %v2747_v17 = vsel %vm2729_vm11, %v2682_v5, %v1864_v12 }
 0x1e4   :  { %v10930_v6 = vpop.permute.xlu1 %1481  ;;  %v10932_v48 = vpop.permute.xlu0 %1291 }
 0x1e6   :  { %v9302_v33 = vpop.f32.mrb[2].mxu0  ;;  %1877 = vrot.lane.b32.xlu1 %v10919_v51, %s9687_s25  ;;  %1687 = vrot.lane.b32.xlu0 %v726_v43, %s9686_s22 }
 0x1e7   :  { %v3214_v34 = vadd.f32 %v9302_v33, %v10908_v53  ;;  %v3208_v32 = vpop.f32.mrb[3].mxu0 }
 0x1e8   :  { %v3209_v41 = vadd.f32 %v10908_v53, %v3208_v32  ;;  %v2246_v52 = vpop.permute.xlu1 %2245  ;;  %v2056_v57 = vpop.permute.xlu0 %2055  ;;  %v199_v32 = vld [vmem:[%s15662_s1 + $0x128] sm:$0xff] }
 0x1e9   :  { %vm3516_vm6 = vcmp.gt.f32.partialorder %v3214_v34, 0.0  ;;  %v3577_v62 = vmul.f32 %v10926_v4, %v3214_v34  ;;  %v2876_v26 = vsel %vm2859_vm13, %v2811_v35, %v2246_v52  ;;  %v2812_v19 = vsel %vm2794_vm12, %v2747_v17, %v2056_v57  ;;  %264 = vst.msk [vmem:[#allocation2 + $0x201] sm:$0xff] %vm52_vm0, %v199_v32 }
 0x1ea   :  { %vm3515_vm5 = vcmp.gt.f32.partialorder %v3209_v41, 0.0  ;;  %v3576_v15 = vmul.f32 %v10926_v4, %v3209_v41  ;;  %1305 = vrot.lane.b32.xlu1 %v10919_v51, %s9682_s17  ;;  %1115 = vrot.lane.b32.xlu0 %v726_v43, %s9683_s18  ;;  %v569_v43 = vrot.slane %v335_v36, 1  ;;  %v730_v51 = vrot.slane %v335_v36, 2 }
 0x1eb   :  { %v10965_v22 = vsel %vm3516_vm6, %v3214_v34, %v3577_v62  ;;  %9321 = vmatprep.mubr.msk.f32.mxu0 %vm2935_vm14, %v2876_v26  ;;  %v11027_v34 = vld [vmem:[#allocation2 + $0x168] sm:$0xff]  ;;  %v572_v26 = vrot.slane %v11038_v3, 1  ;;  %v2424_v36 = vsel %vm52_vm0, %v10527_v59, %v10886_v42  ;;  %vm4170_vm6 = vcmask 1040384  }
 0x1ec   :  { %v3695_v18 = vmax.f32 %v10963_v63, %v10965_v22  ;;  %v10975_v25 = vsel %vm3515_vm5, %v3209_v41, %v3576_v15  ;;  %v10977_v14 = vpop.permute.xlu1 %1483  ;;  %v10979_v38 = vpop.permute.xlu0 %909  ;;  %v570_v12 = vsel %vm495_vm3, %v567_v47, %v569_v43  ;;  %v731_v31 = vsel %vm656_vm2, %v728_v61, %v730_v51  ;;  %v11068_v61 = vld [vmem:[#allocation2 + $0x178] sm:$0x3] }
 0x1ed   :  { %v3694_v21 = vmax.f32 %v10971_v10, %v10975_v25  ;;  %v2553_v47 = vsel %vm2534_vm8, %v2488_v55, %v10895_v49  ;;  %v571_v62 = vrot.slane %v11027_v34, 1  ;;  %v2489_v5 = vsel %vm2469_vm7, %v2424_v36, %v10897_v40 }
 0x1ee   :  { %2069 = vrot.lane.b32.xlu1 %v568_v37, %s9688_s14  ;;  %1879 = vrot.lane.b32.xlu0 %v10934_v7, %s9687_s25  ;;  %v2618_v20 = vsel %vm2599_vm9, %v2553_v47, %v10930_v6  ;;  %v2554_v59 = vsel %vm2534_vm8, %v2489_v5, %v10932_v48  ;;  %v732_v48 = vrot.slane %v11027_v34, 2  ;;  %v4272_v55 = vlaneseq }
 0x1ef   :  { %v573_v30 = vsel %vm495_vm3, %v571_v62, %v572_v26  ;;  %v735_v62 = vrot.slane %v11068_v61, 2 }
 0x1f0   :  { %v2248_v16 = vpop.permute.xlu1 %2247  ;;  %v1674_v58 = vpop.permute.xlu0 %1673 }
 0x1f1   :  { %v2877_v27 = vsel %vm2859_vm13, %v2812_v19, %v2248_v16  ;;  %v2683_v39 = vsel %vm15740_vm10, %v2618_v20, %v1674_v58  ;;  %v2619_v16 = vsel %vm2599_vm9, %v2554_v59, %v10977_v14  ;;  %v574_v14 = vrot.slane %v11068_v61, 1 }
 0x1f2   :  { %1497 = vrot.lane.b32.xlu1 %v568_v37, %s9685_s0  ;;  %1307 = vrot.lane.b32.xlu0 %v10934_v7, %s9682_s17 }
 0x1f3   :  { %9322 = vmatmul.mubr.msk.f32.gmra.mrb[16].mxu0 %vm2935_vm14, %v2877_v27  ;;  %v733_v27 = vrot.slane %v11038_v3, 2  ;;  %v575_v32 = vsel %vm495_vm3, %v572_v26, %v574_v14  ;;  %v2425_v14 = vsel %vm52_vm0, %v10600_v1, %v10979_v38  ;;  %v201_v1 = vld [vmem:[%s15662_s1 + $0x138] sm:$0xff] }
 0x1f4   :  { %v11001_v29 = vpop.permute.xlu1 %1101  ;;  %v11003_v46 = vpop.permute.xlu0 %911  ;;  %266 = vst.msk [vmem:[#allocation2 + $0x219] sm:$0xff] %vm52_vm0, %v201_v1 }
 0x1f5   :  { %v736_v59 = vsel %vm656_vm2, %v733_v27, %v735_v62 }
 0x1f6   :  { %2261 = vrot.lane.b32.xlu1 %v729_v44, %s9690_s2  ;;  %2071 = vrot.lane.b32.xlu0 %v570_v12, %s9688_s14 }
 0x1f8   :  { %v1866_v56 = vpop.permute.xlu1 %1865  ;;  %v1676_v23 = vpop.permute.xlu0 %1675 }
 0x1f9   :  { %v2748_v49 = vsel %vm2729_vm11, %v2683_v39, %v1866_v56  ;;  %v2684_v63 = vsel %vm15740_vm10, %v2619_v16, %v1676_v23 }
 0x1fa   :  { %1499 = vrot.lane.b32.xlu1 %v570_v12, %s9685_s0  ;;  %925 = vrot.lane.b32.xlu0 %v568_v37, %s9684_s19 }
 0x1fc   :  { %v11010_v7 = vpop.permute.xlu1 %1293  ;;  %v11012_v11 = vpop.permute.xlu0 %1103 }
 0x1fe   :  { %2263 = vrot.lane.b32.xlu1 %v731_v31, %s9690_s2  ;;  %1689 = vrot.lane.b32.xlu0 %v729_v44, %s9686_s22 }
 0x200   :  { %v2058_v33 = vpop.permute.xlu1 %2057  ;;  %v1868_v8 = vpop.permute.xlu0 %1867 }
 0x201   :  { %v2813_v28 = vsel %vm2794_vm12, %v2748_v49, %v2058_v33 }
 0x202   :  { %1117 = vrot.lane.b32.xlu1 %v729_v44, %s9683_s18  ;;  %927 = vrot.lane.b32.xlu0 %v570_v12, %s9684_s19  ;;  %v2749_v44 = vsel %vm2729_vm11, %v2684_v63, %v1868_v8  ;;  %v9691_v8 = vmov 1966171168  }
 0x203   :  { %v4270_v24 = vunpack.c.l.s4 %v9691_v8 }
 0x204   :  { %v11034_v60 = vpop.permute.xlu1 %1485  ;;  %v11036_v35 = vpop.permute.xlu0 %1295 }
 0x206   :  { %v9305_v41 = vpop.f32.mrb[4].mxu0  ;;  %1881 = vrot.lane.b32.xlu1 %v11027_v34, %s9687_s25  ;;  %1691 = vrot.lane.b32.xlu0 %v731_v31, %s9686_s22 }
 0x207   :  { %v3224_v52 = vadd.f32 %v9305_v41, %v10908_v53  ;;  %v3218_v57 = vpop.f32.mrb[5].mxu0 }
 0x208   :  { %v3219_v6 = vadd.f32 %v10908_v53, %v3218_v57  ;;  %v2250_v15 = vpop.permute.xlu1 %2249  ;;  %v2060_v54 = vpop.permute.xlu0 %2059  ;;  %v4273_v57 = vshrl.u32 %v4272_v55, 7 }
 0x209   :  { %vm3518_vm5 = vcmp.gt.f32.partialorder %v3224_v52, 0.0  ;;  %v3579_v37 = vmul.f32 %v10926_v4, %v3224_v52  ;;  %v2878_v45 = vsel %vm2859_vm13, %v2813_v28, %v2250_v15  ;;  %v2814_v25 = vsel %vm2794_vm12, %v2749_v44, %v2060_v54 }
 0x20a   :  { %vm3517_vm15 = vcmp.gt.f32.partialorder %v3219_v6, 0.0  ;;  %v3578_v9 = vmul.f32 %v10926_v4, %v3219_v6  ;;  %1309 = vrot.lane.b32.xlu1 %v11027_v34, %s9682_s17  ;;  %1119 = vrot.lane.b32.xlu0 %v731_v31, %s9683_s18  ;;  %v734_v34 = vsel %vm656_vm2, %v732_v48, %v733_v27 }
 0x20b   :  { %v11064_v17 = vsel %vm3518_vm5, %v3224_v52, %v3579_v37  ;;  %9324 = vmatprep.mubr.msk.f32.mxu0 %vm2935_vm14, %v2878_v45  ;;  %vm15674_vm5 = vcmask 1043456  }
 0x20c   :  { %v3723_v42 = vmax.f32 %v3695_v18, %v11064_v17  ;;  %v11076_v43 = vsel %vm3517_vm15, %v3219_v6, %v3578_v9  ;;  %v11078_v19 = vpop.permute.xlu1 %1487  ;;  %v11080_v40 = vpop.permute.xlu0 %913  ;;  %vm15673_vm15 = vcmask 1044480  }
 0x20d   :  { %v3722_v58 = vmax.f32 %v3694_v21, %v11076_v43 }
 0x20e   :  { %v3779_v22 = vrot.slane %v3723_v42, 1  ;;  %v3877_v18 = vrot.slane %v3723_v42, 2  ;;  %2073 = vrot.lane.b32.xlu1 %v573_v30, %s9688_s14  ;;  %1883 = vrot.lane.b32.xlu0 %v11038_v3, %s9687_s25 }
 0x20f   :  { %v3778_v12 = vrot.slane %v3722_v58, 1  ;;  %v3876_v10 = vrot.slane %v3722_v58, 2 }
 0x210   :  { %v2252_v21 = vpop.permute.xlu1 %2251  ;;  %v11097_v51 = vpop.permute.xlu0 %1677  ;;  %v3849_v56 = vmax.f32 %v3723_v42, %v3779_v22 }
 0x211   :  { %v3780_v23 = vsel %vm495_vm3, %v3778_v12, %v3779_v22  ;;  %v3878_v31 = vsel %vm656_vm2, %v3876_v10, %v3877_v18  ;;  %v2879_v50 = vsel %vm2859_vm13, %v2814_v25, %v2252_v21  ;;  %v2490_v10 = vsel %vm2469_vm7, %v2425_v14, %v11001_v29  ;;  %v11155_v25 = vld [vmem:[#allocation2 + $0x180] sm:$0xff]  ;;  %v11157_v21 = vld [vmem:[#allocation2 + $0x188] sm:$0xff] }
 0x212   :  { %v3848_v33 = vmax.f32 %v3722_v58, %v3780_v23  ;;  %1501 = vrot.lane.b32.xlu1 %v573_v30, %s9685_s0  ;;  %1311 = vrot.lane.b32.xlu0 %v11038_v3, %s9682_s17  ;;  %v3947_v41 = vmax.f32 %v3849_v56, %v3877_v18  ;;  %v4271_v3 = vunpack.c.0.s8 %v4270_v24  ;;  %v2555_v38 = vsel %vm2534_vm8, %v2490_v10, %v11010_v7 }
 0x213   :  { %9325 = vmatmul.mubr.msk.f32.gmra.mrb[18].mxu0 %vm2935_vm14, %v2879_v50  ;;  %v2620_v50 = vsel %vm2599_vm9, %v2555_v38, %v11034_v60  ;;  %v823_v7 = vrot.slane %v11155_v25, 1  ;;  %v824_v24 = vrot.slane %v11157_v21, 1  ;;  %v208_v60 = vld [vmem:[%s15662_s1 + $0x170] sm:$0xff] }
 0x214   :  { %v3946_v47 = vmax.f32 %v3848_v33, %v3878_v31  ;;  %v11108_v20 = vpop.permute.xlu1 %1105  ;;  %v11110_v39 = vpop.permute.xlu0 %915  ;;  %v4086_v54 = vrot.slane %v3947_v41, 4  ;;  %v4114_v45 = vrot.slane %v3947_v41, 5  ;;  %v11122_v9 = vsub.s32 %v4271_v3, %v4273_v57  ;;  %273 = vst.msk [vmem:[#allocation2 + $0x271] sm:$0xff] %vm52_vm0, %v208_v60  ;;  %v345_v38 = vld [vmem:[#allocation2 + $0x1b0] sm:$0xff] }
 0x215   :  { %v4142_v5 = vrot.slane %v3947_v41, 6  ;;  %v2685_v33 = vsel %vm15740_vm10, %v2620_v50, %v11097_v51  ;;  %v209_v51 = vld [vmem:[%s15662_s1 + $0x178] sm:$0xff]  ;;  %v737_v60 = vrot.slane %v345_v38, 2 }
 0x216   :  { %v3988_v49 = vrot.slane %v3946_v47, 1  ;;  %v4016_v52 = vrot.slane %v3946_v47, 2  ;;  %2265 = vrot.lane.b32.xlu1 %v734_v34, %s9690_s2  ;;  %2075 = vrot.lane.b32.xlu0 %v575_v32, %s9688_s14  ;;  %v4044_v28 = vrot.slane %v3946_v47, 3  ;;  %274 = vst.msk [vmem:[#allocation2 + $0x279] sm:$0xff] %vm52_vm0, %v209_v51 }
 0x218   :  { %v4171_v26 = vsel %vm4170_vm6, %v3946_v47, %v3988_v49  ;;  %v1870_v6 = vpop.permute.xlu1 %1869  ;;  %v11116_v15 = vpop.permute.xlu0 %1679 }
 0x219   :  { %v4186_v37 = vsel %vm15729_vm1, %v4171_v26, %v4016_v52  ;;  %v2750_v55 = vsel %vm2729_vm11, %v2685_v33, %v1870_v6  ;;  %v2426_v26 = vsel %vm52_vm0, %v10611_v13, %v11003_v46 }
 0x21a   :  { %v4200_v36 = vsel %vm15728_vm4, %v4186_v37, %v4044_v28  ;;  %1503 = vrot.lane.b32.xlu1 %v575_v32, %s9685_s0  ;;  %929 = vrot.lane.b32.xlu0 %v573_v30, %s9684_s19  ;;  %v200_v30 = vld [vmem:[%s15662_s1 + $0x130] sm:$0xff] }
 0x21b   :  { %v4215_v61 = vsel %vm15674_vm5, %v4200_v36, %v4086_v54  ;;  %265 = vst.msk [vmem:[#allocation2 + $0x211] sm:$0xff] %vm52_vm0, %v200_v30  ;;  %v2491_v54 = vsel %vm2469_vm7, %v2426_v26, %v11012_v11 }
 0x21c   :  { %v11126_v42 = vpop.permute.xlu1 %1297  ;;  %v11128_v16 = vpop.permute.xlu0 %1107  ;;  %v4230_v58 = vsel %vm15673_vm15, %v4215_v61, %v4114_v45  ;;  %v825_v45 = vsel %vm495_vm3, %v823_v7, %v824_v24  ;;  %v2556_v46 = vsel %vm2534_vm8, %v2491_v54, %v11036_v35 }
 0x21d   :  { %v11132_v48 = vsel %vm656_vm2, %v4230_v58, %v4142_v5  ;;  %v2621_v58 = vsel %vm2599_vm9, %v2556_v46, %v11078_v19  ;;  %v11276_v46 = vld [vmem:[#allocation2 + $0x198] sm:$0xff] }
 0x21e   :  { %2267 = vrot.lane.b32.xlu1 %v736_v59, %s9690_s2  ;;  %1693 = vrot.lane.b32.xlu0 %v734_v34, %s9686_s22  ;;  %v4275_v27 = vrot.slane %v11132_v48, %v11122_v9 }
 0x220   :  { %v2062_v63 = vpop.permute.xlu1 %2061  ;;  %v1872_v22 = vpop.permute.xlu0 %1871  ;;  %v4283_v18 = vcombine.high %v4275_v27, %v4275_v27  ;;  %v11148_v44 = vrot.slane %v4275_v27, %v11122_v9  ;;  %v2686_v27 = vsel %vm15740_vm10, %v2621_v58, %v11116_v15 }
 0x221   :  { %v2815_v49 = vsel %vm2794_vm12, %v2750_v55, %v2062_v63  ;;  %v2751_v35 = vsel %vm2729_vm11, %v2686_v27, %v1872_v22  ;;  %v833_v63 = vrot.slane %v11155_v25, 2 }
 0x222   :  { %1121 = vrot.lane.b32.xlu1 %v734_v34, %s9683_s18  ;;  %931 = vrot.lane.b32.xlu0 %v575_v32, %s9684_s19  ;;  %v11151_v12 = vrot.slane %v4283_v18, %v11122_v9  ;;  %v834_v18 = vrot.slane %v11157_v21, 2 }
 0x224   :  { %v11164_v56 = vpop.permute.xlu1 %1489  ;;  %v11166_v23 = vpop.permute.xlu0 %1299  ;;  %v9129_v29 = vcombine.high %v11148_v44, %v11151_v12  ;;  %v4944_v31 = vcombine.low %v11148_v44, %v11151_v12  ;;  %v835_v22 = vsel %vm656_vm2, %v833_v63, %v834_v18 }
 0x226   :  { %v9308_v8 = vpop.f32.mrb[6].mxu0  ;;  %1885 = vrot.lane.b32.xlu1 %v11155_v25, %s9687_s25  ;;  %1695 = vrot.lane.b32.xlu0 %v736_v59, %s9686_s22  ;;  %v11191_v47 = vrot.slane %v9129_v29, %v11122_v9  ;;  %v11194_v41 = vrot.slane %v4944_v31, %v11122_v9  ;;  %v346_v29 = vld [vmem:[#allocation2 + $0x1b8] sm:$0xff]  ;;  %v576_v31 = vrot.slane %v345_v38, 1 }
 0x227   :  { %v3234_v34 = vadd.f32 %v9308_v8, %v10908_v53  ;;  %v3228_v32 = vpop.f32.mrb[7].mxu0  ;;  %v577_v50 = vrot.slane %v346_v29, 1  ;;  %v738_v51 = vrot.slane %v346_v29, 2 }
 0x228   :  { %v3229_v52 = vadd.f32 %v10908_v53, %v3228_v32  ;;  %v2254_v3 = vpop.permute.xlu1 %2253  ;;  %v2064_v57 = vpop.permute.xlu0 %2063  ;;  %v4976_v13 = vcombine.low %v11194_v41, %v11191_v47  ;;  %v347_v32 = vld [vmem:[#allocation2 + $0x1c0] sm:$0x3] }
 0x229   :  { %vm3520_vm15 = vcmp.gt.f32.partialorder %v3234_v34, 0.0  ;;  %v3581_v62 = vmul.f32 %v10926_v4, %v3234_v34  ;;  %v2880_v28 = vsel %vm2859_vm13, %v2815_v49, %v2254_v3  ;;  %v2816_v19 = vsel %vm2794_vm12, %v2751_v35, %v2064_v57  ;;  %v11284_v35 = vld [vmem:[#allocation2 + $0x1a0] sm:$0xff] }
 0x22a   :  { %vm3519_vm5 = vcmp.gt.f32.partialorder %v3229_v52, 0.0  ;;  %v3580_v6 = vmul.f32 %v10926_v4, %v3229_v52  ;;  %1313 = vrot.lane.b32.xlu1 %v11155_v25, %s9682_s17  ;;  %1123 = vrot.lane.b32.xlu0 %v736_v59, %s9683_s18  ;;  %v341_v59 = vld [vmem:[#allocation2 + $0x190] sm:$0x3]  ;;  %v578_v7 = vsel %vm495_vm3, %v576_v31, %v577_v50  ;;  %v579_v49 = vrot.slane %v347_v32, 1 }
 0x22b   :  { %v11211_v37 = vsel %vm3520_vm15, %v3234_v34, %v3581_v62  ;;  %9327 = vmatprep.mubr.msk.f32.mxu0 %vm2935_vm14, %v2880_v28  ;;  %v826_v14 = vrot.slane %v341_v59, 1  ;;  %v836_v55 = vrot.slane %v341_v59, 2  ;;  %v739_v57 = vsel %vm656_vm2, %v737_v60, %v738_v51  ;;  %v202_v60 = vld [vmem:[%s15662_s1 + $0x140] sm:$0xff] }
 0x22c   :  { %v3697_v36 = vmax.f32 %v11064_v17, %v11211_v37  ;;  %v11221_v5 = vsel %vm3519_vm5, %v3229_v52, %v3580_v6  ;;  %v11223_v61 = vpop.permute.xlu1 %1491  ;;  %v11225_v11 = vpop.permute.xlu0 %917  ;;  %v580_v62 = vsel %vm495_vm3, %v577_v50, %v579_v49  ;;  %v2427_v6 = vsel %vm52_vm0, %v10684_v0, %v11080_v40  ;;  %267 = vst.msk [vmem:[#allocation2 + $0x229] sm:$0xff] %vm52_vm0, %v202_v60 }
 0x22d   :  { %v3696_v30 = vmax.f32 %v11076_v43, %v11221_v5  ;;  %v827_v25 = vsel %vm495_vm3, %v824_v24, %v826_v14  ;;  %v837_v24 = vsel %vm656_vm2, %v834_v18, %v836_v55  ;;  %v740_v54 = vrot.slane %v347_v32, 2  ;;  %v210_v18 = vld [vmem:[%s15662_s1 + $0x180] sm:$0xff]  ;;  %v211_v43 = vld [vmem:[%s15662_s1 + $0x188] sm:$0xff] }
 0x22e   :  { %2077 = vrot.lane.b32.xlu1 %v825_v45, %s9688_s14  ;;  %1887 = vrot.lane.b32.xlu0 %v11157_v21, %s9687_s25  ;;  %v850_v38 = vrot.slane %v11284_v35, 1  ;;  %275 = vst.msk [vmem:[#allocation2 + $0x289] sm:$0xff] %vm52_vm0, %v210_v18  ;;  %276 = vst.msk [vmem:[#allocation2 + $0x291] sm:$0xff] %vm52_vm0, %v211_v43  ;;  %v11367_v18 = vld [vmem:[#allocation2 + $0x1d8] sm:$0x3] }
 0x230   :  { %v2256_v10 = vpop.permute.xlu1 %2255  ;;  %v1682_v1 = vpop.permute.xlu0 %1681 }
 0x231   :  { %v2881_v15 = vsel %vm2859_vm13, %v2816_v19, %v2256_v10  ;;  %v849_v19 = vrot.slane %v11276_v46, 1 }
 0x232   :  { %1505 = vrot.lane.b32.xlu1 %v825_v45, %s9685_s0  ;;  %1315 = vrot.lane.b32.xlu0 %v11157_v21, %s9682_s17  ;;  %v2492_v45 = vsel %vm2469_vm7, %v2427_v6, %v11108_v20  ;;  %v741_v20 = vsel %vm656_vm2, %v738_v51, %v740_v54  ;;  %v11339_v54 = vld [vmem:[#allocation2 + $0x1a8] sm:$0x3] }
 0x233   :  { %9328 = vmatmul.mubr.msk.f32.gmra.mrb[20].mxu0 %vm2935_vm14, %v2881_v15  ;;  %v2557_v59 = vsel %vm2534_vm8, %v2492_v45, %v11126_v42  ;;  %v11293_v42 = vld [vmem:[#allocation2 + $0x1d0] sm:$0xff] }
 0x234   :  { %v11247_v33 = vpop.permute.xlu1 %1109  ;;  %v11249_v8 = vpop.permute.xlu0 %919  ;;  %v2622_v0 = vsel %vm2599_vm9, %v2557_v59, %v11164_v56  ;;  %v582_v55 = vrot.slane %v11293_v42, 1  ;;  %v859_v59 = vrot.slane %v11276_v46, 2 }
 0x235   :  { %v2687_v40 = vsel %vm15740_vm10, %v2622_v0, %v1682_v1  ;;  %v11301_v1 = vld [vmem:[#allocation2 + $0x1c8] sm:$0xff] }
 0x236   :  { %2269 = vrot.lane.b32.xlu1 %v835_v22, %s9690_s2  ;;  %2079 = vrot.lane.b32.xlu0 %v827_v25, %s9688_s14  ;;  %v581_v31 = vrot.slane %v11301_v1, 1 }
 0x238   :  { %v1874_v21 = vpop.permute.xlu1 %1873  ;;  %v11254_v34 = vpop.permute.xlu0 %1683  ;;  %v583_v17 = vsel %vm495_vm3, %v581_v31, %v582_v55 }
 0x239   :  { %v2752_v14 = vsel %vm2729_vm11, %v2687_v40, %v1874_v21  ;;  %v9600_v21 = vld [vmem:[#allocation2 + $0x110] sm:$0xff] }
 0x23a   :  { %1507 = vrot.lane.b32.xlu1 %v827_v25, %s9685_s0  ;;  %933 = vrot.lane.b32.xlu0 %v578_v7, %s9684_s19  ;;  %v2428_v32 = vsel %vm52_vm0, %v9600_v21, %v11110_v39  ;;  %v851_v39 = vsel %vm495_vm3, %v849_v19, %v850_v38 }
 0x23b   :  { %v2493_v51 = vsel %vm2469_vm7, %v2428_v32, %v11128_v16 }
 0x23c   :  { %v11259_v52 = vpop.permute.xlu1 %1301  ;;  %v11261_v3 = vpop.permute.xlu0 %1111 }
 0x23e   :  { %2271 = vrot.lane.b32.xlu1 %v837_v24, %s9690_s2  ;;  %1697 = vrot.lane.b32.xlu0 %v835_v22, %s9686_s22 }
 0x240   :  { %v2066_v28 = vpop.permute.xlu1 %2065  ;;  %v11267_v26 = vpop.permute.xlu0 %1875 }
 0x241   :  { %v2817_v29 = vsel %vm2794_vm12, %v2752_v14, %v2066_v28 }
 0x242   :  { %1125 = vrot.lane.b32.xlu1 %v739_v57, %s9683_s18  ;;  %935 = vrot.lane.b32.xlu0 %v580_v62, %s9684_s19  ;;  %v2558_v57 = vsel %vm2534_vm8, %v2493_v51, %v11166_v23  ;;  %v862_v51 = vrot.slane %v11339_v54, 2 }
 0x243   :  { %v2623_v45 = vsel %vm2599_vm9, %v2558_v57, %v11223_v61  ;;  %v860_v61 = vrot.slane %v11284_v35, 2 }
 0x244   :  { %v11280_v58 = vpop.permute.xlu1 %1493  ;;  %v11282_v27 = vpop.permute.xlu0 %1303  ;;  %v2688_v37 = vsel %vm15740_vm10, %v2623_v45, %v11254_v34  ;;  %v852_v34 = vrot.slane %v11339_v54, 1 }
 0x245   :  { %v2753_v5 = vsel %vm2729_vm11, %v2688_v37, %v11267_v26  ;;  %v863_v54 = vsel %vm656_vm2, %v860_v61, %v862_v51 }
 0x246   :  { %v9311_v63 = vpop.f32.mrb[8].mxu0  ;;  %1889 = vrot.lane.b32.xlu1 %v11276_v46, %s9687_s25  ;;  %1699 = vrot.lane.b32.xlu0 %v837_v24, %s9686_s22 }
 0x247   :  { %v3244_v56 = vadd.f32 %v9311_v63, %v10908_v53  ;;  %v3238_v10 = vpop.f32.mrb[9].mxu0 }
 0x248   :  { %v3239_v15 = vadd.f32 %v10908_v53, %v3238_v10  ;;  %v2258_v22 = vpop.permute.xlu1 %2257  ;;  %v2068_v25 = vpop.permute.xlu0 %2067 }
 0x249   :  { %vm3522_vm5 = vcmp.gt.f32.partialorder %v3244_v56, 0.0  ;;  %v3583_v50 = vmul.f32 %v10926_v4, %v3244_v56  ;;  %v2882_v7 = vsel %vm2859_vm13, %v2817_v29, %v2258_v22  ;;  %v2818_v40 = vsel %vm2794_vm12, %v2753_v5, %v2068_v25  ;;  %v203_v29 = vld [vmem:[%s15662_s1 + $0x148] sm:$0xff] }
 0x24a   :  { %vm3521_vm15 = vcmp.gt.f32.partialorder %v3239_v15, 0.0  ;;  %v3582_v24 = vmul.f32 %v10926_v4, %v3239_v15  ;;  %1317 = vrot.lane.b32.xlu1 %v11301_v1, %s9682_s17  ;;  %1127 = vrot.lane.b32.xlu0 %v741_v20, %s9683_s18  ;;  %v584_v22 = vrot.slane %v11367_v18, 1  ;;  %268 = vst.msk [vmem:[#allocation2 + $0x231] sm:$0xff] %vm52_vm0, %v203_v29 }
 0x24b   :  { %v11322_v49 = vsel %vm3522_vm5, %v3244_v56, %v3583_v50  ;;  %9330 = vmatprep.mubr.msk.f32.mxu0 %vm2935_vm14, %v2882_v7  ;;  %vm15745_vm5 = vcmask 1043456  }
 0x24c   :  { %v3725_v62 = vmax.f32 %v3697_v36, %v11322_v49  ;;  %v11333_v28 = vsel %vm3521_vm15, %v3239_v15, %v3582_v24  ;;  %v11335_v6 = vpop.permute.xlu1 %1495  ;;  %v11337_v16 = vpop.permute.xlu0 %921  ;;  %v853_v15 = vsel %vm495_vm3, %v850_v38, %v852_v34  ;;  %v742_v38 = vrot.slane %v11301_v1, 2 }
 0x24d   :  { %v3724_v23 = vmax.f32 %v3696_v30, %v11333_v28  ;;  %v585_v60 = vsel %vm495_vm3, %v582_v55, %v584_v22  ;;  %vm15746_vm15 = vcmask 1044480   ;;  %v4306_v34 = vcombine.high %v11151_v12, %v11151_v12 }
 0x24e   :  { %v3782_v36 = vrot.slane %v3725_v62, 1  ;;  %v3880_v0 = vrot.slane %v3725_v62, 2  ;;  %2081 = vrot.lane.b32.xlu1 %v851_v39, %s9688_s14  ;;  %1891 = vrot.lane.b32.xlu0 %v11284_v35, %s9687_s25  ;;  %v4268_v35 = vcombine.high %v11132_v48, %v11132_v48  ;;  %v861_v48 = vsel %vm656_vm2, %v859_v59, %v860_v61 }
 0x24f   :  { %v3781_v30 = vrot.slane %v3724_v23, 1  ;;  %v3879_v46 = vrot.slane %v3724_v23, 2  ;;  %v743_v39 = vrot.slane %v11293_v42, 2 }
 0x250   :  { %v2260_v63 = vpop.permute.xlu1 %2259  ;;  %v11365_v20 = vpop.permute.xlu0 %1685  ;;  %v3851_v14 = vmax.f32 %v3725_v62, %v3782_v36  ;;  %v4282_v21 = vrot.slane %v4268_v35, %v11122_v9 }
 0x251   :  { %v3783_v56 = vsel %vm495_vm3, %v3781_v30, %v3782_v36  ;;  %v3881_v26 = vsel %vm656_vm2, %v3879_v46, %v3880_v0  ;;  %v2883_v19 = vsel %vm2859_vm13, %v2818_v40, %v2260_v63  ;;  %v744_v43 = vsel %vm656_vm2, %v742_v38, %v743_v39  ;;  %v11416_v63 = vld [vmem:[#allocation2 + $0x1e8] sm:$0xff] }
 0x252   :  { %v3850_v10 = vmax.f32 %v3724_v23, %v3783_v56  ;;  %1509 = vrot.lane.b32.xlu1 %v583_v17, %s9685_s0  ;;  %1319 = vrot.lane.b32.xlu0 %v11293_v42, %s9682_s17  ;;  %v3949_v7 = vmax.f32 %v3851_v14, %v3880_v0  ;;  %v4658_v36 = vcombine.high %v4282_v21, %v4282_v21  ;;  %v11423_v14 = vld [vmem:[#allocation2 + $0x1e0] sm:$0xff] }
 0x253   :  { %9331 = vmatmul.mubr.msk.f32.gmra.mrb[22].mxu0 %vm2935_vm14, %v2883_v19  ;;  %v11426_v56 = vrot.slane %v4282_v21, %v11122_v9  ;;  %v745_v19 = vrot.slane %v11367_v18, 2 }
 0x254   :  { %v3948_v25 = vmax.f32 %v3850_v10, %v3881_v26  ;;  %v11385_v31 = vpop.permute.xlu1 %1113  ;;  %v11387_v50 = vpop.permute.xlu0 %923  ;;  %v4087_v23 = vrot.slane %v3949_v7, 4  ;;  %v4115_v0 = vrot.slane %v3949_v7, 5  ;;  %v4143_v55 = vrot.slane %v3949_v7, 6  ;;  %v9601_v7 = vld [vmem:[#allocation2 + $0x120] sm:$0xff] }
 0x255   :  { %v4665_v61 = vrot.slane %v4658_v36, %v11122_v9  ;;  %v586_v10 = vrot.slane %v11423_v14, 1  ;;  %v2429_v21 = vsel %vm52_vm0, %v9601_v7, %v11225_v11 }
 0x256   :  { %v3989_v32 = vrot.slane %v3948_v25, 1  ;;  %v4017_v24 = vrot.slane %v3948_v25, 2  ;;  %2273 = vrot.lane.b32.xlu1 %v861_v48, %s9690_s2  ;;  %2083 = vrot.lane.b32.xlu0 %v853_v15, %s9688_s14  ;;  %v4045_v57 = vrot.slane %v3948_v25, 3  ;;  %v587_v48 = vrot.slane %v11416_v63, 1 }
 0x257   :  { %v2494_v38 = vsel %vm2469_vm7, %v2429_v21, %v11247_v33 }
 0x258   :  { %v4172_v62 = vsel %vm4170_vm6, %v3948_v25, %v3989_v32  ;;  %v1878_v45 = vpop.permute.xlu1 %1877  ;;  %v11399_v59 = vpop.permute.xlu0 %1687  ;;  %v5261_v25 = vcombine.low %v4306_v34, %v11426_v56 }
 0x259   :  { %v4187_v37 = vsel %vm15729_vm1, %v4172_v62, %v4017_v24  ;;  %v5590_v24 = vcombine.low %v11426_v56, %v4665_v61 }
 0x25a   :  { %v4201_v1 = vsel %vm15728_vm4, %v4187_v37, %v4045_v57  ;;  %1511 = vrot.lane.b32.xlu1 %v585_v60, %s9685_s0  ;;  %937 = vrot.lane.b32.xlu0 %v583_v17, %s9684_s19  ;;  %v4305_v17 = vcombine.high %v11148_v44, %v11148_v44  ;;  %v746_v57 = vsel %vm656_vm2, %v743_v39, %v745_v19 }
 0x25b   :  { %v4216_v42 = vsel %vm15745_vm5, %v4201_v1, %v4087_v23  ;;  %v11468_v37 = vsel %vm495_vm3, %v586_v10, %v587_v48 }
 0x25c   :  { %v4231_v5 = vsel %vm15746_vm15, %v4216_v42, %v4115_v0  ;;  %v11409_v30 = vpop.permute.xlu1 %1305  ;;  %v11411_v46 = vpop.permute.xlu0 %1115  ;;  %v5260_v32 = vcombine.low %v11151_v12, %v4305_v17  ;;  %v2559_v12 = vsel %vm2534_vm8, %v2494_v38, %v11259_v52  ;;  %v5277_v52 = vrot.slane %v5261_v25, %v11122_v9 }
 0x25d   :  { %v4245_v40 = vsel %vm656_vm2, %v4231_v5, %v4143_v55  ;;  %v2624_v33 = vsel %vm2599_vm9, %v2559_v12, %v11280_v58 }
 0x25e   :  { %v4307_v35 = vcombine.high %v4245_v40, %v4245_v40  ;;  %2275 = vrot.lane.b32.xlu1 %v863_v54, %s9690_s2  ;;  %1701 = vrot.lane.b32.xlu0 %v744_v43, %s9686_s22  ;;  %v4314_v26 = vrot.slane %v4245_v40, %v11122_v9  ;;  %v2689_v39 = vsel %vm15740_vm10, %v2624_v33, %v11365_v20 }
 0x25f   :  { %v2754_v55 = vsel %vm2729_vm11, %v2689_v39, %v1878_v45  ;;  %v5270_v20 = vrot.slane %v5260_v32, %v11122_v9  ;;  %v5598_v54 = vrot.slane %v5590_v24, %v11122_v9 }
 0x260   :  { %v2070_v29 = vpop.permute.xlu1 %2069  ;;  %v11431_v44 = vpop.permute.xlu0 %1879  ;;  %v4322_v15 = vcombine.high %v4314_v26, %v4314_v26  ;;  %v11435_v22 = vrot.slane %v4314_v26, %v11122_v9  ;;  %v11442_v18 = vrot.slane %v4307_v35, %v11122_v9 }
 0x261   :  { %v2819_v17 = vsel %vm2794_vm12, %v2754_v55, %v2070_v29  ;;  %v5292_v19 = vcombine.low %v5270_v20, %v5277_v52  ;;  %v5606_v32 = vcombine.low %v11191_v47, %v5598_v54  ;;  %v353_v52 = vld [vmem:[#allocation2 + $0x1f0] sm:$0x3]  ;;  %v213_v47 = vld [vmem:[%s15662_s1 + $0x198] sm:$0xff] }
 0x262   :  { %1129 = vrot.lane.b32.xlu1 %v744_v43, %s9683_s18  ;;  %939 = vrot.lane.b32.xlu0 %v585_v60, %s9684_s19  ;;  %v11450_v51 = vrot.slane %v4322_v15, %v11122_v9  ;;  %v9139_v11 = vcombine.high %v11426_v56, %v11435_v22  ;;  %v4946_v62 = vcombine.low %v11426_v56, %v11435_v22  ;;  %v9602_v15 = vld [vmem:[#allocation2 + $0x128] sm:$0xff] }
 0x263   :  { %v11478_v58 = vrot.slane %v11442_v18, %v11122_v9  ;;  %v4344_v10 = vcombine.high %v11435_v22, %v11435_v22  ;;  %v2430_v25 = vsel %vm52_vm0, %v9602_v15, %v11249_v8  ;;  %v5300_v55 = vrot.slane %v5292_v19, %v11122_v9  ;;  %278 = vst.msk [vmem:[#allocation2 + $0x2a9] sm:$0xff] %vm52_vm0, %v213_v47 }
 0x264   :  { %v11461_v23 = vpop.permute.xlu1 %1497  ;;  %v11463_v60 = vpop.permute.xlu0 %1307  ;;  %v5262_v36 = vcombine.low %v4665_v61, %v11450_v51  ;;  %v9134_v0 = vcombine.high %v11435_v22, %v11450_v51  ;;  %v4345_v1 = vcombine.high %v11450_v51, %v11450_v51  ;;  %v2495_v29 = vsel %vm2469_vm7, %v2430_v25, %v11261_v3 }
 0x265   :  { %v2560_v8 = vsel %vm2534_vm8, %v2495_v29, %v11282_v27  ;;  %v5605_v27 = vrot.slane %v9139_v11, %v11122_v9  ;;  %v4947_v39 = vcombine.low %v11450_v51, %v4344_v10  ;;  %v747_v11 = vrot.slane %v11423_v14, 2 }
 0x266   :  { %v9314_v42 = vpop.f32.mrb[10].mxu0  ;;  %1893 = vrot.lane.b32.xlu1 %v11423_v14, %s9687_s25  ;;  %1703 = vrot.lane.b32.xlu0 %v746_v57, %s9686_s22  ;;  %v5284_v34 = vrot.slane %v5262_v36, %v11122_v9  ;;  %v11491_v40 = vrot.slane %v9134_v0, %v11122_v9  ;;  %v4993_v45 = vcombine.low %v4345_v1, %v11478_v58 }
 0x267   :  { %v3254_v43 = vadd.f32 %v9314_v42, %v10908_v53  ;;  %v3248_v5 = vpop.f32.mrb[11].mxu0  ;;  %v2625_v0 = vsel %vm2599_vm9, %v2560_v8, %v11335_v6  ;;  %v748_v6 = vrot.slane %v11416_v63, 2 }
 0x268   :  { %v3249_v61 = vadd.f32 %v10908_v53, %v3248_v5  ;;  %v2262_v35 = vpop.permute.xlu1 %2261  ;;  %v2072_v26 = vpop.permute.xlu0 %2071  ;;  %v5293_v38 = vcombine.low %v5284_v34, %v11491_v40  ;;  %v11516_v3 = vrot.slane %v4993_v45, %v11122_v9  ;;  %v2690_v20 = vsel %vm15740_vm10, %v2625_v0, %v11399_v59 }
 0x269   :  { %vm3524_vm5 = vcmp.gt.f32.partialorder %v3254_v43, 0.0  ;;  %v3585_v7 = vmul.f32 %v10926_v4, %v3254_v43  ;;  %v2884_v21 = vsel %vm2859_vm13, %v2819_v17, %v2262_v35  ;;  %v589_v5 = vrot.slane %v353_v52, 1 }
 0x26a   :  { %vm3523_vm15 = vcmp.gt.f32.partialorder %v3249_v61, 0.0  ;;  %v3584_v53 = vmul.f32 %v10926_v4, %v3249_v61  ;;  %1321 = vrot.lane.b32.xlu1 %v11423_v14, %s9682_s17  ;;  %1131 = vrot.lane.b32.xlu0 %v746_v57, %s9683_s18  ;;  %v5307_v42 = vrot.slane %v5293_v38, %v11122_v9  ;;  %v5607_v54 = vcombine.low %v5605_v27, %v11516_v3  ;;  %v9603_v27 = vld [vmem:[#allocation2 + $0x138] sm:$0xff] }
 0x26b   :  { %v11511_v24 = vsel %vm3524_vm5, %v3254_v43, %v3585_v7  ;;  %9333 = vmatprep.mubr.msk.f32.mxu0 %vm2935_vm14, %v2884_v21  ;;  %v2755_v43 = vsel %vm2729_vm11, %v2690_v20, %v11431_v44  ;;  %v11548_v59 = vrot.slane %v4947_v39, %v11122_v9  ;;  %v11552_v35 = vrot.slane %v5606_v32, %v11122_v9 }
 0x26c   :  { %v3699_v12 = vmax.f32 %v11322_v49, %v11511_v24  ;;  %v11520_v33 = vsel %vm3523_vm15, %v3249_v61, %v3584_v53  ;;  %v11522_v57 = vpop.permute.xlu1 %1499  ;;  %v11524_v36 = vpop.permute.xlu0 %925  ;;  %v11545_v34 = vcombine.low %v5300_v55, %v5307_v42  ;;  %v2820_v45 = vsel %vm2794_vm12, %v2755_v43, %v2072_v26  ;;  %v212_v26 = vld [vmem:[%s15662_s1 + $0x190] sm:$0xff]  ;;  %v11621_v55 = vld [vmem:[#allocation2 + $0x1f8] sm:$0xff] }
 0x26d   :  { %v3698_v1 = vmax.f32 %v11333_v28, %v11520_v33  ;;  %15748 = vst [vmem:[#allocation10_spill] sm:$0xff] %v11552_v35  ;;  %v11555_v14 = vrot.slane %v5607_v54, %v11122_v9  ;;  %v4968_v44 = vrot.slane %v4946_v62, %v11122_v9  ;;  %v749_v15 = vsel %vm656_vm2, %v747_v11, %v748_v6 }
 0x26e   :  { %2085 = vrot.lane.b32.xlu1 %v11468_v37, %s9688_s14  ;;  %1895 = vrot.lane.b32.xlu0 %v11416_v63, %s9687_s25  ;;  %15747 = vst [vmem:[#allocation9_spill] sm:$0xff] %v11545_v34  ;;  %v590_v56 = vsel %vm495_vm3, %v587_v48, %v589_v5  ;;  %277 = vst.msk [vmem:[#allocation2 + $0x2a1] sm:$0xff] %vm52_vm0, %v212_v26  ;;  %v11586_v21 = vrot.slane %v4976_v13, %v11122_v9  ;;  %v752_v49 = vrot.slane %v11621_v55, 2 }
 0x26f   :  { %15749 = vst [vmem:[#allocation11_spill] sm:$0xff] %v11555_v14  ;;  %v4977_v62 = vcombine.low %v4968_v44, %v11548_v59  ;;  %v2431_v39 = vsel %vm52_vm0, %v9603_v27, %v11337_v16 }
 0x270   :  { %v2264_v17 = vpop.permute.xlu1 %2263  ;;  %v1690_v61 = vpop.permute.xlu0 %1689  ;;  %15750 = vst [vmem:[#allocation12_spill] sm:$0xff] %v11586_v21  ;;  %v2496_v0 = vsel %vm2469_vm7, %v2431_v39, %v11385_v31  ;;  %v12075_v21 = vld [vmem:[#allocation2 + $0x238] sm:$0x3] }
 0x271   :  { %v2885_v19 = vsel %vm2859_vm13, %v2820_v45, %v2264_v17  ;;  %v11589_v29 = vrot.slane %v4977_v62, %v11122_v9  ;;  %v2561_v42 = vsel %vm2534_vm8, %v2496_v0, %v11409_v30  ;;  %v11641_v30 = vld [vmem:[%s15664_s3] ss:$0 sm:$0xff] }
 0x272   :  { %1513 = vrot.lane.b32.xlu1 %v11468_v37, %s9685_s0  ;;  %1323 = vrot.lane.b32.xlu0 %v11416_v63, %s9682_s17  ;;  %v750_v63 = vrot.slane %v353_v52, 2  ;;  %v2626_v16 = vsel %vm2599_vm9, %v2561_v42, %v11461_v23  ;;  %v591_v23 = vrot.slane %v11621_v55, 1  ;;  %v9605_v62 = vld [vmem:[#allocation2 + $0x140] sm:$0xff]  ;;  %v356_v42 = vld [vmem:[#allocation2 + $0x208] sm:$0x3] }
 0x273   :  { %9334 = vmatmul.mubr.msk.f32.gmra.mrb[24].mxu0 %vm2935_vm14, %v2885_v19  ;;  %15751 = vst [vmem:[#allocation13_spill] sm:$0xff] %v11589_v29  ;;  %v2691_v54 = vsel %vm15740_vm10, %v2626_v16, %v1690_v61  ;;  %v594_v28 = vrot.slane %v356_v42, 1 }
 0x274   :  { %v11578_v25 = vpop.permute.xlu1 %1117  ;;  %v11580_v7 = vpop.permute.xlu0 %927  ;;  %v751_v41 = vsel %vm656_vm2, %v748_v6, %v750_v63  ;;  %v11629_v6 = vld [vmem:[#allocation2 + $0x200] sm:$0xff]  ;;  %v2432_v63 = vsel %vm52_vm0, %v9605_v62, %v11387_v50  ;;  %v205_v50 = vld [vmem:[%s15662_s1 + $0x158] sm:$0xff] }
 0x275   :  { %v592_v17 = vrot.slane %v11629_v6, 1  ;;  %v2497_v47 = vsel %vm2469_vm7, %v2432_v63, %v11411_v46  ;;  %270 = vst.msk [vmem:[#allocation2 + $0x249] sm:$0xff] %vm52_vm0, %v205_v50 }
 0x276   :  { %2277 = vrot.lane.b32.xlu1 %v749_v15, %s9690_s2  ;;  %2087 = vrot.lane.b32.xlu0 %v590_v56, %s9688_s14  ;;  %v2562_v27 = vsel %vm2534_vm8, %v2497_v47, %v11463_v60  ;;  %v755_v47 = vrot.slane %v356_v42, 2  ;;  %v11719_v42 = vld [vmem:[#allocation2 + $0x218] sm:$0xff] }
 0x277   :  { %v2627_v16 = vsel %vm2599_vm9, %v2562_v27, %v11522_v57 }
 0x278   :  { %v1882_v53 = vpop.permute.xlu1 %1881  ;;  %v11595_v32 = vpop.permute.xlu0 %1691 }
 0x279   :  { %v2756_v31 = vsel %vm2729_vm11, %v2691_v54, %v1882_v53  ;;  %v2692_v24 = vsel %vm15740_vm10, %v2627_v16, %v11595_v32 }
 0x27a   :  { %1515 = vrot.lane.b32.xlu1 %v590_v56, %s9685_s0  ;;  %941 = vrot.lane.b32.xlu0 %v11468_v37, %s9684_s19  ;;  %v204_v37 = vld [vmem:[%s15662_s1 + $0x150] sm:$0xff] }
 0x27b   :  { %269 = vst.msk [vmem:[#allocation2 + $0x241] sm:$0xff] %vm52_vm0, %v204_v37 }
 0x27c   :  { %v11605_v13 = vpop.permute.xlu1 %1309  ;;  %v11607_v8 = vpop.permute.xlu0 %1119 }
 0x27e   :  { %2279 = vrot.lane.b32.xlu1 %v751_v41, %s9690_s2  ;;  %1705 = vrot.lane.b32.xlu0 %v749_v15, %s9686_s22 }
 0x280   :  { %v2074_v38 = vpop.permute.xlu1 %2073  ;;  %v1884_v52 = vpop.permute.xlu0 %1883 }
 0x281   :  { %v2821_v61 = vsel %vm2794_vm12, %v2756_v31, %v2074_v38  ;;  %v593_v38 = vsel %vm495_vm3, %v591_v23, %v592_v17  ;;  %v2757_v57 = vsel %vm2729_vm11, %v2692_v24, %v1884_v52 }
 0x282   :  { %1133 = vrot.lane.b32.xlu1 %v749_v15, %s9683_s18  ;;  %943 = vrot.lane.b32.xlu0 %v590_v56, %s9684_s19 }
 0x284   :  { %v11625_v20 = vpop.permute.xlu1 %1501  ;;  %v11627_v11 = vpop.permute.xlu0 %1311 }
 0x286   :  { %v9317_v43 = vpop.f32.mrb[12].mxu0  ;;  %1897 = vrot.lane.b32.xlu1 %v11621_v55, %s9687_s25  ;;  %1707 = vrot.lane.b32.xlu0 %v751_v41, %s9686_s22 }
 0x287   :  { %v3264_v5 = vadd.f32 %v11641_v30, %v9317_v43  ;;  %v3258_v45 = vpop.f32.mrb[13].mxu0  ;;  %v753_v43 = vrot.slane %v11629_v6, 2 }
 0x288   :  { %v3259_v19 = vadd.f32 %v11641_v30, %v3258_v45  ;;  %v2266_v44 = vpop.permute.xlu1 %2265  ;;  %v2076_v26 = vpop.permute.xlu0 %2075 }
 0x289   :  { %vm3526_vm5 = vcmp.gt.f32.partialorder %v3264_v5, 0.0  ;;  %v3587_v15 = vmul.f32 %v10926_v4, %v3264_v5  ;;  %v2886_v56 = vsel %vm2859_vm13, %v2821_v61, %v2266_v44  ;;  %v2822_v33 = vsel %vm2794_vm12, %v2757_v57, %v2076_v26 }
 0x28a   :  { %vm3525_vm15 = vcmp.gt.f32.partialorder %v3259_v19, 0.0  ;;  %v3586_v53 = vmul.f32 %v10926_v4, %v3259_v19  ;;  %1325 = vrot.lane.b32.xlu1 %v11621_v55, %s9682_s17  ;;  %1135 = vrot.lane.b32.xlu0 %v751_v41, %s9683_s18  ;;  %v754_v52 = vsel %vm656_vm2, %v752_v49, %v753_v43  ;;  %v595_v44 = vsel %vm495_vm3, %v592_v17, %v594_v28 }
 0x28b   :  { %v11658_v37 = vsel %vm3526_vm5, %v3264_v5, %v3587_v15  ;;  %9336 = vmatprep.mubr.msk.f32.mxu0 %vm2935_vm14, %v2886_v56  ;;  %v4666_v17 = vcombine.high %v11442_v18, %v11442_v18  ;;  %vm15752_vm5 = vcmask 1043456   ;;  %v11723_v57 = vsel %vm656_vm2, %v753_v43, %v755_v47 }
 0x28c   :  { %v3727_v41 = vmax.f32 %v3699_v12, %v11658_v37  ;;  %v11671_v39 = vsel %vm3525_vm15, %v3259_v19, %v3586_v53  ;;  %v11673_v46 = vpop.permute.xlu1 %1503  ;;  %v11675_v0 = vpop.permute.xlu0 %929  ;;  %v5840_v18 = vcombine.low %v11435_v22, %v11450_v51  ;;  %vm15753_vm15 = vcmask 1044480  }
 0x28d   :  { %v3726_v60 = vmax.f32 %v3698_v1, %v11671_v39 }
 0x28e   :  { %v3785_v12 = vrot.slane %v3727_v41, 1  ;;  %v3883_v54 = vrot.slane %v3727_v41, 2  ;;  %2089 = vrot.lane.b32.xlu1 %v593_v38, %s9688_s14  ;;  %1899 = vrot.lane.b32.xlu0 %v11629_v6, %s9687_s25 }
 0x28f   :  { %v3784_v31 = vrot.slane %v3726_v60, 1  ;;  %v3882_v5 = vrot.slane %v3726_v60, 2 }
 0x290   :  { %v2268_v1 = vpop.permute.xlu1 %2267  ;;  %v11693_v55 = vpop.permute.xlu0 %1693  ;;  %v3853_v32 = vmax.f32 %v3727_v41, %v3785_v12 }
 0x291   :  { %v3786_v45 = vsel %vm495_vm3, %v3784_v31, %v3785_v12  ;;  %v3884_v23 = vsel %vm656_vm2, %v3882_v5, %v3883_v54  ;;  %v2887_v61 = vsel %vm2859_vm13, %v2822_v33, %v2268_v1  ;;  %v11732_v33 = vld [vmem:[#allocation2 + $0x210] sm:$0xff] }
 0x292   :  { %v3852_v19 = vmax.f32 %v3726_v60, %v3786_v45  ;;  %1517 = vrot.lane.b32.xlu1 %v593_v38, %s9685_s0  ;;  %1327 = vrot.lane.b32.xlu0 %v11629_v6, %s9682_s17  ;;  %v3951_v62 = vmax.f32 %v3853_v32, %v3883_v54  ;;  %v596_v1 = vrot.slane %v11732_v33, 1  ;;  %v597_v32 = vrot.slane %v11719_v42, 1  ;;  %v11744_v45 = vld [vmem:[#allocation2 + $0x270] sm:$0xff] }
 0x293   :  { %9337 = vmatmul.mubr.msk.f32.gmra.mrb[26].mxu0 %vm2935_vm14, %v2887_v61  ;;  %v9606_v61 = vld [vmem:[#allocation2 + $0x150] sm:$0xff] }
 0x294   :  { %v3950_v26 = vmax.f32 %v3852_v19, %v3884_v23  ;;  %v11704_v15 = vpop.permute.xlu1 %1121  ;;  %v11706_v56 = vpop.permute.xlu0 %931  ;;  %v4088_v16 = vrot.slane %v3951_v62, 4  ;;  %v4116_v49 = vrot.slane %v3951_v62, 5  ;;  %v4144_v12 = vrot.slane %v3951_v62, 6 }
 0x295   :  { %v5848_v23 = vrot.slane %v5840_v18, %v11122_v9  ;;  %v2433_v19 = vsel %vm52_vm0, %v9606_v61, %v11524_v36 }
 0x296   :  { %v3990_v63 = vrot.slane %v3950_v26, 1  ;;  %v4018_v53 = vrot.slane %v3950_v26, 2  ;;  %2281 = vrot.lane.b32.xlu1 %v754_v52, %s9690_s2  ;;  %2091 = vrot.lane.b32.xlu0 %v595_v44, %s9688_s14  ;;  %v4046_v6 = vrot.slane %v3950_v26, 3 }
 0x298   :  { %v4173_v50 = vsel %vm4170_vm6, %v3950_v26, %v3990_v63  ;;  %v1886_v27 = vpop.permute.xlu1 %1885  ;;  %v11711_v41 = vpop.permute.xlu0 %1695 }
 0x299   :  { %v4188_v60 = vsel %vm15729_vm1, %v4173_v50, %v4018_v53  ;;  %v11761_v50 = vsel %vm495_vm3, %v596_v1, %v597_v32 }
 0x29a   :  { %v4202_v24 = vsel %vm15728_vm4, %v4188_v60, %v4046_v6  ;;  %1519 = vrot.lane.b32.xlu1 %v595_v44, %s9685_s0  ;;  %945 = vrot.lane.b32.xlu0 %v593_v38, %s9684_s19  ;;  %v11735_v38 = vrot.slane %v4666_v17, %v11122_v9  ;;  %v2498_v6 = vsel %vm2469_vm7, %v2433_v19, %v11578_v25  ;;  %v616_v17 = vrot.slane %v11744_v45, 1 }
 0x29b   :  { %v4217_v54 = vsel %vm15752_vm5, %v4202_v24, %v4088_v16  ;;  %v11778_v24 = vld [vmem:[#allocation2 + $0x278] sm:$0xff] }
 0x29c   :  { %v4232_v31 = vsel %vm15753_vm15, %v4217_v54, %v4116_v49  ;;  %v11728_v5 = vpop.permute.xlu1 %1313  ;;  %v11730_v28 = vpop.permute.xlu0 %1123  ;;  %v5309_v47 = vcombine.low %v11478_v58, %v11735_v38  ;;  %v2563_v49 = vsel %vm2534_vm8, %v2498_v6, %v11605_v13 }
 0x29d   :  { %v4246_v43 = vsel %vm656_vm2, %v4232_v31, %v4144_v12  ;;  %v2628_v54 = vsel %vm2599_vm9, %v2563_v49, %v11625_v20 }
 0x29e   :  { %2283 = vrot.lane.b32.xlu1 %v11723_v57, %s9690_s2  ;;  %1709 = vrot.lane.b32.xlu0 %v754_v52, %s9686_s22  ;;  %v4353_v22 = vrot.slane %v4246_v43, %v11122_v9  ;;  %v4346_v51 = vcombine.high %v4246_v43, %v4246_v43  ;;  %v11795_v43 = vrot.slane %v5309_v47, %v11122_v9 }
 0x2a0   :  { %v2078_v26 = vpop.permute.xlu1 %2077  ;;  %v11749_v62 = vpop.permute.xlu0 %1887  ;;  %v4361_v63 = vcombine.high %v4353_v22, %v4353_v22  ;;  %v11752_v53 = vrot.slane %v4353_v22, %v11122_v9  ;;  %v11764_v36 = vrot.slane %v4346_v51, %v11122_v9 }
 0x2a2   :  { %1137 = vrot.lane.b32.xlu1 %v754_v52, %s9683_s18  ;;  %947 = vrot.lane.b32.xlu0 %v595_v44, %s9684_s19  ;;  %v11770_v16 = vrot.slane %v4361_v63, %v11122_v9  ;;  %v4383_v25 = vcombine.high %v11752_v53, %v11752_v53  ;;  %v5841_v60 = vcombine.low %v11478_v58, %v11752_v53 }
 0x2a3   :  { %v5856_v52 = vcombine.low %v5848_v23, %v11491_v40  ;;  %v6066_v44 = vcombine.low %v11548_v59, %v11516_v3  ;;  %v9146_v12 = vcombine.high %v11478_v58, %v11752_v53  ;;  %v2693_v59 = vsel %vm15740_vm10, %v2628_v54, %v11693_v55  ;;  %v9607_v23 = vld [vmem:[#allocation2 + $0x158] sm:$0xff] }
 0x2a4   :  { %v11787_v18 = vpop.permute.xlu1 %1505  ;;  %v11789_v31 = vpop.permute.xlu0 %1315  ;;  %v5310_v1 = vcombine.low %v11770_v16, %v4383_v25  ;;  %v9130_v13 = vcombine.high %v11752_v53, %v11770_v16  ;;  %v6058_v22 = vcombine.low %v11735_v38, %v11770_v16  ;;  %v11803_v20 = vrot.slane %v11764_v36, %v11122_v9 }
 0x2a5   :  { %v4384_v51 = vcombine.high %v11770_v16, %v11770_v16  ;;  %v2434_v61 = vsel %vm52_vm0, %v9607_v23, %v11580_v7  ;;  %v2758_v19 = vsel %vm2729_vm11, %v2693_v59, %v1886_v27  ;;  %v617_v55 = vrot.slane %v11778_v24, 1 }
 0x2a6   :  { %v9320_v63 = vpop.f32.mrb[14].mxu0  ;;  %1901 = vrot.lane.b32.xlu1 %v11732_v33, %s9687_s25  ;;  %1711 = vrot.lane.b32.xlu0 %v11723_v57, %s9686_s22  ;;  %v11816_v47 = vrot.slane %v5310_v1, %v11122_v9  ;;  %v11820_v49 = vrot.slane %v9130_v13, %v11122_v9  ;;  %v6065_v7 = vrot.slane %v6058_v22, %v11122_v9 }
 0x2a7   :  { %v3274_v6 = vadd.f32 %v11641_v30, %v9320_v63  ;;  %v3268_v25 = vpop.f32.mrb[15].mxu0  ;;  %v5311_v27 = vcombine.low %v4384_v51, %v11803_v20  ;;  %v2499_v54 = vsel %vm2469_vm7, %v2434_v61, %v11607_v8  ;;  %v2823_v59 = vsel %vm2794_vm12, %v2758_v19, %v2078_v26 }
 0x2a8   :  { %v3269_v23 = vadd.f32 %v11641_v30, %v3268_v25  ;;  %v2270_v48 = vpop.permute.xlu1 %2269  ;;  %v2080_v1 = vpop.permute.xlu0 %2079  ;;  %v11829_v2 = vrot.slane %v5856_v52, %v11122_v9  ;;  %v5855_v22 = vrot.slane %v5841_v60, %v11122_v9  ;;  %v2564_v51 = vsel %vm2534_vm8, %v2499_v54, %v11627_v11 }
 0x2a9   :  { %vm3528_vm5 = vcmp.gt.f32.partialorder %v3274_v6, 0.0  ;;  %v3589_v13 = vmul.f32 %v10926_v4, %v3274_v6  ;;  %v2888_v63 = vsel %vm2859_vm13, %v2823_v59, %v2270_v48  ;;  %v6252_v26 = vcombine.low %v11491_v40, %v11795_v43  ;;  %v11859_v40 = vld [vmem:[#allocation2 + $0x220] sm:$0x3] }
 0x2aa   :  { %15754 = vst [vmem:[#allocation14_spill] sm:$0xff] %v11829_v2  ;;  %vm3527_vm15 = vcmp.gt.f32.partialorder %v3269_v23, 0.0  ;;  %v3588_v8 = vmul.f32 %v10926_v4, %v3269_v23  ;;  %1329 = vrot.lane.b32.xlu1 %v11732_v33, %s9682_s17  ;;  %1139 = vrot.lane.b32.xlu0 %v11723_v57, %s9683_s18  ;;  %v5857_v48 = vcombine.low %v5855_v22, %v11816_v47 }
 0x2ab   :  { %v11843_v52 = vsel %vm3528_vm5, %v3274_v6, %v3589_v13  ;;  %9339 = vmatprep.mubr.msk.f32.mxu0 %vm2935_vm14, %v2888_v63  ;;  %v6067_v11 = vcombine.low %v6065_v7, %v11820_v49  ;;  %v11849_v60 = vrot.slane %v5311_v27, %v11122_v9  ;;  %v6251_v54 = vrot.slane %v9146_v12, %v11122_v9 }
 0x2ac   :  { %v11853_v19 = vsel %vm3527_vm15, %v3269_v23, %v3588_v8  ;;  %v11855_v57 = vpop.permute.xlu1 %1507  ;;  %v11857_v25 = vpop.permute.xlu0 %933  ;;  %v2629_v7 = vsel %vm2599_vm9, %v2564_v51, %v11673_v46  ;;  %v11869_v59 = vrot.slane %v5857_v48, %v11122_v9  ;;  %v11872_v23 = vrot.slane %v6066_v44, %v11122_v9 }
 0x2ad   :  { %v2694_v13 = vsel %vm15740_vm10, %v2629_v7, %v11711_v41  ;;  %v11881_v46 = vrot.slane %v6067_v11, %v11122_v9  ;;  %v6253_v12 = vcombine.low %v6251_v54, %v11849_v60  ;;  %v11891_v41 = vsel %vm495_vm3, %v616_v17, %v617_v55 }
 0x2ae   :  { %15755 = vst [vmem:[#allocation15_spill] sm:$0xff] %v11869_v59  ;;  %15756 = vst [vmem:[#allocation16_spill] sm:$0xff] %v11872_v23  ;;  %2093 = vrot.lane.b32.xlu1 %v11761_v50, %s9688_s14  ;;  %1903 = vrot.lane.b32.xlu0 %v11719_v42, %s9687_s25  ;;  %v2759_v63 = vsel %vm2729_vm11, %v2694_v13, %v11749_v62  ;;  %v599_v44 = vrot.slane %v11859_v40, 1  ;;  %v11900_v62 = vrot.slane %v6252_v26, %v11122_v9 }
 0x2af   :  { %15757 = vst [vmem:[#allocation17_spill] sm:$0xff] %v11881_v46  ;;  %v2824_v51 = vsel %vm2794_vm12, %v2759_v63, %v2080_v1  ;;  %v11903_v54 = vrot.slane %v6253_v12, %v11122_v9  ;;  %v214_v1 = vld [vmem:[%s15662_s1 + $0x1a0] sm:$0xff]  ;;  %v757_v13 = vrot.slane %v11732_v33, 2  ;;  %v758_v12 = vrot.slane %v11719_v42, 2 }
 0x2b0   :  { %v2272_v8 = vpop.permute.xlu1 %2271  ;;  %v1698_v48 = vpop.permute.xlu0 %1697  ;;  %15758 = vst [vmem:[#allocation18_spill] sm:$0xff] %v11900_v62  ;;  %v600_v26 = vsel %vm495_vm3, %v597_v32, %v599_v44  ;;  %279 = vst.msk [vmem:[#allocation2 + $0x2b9] sm:$0xff] %vm52_vm0, %v214_v1  ;;  %v777_v32 = vrot.slane %v11744_v45, 2  ;;  %v778_v33 = vrot.slane %v11778_v24, 2  ;;  %v215_v1 = vld [vmem:[%s15662_s1 + $0x1a8] sm:$0xff]  ;;  %v760_v24 = vrot.slane %v11859_v40, 2 }
 0x2b1   :  { %15759 = vst [vmem:[#allocation19_spill] sm:$0xff] %v11903_v54  ;;  %v2889_v17 = vsel %vm2859_vm13, %v2824_v51, %v2272_v8  ;;  %v371_v8 = vld [vmem:[#allocation2 + $0x280] sm:$0x3]  ;;  %280 = vst.msk [vmem:[#allocation2 + $0x2c1] sm:$0xff] %vm52_vm0, %v215_v1 }
 0x2b2   :  { %1331 = vrot.lane.b32.xlu1 %v11719_v42, %s9682_s17  ;;  %965 = vrot.lane.b32.xlu0 %v11891_v41, %s9684_s19  ;;  %v619_v44 = vrot.slane %v371_v8, 1  ;;  %v11939_v11 = vsel %vm656_vm2, %v777_v32, %v778_v33  ;;  %v761_v6 = vsel %vm656_vm2, %v758_v12, %v760_v24  ;;  %v780_v27 = vrot.slane %v371_v8, 2 }
 0x2b3   :  { %9340 = vmatmul.mubr.msk.f32.gmra.mrb[28].mxu0 %vm2935_vm14, %v2889_v17  ;;  %v759_v17 = vsel %vm656_vm2, %v757_v13, %v758_v12  ;;  %15760 = vst [vmem:[#allocation20_spill] sm:$0xff] %v11939_v11 }
 0x2b4   :  { %v11922_v63 = vpop.permute.xlu1 %1125  ;;  %v11924_v51 = vpop.permute.xlu0 %935  ;;  %v11944_v45 = vsel %vm495_vm3, %v617_v55, %v619_v44  ;;  %v9608_v44 = vld [vmem:[#allocation2 + $0x168] sm:$0xff] }
 0x2b5   :  { %15761 = vst [vmem:[#allocation21_spill] sm:$0xff] %v11944_v45  ;;  %v2435_v1 = vsel %vm52_vm0, %v9608_v44, %v11675_v0 }
 0x2b6   :  { %2095 = vrot.lane.b32.xlu1 %v600_v26, %s9688_s14  ;;  %1521 = vrot.lane.b32.xlu0 %v11761_v50, %s9685_s0  ;;  %v2500_v10 = vsel %vm2469_vm7, %v2435_v1, %v11704_v15 }
 0x2b7   :  { %v2565_v40 = vsel %vm2534_vm8, %v2500_v10, %v11728_v5  ;;  %v11981_v10 = vsel %vm656_vm2, %v778_v33, %v780_v27 }
 0x2b8   :  { %v1890_v42 = vpop.permute.xlu1 %1889  ;;  %v1700_v7 = vpop.permute.xlu0 %1699  ;;  %v2630_v0 = vsel %vm2599_vm9, %v2565_v40, %v11787_v18  ;;  %15762 = vst [vmem:[#allocation22_spill] sm:$0xff] %v11981_v10  ;;  %v9609_v40 = vld [vmem:[#allocation2 + $0x170] sm:$0xff] }
 0x2b9   :  { %v2695_v44 = vsel %vm15740_vm10, %v2630_v0, %v1698_v48 }
 0x2ba   :  { %949 = vrot.lane.b32.xlu1 %v11761_v50, %s9684_s19  ;;  %2285 = vrot.lane.b32.xlu0 %v759_v17, %s9690_s2  ;;  %v206_v50 = vld [vmem:[%s15662_s1 + $0x160] sm:$0xff]  ;;  %v2760_v15 = vsel %vm2729_vm11, %v2695_v44, %v1890_v42  ;;  %v2436_v42 = vsel %vm52_vm0, %v9609_v40, %v11706_v56  ;;  %v207_v56 = vld [vmem:[%s15662_s1 + $0x168] sm:$0xff] }
 0x2bb   :  { %271 = vst.msk [vmem:[#allocation2 + $0x259] sm:$0xff] %vm52_vm0, %v206_v50  ;;  %v2501_v27 = vsel %vm2469_vm7, %v2436_v42, %v11730_v28  ;;  %272 = vst.msk [vmem:[#allocation2 + $0x261] sm:$0xff] %vm52_vm0, %v207_v56  ;;  %v12027_v40 = vld [vmem:[#allocation2 + $0x228] sm:$0xff] }
 0x2bc   :  { %v11947_v13 = vpop.permute.xlu1 %1317  ;;  %v11949_v22 = vpop.permute.xlu0 %1127  ;;  %v2566_v0 = vsel %vm2534_vm8, %v2501_v27, %v11789_v31  ;;  %v15764_v31 = vmax.f32 %v11671_v39, %v11853_v19  ;;  %v12032_v19 = vld [vmem:[#allocation2 + $0x290] sm:$0xff] }
 0x2be   :  { %1157 = vrot.lane.b32.xlu1 %v11939_v11, %s9683_s18  ;;  %967 = vrot.lane.b32.xlu0 %v11944_v45, %s9684_s19  ;;  %v12842_v11 = vld [vmem:[#allocation2 + $0x2c8] sm:$0x3]  ;;  %v9617_v45 = vld [vmem:[#allocation2 + $0x1f8] sm:$0xff] }
 0x2c0   :  { %v2082_v55 = vpop.permute.xlu1 %2081  ;;  %v1892_v32 = vpop.permute.xlu0 %1891 }
 0x2c1   :  { %v2825_v5 = vsel %vm2794_vm12, %v2760_v15, %v2082_v55  ;;  %v11998_v55 = vld [vmem:[#allocation2 + $0x288] sm:$0xff] }
 0x2c2   :  { %1713 = vrot.lane.b32.xlu1 %v759_v17, %s9686_s22  ;;  %1523 = vrot.lane.b32.xlu0 %v600_v26, %s9685_s0 }
 0x2c4   :  { %v11969_v50 = vpop.permute.xlu1 %1509  ;;  %v11971_v61 = vpop.permute.xlu0 %1319 }
 0x2c6   :  { %v9323_v29 = vpop.f32.mrb[16].mxu0  ;;  %951 = vrot.lane.b32.xlu1 %v600_v26, %s9684_s19  ;;  %2287 = vrot.lane.b32.xlu0 %v761_v6, %s9690_s2 }
 0x2c7   :  { %v3284_v12 = vadd.f32 %v11641_v30, %v9323_v29  ;;  %v3278_v8 = vpop.f32.mrb[17].mxu0 }
 0x2c8   :  { %v3279_v24 = vadd.f32 %v11641_v30, %v3278_v8  ;;  %v2274_v18 = vpop.permute.xlu1 %2273  ;;  %v2084_v1 = vpop.permute.xlu0 %2083  ;;  %v2631_v8 = vsel %vm2599_vm9, %v2566_v0, %v11855_v57 }
 0x2c9   :  { %vm3530_vm5 = vcmp.gt.f32.partialorder %v3284_v12, 0.0  ;;  %v3591_v48 = vmul.f32 %v10926_v4, %v3284_v12  ;;  %v2890_v26 = vsel %vm2859_vm13, %v2825_v5, %v2274_v18  ;;  %v2696_v18 = vsel %vm15740_vm10, %v2631_v8, %v1700_v7  ;;  %v12034_v7 = vld [vmem:[#allocation2 + $0x230] sm:$0xff] }
 0x2ca   :  { %vm3529_vm15 = vcmp.gt.f32.partialorder %v3279_v24, 0.0  ;;  %v3590_v29 = vmul.f32 %v10926_v4, %v3279_v24  ;;  %1159 = vrot.lane.b32.xlu1 %v11981_v10, %s9683_s18  ;;  %1141 = vrot.lane.b32.xlu0 %v759_v17, %s9683_s18  ;;  %v15763_v17 = vmax.f32 %v11658_v37, %v11843_v52  ;;  %v601_v8 = vrot.slane %v12027_v40, 1 }
 0x2cb   :  { %v11995_v33 = vsel %vm3530_vm5, %v3284_v12, %v3591_v48  ;;  %9342 = vmatprep.mubr.msk.f32.mxu0 %vm2935_vm14, %v2890_v26  ;;  %vm15766_vm5 = vcmask 1043456  }
 0x2cc   :  { %v3729_v44 = vmax.f32 %v15763_v17, %v11995_v33  ;;  %v12009_v15 = vsel %vm3529_vm15, %v3279_v24, %v3590_v29  ;;  %v12011_v28 = vpop.permute.xlu1 %1511  ;;  %v12013_v12 = vpop.permute.xlu0 %937  ;;  %v2761_v24 = vsel %vm2729_vm11, %v2696_v18, %v1892_v32  ;;  %v621_v17 = vrot.slane %v11998_v55, 1 }
 0x2cd   :  { %v3728_v5 = vmax.f32 %v15764_v31, %v12009_v15  ;;  %v2826_v57 = vsel %vm2794_vm12, %v2761_v24, %v2084_v1  ;;  %v4739_v1 = vcombine.high %v11478_v58, %v11478_v58  ;;  %v602_v31 = vrot.slane %v12034_v7, 1 }
 0x2ce   :  { %v3788_v37 = vrot.slane %v3729_v44, 1  ;;  %v3886_v52 = vrot.slane %v3729_v44, 2  ;;  %1715 = vrot.lane.b32.xlu1 %v761_v6, %s9686_s22  ;;  %1349 = vrot.lane.b32.xlu0 %v11998_v55, %s9682_s17  ;;  %vm15767_vm15 = vcmask 1044480  }
 0x2cf   :  { %v3787_v48 = vrot.slane %v3728_v5, 1  ;;  %v3885_v26 = vrot.slane %v3728_v5, 2 }
 0x2d0   :  { %v2276_v42 = vpop.permute.xlu1 %2275  ;;  %v12030_v39 = vpop.permute.xlu0 %1701  ;;  %v3855_v29 = vmax.f32 %v3729_v44, %v3788_v37  ;;  %v622_v44 = vrot.slane %v12032_v19, 1 }
 0x2d1   :  { %v3789_v27 = vsel %vm495_vm3, %v3787_v48, %v3788_v37  ;;  %v3887_v56 = vsel %vm656_vm2, %v3885_v26, %v3886_v52  ;;  %v2891_v32 = vsel %vm2859_vm13, %v2826_v57, %v2276_v42  ;;  %v4674_v37 = vcombine.high %v11764_v36, %v11764_v36  ;;  %v12059_v26 = vld [vmem:[#allocation2 + $0x298] sm:$0x3] }
 0x2d2   :  { %v3854_v0 = vmax.f32 %v3728_v5, %v3789_v27  ;;  %1143 = vrot.lane.b32.xlu1 %v761_v6, %s9683_s18  ;;  %1905 = vrot.lane.b32.xlu0 %v12027_v40, %s9687_s25  ;;  %v3953_v24 = vmax.f32 %v3855_v29, %v3886_v52  ;;  %v5623_v57 = vcombine.low %v11735_v38, %v4739_v1  ;;  %v782_v36 = vrot.slane %v11998_v55, 2 }
 0x2d3   :  { %9343 = vmatmul.mubr.msk.f32.gmra.mrb[30].mxu0 %vm2935_vm14, %v2891_v32  ;;  %v12063_v42 = vsel %vm495_vm3, %v621_v17, %v622_v44  ;;  %v12066_v27 = vsel %vm495_vm3, %v601_v8, %v602_v31  ;;  %v12078_v38 = vrot.slane %v4674_v37, %v11122_v9  ;;  %v624_v8 = vrot.slane %v12059_v26, 1 }
 0x2d4   :  { %v3952_v18 = vmax.f32 %v3854_v0, %v3887_v56  ;;  %v12049_v5 = vpop.permute.xlu1 %1129  ;;  %v12051_v6 = vpop.permute.xlu0 %939  ;;  %15765 = vst [vmem:[#allocation23_spill] sm:$0xff] %v12063_v42  ;;  %v4089_v1 = vrot.slane %v3953_v24, 4  ;;  %v762_v55 = vrot.slane %v12027_v40, 2  ;;  %v4117_v54 = vrot.slane %v3953_v24, 5 }
 0x2d5   :  { %v5632_v37 = vrot.slane %v5623_v57, %v11122_v9  ;;  %v4145_v0 = vrot.slane %v3953_v24, 6  ;;  %v5624_v46 = vcombine.low %v11803_v20, %v12078_v38  ;;  %v15768_v57 = vrot.slane %v12032_v19, 2 }
 0x2d6   :  { %v3991_v58 = vrot.slane %v3952_v18, 1  ;;  %v4019_v48 = vrot.slane %v3952_v18, 2  ;;  %1351 = vrot.lane.b32.xlu1 %v12032_v19, %s9682_s17  ;;  %1333 = vrot.lane.b32.xlu0 %v12027_v40, %s9682_s17  ;;  %v4047_v52 = vrot.slane %v3952_v18, 3  ;;  %v4994_v40 = vcombine.low %v11752_v53, %v11770_v16 }
 0x2d7   :  { %v6640_v53 = vcombine.low %v11816_v47, %v11849_v60  ;;  %v4740_v16 = vcombine.high %v11803_v20, %v11803_v20 }
 0x2d8   :  { %v4174_v29 = vsel %vm4170_vm6, %v3952_v18, %v3991_v58  ;;  %v12070_v56 = vpop.permute.xlu1 %1893  ;;  %v12072_v32 = vpop.permute.xlu0 %1703  ;;  %v12102_v58 = vcombine.low %v5632_v37, %v11820_v49  ;;  %v9610_v37 = vld [vmem:[#allocation2 + $0x1b0] sm:$0xff] }
 0x2d9   :  { %v4189_v17 = vsel %vm15729_vm1, %v4174_v29, %v4019_v48  ;;  %v604_v29 = vrot.slane %v12075_v21, 1 }
 0x2da   :  { %v4203_v18 = vsel %vm15728_vm4, %v4189_v17, %v4047_v52  ;;  %1907 = vrot.lane.b32.xlu1 %v12034_v7, %s9687_s25  ;;  %1541 = vrot.lane.b32.xlu0 %v12063_v42, %s9685_s0 }
 0x2db   :  { %v4218_v48 = vsel %vm15766_vm5, %v4203_v18, %v4089_v1  ;;  %v12110_v1 = vsel %vm656_vm2, %v782_v36, %v15768_v57  ;;  %v12142_v57 = vrot.slane %v4994_v40, %v11122_v9  ;;  %v12159_v40 = vrot.slane %v6640_v53, %v11122_v9 }
 0x2dc   :  { %v4233_v52 = vsel %vm15767_vm15, %v4218_v48, %v4117_v54  ;;  %v12095_v17 = vpop.permute.xlu1 %1321  ;;  %v12097_v62 = vpop.permute.xlu0 %1131  ;;  %15769 = vst [vmem:[#allocation24_spill] sm:$0xff] %v12110_v1  ;;  %v12121_v54 = vsel %vm495_vm3, %v622_v44, %v624_v8  ;;  %v2437_v48 = vsel %vm52_vm0, %v9610_v37, %v11857_v25  ;;  %v15772_v44 = vcombine.low %v11795_v43, %v11816_v47  ;;  %v9611_v47 = vld [vmem:[#allocation2 + $0x1b8] sm:$0xff] }
 0x2dd   :  { %v12105_v24 = vsel %vm656_vm2, %v4233_v52, %v4145_v0  ;;  %15770 = vst [vmem:[#allocation25_spill] sm:$0xff] %v12121_v54  ;;  %v15771_v0 = vrot.slane %v12034_v7, 2  ;;  %v12133_v52 = vsel %vm495_vm3, %v602_v31, %v604_v29  ;;  %v12150_v25 = vrot.slane %v5624_v46, %v11122_v9  ;;  %15774 = vst [vmem:[#allocation27_spill] sm:$0xff] %v12159_v40 }
 0x2de   :  { %969 = vrot.lane.b32.xlu1 %v12063_v42, %s9684_s19  ;;  %2097 = vrot.lane.b32.xlu0 %v12066_v27, %s9688_s14  ;;  %v4392_v18 = vrot.slane %v12105_v24, %v11122_v9  ;;  %v12139_v8 = vrot.slane %v15772_v44, %v11122_v9  ;;  %v2502_v43 = vsel %vm2469_vm7, %v2437_v48, %v11922_v63 }
 0x2df   :  { %v12126_v36 = vsel %vm656_vm2, %v762_v55, %v15771_v0  ;;  %v2438_v29 = vsel %vm52_vm0, %v9611_v47, %v11924_v51  ;;  %v12162_v37 = vcombine.low %v12078_v38, %v4740_v16  ;;  %v2567_v53 = vsel %vm2534_vm8, %v2502_v43, %v11947_v13 }
 0x2e0   :  { %15773 = vst [vmem:[#allocation26_spill] sm:$0xff] %v12139_v8  ;;  %v2086_v55 = vpop.permute.xlu1 %2085  ;;  %v12144_v0 = vpop.permute.xlu0 %1895  ;;  %v4400_v23 = vcombine.high %v4392_v18, %v4392_v18  ;;  %v12147_v59 = vrot.slane %v4392_v18, %v11122_v9  ;;  %v2503_v16 = vsel %vm2469_vm7, %v2438_v29, %v11949_v22  ;;  %v6462_v48 = vcombine.low %v12142_v57, %v11820_v49 }
 0x2e1   :  { %v6277_v29 = vrot.slane %v12162_v37, %v11122_v9 }
 0x2e2   :  { %1525 = vrot.lane.b32.xlu1 %v12066_v27, %s9685_s0  ;;  %1335 = vrot.lane.b32.xlu0 %v12034_v7, %s9682_s17  ;;  %v12169_v46 = vrot.slane %v4400_v23, %v11122_v9  ;;  %v9140_v63 = vcombine.high %v11803_v20, %v12147_v59  ;;  %v4422_v51 = vcombine.high %v12147_v59, %v12147_v59 }
 0x2e3   :  { %v4996_v18 = vcombine.low %v11803_v20, %v12147_v59  ;;  %v2568_v23 = vsel %vm2534_vm8, %v2503_v16, %v11971_v61  ;;  %v2632_v20 = vsel %vm2599_vm9, %v2567_v53, %v11969_v50 }
 0x2e4   :  { %v12185_v44 = vpop.permute.xlu1 %1513  ;;  %v12187_v47 = vpop.permute.xlu0 %1323  ;;  %v5312_v31 = vcombine.low %v12078_v38, %v12169_v46  ;;  %v12192_v13 = vrot.slane %v9140_v63, %v11122_v9  ;;  %v5042_v22 = vcombine.low %v12169_v46, %v4422_v51  ;;  %v2633_v43 = vsel %vm2599_vm9, %v2568_v23, %v12011_v28 }
 0x2e5   :  { %v9135_v61 = vcombine.high %v12147_v59, %v12169_v46  ;;  %v2697_v38 = vsel %vm15740_vm10, %v2632_v20, %v12030_v39  ;;  %v4385_v28 = vcombine.high %v12105_v24, %v12105_v24 }
 0x2e6   :  { %v9326_v16 = vpop.f32.mrb[18].mxu0  ;;  %1733 = vrot.lane.b32.xlu1 %v12110_v1, %s9686_s22  ;;  %1543 = vrot.lane.b32.xlu0 %v12121_v54, %s9685_s0  ;;  %v5648_v50 = vcombine.low %v12150_v25, %v12192_v13  ;;  %v2762_v63 = vsel %vm2729_vm11, %v2697_v38, %v12070_v56  ;;  %v5340_v39 = vrot.slane %v5312_v31, %v11122_v9 }
 0x2e7   :  { %v3294_v37 = vadd.f32 %v11641_v30, %v9326_v16  ;;  %v3288_v51 = vpop.f32.mrb[19].mxu0  ;;  %v12218_v53 = vrot.slane %v5042_v22, %v11122_v9  ;;  %v2827_v23 = vsel %vm2794_vm12, %v2762_v63, %v2086_v55  ;;  %v12223_v35 = vrot.slane %v9135_v61, %v11122_v9 }
 0x2e8   :  { %v3289_v20 = vadd.f32 %v11641_v30, %v3288_v51  ;;  %v2278_v2 = vpop.permute.xlu1 %2277  ;;  %v2088_v14 = vpop.permute.xlu0 %2087  ;;  %v5873_v56 = vcombine.low %v12147_v59, %v12169_v46  ;;  %v5024_v22 = vrot.slane %v4996_v18, %v11122_v9  ;;  %v2698_v55 = vsel %vm15740_vm10, %v2633_v43, %v12072_v32 }
 0x2e9   :  { %vm3532_vm5 = vcmp.gt.f32.partialorder %v3294_v37, 0.0  ;;  %v3593_v24 = vmul.f32 %v10926_v4, %v3294_v37  ;;  %v2892_v31 = vsel %vm2859_vm13, %v2827_v23, %v2278_v2  ;;  %v12238_v59 = vrot.slane %v4385_v28, %v11122_v9 }
 0x2ea   :  { %vm3531_vm15 = vcmp.gt.f32.partialorder %v3289_v20, 0.0  ;;  %v3592_v38 = vmul.f32 %v10926_v4, %v3289_v20  ;;  %2289 = vrot.lane.b32.xlu1 %v12126_v36, %s9690_s2  ;;  %2099 = vrot.lane.b32.xlu0 %v12133_v52, %s9688_s14  ;;  %v5342_v2 = vcombine.low %v11849_v60, %v5340_v39  ;;  %v5662_v32 = vrot.slane %v5648_v50, %v11122_v9 }
 0x2eb   :  { %v12240_v61 = vsel %vm3532_vm5, %v3294_v37, %v3593_v24  ;;  %9345 = vmatprep.mubr.msk.f32.mxu0 %vm2935_vm14, %v2892_v31  ;;  %v6463_v18 = vcombine.low %v5024_v22, %v12218_v53  ;;  %v12255_v28 = vrot.slane %v5873_v56, %v11122_v9  ;;  %v6641_v37 = vcombine.low %v5340_v39, %v12223_v35 }
 0x2ec   :  { %v12248_v16 = vsel %vm3531_vm15, %v3289_v20, %v3592_v38  ;;  %v12250_v63 = vpop.permute.xlu1 %1515  ;;  %v12252_v51 = vpop.permute.xlu0 %941  ;;  %v2763_v23 = vsel %vm2729_vm11, %v2698_v55, %v12144_v0  ;;  %v12263_v24 = vrot.slane %v5342_v2, %v11122_v9  ;;  %v12266_v20 = vrot.slane %v6462_v48, %v11122_v9 }
 0x2ed   :  { %v785_v39 = vrot.slane %v12059_v26, 2  ;;  %v15777_v0 = vrot.slane %v12102_v58, %v11122_v9  ;;  %v12279_v31 = vrot.slane %v6463_v18, %v11122_v9  ;;  %v12287_v38 = vrot.slane %v12238_v59, %v11122_v9 }
 0x2ee   :  { %15775 = vst [vmem:[#allocation28_spill] sm:$0xff] %v12263_v24  ;;  %15776 = vst [vmem:[#allocation29_spill] sm:$0xff] %v12266_v20  ;;  %971 = vrot.lane.b32.xlu1 %v12121_v54, %s9684_s19  ;;  %953 = vrot.lane.b32.xlu0 %v12066_v27, %s9684_s19  ;;  %v12290_v26 = vrot.slane %v6641_v37, %v11122_v9  ;;  %v4423_v27 = vcombine.high %v12169_v46, %v12169_v46 }
 0x2ef   :  { %v12276_v56 = vcombine.low %v15777_v0, %v5662_v32  ;;  %15779 = vst [vmem:[#allocation31_spill] sm:$0xff] %v12279_v31  ;;  %v2828_v58 = vsel %vm2794_vm12, %v2763_v23, %v2088_v14  ;;  %v12300_v55 = vcombine.low %v6277_v29, %v12223_v35  ;;  %v15781_v14 = vrot.slane %v12032_v19, 2  ;;  %v216_v29 = vld [vmem:[%s15662_s1 + $0x1b0] sm:$0xff] }
 0x2f0   :  { %15780 = vst [vmem:[#allocation32_spill] sm:$0xff] %v12290_v26  ;;  %v2280_v2 = vpop.permute.xlu1 %2279  ;;  %v1706_v32 = vpop.permute.xlu0 %1705  ;;  %v5043_v46 = vcombine.low %v4423_v27, %v12287_v38  ;;  %v765_v27 = vrot.slane %v12075_v21, 2  ;;  %281 = vst.msk [vmem:[#allocation2 + $0x2d1] sm:$0xff] %vm52_vm0, %v216_v29  ;;  %v6810_v19 = vcombine.low %v11820_v49, %v12150_v25 }
 0x2f1   :  { %15778 = vst [vmem:[#allocation30_spill] sm:$0xff] %v12276_v56  ;;  %v2893_v48 = vsel %vm2859_vm13, %v2828_v58, %v2280_v2  ;;  %v12313_v23 = vsel %vm656_vm2, %v15781_v14, %v785_v39  ;;  %v5025_v58 = vcombine.low %v11516_v3, %v12142_v57  ;;  %v5026_v39 = vcombine.low %v11820_v49, %v5024_v22  ;;  %v9612_v49 = vld [vmem:[#allocation2 + $0x1c8] sm:$0xff] }
 0x2f2   :  { %1527 = vrot.lane.b32.xlu1 %v12133_v52, %s9685_s0  ;;  %1161 = vrot.lane.b32.xlu0 %v12110_v1, %s9683_s18  ;;  %15782 = vst [vmem:[#allocation33_spill] sm:$0xff] %v12313_v23  ;;  %v12324_v2 = vrot.slane %v5043_v46, %v11122_v9  ;;  %v15785_v22 = vrot.slane %v12034_v7, 2  ;;  %v12355_v46 = vrot.slane %v6810_v19, %v11122_v9  ;;  %v217_v7 = vld [vmem:[%s15662_s1 + $0x1b8] sm:$0xff] }
 0x2f3   :  { %9346 = vmatmul.mubr.msk.f32.gmra.mrb[32].mxu0 %vm2935_vm14, %v2893_v48  ;;  %v12340_v21 = vrot.slane %v5025_v58, %v11122_v9  ;;  %v12343_v57 = vrot.slane %v5026_v39, %v11122_v9  ;;  %282 = vst.msk [vmem:[#allocation2 + $0x2d9] sm:$0xff] %vm52_vm0, %v217_v7  ;;  %v12380_v39 = vld [vmem:[#allocation2 + $0x2a8] sm:$0xff]  ;;  %v2439_v0 = vsel %vm52_vm0, %v9612_v49, %v12013_v12  ;;  %v12390_v7 = vld [vmem:[#allocation2 + $0x240] sm:$0xff] }
 0x2f4   :  { %v12329_v14 = vpop.permute.xlu1 %1133  ;;  %v12331_v37 = vpop.permute.xlu0 %943  ;;  %v6811_v3 = vcombine.low %v12192_v13, %v12324_v2  ;;  %v12350_v48 = vsel %vm656_vm2, %v15785_v22, %v765_v27  ;;  %v12352_v13 = vld [vmem:[#allocation2 + $0x2a0] sm:$0xff]  ;;  %15786 = vst [vmem:[#allocation36_spill] sm:$0xff] %v12355_v46  ;;  %v627_v50 = vrot.slane %v12380_v39, 1 }
 0x2f5   :  { %15783 = vst [vmem:[#allocation34_spill] sm:$0xff] %v12340_v21  ;;  %15784 = vst [vmem:[#allocation35_spill] sm:$0xff] %v12343_v57 }
 0x2f6   :  { %1735 = vrot.lane.b32.xlu1 %v12313_v23, %s9686_s22  ;;  %1717 = vrot.lane.b32.xlu0 %v12126_v36, %s9686_s22  ;;  %v12358_v29 = vrot.slane %v6811_v3, %v11122_v9 }
 0x2f8   :  { %15787 = vst [vmem:[#allocation37_spill] sm:$0xff] %v12358_v29  ;;  %v1898_v58 = vpop.permute.xlu1 %1897  ;;  %v1708_v18 = vpop.permute.xlu0 %1707 }
 0x2fa   :  { %2291 = vrot.lane.b32.xlu1 %v12350_v48, %s9690_s2  ;;  %1925 = vrot.lane.b32.xlu0 %v12352_v13, %s9687_s25 }
 0x2fc   :  { %v12372_v27 = vpop.permute.xlu1 %1325  ;;  %v12374_v19 = vpop.permute.xlu0 %1135 }
 0x2fe   :  { %1145 = vrot.lane.b32.xlu1 %v12126_v36, %s9683_s18  ;;  %955 = vrot.lane.b32.xlu0 %v12133_v52, %s9684_s19  ;;  %v2504_v36 = vsel %vm2469_vm7, %v2439_v0, %v12049_v5  ;;  %v626_v52 = vrot.slane %v12352_v13, 1 }
 0x2ff   :  { %v2569_v43 = vsel %vm2534_vm8, %v2504_v36, %v12095_v17 }
 0x300   :  { %v2090_v3 = vpop.permute.xlu1 %2089  ;;  %v1900_v22 = vpop.permute.xlu0 %1899  ;;  %v2634_v49 = vsel %vm2599_vm9, %v2569_v43, %v12185_v44  ;;  %v12412_v36 = vsel %vm495_vm3, %v626_v52, %v627_v50 }
 0x301   :  { %v2699_v21 = vsel %vm15740_vm10, %v2634_v49, %v1706_v32 }
 0x302   :  { %1353 = vrot.lane.b32.xlu1 %v12352_v13, %s9682_s17  ;;  %1163 = vrot.lane.b32.xlu0 %v12313_v23, %s9683_s18  ;;  %v2764_v5 = vsel %vm2729_vm11, %v2699_v21, %v1898_v58  ;;  %v9613_v21 = vld [vmem:[#allocation2 + $0x1d0] sm:$0xff] }
 0x303   :  { %v2829_v44 = vsel %vm2794_vm12, %v2764_v5, %v2090_v3 }
 0x304   :  { %v12396_v57 = vpop.permute.xlu1 %1517  ;;  %v12398_v12 = vpop.permute.xlu0 %1327 }
 0x306   :  { %v9329_v29 = vpop.f32.mrb[20].mxu0  ;;  %1909 = vrot.lane.b32.xlu1 %v12390_v7, %s9687_s25  ;;  %1719 = vrot.lane.b32.xlu0 %v12350_v48, %s9686_s22 }
 0x307   :  { %v3304_v17 = vadd.f32 %v11641_v30, %v9329_v29  ;;  %v3298_v0 = vpop.f32.mrb[21].mxu0  ;;  %v2440_v29 = vsel %vm52_vm0, %v9613_v21, %v12051_v6  ;;  %v15788_v6 = vmax.f32 %v11995_v33, %v12240_v61  ;;  %v12442_v21 = vld [vmem:[#allocation2 + $0x248] sm:$0xff] }
 0x308   :  { %v3299_v43 = vadd.f32 %v11641_v30, %v3298_v0  ;;  %v2282_v32 = vpop.permute.xlu1 %2281  ;;  %v2092_v49 = vpop.permute.xlu0 %2091  ;;  %v2505_v30 = vsel %vm2469_vm7, %v2440_v29, %v12097_v62 }
 0x309   :  { %vm3534_vm5 = vcmp.gt.f32.partialorder %v3304_v17, 0.0  ;;  %v3595_v46 = vmul.f32 %v10926_v4, %v3304_v17  ;;  %v2894_v26 = vsel %vm2859_vm13, %v2829_v44, %v2282_v32  ;;  %v2570_v52 = vsel %vm2534_vm8, %v2505_v30, %v12187_v47  ;;  %v377_v30 = vld [vmem:[#allocation2 + $0x2b0] sm:$0x3] }
 0x30a   :  { %vm3533_vm15 = vcmp.gt.f32.partialorder %v3299_v43, 0.0  ;;  %v3594_v58 = vmul.f32 %v10926_v4, %v3299_v43  ;;  %2117 = vrot.lane.b32.xlu1 %v12412_v36, %s9688_s14  ;;  %1927 = vrot.lane.b32.xlu0 %v12380_v39, %s9687_s25  ;;  %v2635_v62 = vsel %vm2599_vm9, %v2570_v52, %v12250_v63  ;;  %v15789_v47 = vmax.f32 %v12009_v15, %v12248_v16 }
 0x30b   :  { %v12427_v3 = vsel %vm3534_vm5, %v3304_v17, %v3595_v46  ;;  %9348 = vmatprep.mubr.msk.f32.mxu0 %vm2935_vm14, %v2894_v26  ;;  %v2700_v46 = vsel %vm15740_vm10, %v2635_v62, %v1708_v18  ;;  %v606_v17 = vrot.slane %v12390_v7, 1  ;;  %vm15790_vm5 = vcmask 1043456  }
 0x30c   :  { %v3731_v5 = vmax.f32 %v15788_v6, %v12427_v3  ;;  %v12436_v0 = vsel %vm3533_vm15, %v3299_v43, %v3594_v58  ;;  %v12438_v44 = vpop.permute.xlu1 %1519  ;;  %v12440_v32 = vpop.permute.xlu0 %945  ;;  %v2765_v43 = vsel %vm2729_vm11, %v2700_v46, %v1900_v22  ;;  %v607_v58 = vrot.slane %v12442_v21, 1 }
 0x30d   :  { %v3730_v26 = vmax.f32 %v15789_v47, %v12436_v0  ;;  %v2830_v15 = vsel %vm2794_vm12, %v2765_v43, %v2092_v49  ;;  %v787_v49 = vrot.slane %v12352_v13, 2  ;;  %v629_v46 = vrot.slane %v377_v30, 1  ;;  %v12484_v13 = vld [vmem:[#allocation2 + $0x250] sm:$0x3] }
 0x30e   :  { %v3791_v33 = vrot.slane %v3731_v5, 1  ;;  %v3889_v61 = vrot.slane %v3731_v5, 2  ;;  %1337 = vrot.lane.b32.xlu1 %v12390_v7, %s9682_s17  ;;  %1147 = vrot.lane.b32.xlu0 %v12350_v48, %s9683_s18  ;;  %v12470_v22 = vsel %vm495_vm3, %v606_v17, %v607_v58  ;;  %v609_v40 = vrot.slane %v12484_v13, 1 }
 0x30f   :  { %v3790_v63 = vrot.slane %v3730_v26, 1  ;;  %v3888_v29 = vrot.slane %v3730_v26, 2  ;;  %vm15791_vm15 = vcmask 1044480  }
 0x310   :  { %v2284_v16 = vpop.permute.xlu1 %2283  ;;  %v12459_v18 = vpop.permute.xlu0 %1709  ;;  %v3857_v52 = vmax.f32 %v3731_v5, %v3791_v33  ;;  %v788_v5 = vrot.slane %v12380_v39, 2 }
 0x311   :  { %v3792_v6 = vsel %vm495_vm3, %v3790_v63, %v3791_v33  ;;  %v3890_v62 = vsel %vm656_vm2, %v3888_v29, %v3889_v61  ;;  %v2895_v48 = vsel %vm2859_vm13, %v2830_v15, %v2284_v16  ;;  %v4682_v29 = vcombine.high %v12238_v59, %v12238_v59 }
 0x312   :  { %v3856_v47 = vmax.f32 %v3730_v26, %v3792_v6  ;;  %1545 = vrot.lane.b32.xlu1 %v12412_v36, %s9685_s0  ;;  %1355 = vrot.lane.b32.xlu0 %v12380_v39, %s9682_s17  ;;  %v3955_v63 = vmax.f32 %v3857_v52, %v3889_v61  ;;  %v12487_v17 = vsel %vm656_vm2, %v787_v49, %v788_v5 }
 0x313   :  { %9349 = vmatmul.mubr.msk.f32.gmra.mrb[34].mxu0 %vm2935_vm14, %v2895_v48  ;;  %v12492_v61 = vsel %vm495_vm3, %v627_v50, %v629_v46  ;;  %v4689_v31 = vrot.slane %v4682_v29, %v11122_v9  ;;  %v790_v50 = vrot.slane %v377_v30, 2 }
 0x314   :  { %v3954_v33 = vmax.f32 %v3856_v47, %v3890_v62  ;;  %v12474_v43 = vpop.permute.xlu1 %1137  ;;  %v12476_v26 = vpop.permute.xlu0 %947  ;;  %v4090_v48 = vrot.slane %v3955_v63, 4  ;;  %v4118_v49 = vrot.slane %v3955_v63, 5  ;;  %v4146_v39 = vrot.slane %v3955_v63, 6 }
 0x315   :  { %v5359_v30 = vcombine.low %v12287_v38, %v4689_v31 }
 0x316   :  { %v3992_v15 = vrot.slane %v3954_v33, 1  ;;  %v4020_v16 = vrot.slane %v3954_v33, 2  ;;  %2101 = vrot.lane.b32.xlu1 %v12470_v22, %s9688_s14  ;;  %1911 = vrot.lane.b32.xlu0 %v12442_v21, %s9687_s25  ;;  %v4048_v52 = vrot.slane %v3954_v33, 3 }
 0x318   :  { %v4175_v59 = vsel %vm4170_vm6, %v3954_v33, %v3992_v15  ;;  %v1902_v6 = vpop.permute.xlu1 %1901  ;;  %v12495_v62 = vpop.permute.xlu0 %1711  ;;  %v767_v33 = vrot.slane %v12390_v7, 2  ;;  %v15695_v15 = vrot.slane %v12442_v21, 2 }
 0x319   :  { %v4190_v47 = vsel %vm15729_vm1, %v4175_v59, %v4020_v16 }
 0x31a   :  { %v4204_v20 = vsel %vm15728_vm4, %v4190_v47, %v4048_v52  ;;  %2309 = vrot.lane.b32.xlu1 %v12487_v17, %s9690_s2  ;;  %2119 = vrot.lane.b32.xlu0 %v12492_v61, %s9688_s14  ;;  %v12514_v52 = vsel %vm495_vm3, %v607_v58, %v609_v40  ;;  %v12531_v58 = vsel %vm656_vm2, %v767_v33, %v15695_v15 }
 0x31b   :  { %v4219_v46 = vsel %vm15790_vm5, %v4204_v20, %v4090_v48  ;;  %v12523_v20 = vsel %vm656_vm2, %v788_v5, %v790_v50  ;;  %v9614_v48 = vld [vmem:[#allocation2 + $0x1e0] sm:$0xff]  ;;  %v4741_v5 = vcombine.high %v12287_v38, %v12287_v38 }
 0x31c   :  { %v4234_v16 = vsel %vm15791_vm15, %v4219_v46, %v4118_v49  ;;  %v12509_v29 = vpop.permute.xlu1 %1329  ;;  %v12511_v59 = vpop.permute.xlu0 %1139  ;;  %v2441_v40 = vsel %vm52_vm0, %v9614_v48, %v12252_v51  ;;  %v15792_v49 = vcombine.low %v11849_v60, %v12255_v28  ;;  %v15794_v28 = vcombine.low %v12150_v25, %v12218_v53 }
 0x31d   :  { %v4248_v47 = vsel %vm656_vm2, %v4234_v16, %v4146_v39  ;;  %v2506_v50 = vsel %vm2469_vm7, %v2441_v40, %v12329_v14  ;;  %v12558_v14 = vrot.slane %v5359_v30, %v11122_v9  ;;  %v5664_v40 = vcombine.low %v4689_v31, %v4741_v5 }
 0x31e   :  { %1339 = vrot.lane.b32.xlu1 %v12442_v21, %s9682_s17  ;;  %973 = vrot.lane.b32.xlu0 %v12412_v36, %s9684_s19  ;;  %v4424_v7 = vcombine.high %v4248_v47, %v4248_v47  ;;  %v4431_v63 = vrot.slane %v4248_v47, %v11122_v9  ;;  %v12537_v36 = vrot.slane %v15792_v49, %v11122_v9 }
 0x31f   :  { %v2571_v60 = vsel %vm2534_vm8, %v2506_v50, %v12372_v27  ;;  %v12555_v47 = vrot.slane %v15794_v28, %v11122_v9  ;;  %v12626_v23 = vrot.slane %v5664_v40, %v11122_v9 }
 0x320   :  { %15793 = vst [vmem:[#allocation38_spill] sm:$0xff] %v12537_v36  ;;  %v2094_v39 = vpop.permute.xlu1 %2093  ;;  %v12543_v46 = vpop.permute.xlu0 %1903  ;;  %v4438_v51 = vrot.slane %v4424_v7, %v11122_v9  ;;  %v12547_v33 = vrot.slane %v4431_v63, %v11122_v9  ;;  %v4439_v16 = vcombine.high %v4431_v63, %v4431_v63  ;;  %v2636_v7 = vsel %vm2599_vm9, %v2571_v60, %v12396_v57 }
 0x321   :  { %15795 = vst [vmem:[#allocation39_spill] sm:$0xff] %v12555_v47  ;;  %v2701_v30 = vsel %vm15740_vm10, %v2636_v7, %v12459_v18  ;;  %v12829_v47 = vld [vmem:[#allocation2 + $0x260] sm:$0xff] }
 0x322   :  { %1547 = vrot.lane.b32.xlu1 %v12492_v61, %s9685_s0  ;;  %1529 = vrot.lane.b32.xlu0 %v12470_v22, %s9685_s0  ;;  %v5874_v25 = vcombine.low %v12287_v38, %v12547_v33  ;;  %v12571_v27 = vrot.slane %v4439_v16, %v11122_v9  ;;  %v4461_v63 = vcombine.high %v12547_v33, %v12547_v33 }
 0x323   :  { %v9147_v57 = vcombine.high %v12287_v38, %v12547_v33  ;;  %v4690_v15 = vcombine.high %v4438_v51, %v4438_v51  ;;  %v2766_v18 = vsel %vm2729_vm11, %v2701_v30, %v1902_v6  ;;  %v12589_v7 = vrot.slane %v4438_v51, %v11122_v9  ;;  %v12604_v51 = vld [vmem:[%s15664_s3] ss:$0 sm:$0xff] }
 0x324   :  { %v12579_v49 = vpop.permute.xlu1 %1331  ;;  %v12581_v50 = vpop.permute.xlu0 %965  ;;  %v5888_v60 = vrot.slane %v5874_v25, %v11122_v9  ;;  %v6083_v28 = vcombine.low %v4689_v31, %v12571_v27  ;;  %v4462_v16 = vcombine.high %v12571_v27, %v12571_v27  ;;  %v5390_v38 = vcombine.low %v12223_v35, %v12558_v14 }
 0x325   :  { %15796 = vst [vmem:[#allocation40_spill] sm:$0xff] %v12589_v7  ;;  %v6284_v5 = vrot.slane %v9147_v57, %v11122_v9  ;;  %v5360_v6 = vcombine.low %v12571_v27, %v4461_v63  ;;  %v9131_v8 = vcombine.high %v12547_v33, %v12571_v27 }
 0x326   :  { %v9332_v48 = vpop.f32.mrb[22].mxu0  ;;  %2103 = vrot.lane.b32.xlu1 %v12514_v52, %s9688_s14  ;;  %1737 = vrot.lane.b32.xlu0 %v12487_v17, %s9686_s22  ;;  %v5890_v31 = vcombine.low %v12223_v35, %v5888_v60  ;;  %v6090_v25 = vrot.slane %v6083_v28, %v11122_v9  ;;  %v5361_v56 = vcombine.low %v4462_v16, %v12589_v7 }
 0x327   :  { %v3314_v30 = vadd.f32 %v12604_v51, %v9332_v48  ;;  %v3308_v57 = vpop.f32.mrb[23].mxu0  ;;  %v6286_v24 = vcombine.low %v12558_v14, %v6284_v5  ;;  %v12621_v48 = vrot.slane %v4690_v15, %v11122_v9  ;;  %v2831_v16 = vsel %vm2794_vm12, %v2766_v18, %v2094_v39 }
 0x328   :  { %v3309_v35 = vadd.f32 %v12604_v51, %v3308_v57  ;;  %v12612_v60 = vpop.permute.xlu1 %2095  ;;  %v12614_v63 = vpop.permute.xlu0 %1521  ;;  %v12617_v28 = vrot.slane %v5890_v31, %v11122_v9  ;;  %v6092_v34 = vcombine.low %v12324_v2, %v6090_v25  ;;  %v12636_v39 = vrot.slane %v5360_v6, %v11122_v9 }
 0x329   :  { %15798 = vst [vmem:[#allocation42_spill] sm:$0xff] %v12621_v48  ;;  %vm3536_vm5 = vcmp.gt.f32.partialorder %v3314_v30, 0.0  ;;  %v3597_v5 = vmul.f32 %v10926_v4, %v3314_v30  ;;  %v12644_v31 = vrot.slane %v5361_v56, %v11122_v9  ;;  %v6300_v25 = vrot.slane %v6286_v24, %v11122_v9 }
 0x32a   :  { %15797 = vst [vmem:[#allocation41_spill] sm:$0xff] %v12617_v28  ;;  %vm3535_vm15 = vcmp.gt.f32.partialorder %v3309_v35, 0.0  ;;  %v3596_v57 = vmul.f32 %v10926_v4, %v3309_v35  ;;  %2311 = vrot.lane.b32.xlu1 %v12523_v20, %s9690_s2  ;;  %2293 = vrot.lane.b32.xlu0 %v12531_v58, %s9690_s2  ;;  %v12641_v40 = vrot.slane %v6092_v34, %v11122_v9 }
 0x32b   :  { %v12638_v18 = vsel %vm3536_vm5, %v3314_v30, %v3597_v5  ;;  %v12654_v6 = vrot.slane %v9131_v8, %v11122_v9  ;;  %v5665_v34 = vcombine.low %v12589_v7, %v12621_v48  ;;  %v218_v8 = vld [vmem:[%s15662_s1 + $0x1c0] sm:$0xff]  ;;  %v5391_v5 = vcombine.low %v12636_v39, %v12644_v31 }
 0x32c   :  { %15799 = vst [vmem:[#allocation43_spill] sm:$0xff] %v12641_v40  ;;  %v12649_v1 = vsel %vm3535_vm15, %v3309_v35, %v3596_v57  ;;  %v12651_v42 = vpop.permute.xlu1 %949  ;;  %v2286_v15 = vpop.permute.xlu0 %2285  ;;  %v5680_v35 = vcombine.low %v12324_v2, %v12626_v23  ;;  %283 = vst.msk [vmem:[#allocation2 + $0x2e9] sm:$0xff] %vm52_vm0, %v218_v8 }
 0x32d   :  { %v2896_v30 = vsel %vm2859_vm13, %v2831_v16, %v2286_v15  ;;  %v15800_v16 = vrot.slane %v12300_v55, %v11122_v9  ;;  %v12680_v15 = vrot.slane %v5665_v34, %v11122_v9  ;;  %v12698_v34 = vrot.slane %v5391_v5, %v11122_v9 }
 0x32e   :  { %975 = vrot.lane.b32.xlu1 %v12492_v61, %s9684_s19  ;;  %957 = vrot.lane.b32.xlu0 %v12470_v22, %s9684_s19  ;;  %v5044_v22 = vcombine.low %v12547_v33, %v12571_v27  ;;  %v9616_v33 = vld [vmem:[#allocation2 + $0x1e8] sm:$0xff]  ;;  %v12714_v5 = vrot.slane %v5680_v35, %v11122_v9  ;;  %v15813_v28 = vmax.f32 %v12436_v0, %v12649_v1 }
 0x32f   :  { %v12677_v57 = vcombine.low %v15800_v16, %v6300_v25  ;;  %9351 = vmatprep.mubr.msk.f32.mxu0 %vm2935_vm14, %v2896_v30  ;;  %v12695_v25 = vrot.slane %v5390_v38, %v11122_v9  ;;  %v5681_v30 = vcombine.low %v12654_v6, %v12680_v15  ;;  %v2442_v27 = vsel %vm52_vm0, %v9616_v33, %v12331_v37 }
 0x330   :  { %v12690_v56 = vpop.permute.xlu1 %1157  ;;  %v12692_v55 = vpop.permute.xlu0 %967  ;;  %v12705_v8 = vrot.slane %v5044_v22, %v11122_v9  ;;  %15803 = vst [vmem:[#allocation46_spill] sm:$0xff] %v12714_v5  ;;  %v2507_v37 = vsel %vm2469_vm7, %v2442_v27, %v12374_v19  ;;  %v770_v22 = vrot.slane %v12484_v13, 2 }
 0x331   :  { %15801 = vst [vmem:[#allocation44_spill] sm:$0xff] %v12677_v57  ;;  %15802 = vst [vmem:[#allocation45_spill] sm:$0xff] %v12695_v25  ;;  %v12717_v16 = vrot.slane %v5681_v30, %v11122_v9  ;;  %v2572_v38 = vsel %vm2534_vm8, %v2507_v37, %v12398_v12  ;;  %v15804_v12 = vcombine.low %v12218_v53, %v12324_v2 }
 0x332   :  { %1531 = vrot.lane.b32.xlu1 %v12514_v52, %s9685_s0  ;;  %1165 = vrot.lane.b32.xlu0 %v12487_v17, %s9683_s18  ;;  %v5075_v17 = vcombine.low %v12705_v8, %v12654_v6  ;;  %v2637_v19 = vsel %vm2599_vm9, %v2572_v38, %v12438_v44 }
 0x333   :  { %v2702_v13 = vsel %vm15740_vm10, %v2637_v19, %v12495_v62  ;;  %v12746_v27 = vrot.slane %v15804_v12, %v11122_v9  ;;  %v15807_v62 = vrot.slane %v12442_v21, 2  ;;  %v12756_v19 = vld [vmem:[#allocation2 + $0x2b8] sm:$0xff]  ;;  %v219_v21 = vld [vmem:[%s15662_s1 + $0x1c8] sm:$0xff] }
 0x334   :  { %v12728_v24 = vpop.permute.xlu1 %1713  ;;  %v12730_v35 = vpop.permute.xlu0 %1523  ;;  %v12749_v37 = vrot.slane %v5075_v17, %v11122_v9  ;;  %v2767_v44 = vsel %vm2729_vm11, %v2702_v13, %v12543_v46  ;;  %284 = vst.msk [vmem:[#allocation2 + $0x2f1] sm:$0xff] %vm52_vm0, %v219_v21  ;;  %v12785_v13 = vld [vmem:[#allocation2 + $0x2c0] sm:$0xff] }
 0x335   :  { %15805 = vst [vmem:[#allocation47_spill] sm:$0xff] %v12746_v27  ;;  %v771_v38 = vsel %vm656_vm2, %v15807_v62, %v770_v22  ;;  %v2832_v30 = vsel %vm2794_vm12, %v2767_v44, %v12612_v60  ;;  %v12791_v44 = vld [vmem:[#allocation2 + $0x258] sm:$0xff]  ;;  %v631_v62 = vrot.slane %v12756_v19, 1 }
 0x336   :  { %1739 = vrot.lane.b32.xlu1 %v12523_v20, %s9686_s22  ;;  %1721 = vrot.lane.b32.xlu0 %v12531_v58, %s9686_s22  ;;  %15806 = vst [vmem:[#allocation48_spill] sm:$0xff] %v12749_v37 }
 0x338   :  { %v12760_v61 = vpop.permute.xlu1 %951  ;;  %v2288_v53 = vpop.permute.xlu0 %2287 }
 0x339   :  { %15808 = vst [vmem:[#allocation49_spill] sm:$0xff] %v12760_v61  ;;  %v2897_v17 = vsel %vm2859_vm13, %v2832_v30, %v2288_v53  ;;  %v2443_v61 = vsel %vm52_vm0, %v9617_v45, %v12440_v32 }
 0x33a   :  { %2295 = vrot.lane.b32.xlu1 %v771_v38, %s9690_s2  ;;  %1929 = vrot.lane.b32.xlu0 %v12756_v19, %s9687_s25 }
 0x33b   :  { %9352 = vmatmul.mubr.msk.f32.gmra.mrb[36].mxu0 %vm2935_vm14, %v2897_v17 }
 0x33c   :  { %v12773_v46 = vpop.permute.xlu1 %1159  ;;  %v12775_v60 = vpop.permute.xlu0 %1141 }
 0x33e   :  { %1149 = vrot.lane.b32.xlu1 %v12531_v58, %s9683_s18  ;;  %959 = vrot.lane.b32.xlu0 %v12514_v52, %s9684_s19  ;;  %v632_v58 = vrot.slane %v12785_v13, 1 }
 0x340   :  { %v12781_v22 = vpop.permute.xlu1 %1715  ;;  %v12783_v30 = vpop.permute.xlu0 %1349 }
 0x342   :  { %1357 = vrot.lane.b32.xlu1 %v12756_v19, %s9682_s17  ;;  %1167 = vrot.lane.b32.xlu0 %v12523_v20, %s9683_s18  ;;  %v12804_v20 = vsel %vm495_vm3, %v631_v62, %v632_v58 }
 0x344   :  { %v12795_v53 = vpop.permute.xlu1 %1143  ;;  %v12797_v52 = vpop.permute.xlu0 %1905 }
 0x345   :  { %15809 = vst [vmem:[#allocation50_spill] sm:$0xff] %v12795_v53 }
 0x346   :  { %v9335_v17 = vpop.f32.mrb[24].mxu0  ;;  %1913 = vrot.lane.b32.xlu1 %v12791_v44, %s9687_s25  ;;  %1723 = vrot.lane.b32.xlu0 %v771_v38, %s9686_s22 }
 0x347   :  { %v3324_v21 = vadd.f32 %v12604_v51, %v9335_v17  ;;  %v3318_v12 = vpop.f32.mrb[25].mxu0 }
 0x348   :  { %v3319_v33 = vadd.f32 %v12604_v51, %v3318_v12  ;;  %v12807_v54 = vpop.permute.xlu1 %1351  ;;  %v12809_v37 = vpop.permute.xlu0 %1333  ;;  %v15812_v12 = vmax.f32 %v12427_v3, %v12638_v18 }
 0x349   :  { %15810 = vst [vmem:[#allocation51_spill] sm:$0xff] %v12807_v54  ;;  %15811 = vst [vmem:[#allocation52_spill] sm:$0xff] %v12809_v37  ;;  %vm3538_vm5 = vcmp.gt.f32.partialorder %v3324_v21, 0.0  ;;  %v3599_v27 = vmul.f32 %v10926_v4, %v3324_v21 }
 0x34a   :  { %vm3537_vm15 = vcmp.gt.f32.partialorder %v3319_v33, 0.0  ;;  %v3598_v5 = vmul.f32 %v10926_v4, %v3319_v33  ;;  %2121 = vrot.lane.b32.xlu1 %v12804_v20, %s9688_s14  ;;  %1931 = vrot.lane.b32.xlu0 %v12785_v13, %s9687_s25 }
 0x34b   :  { %v12817_v62 = vsel %vm3538_vm5, %v3324_v21, %v3599_v27  ;;  %vm15815_vm5 = vcmask 1043456  }
 0x34c   :  { %v3733_v17 = vmax.f32 %v15812_v12, %v12817_v62  ;;  %v12823_v57 = vsel %vm3537_vm15, %v3319_v33, %v3598_v5  ;;  %v12825_v25 = vpop.permute.xlu1 %1907  ;;  %v12827_v40 = vpop.permute.xlu0 %1541  ;;  %v611_v5 = vrot.slane %v12791_v44, 1  ;;  %v612_v33 = vrot.slane %v12829_v47, 1 }
 0x34d   :  { %v3732_v36 = vmax.f32 %v15813_v28, %v12823_v57  ;;  %vm15816_vm15 = vcmask 1044480  }
 0x34e   :  { %v3794_v27 = vrot.slane %v3733_v17, 1  ;;  %v3892_v21 = vrot.slane %v3733_v17, 2  ;;  %1341 = vrot.lane.b32.xlu1 %v12791_v44, %s9682_s17  ;;  %1151 = vrot.lane.b32.xlu0 %v771_v38, %s9683_s18  ;;  %v12853_v38 = vsel %vm495_vm3, %v611_v5, %v612_v33 }
 0x34f   :  { %v3793_v3 = vrot.slane %v3732_v36, 1  ;;  %v3891_v18 = vrot.slane %v3732_v36, 2 }
 0x350   :  { %v12840_v12 = vpop.permute.xlu1 %969  ;;  %v2098_v10 = vpop.permute.xlu0 %2097  ;;  %v3859_v1 = vmax.f32 %v3733_v17, %v3794_v27  ;;  %v793_v17 = vrot.slane %v12785_v13, 2 }
 0x351   :  { %15814 = vst [vmem:[#allocation53_spill] sm:$0xff] %v12840_v12  ;;  %v3795_v0 = vsel %vm495_vm3, %v3793_v3, %v3794_v27  ;;  %v3893_v28 = vsel %vm656_vm2, %v3891_v18, %v3892_v21  ;;  %v792_v12 = vrot.slane %v12756_v19, 2  ;;  %v634_v27 = vrot.slane %v12842_v11, 1 }
 0x352   :  { %v3858_v53 = vmax.f32 %v3732_v36, %v3795_v0  ;;  %1549 = vrot.lane.b32.xlu1 %v12804_v20, %s9685_s0  ;;  %1359 = vrot.lane.b32.xlu0 %v12785_v13, %s9682_s17  ;;  %v3957_v0 = vmax.f32 %v3859_v1, %v3892_v21  ;;  %v2508_v19 = vsel %vm2469_vm7, %v2443_v61, %v12474_v43 }
 0x353   :  { %v12871_v13 = vsel %vm656_vm2, %v792_v12, %v793_v17  ;;  %v2573_v45 = vsel %vm2534_vm8, %v2508_v19, %v12509_v29  ;;  %v12886_v12 = vld [vmem:[#allocation2 + $0x268] sm:$0x3] }
 0x354   :  { %v3956_v3 = vmax.f32 %v3858_v53, %v3893_v28  ;;  %v12858_v18 = vpop.permute.xlu1 %1525  ;;  %v12860_v36 = vpop.permute.xlu0 %1335  ;;  %v12874_v53 = vsel %vm495_vm3, %v632_v58, %v634_v27  ;;  %v2638_v28 = vsel %vm2599_vm9, %v2573_v45, %v12614_v63  ;;  %v4091_v43 = vrot.slane %v3957_v0, 4 }
 0x355   :  { %v2703_v58 = vsel %vm15740_vm10, %v2638_v28, %v12728_v24  ;;  %v4119_v27 = vrot.slane %v3957_v0, 5 }
 0x356   :  { %v3993_v37 = vrot.slane %v3956_v3, 1  ;;  %v4021_v54 = vrot.slane %v3956_v3, 2  ;;  %2105 = vrot.lane.b32.xlu1 %v12853_v38, %s9688_s14  ;;  %1915 = vrot.lane.b32.xlu0 %v12829_v47, %s9687_s25  ;;  %v4049_v32 = vrot.slane %v3956_v3, 3  ;;  %v2768_v63 = vsel %vm2729_vm11, %v2703_v58, %v12797_v52  ;;  %v9618_v58 = vld [vmem:[#allocation2 + $0x200] sm:$0xff] }
 0x357   :  { %v2833_v19 = vsel %vm2794_vm12, %v2768_v63, %v2098_v10  ;;  %v15716_v52 = vrot.slane %v12829_v47, 2  ;;  %v220_v10 = vld [vmem:[%s15662_s1 + $0x1d0] sm:$0xff] }
 0x358   :  { %v4176_v21 = vsel %vm4170_vm6, %v3956_v3, %v3993_v37  ;;  %v12879_v5 = vpop.permute.xlu1 %1733  ;;  %v12881_v1 = vpop.permute.xlu0 %1543  ;;  %v4147_v37 = vrot.slane %v3957_v0, 6  ;;  %285 = vst.msk [vmem:[#allocation2 + $0x301] sm:$0xff] %vm52_vm0, %v220_v10 }
 0x359   :  { %v4191_v61 = vsel %vm15729_vm1, %v4176_v21, %v4021_v54  ;;  %v795_v21 = vrot.slane %v12842_v11, 2 }
 0x35a   :  { %v4205_v29 = vsel %vm15728_vm4, %v4191_v61, %v4049_v32  ;;  %2313 = vrot.lane.b32.xlu1 %v12871_v13, %s9690_s2  ;;  %2123 = vrot.lane.b32.xlu0 %v12874_v53, %s9688_s14  ;;  %v614_v32 = vrot.slane %v12886_v12, 1  ;;  %v772_v61 = vrot.slane %v12791_v44, 2  ;;  %v4742_v44 = vcombine.high %v12589_v7, %v12589_v7 }
 0x35b   :  { %v4220_v54 = vsel %vm15815_vm5, %v4205_v29, %v4091_v43 }
 0x35c   :  { %v4235_v3 = vsel %vm15816_vm15, %v4220_v54, %v4119_v27  ;;  %v2290_v24 = vpop.permute.xlu1 %2289  ;;  %v12900_v45 = vpop.permute.xlu0 %2099  ;;  %v2444_v27 = vsel %vm52_vm0, %v9618_v58, %v12476_v26  ;;  %v12929_v63 = vsel %vm495_vm3, %v612_v33, %v614_v32  ;;  %v12940_v26 = vsel %vm656_vm2, %v772_v61, %v15716_v52 }
 0x35d   :  { %v2898_v28 = vsel %vm2859_vm13, %v2833_v19, %v2290_v24  ;;  %v4249_v0 = vsel %vm656_vm2, %v4235_v3, %v4147_v37  ;;  %v2509_v3 = vsel %vm2469_vm7, %v2444_v27, %v12511_v59  ;;  %v12935_v19 = vsel %vm656_vm2, %v793_v17, %v795_v21  ;;  %v221_v21 = vld [vmem:[%s15662_s1 + $0x1d8] sm:$0xff] }
 0x35e   :  { %1343 = vrot.lane.b32.xlu1 %v12829_v47, %s9682_s17  ;;  %977 = vrot.lane.b32.xlu0 %v12804_v20, %s9684_s19  ;;  %v4757_v11 = vrot.slane %v4249_v0, %v11122_v9  ;;  %v4750_v43 = vcombine.high %v4249_v0, %v4249_v0  ;;  %v2574_v33 = vsel %vm2534_vm8, %v2509_v3, %v12579_v49 }
 0x35f   :  { %9354 = vmatprep.mubr.msk.f32.mxu0 %vm2935_vm14, %v2898_v28  ;;  %v2639_v32 = vsel %vm2599_vm9, %v2574_v33, %v12730_v35  ;;  %v12960_v61 = vcombine.low %v12621_v48, %v4742_v44  ;;  %286 = vst.msk [vmem:[#allocation2 + $0x309] sm:$0xff] %vm52_vm0, %v221_v21  ;;  %v15819_v44 = vcombine.low %v12324_v2, %v12705_v8 }
 0x360   :  { %v12922_v29 = vpop.permute.xlu1 %971  ;;  %v12924_v20 = vpop.permute.xlu0 %953  ;;  %v4772_v37 = vrot.slane %v4757_v11, %v11122_v9  ;;  %v4765_v54 = vcombine.high %v4757_v11, %v4757_v11  ;;  %v12943_v24 = vrot.slane %v4750_v43, %v11122_v9  ;;  %v2704_v27 = vsel %vm15740_vm10, %v2639_v32, %v12781_v22 }
 0x361   :  { %15817 = vst [vmem:[#allocation54_spill] sm:$0xff] %v12922_v29  ;;  %15818 = vst [vmem:[#allocation55_spill] sm:$0xff] %v12924_v20 }
 0x362   :  { %1551 = vrot.lane.b32.xlu1 %v12874_v53, %s9685_s0  ;;  %1533 = vrot.lane.b32.xlu0 %v12853_v38, %s9685_s0  ;;  %v6479_v59 = vcombine.low %v12589_v7, %v4772_v37  ;;  %v4786_v17 = vrot.slane %v4765_v54, %v11122_v9  ;;  %v4787_v28 = vcombine.high %v4772_v37, %v4772_v37 }
 0x363   :  { %v9153_v49 = vcombine.high %v12589_v7, %v4772_v37  ;;  %v12975_v54 = vrot.slane %v15819_v44, %v11122_v9  ;;  %v12979_v3 = vrot.slane %v12943_v24, %v11122_v9 }
 0x364   :  { %v12962_v0 = vpop.permute.xlu1 %1527  ;;  %v12964_v10 = vpop.permute.xlu0 %1161  ;;  %v6486_v11 = vrot.slane %v6479_v59, %v11122_v9  ;;  %v5906_v43 = vcombine.low %v4772_v37, %v4786_v17  ;;  %v9144_v35 = vcombine.high %v4772_v37, %v4786_v17  ;;  %v6657_v58 = vcombine.low %v12621_v48, %v4786_v17 }
 0x365   :  { %15820 = vst [vmem:[#allocation56_spill] sm:$0xff] %v12979_v3  ;;  %v4788_v33 = vcombine.high %v4786_v17, %v4786_v17  ;;  %v6108_v44 = vcombine.low %v4786_v17, %v4787_v28  ;;  %v4828_v28 = vcombine.high %v12943_v24, %v12943_v24 }
 0x366   :  { %v9338_v21 = vpop.f32.mrb[26].mxu0  ;;  %2107 = vrot.lane.b32.xlu1 %v12929_v63, %s9688_s14  ;;  %1741 = vrot.lane.b32.xlu0 %v12871_v13, %s9686_s22  ;;  %v6488_v22 = vcombine.low %v12654_v6, %v6486_v11  ;;  %v5914_v37 = vrot.slane %v5906_v43, %v11122_v9  ;;  %v12988_v2 = vrot.slane %v9144_v35, %v11122_v9 }
 0x367   :  { %v3334_v8 = vadd.f32 %v12604_v51, %v9338_v21  ;;  %v3328_v59 = vpop.f32.mrb[27].mxu0  ;;  %v6664_v32 = vrot.slane %v6657_v58, %v11122_v9  ;;  %v6109_v52 = vcombine.low %v4788_v33, %v12979_v3  ;;  %v6834_v35 = vrot.slane %v9153_v49, %v11122_v9 }
 0x368   :  { %v3329_v7 = vadd.f32 %v12604_v51, %v3328_v59  ;;  %v12994_v48 = vpop.permute.xlu1 %1735  ;;  %v12996_v20 = vpop.permute.xlu0 %1717  ;;  %v12999_v11 = vrot.slane %v6488_v22, %v11122_v9  ;;  %v5922_v43 = vcombine.low %v5914_v37, %v12988_v2  ;;  %v2769_v21 = vsel %vm2729_vm11, %v2704_v27, %v12825_v25 }
 0x369   :  { %vm3540_vm5 = vcmp.gt.f32.partialorder %v3334_v8, 0.0  ;;  %v3601_v17 = vmul.f32 %v10926_v4, %v3334_v8  ;;  %v6666_v33 = vcombine.low %v12644_v31, %v6664_v32  ;;  %v13022_v24 = vrot.slane %v6109_v52, %v11122_v9 }
 0x36a   :  { %15821 = vst [vmem:[#allocation57_spill] sm:$0xff] %v12999_v11  ;;  %vm3539_vm15 = vcmp.gt.f32.partialorder %v3329_v7, 0.0  ;;  %v3600_v58 = vmul.f32 %v10926_v4, %v3329_v7  ;;  %2315 = vrot.lane.b32.xlu1 %v12935_v19, %s9690_s2  ;;  %2297 = vrot.lane.b32.xlu0 %v12940_v26, %s9690_s2  ;;  %v13016_v25 = vrot.slane %v5922_v43, %v11122_v9 }
 0x36b   :  { %v13018_v27 = vsel %vm3540_vm5, %v3334_v8, %v3601_v17  ;;  %v6836_v22 = vcombine.low %v12680_v15, %v6834_v35  ;;  %v2834_v37 = vsel %vm2794_vm12, %v2769_v21, %v12900_v45  ;;  %v6116_v8 = vrot.slane %v6108_v44, %v11122_v9 }
 0x36c   :  { %15822 = vst [vmem:[#allocation58_spill] sm:$0xff] %v13016_v25  ;;  %v13029_v29 = vsel %vm3539_vm15, %v3329_v7, %v3600_v58  ;;  %v2292_v49 = vpop.permute.xlu1 %2291  ;;  %v13031_v43 = vpop.permute.xlu0 %1925  ;;  %v15823_v7 = vcombine.low %v12558_v14, %v12636_v39  ;;  %v13050_v44 = vrot.slane %v6666_v33, %v11122_v9  ;;  %v13064_v14 = vrot.slane %v4828_v28, %v11122_v9 }
 0x36d   :  { %v2899_v52 = vsel %vm2859_vm13, %v2834_v37, %v2292_v49  ;;  %v6124_v35 = vcombine.low %v6116_v8, %v13022_v24  ;;  %v6310_v39 = vrot.slane %v12960_v61, %v11122_v9  ;;  %v775_v33 = vrot.slane %v12886_v12, 2  ;;  %v9619_v61 = vld [vmem:[#allocation2 + $0x270] sm:$0xff] }
 0x36e   :  { %979 = vrot.lane.b32.xlu1 %v12874_v53, %s9684_s19  ;;  %961 = vrot.lane.b32.xlu0 %v12853_v38, %s9684_s19  ;;  %v13047_v45 = vrot.slane %v15823_v7, %v11122_v9  ;;  %15825 = vst [vmem:[#allocation60_spill] sm:$0xff] %v13050_v44  ;;  %v15826_v53 = vcombine.low %v12626_v23, %v12654_v6  ;;  %15829 = vst [vmem:[#allocation63_spill] sm:$0xff] %v13064_v14 }
 0x36f   :  { %9355 = vmatmul.mubr.msk.f32.gmra.mrb[38].mxu0 %vm2935_vm14, %v2899_v52  ;;  %v13061_v38 = vrot.slane %v6836_v22, %v11122_v9  ;;  %v13075_v23 = vrot.slane %v6124_v35, %v11122_v9  ;;  %v6303_v28 = vcombine.low %v12979_v3, %v13064_v14  ;;  %v6318_v37 = vcombine.low %v12644_v31, %v6310_v39  ;;  %v13102_v35 = vld [vmem:[#allocation2 + $0x2d0] sm:$0xff] }
 0x370   :  { %15824 = vst [vmem:[#allocation59_spill] sm:$0xff] %v13047_v45  ;;  %v13058_v21 = vrot.slane %v15826_v53, %v11122_v9  ;;  %v13068_v17 = vpop.permute.xlu1 %1145  ;;  %v13070_v58 = vpop.permute.xlu0 %955  ;;  %v2453_v49 = vsel %vm52_vm0, %v9619_v61, %v12581_v50 }
 0x371   :  { %15828 = vst [vmem:[#allocation62_spill] sm:$0xff] %v13061_v38  ;;  %v6317_v22 = vrot.slane %v6303_v28, %v11122_v9  ;;  %v6326_v31 = vrot.slane %v6318_v37, %v11122_v9 }
 0x372   :  { %15827 = vst [vmem:[#allocation61_spill] sm:$0xff] %v13058_v21  ;;  %1535 = vrot.lane.b32.xlu1 %v12929_v63, %s9685_s0  ;;  %1169 = vrot.lane.b32.xlu0 %v12871_v13, %s9683_s18  ;;  %v15830_v13 = vrot.slane %v12829_v47, 2 }
 0x373   :  { %v6319_v7 = vcombine.low %v12988_v2, %v6317_v22  ;;  %v222_v22 = vld [vmem:[%s15662_s1 + $0x1e0] sm:$0xff] }
 0x374   :  { %v13090_v8 = vpop.permute.xlu1 %1353  ;;  %v13092_v52 = vpop.permute.xlu0 %1163  ;;  %v776_v12 = vsel %vm656_vm2, %v15830_v13, %v775_v33  ;;  %287 = vst.msk [vmem:[#allocation2 + $0x319] sm:$0xff] %vm52_vm0, %v222_v22  ;;  %v13132_v13 = vld [vmem:[#allocation2 + $0x2d8] sm:$0xff] }
 0x375   :  { %v13106_v53 = vrot.slane %v6319_v7, %v11122_v9 }
 0x376   :  { %1743 = vrot.lane.b32.xlu1 %v12935_v19, %s9686_s22  ;;  %1725 = vrot.lane.b32.xlu0 %v12940_v26, %s9686_s22 }
 0x377   :  { %v13113_v28 = vcombine.low %v6326_v31, %v13106_v53  ;;  %v223_v31 = vld [vmem:[%s15662_s1 + $0x1e8] sm:$0xff] }
 0x378   :  { %v13108_v39 = vpop.permute.xlu1 %1909  ;;  %v13110_v2 = vpop.permute.xlu0 %1719  ;;  %288 = vst.msk [vmem:[#allocation2 + $0x321] sm:$0xff] %vm52_vm0, %v223_v31 }
 0x379   :  { %15831 = vst [vmem:[#allocation64_spill] sm:$0xff] %v13113_v28 }
 0x37a   :  { %2299 = vrot.lane.b32.xlu1 %v776_v12, %s9690_s2  ;;  %1933 = vrot.lane.b32.xlu0 %v13102_v35, %s9687_s25 }
 0x37c   :  { %v2118_v47 = vpop.permute.xlu1 %2117  ;;  %v13118_v33 = vpop.permute.xlu0 %1927 }
 0x37e   :  { %1153 = vrot.lane.b32.xlu1 %v12940_v26, %s9683_s18  ;;  %963 = vrot.lane.b32.xlu0 %v12929_v63, %s9684_s19  ;;  %v636_v63 = vrot.slane %v13102_v35, 1  ;;  %v15722_v26 = vrot.slane %v13132_v13, 1 }
 0x380   :  { %v13128_v37 = vpop.permute.xlu1 %1337  ;;  %v13130_v7 = vpop.permute.xlu0 %1147  ;;  %v13158_v28 = vsel %vm495_vm3, %v636_v63, %v15722_v26  ;;  %v15833_v26 = vmax.f32 %v12823_v57, %v13029_v29 }
 0x382   :  { %1361 = vrot.lane.b32.xlu1 %v13102_v35, %s9682_s17  ;;  %1171 = vrot.lane.b32.xlu0 %v12935_v19, %s9683_s18  ;;  %v2518_v19 = vsel %vm2469_vm7, %v2453_v49, %v12690_v56 }
 0x383   :  { %v2583_v31 = vsel %vm2534_vm8, %v2518_v19, %v12783_v30 }
 0x384   :  { %v13143_v22 = vpop.permute.xlu1 %1545  ;;  %v13145_v6 = vpop.permute.xlu0 %1355  ;;  %v2648_v56 = vsel %vm2599_vm9, %v2583_v31, %v12827_v40 }
 0x385   :  { %v2713_v49 = vsel %vm15740_vm10, %v2648_v56, %v12879_v5 }
 0x386   :  { %v9341_v15 = vpop.f32.mrb[28].mxu0  ;;  %1917 = vrot.lane.b32.xlu1 %v9619_v61, %s9687_s25  ;;  %1727 = vrot.lane.b32.xlu0 %v776_v12, %s9686_s22 }
 0x387   :  { %v3344_v32 = vadd.f32 %v12604_v51, %v9341_v15  ;;  %v3338_v59 = vpop.f32.mrb[29].mxu0 }
 0x388   :  { %v3339_v50 = vadd.f32 %v12604_v51, %v3338_v59  ;;  %v13163_v38 = vpop.permute.xlu1 %2101  ;;  %v13165_v21 = vpop.permute.xlu0 %1911  ;;  %v2778_v51 = vsel %vm2729_vm11, %v2713_v49, %v13031_v43  ;;  %v15832_v59 = vmax.f32 %v12817_v62, %v13018_v27 }
 0x389   :  { %vm3542_vm5 = vcmp.gt.f32.partialorder %v3344_v32, 0.0  ;;  %v3603_v15 = vmul.f32 %v10926_v4, %v3344_v32  ;;  %v2843_v40 = vsel %vm2794_vm12, %v2778_v51, %v2118_v47  ;;  %v13196_v47 = vld [vmem:[#allocation2 + $0x2e0] sm:$0x3]  ;;  %v9620_v51 = vld [vmem:[#allocation2 + $0x210] sm:$0xff] }
 0x38a   :  { %vm3541_vm15 = vcmp.gt.f32.partialorder %v3339_v50, 0.0  ;;  %v3602_v63 = vmul.f32 %v10926_v4, %v3339_v50  ;;  %2125 = vrot.lane.b32.xlu1 %v13158_v28, %s9688_s14  ;;  %1935 = vrot.lane.b32.xlu0 %v13132_v13, %s9687_s25 }
 0x38b   :  { %v3663_v30 = vsel %vm3542_vm5, %v3344_v32, %v3603_v15  ;;  %vm15837_vm5 = vcmask 1043456  }
 0x38c   :  { %v3735_v19 = vmax.f32 %v15832_v59, %v3663_v30  ;;  %v3662_v5 = vsel %vm3541_vm15, %v3339_v50, %v3602_v63  ;;  %v2310_v31 = vpop.permute.xlu1 %2309  ;;  %v13183_v56 = vpop.permute.xlu0 %2119  ;;  %v9621_v30 = vld [vmem:[#allocation2 + $0x278] sm:$0xff]  ;;  %vm15838_vm15 = vcmask 1044480  }
 0x38d   :  { %v3734_v44 = vmax.f32 %v15833_v26, %v3662_v5  ;;  %v2908_v45 = vsel %vm2859_vm13, %v2843_v40, %v2310_v31  ;;  %v2454_v40 = vsel %vm52_vm0, %v9621_v30, %v12692_v55  ;;  %v15834_v55 = vrot.slane %v13132_v13, 1  ;;  %v15835_v31 = vld [vmem:[#allocation51_spill] sm:$0xff] }
 0x38e   :  { %v3797_v25 = vrot.slane %v3735_v19, 1  ;;  %v3895_v11 = vrot.slane %v3735_v19, 2  ;;  %1345 = vrot.lane.b32.xlu1 %v9619_v61, %s9682_s17  ;;  %1155 = vrot.lane.b32.xlu0 %v776_v12, %s9683_s18  ;;  %v798_v61 = vrot.slane %v13132_v13, 2  ;;  %v639_v12 = vrot.slane %v13196_v47, 1 }
 0x38f   :  { %v3796_v43 = vrot.slane %v3734_v44, 1  ;;  %v3894_v32 = vrot.slane %v3734_v44, 2  ;;  %9369 = vmatprep.mubr.msk.f32.mxu1 %vm2935_vm14, %v2908_v45  ;;  %v797_v45 = vrot.slane %v13102_v35, 2 }
 0x390   :  { %v13192_v62 = vpop.permute.xlu1 %1339  ;;  %v13194_v27 = vpop.permute.xlu0 %973  ;;  %v3861_v57 = vmax.f32 %v3735_v19, %v3797_v25  ;;  %v2519_v19 = vsel %vm2469_vm7, %v2454_v40, %v12773_v46  ;;  %v13230_v5 = vsel %vm495_vm3, %v15834_v55, %v639_v12 }
 0x391   :  { %v3798_v29 = vsel %vm495_vm3, %v3796_v43, %v3797_v25  ;;  %v3896_v26 = vsel %vm656_vm2, %v3894_v32, %v3895_v11  ;;  %v2584_v43 = vsel %vm2534_vm8, %v2519_v19, %v15835_v31  ;;  %v15836_v32 = vld [vmem:[#allocation52_spill] sm:$0xff] }
 0x392   :  { %v3860_v50 = vmax.f32 %v3734_v44, %v3798_v29  ;;  %1553 = vrot.lane.b32.xlu1 %v13158_v28, %s9685_s0  ;;  %1363 = vrot.lane.b32.xlu0 %v13132_v13, %s9682_s17  ;;  %v3959_v25 = vmax.f32 %v3861_v57, %v3895_v11  ;;  %v2445_v44 = vsel %vm52_vm0, %v9620_v51, %v12651_v42 }
 0x393   :  { %v2510_v11 = vsel %vm2469_vm7, %v2445_v44, %v12775_v60  ;;  %v13225_v42 = vsel %vm656_vm2, %v797_v45, %v798_v61  ;;  %v2649_v45 = vsel %vm2599_vm9, %v2584_v43, %v12881_v1 }
 0x394   :  { %v3958_v15 = vmax.f32 %v3860_v50, %v3896_v26  ;;  %v13207_v49 = vpop.permute.xlu1 %1547  ;;  %v13209_v63 = vpop.permute.xlu0 %1529  ;;  %v2575_v57 = vsel %vm2534_vm8, %v2510_v11, %v15836_v32  ;;  %v4092_v12 = vrot.slane %v3959_v25, 4  ;;  %v2714_v44 = vsel %vm15740_vm10, %v2649_v45, %v12994_v48  ;;  %v225_v48 = vld [vmem:[%s15662_s1 + $0x1f8] sm:$0xff] }
 0x395   :  { %v2640_v50 = vsel %vm2599_vm9, %v2575_v57, %v12858_v18  ;;  %v224_v18 = vld [vmem:[%s15662_s1 + $0x1f0] sm:$0xff]  ;;  %290 = vst.msk [vmem:[#allocation2 + $0x339] sm:$0xff] %vm52_vm0, %v225_v48  ;;  %s9706_s1 = smov 96  }
 0x396   :  { %v3994_v59 = vrot.slane %v3958_v15, 1  ;;  %v4022_v35 = vrot.slane %v3958_v15, 2  ;;  %2109 = vrot.lane.b32.xlu1 %v11891_v41, %s9688_s14  ;;  %1919 = vrot.lane.b32.xlu0 %v9621_v30, %s9687_s25  ;;  %v4050_v46 = vrot.slane %v3958_v15, 3  ;;  %v2705_v40 = vsel %vm15740_vm10, %v2640_v50, %v12996_v20  ;;  %289 = vst.msk [vmem:[#allocation2 + $0x331] sm:$0xff] %vm52_vm0, %v224_v18 }
 0x397   :  { %v2770_v1 = vsel %vm2729_vm11, %v2705_v40, %v13108_v39  ;;  %v2779_v20 = vsel %vm2729_vm11, %v2714_v44, %v13118_v33 }
 0x398   :  { %v4177_v29 = vsel %vm4170_vm6, %v3958_v15, %v3994_v59  ;;  %v13237_v60 = vpop.permute.xlu1 %2103  ;;  %v13239_v26 = vpop.permute.xlu0 %1737  ;;  %v4120_v15 = vrot.slane %v3959_v25, 5  ;;  %v2835_v11 = vsel %vm2794_vm12, %v2770_v1, %v13163_v38  ;;  %v2844_v55 = vsel %vm2794_vm12, %v2779_v20, %v13183_v56 }
 0x399   :  { %v4192_v51 = vsel %vm15729_vm1, %v4177_v29, %v4022_v35  ;;  %v4148_v35 = vrot.slane %v3959_v25, 6 }
 0x39a   :  { %v4206_v59 = vsel %vm15728_vm4, %v4192_v51, %v4050_v46  ;;  %2317 = vrot.lane.b32.xlu1 %v13225_v42, %s9690_s2  ;;  %2127 = vrot.lane.b32.xlu0 %v13230_v5, %s9688_s14 }
 0x39b   :  { %v4221_v19 = vsel %vm15837_vm5, %v4206_v59, %v4092_v12 }
 0x39c   :  { %v2312_v31 = vpop.permute.xlu1 %2311  ;;  %v2294_v43 = vpop.permute.xlu0 %2293  ;;  %v4236_v39 = vsel %vm15838_vm15, %v4221_v19, %v4120_v15  ;;  %v15840_v19 = vld [vmem:[#allocation49_spill] sm:$0xff] }
 0x39d   :  { %v2909_v32 = vsel %vm2859_vm13, %v2844_v55, %v2312_v31  ;;  %v2900_v33 = vsel %vm2859_vm13, %v2835_v11, %v2294_v43  ;;  %v4250_v25 = vsel %vm656_vm2, %v4236_v39, %v4148_v35  ;;  %v15841_v55 = vld [vmem:[#allocation21_spill] sm:$0xff]  ;;  %v15842_v39 = vld [vmem:[#allocation50_spill] sm:$0xff] }
 0x39e   :  { %1347 = vrot.lane.b32.xlu1 %v9621_v30, %s9682_s17  ;;  %981 = vrot.lane.b32.xlu0 %v13158_v28, %s9684_s19  ;;  %v4848_v57 = vcombine.high %v4250_v25, %v4250_v25  ;;  %v4855_v38 = vrot.slane %v4250_v25, %v11122_v9  ;;  %v4844_v30 = vcombine.high %v12979_v3, %v12979_v3  ;;  %v800_v28 = vrot.slane %v13196_v47, 2 }
 0x39f   :  { %9357 = vmatprep.mubr.msk.f32.mxu0 %vm2935_vm14, %v2900_v33  ;;  %9370 = vmatmul.mubr.msk.f32.vlgmr.msra.gmra.mrb[0].mxu1 %vm2935_vm14, %v2909_v32 }
 0x3a0   :  { %v13282_v56 = vpop.permute.xlu1 %975  ;;  %v13284_v46 = vpop.permute.xlu0 %957  ;;  %v4863_v29 = vcombine.high %v4855_v38, %v4855_v38  ;;  %v4870_v50 = vrot.slane %v4855_v38, %v11122_v9  ;;  %v4862_v45 = vrot.slane %v4848_v57, %v11122_v9  ;;  %v6852_v48 = vcombine.low %v13064_v14, %v4844_v30 }
 0x3a1   :  { %v801_v31 = vsel %vm656_vm2, %v798_v61, %v800_v28 }
 0x3a2   :  { %1555 = vrot.lane.b32.xlu1 %v13230_v5, %s9685_s0  ;;  %1537 = vrot.lane.b32.xlu0 %v11891_v41, %s9685_s0  ;;  %v4884_v12 = vrot.slane %v4863_v29, %v11122_v9  ;;  %v4885_v51 = vcombine.high %v4870_v50, %v4870_v50  ;;  %v13302_v1 = vrot.slane %v4862_v45, %v11122_v9  ;;  %v9622_v41 = vld [vmem:[#allocation2 + $0x218] sm:$0xff] }
 0x3a3   :  { %v4926_v35 = vcombine.high %v4862_v45, %v4862_v45  ;;  %v2446_v47 = vsel %vm52_vm0, %v9622_v41, %v15840_v19  ;;  %v6860_v61 = vrot.slane %v6852_v48, %v11122_v9 }
 0x3a4   :  { %v13296_v44 = vpop.permute.xlu1 %1531  ;;  %v13298_v40 = vpop.permute.xlu0 %1165  ;;  %v6504_v15 = vcombine.low %v4870_v50, %v4884_v12  ;;  %v9151_v59 = vcombine.high %v4870_v50, %v4884_v12  ;;  %v4886_v18 = vcombine.high %v4884_v12, %v4884_v12  ;;  %15839 = vst [vmem:[#allocation51_spill] sm:$0xff] %v13302_v1  ;;  %v6682_v20 = vcombine.low %v4884_v12, %v4885_v51 }
 0x3a5   :  { %v2511_v32 = vsel %vm2469_vm7, %v2446_v47, %v15842_v39  ;;  %v13319_v38 = vrot.slane %v4926_v35, %v11122_v9  ;;  %v6868_v41 = vcombine.low %v13022_v24, %v6860_v61 }
 0x3a6   :  { %v9344_v11 = vpop.f32.mrb[30].mxu0  ;;  %2111 = vrot.lane.b32.xlu1 %v15841_v55, %s9688_s14  ;;  %1745 = vrot.lane.b32.xlu0 %v13225_v42, %s9686_s22  ;;  %v6512_v43 = vrot.slane %v6504_v15, %v11122_v9  ;;  %v6519_v25 = vrot.slane %v9151_v59, %v11122_v9  ;;  %v6683_v57 = vcombine.low %v4886_v18, %v13302_v1 }
 0x3a7   :  { %v3348_v33 = vpop.f32.mrb[31].mxu0  ;;  %15843 = vst [vmem:[#allocation52_spill] sm:$0xff] %v13319_v38  ;;  %v2576_v29 = vsel %vm2534_vm8, %v2511_v32, %v12860_v36  ;;  %v6690_v28 = vrot.slane %v6682_v20, %v11122_v9  ;;  %v15844_v36 = vld [vmem:[#allocation20_spill] sm:$0xff]  ;;  %v6853_v15 = vcombine.low %v13302_v1, %v13319_v38  ;;  %v6876_v39 = vrot.slane %v6868_v41, %v11122_v9 }
 0x3a8   :  { %v13323_v50 = vpop.permute.xlu1 %1739  ;;  %v13325_v13 = vpop.permute.xlu0 %1721  ;;  %v2641_v30 = vsel %vm2599_vm9, %v2576_v29, %v12962_v0  ;;  %v6520_v45 = vcombine.low %v6512_v43, %v6519_v25  ;;  %v6697_v12 = vrot.slane %v6683_v57, %v11122_v9  ;;  %v15848_v29 = vld [vmem:[#allocation22_spill] sm:$0xff] }
 0x3a9   :  { %v2706_v51 = vsel %vm15740_vm10, %v2641_v30, %v13110_v2  ;;  %v6867_v35 = vrot.slane %v6853_v15, %v11122_v9  ;;  %v13387_v30 = vld [vmem:[#allocation2 + $0x2f0] sm:$0xff] }
 0x3aa   :  { %2319 = vrot.lane.b32.xlu1 %v801_v31, %s9690_s2  ;;  %2301 = vrot.lane.b32.xlu0 %v15844_v36, %s9690_s2  ;;  %v2771_v59 = vsel %vm2729_vm11, %v2706_v51, %v13165_v21  ;;  %v13342_v0 = vrot.slane %v6520_v45, %v11122_v9  ;;  %v6698_v18 = vcombine.low %v6690_v28, %v6697_v12  ;;  %v642_v28 = vrot.slane %v13387_v30, 1 }
 0x3ab   :  { %v2836_v48 = vsel %vm2794_vm12, %v2771_v59, %v13237_v60  ;;  %v6869_v60 = vcombine.low %v6519_v25, %v6867_v35 }
 0x3ac   :  { %15845 = vst [vmem:[#allocation49_spill] sm:$0xff] %v13342_v0  ;;  %v2296_v20 = vpop.permute.xlu1 %2295  ;;  %v1930_v2 = vpop.permute.xlu0 %1929  ;;  %v6705_v21 = vrot.slane %v6698_v18, %v11122_v9  ;;  %v386_v18 = vld [vmem:[#allocation2 + $0x2f8] sm:$0x3] }
 0x3ad   :  { %v2901_v19 = vsel %vm2859_vm13, %v2836_v48, %v2296_v20  ;;  %v6883_v32 = vrot.slane %v6869_v60, %v11122_v9  ;;  %v15849_v48 = vld [vmem:[#allocation53_spill] sm:$0xff] }
 0x3ae   :  { %1173 = vrot.lane.b32.xlu1 %v13225_v42, %s9683_s18  ;;  %983 = vrot.lane.b32.xlu0 %v13230_v5, %s9684_s19  ;;  %v13358_v11 = vcombine.low %v13106_v53, %v6705_v21  ;;  %v384_v5 = vld [vmem:[#allocation2 + $0x2e8] sm:$0xff]  ;;  %v644_v21 = vrot.slane %v386_v18, 1 }
 0x3af   :  { %9358 = vmatmul.mubr.msk.f32.gmra.mrb[40].mxu0 %vm2935_vm14, %v2901_v19  ;;  %v13370_v42 = vcombine.low %v6876_v39, %v6883_v32  ;;  %v641_v45 = vrot.slane %v384_v5, 1 }
 0x3b0   :  { %15846 = vst [vmem:[#allocation21_spill] sm:$0xff] %v13358_v11  ;;  %v13360_v24 = vpop.permute.xlu1 %1149  ;;  %v13362_v43 = vpop.permute.xlu0 %959 }
 0x3b1   :  { %15847 = vst [vmem:[#allocation50_spill] sm:$0xff] %v13370_v42 }
 0x3b2   :  { %1729 = vrot.lane.b32.xlu1 %v15844_v36, %s9686_s22  ;;  %1539 = vrot.lane.b32.xlu0 %v15841_v55, %s9685_s0  ;;  %v643_v36 = vsel %vm495_vm3, %v641_v45, %v642_v28 }
 0x3b4   :  { %v13372_v33 = vpop.permute.xlu1 %1357  ;;  %v13374_v53 = vpop.permute.xlu0 %1167 }
 0x3b6   :  { %1937 = vrot.lane.b32.xlu1 %v384_v5, %s9687_s25  ;;  %1747 = vrot.lane.b32.xlu0 %v801_v31, %s9686_s22 }
 0x3b8   :  { %v13378_v25 = vpop.permute.xlu1 %1913  ;;  %v13380_v57 = vpop.permute.xlu0 %1723 }
 0x3ba   :  { %1175 = vrot.lane.b32.xlu1 %v801_v31, %s9683_s18  ;;  %2303 = vrot.lane.b32.xlu0 %v15848_v29, %s9690_s2  ;;  %v9623_v31 = vld [vmem:[#allocation2 + $0x288] sm:$0xff] }
 0x3bb   :  { %v2455_v20 = vsel %vm52_vm0, %v9623_v31, %v15849_v48  ;;  %v645_v48 = vsel %vm495_vm3, %v642_v28, %v644_v21  ;;  %v9625_v21 = vld [vmem:[#allocation2 + $0x228] sm:$0xff] }
 0x3bc   :  { %v2122_v55 = vpop.permute.xlu1 %2121  ;;  %v13385_v61 = vpop.permute.xlu0 %1931  ;;  %v2520_v41 = vsel %vm2469_vm7, %v2455_v20, %v12964_v10  ;;  %v802_v20 = vrot.slane %v384_v5, 2 }
 0x3bd   :  { %v2585_v60 = vsel %vm2534_vm8, %v2520_v41, %v13090_v8  ;;  %v803_v8 = vrot.slane %v13387_v30, 2 }
 0x3be   :  { %1731 = vrot.lane.b32.xlu1 %v15848_v29, %s9686_s22  ;;  %1365 = vrot.lane.b32.xlu0 %v384_v5, %s9682_s17  ;;  %v2650_v29 = vsel %vm2599_vm9, %v2585_v60, %v13143_v22 }
 0x3bf   :  { %v2715_v45 = vsel %vm15740_vm10, %v2650_v29, %v13239_v26  ;;  %v15850_v26 = vld [vmem:[#allocation23_spill] sm:$0xff] }
 0x3c0   :  { %v13393_v12 = vpop.permute.xlu1 %1341  ;;  %v13395_v51 = vpop.permute.xlu0 %1151  ;;  %v2780_v10 = vsel %vm2729_vm11, %v2715_v45, %v1930_v2  ;;  %v804_v2 = vsel %vm656_vm2, %v802_v20, %v803_v8  ;;  %v15852_v29 = vld [vmem:[#allocation55_spill] sm:$0xff]  ;;  %v805_v20 = vrot.slane %v386_v18, 2 }
 0x3c1   :  { %v2845_v41 = vsel %vm2794_vm12, %v2780_v10, %v2122_v55  ;;  %v2447_v45 = vsel %vm52_vm0, %v9625_v21, %v15852_v29 }
 0x3c2   :  { %1939 = vrot.lane.b32.xlu1 %v13387_v30, %s9687_s25  ;;  %1921 = vrot.lane.b32.xlu0 %v9623_v31, %s9687_s25  ;;  %v9624_v31 = vld [vmem:[#allocation2 + $0x290] sm:$0xff] }
 0x3c4   :  { %v13401_v15 = vpop.permute.xlu1 %1549  ;;  %v13403_v59 = vpop.permute.xlu0 %1359 }
 0x3c6   :  { %v13407_v35 = vpop.f32.mrb[32].mxu0  ;;  %1367 = vrot.lane.b32.xlu1 %v13387_v30, %s9682_s17  ;;  %2129 = vrot.lane.b32.xlu0 %v643_v36, %s9688_s14  ;;  %v15851_v30 = vld [vmem:[#allocation54_spill] sm:$0xff] }
 0x3c7   :  { %v13414_v19 = vpop.f32.mrb[33].mxu0  ;;  %v2456_v28 = vsel %vm52_vm0, %v9624_v31, %v15851_v30 }
 0x3c8   :  { %v2106_v39 = vpop.permute.xlu1 %2105  ;;  %v13418_v32 = vpop.permute.xlu0 %1915  ;;  %v2521_v10 = vsel %vm2469_vm7, %v2456_v28, %v13092_v52 }
 0x3ca   :  { %1923 = vrot.lane.b32.xlu1 %v9624_v31, %s9687_s25  ;;  %1557 = vrot.lane.b32.xlu0 %v643_v36, %s9685_s0  ;;  %v2586_v31 = vsel %vm2534_vm8, %v2521_v10, %v13145_v6  ;;  %v15854_v6 = vld [vmem:[#allocation25_spill] sm:$0xff] }
 0x3cb   :  { %v2651_v30 = vsel %vm2599_vm9, %v2586_v31, %v13207_v49 }
 0x3cc   :  { %v2314_v47 = vpop.permute.xlu1 %2313  ;;  %v2124_v38 = vpop.permute.xlu0 %2123  ;;  %v2716_v52 = vsel %vm15740_vm10, %v2651_v30, %v13323_v50 }
 0x3cd   :  { %v2910_v22 = vsel %vm2859_vm13, %v2845_v41, %v2314_v47  ;;  %v2781_v49 = vsel %vm2729_vm11, %v2716_v52, %v13385_v61 }
 0x3ce   :  { %2131 = vrot.lane.b32.xlu1 %v645_v48, %s9688_s14  ;;  %2113 = vrot.lane.b32.xlu0 %v15850_v26, %s9688_s14  ;;  %v2846_v50 = vsel %vm2794_vm12, %v2781_v49, %v2124_v38  ;;  %v13498_v38 = vld [vmem:[%s15664_s3] ss:$0 sm:$0xff] }
 0x3cf   :  { %9372 = vmatprep.mubr.msk.f32.mxu1 %vm2935_vm14, %v2910_v22 }
 0x3d0   :  { %v13436_v60 = vpop.permute.xlu1 %1343  ;;  %v13438_v5 = vpop.permute.xlu0 %977 }
 0x3d2   :  { %985 = vrot.lane.b32.xlu1 %v643_v36, %s9684_s19  ;;  %2321 = vrot.lane.b32.xlu0 %v804_v2, %s9690_s2  ;;  %v2512_v36 = vsel %vm2469_vm7, %v2447_v45, %v13068_v17 }
 0x3d3   :  { %v2577_v41 = vsel %vm2534_vm8, %v2512_v36, %v13128_v37  ;;  %v15853_v37 = vld [vmem:[#allocation24_spill] sm:$0xff] }
 0x3d4   :  { %v13442_v55 = vpop.permute.xlu1 %1551  ;;  %v13444_v47 = vpop.permute.xlu0 %1533  ;;  %v2642_v17 = vsel %vm2599_vm9, %v2577_v41, %v13209_v63  ;;  %v806_v63 = vsel %vm656_vm2, %v803_v8, %v805_v20  ;;  %v3357_v8 = vadd.f32 %v13498_v38, %v13414_v19  ;;  %v13510_v41 = vld [vmem:[#allocation2 + $0x308] sm:$0xff] }
 0x3d5   :  { %v2707_v18 = vsel %vm15740_vm10, %v2642_v17, %v13325_v13  ;;  %15856 = vst [vmem:[#allocation22_spill] sm:$0xff] %v13510_v41  ;;  %v15857_v17 = vld [vmem:[#allocation33_spill] sm:$0xff] }
 0x3d6   :  { %1749 = vrot.lane.b32.xlu1 %v804_v2, %s9686_s22  ;;  %1559 = vrot.lane.b32.xlu0 %v645_v48, %s9685_s0  ;;  %v2772_v28 = vsel %vm2729_vm11, %v2707_v18, %v13378_v25  ;;  %vm3543_vm15 = vcmp.gt.f32.partialorder %v3357_v8, 0.0 }
 0x3d7   :  { %v2837_v21 = vsel %vm2794_vm12, %v2772_v28, %v2106_v39  ;;  %v3362_v39 = vadd.f32 %v13498_v38, %v13407_v35  ;;  %v3604_v28 = vmul.f32 %v10926_v4, %v3357_v8 }
 0x3d8   :  { %v13460_v22 = vpop.permute.xlu1 %2107  ;;  %v13462_v26 = vpop.permute.xlu0 %1741 }
 0x3d9   :  { %v3605_v52 = vmul.f32 %v10926_v4, %v3362_v39  ;;  %vm3544_vm5 = vcmp.gt.f32.partialorder %v3362_v39, 0.0 }
 0x3da   :  { %2305 = vrot.lane.b32.xlu1 %v15853_v37, %s9690_s2  ;;  %2115 = vrot.lane.b32.xlu0 %v15854_v6, %s9688_s14  ;;  %v647_v6 = vrot.slane %v13510_v41, 1 }
 0x3dc   :  { %v2316_v29 = vpop.permute.xlu1 %2315  ;;  %v2298_v13 = vpop.permute.xlu0 %2297 }
 0x3dd   :  { %v2911_v45 = vsel %vm2859_vm13, %v2846_v50, %v2316_v29  ;;  %v2902_v36 = vsel %vm2859_vm13, %v2837_v21, %v2298_v13 }
 0x3de   :  { %987 = vrot.lane.b32.xlu1 %v645_v48, %s9684_s19  ;;  %2323 = vrot.lane.b32.xlu0 %v806_v63, %s9690_s2  ;;  %v13502_v48 = vld [vmem:[#allocation2 + $0x300] sm:$0xff] }
 0x3df   :  { %9360 = vmatprep.mubr.msk.f32.mxu0 %vm2935_vm14, %v2902_v36  ;;  %9373 = vmatmul.mubr.msk.f32.gmra.mrb[2].mxu1 %vm2935_vm14, %v2911_v45  ;;  %15855 = vst [vmem:[#allocation20_spill] sm:$0xff] %v13502_v48  ;;  %v646_v35 = vrot.slane %v13502_v48, 1  ;;  %v13541_v45 = vsel %vm3544_vm5, %v3362_v39, %v3605_v52  ;;  %vm15862_vm5 = vcmask 1041408  }
 0x3e0   :  { %v13489_v25 = vpop.permute.xlu1 %979  ;;  %v13491_v61 = vpop.permute.xlu0 %961 }
 0x3e2   :  { %1751 = vrot.lane.b32.xlu1 %v806_v63, %s9686_s22  ;;  %1177 = vrot.lane.b32.xlu0 %v804_v2, %s9683_s18  ;;  %v9627_v2 = vld [vmem:[#allocation2 + $0x230] sm:$0xff] }
 0x3e3   :  { %v2448_v31 = vsel %vm52_vm0, %v9627_v2, %v13070_v58  ;;  %v648_v2 = vsel %vm495_vm3, %v646_v35, %v647_v6 }
 0x3e4   :  { %v13506_v10 = vpop.permute.xlu1 %1535  ;;  %v13508_v20 = vpop.permute.xlu0 %1169  ;;  %v2513_v19 = vsel %vm2469_vm7, %v2448_v31, %v13130_v7  ;;  %v13548_v31 = vsel %vm3543_vm15, %v3357_v8, %v3604_v28  ;;  %v808_v8 = vrot.slane %v13510_v41, 2  ;;  %vm15863_vm15 = vcmask 1042432  }
 0x3e5   :  { %v2578_v58 = vsel %vm2534_vm8, %v2513_v19, %v13192_v62  ;;  %v389_v19 = vld [vmem:[#allocation2 + $0x310] sm:$0x3] }
 0x3e6   :  { %v9350_v30 = vpop.f32.mrb[34].mxu0  ;;  %2307 = vrot.lane.b32.xlu1 %v15857_v17, %s9690_s2  ;;  %1941 = vrot.lane.b32.xlu0 %v13502_v48, %s9687_s25  ;;  %v2643_v7 = vsel %vm2599_vm9, %v2578_v58, %v13296_v44  ;;  %v649_v35 = vrot.slane %v389_v19, 1 }
 0x3e7   :  { %v3372_v18 = vadd.f32 %v13498_v38, %v9350_v30  ;;  %v3366_v37 = vpop.f32.mrb[35].mxu0  ;;  %v2708_v13 = vsel %vm15740_vm10, %v2643_v7, %v13380_v57 }
 0x3e8   :  { %v3367_v49 = vadd.f32 %v13498_v38, %v3366_v37  ;;  %v13528_v21 = vpop.permute.xlu1 %1743  ;;  %v13530_v50 = vpop.permute.xlu0 %1725  ;;  %v2773_v44 = vsel %vm2729_vm11, %v2708_v13, %v13418_v32  ;;  %v650_v28 = vsel %vm495_vm3, %v647_v6, %v649_v35  ;;  %v9628_v35 = vld [vmem:[#allocation2 + $0x2a0] sm:$0xff] }
 0x3e9   :  { %vm3546_vm4 = vcmp.gt.f32.partialorder %v3372_v18, 0.0  ;;  %v3607_v29 = vmul.f32 %v10926_v4, %v3372_v18  ;;  %v2838_v57 = vsel %vm2794_vm12, %v2773_v44, %v13460_v22  ;;  %v807_v22 = vrot.slane %v13502_v48, 2 }
 0x3ea   :  { %vm3545_vm1 = vcmp.gt.f32.partialorder %v3367_v49, 0.0  ;;  %v3606_v62 = vmul.f32 %v10926_v4, %v3367_v49  ;;  %1369 = vrot.lane.b32.xlu1 %v13502_v48, %s9682_s17  ;;  %1179 = vrot.lane.b32.xlu0 %v806_v63, %s9683_s18  ;;  %v392_v48 = vld [vmem:[#allocation2 + $0x328] sm:$0x3] }
 0x3eb   :  { %v13545_v36 = vsel %vm3546_vm4, %v3372_v18, %v3607_v29  ;;  %v809_v58 = vsel %vm656_vm2, %v807_v22, %v808_v8  ;;  %v810_v29 = vrot.slane %v389_v19, 2 }
 0x3ec   :  { %v13554_v17 = vsel %vm3545_vm1, %v3367_v49, %v3606_v62  ;;  %v2300_v63 = vpop.permute.xlu1 %2299  ;;  %v1934_v39 = vpop.permute.xlu0 %1933 }
 0x3ed   :  { %v2903_v52 = vsel %vm2859_vm13, %v2838_v57, %v2300_v63  ;;  %v811_v44 = vsel %vm656_vm2, %v808_v8, %v810_v29  ;;  %v13603_v8 = vld [vmem:[#allocation2 + $0x320] sm:$0xff]  ;;  %v2457_v29 = vsel %vm52_vm0, %v9628_v35, %v13194_v27 }
 0x3ee   :  { %2133 = vrot.lane.b32.xlu1 %v648_v2, %s9688_s14  ;;  %1943 = vrot.lane.b32.xlu0 %v13510_v41, %s9687_s25  ;;  %15859 = vst [vmem:[#allocation23_spill] sm:$0xff] %v13603_v8  ;;  %v652_v32 = vrot.slane %v13603_v8, 1 }
 0x3ef   :  { %9361 = vmatmul.mubr.msk.f32.gmra.mrb[42].mxu0 %vm2935_vm14, %v2903_v52  ;;  %v13597_v52 = vld [vmem:[#allocation2 + $0x318] sm:$0xff] }
 0x3f0   :  { %v13565_v18 = vpop.permute.xlu1 %1153  ;;  %v13567_v37 = vpop.permute.xlu0 %963  ;;  %15858 = vst [vmem:[#allocation53_spill] sm:$0xff] %v13597_v52 }
 0x3f2   :  { %1561 = vrot.lane.b32.xlu1 %v648_v2, %s9685_s0  ;;  %1371 = vrot.lane.b32.xlu0 %v13510_v41, %s9682_s17 }
 0x3f4   :  { %v13574_v49 = vpop.permute.xlu1 %1361  ;;  %v13576_v7 = vpop.permute.xlu0 %1171 }
 0x3f6   :  { %2325 = vrot.lane.b32.xlu1 %v809_v58, %s9690_s2  ;;  %2135 = vrot.lane.b32.xlu0 %v650_v28, %s9688_s14 }
 0x3f8   :  { %v13580_v13 = vpop.permute.xlu1 %1917  ;;  %v13582_v62 = vpop.permute.xlu0 %1727 }
 0x3fa   :  { %1563 = vrot.lane.b32.xlu1 %v650_v28, %s9685_s0  ;;  %989 = vrot.lane.b32.xlu0 %v648_v2, %s9684_s19 }
 0x3fc   :  { %v2126_v6 = vpop.permute.xlu1 %2125  ;;  %v13587_v57 = vpop.permute.xlu0 %1935 }
 0x3fe   :  { %2327 = vrot.lane.b32.xlu1 %v811_v44, %s9690_s2  ;;  %1753 = vrot.lane.b32.xlu0 %v809_v58, %s9686_s22 }
 0x400   :  { %v13591_v63 = vpop.permute.xlu1 %1345  ;;  %v13593_v19 = vpop.permute.xlu0 %1155 }
 0x402   :  { %1181 = vrot.lane.b32.xlu1 %v809_v58, %s9683_s18  ;;  %991 = vrot.lane.b32.xlu0 %v650_v28, %s9684_s19  ;;  %v2522_v58 = vsel %vm2469_vm7, %v2457_v29, %v13298_v40  ;;  %v651_v28 = vrot.slane %v13597_v52, 1 }
 0x403   :  { %v2587_v30 = vsel %vm2534_vm8, %v2522_v58, %v13372_v33 }
 0x404   :  { %v13599_v2 = vpop.permute.xlu1 %1553  ;;  %v13601_v22 = vpop.permute.xlu0 %1363  ;;  %v2652_v27 = vsel %vm2599_vm9, %v2587_v30, %v13401_v15  ;;  %v13629_v29 = vsel %vm495_vm3, %v651_v28, %v652_v32  ;;  %v654_v28 = vrot.slane %v392_v48, 1 }
 0x405   :  { %v2717_v35 = vsel %vm15740_vm10, %v2652_v27, %v13462_v26 }
 0x406   :  { %1945 = vrot.lane.b32.xlu1 %v13597_v52, %s9687_s25  ;;  %1755 = vrot.lane.b32.xlu0 %v811_v44, %s9686_s22  ;;  %v2782_v40 = vsel %vm2729_vm11, %v2717_v35, %v1934_v39 }
 0x407   :  { %v2847_v33 = vsel %vm2794_vm12, %v2782_v40, %v2126_v6  ;;  %v813_v6 = vrot.slane %v13603_v8, 2 }
 0x408   :  { %v13616_v1 = vpop.permute.xlu1 %2109  ;;  %v13618_v14 = vpop.permute.xlu0 %1919 }
 0x40a   :  { %1373 = vrot.lane.b32.xlu1 %v13597_v52, %s9682_s17  ;;  %1183 = vrot.lane.b32.xlu0 %v811_v44, %s9683_s18  ;;  %v812_v44 = vrot.slane %v13597_v52, 2  ;;  %v15860_v52 = vmax.f32 %v13541_v45, %v13545_v36 }
 0x40c   :  { %v2318_v58 = vpop.permute.xlu1 %2317  ;;  %v13632_v3 = vpop.permute.xlu0 %2127 }
 0x40d   :  { %v2912_v15 = vsel %vm2859_vm13, %v2847_v33, %v2318_v58 }
 0x40e   :  { %v9353_v30 = vpop.f32.mrb[36].mxu0  ;;  %2137 = vrot.lane.b32.xlu1 %v13629_v29, %s9688_s14  ;;  %1947 = vrot.lane.b32.xlu0 %v13603_v8, %s9687_s25 }
 0x40f   :  { %v3382_v26 = vadd.f32 %v13498_v38, %v9353_v30  ;;  %v3376_v39 = vpop.f32.mrb[37].mxu0  ;;  %9375 = vmatprep.mubr.msk.f32.mxu1 %vm2935_vm14, %v2912_v15  ;;  %v13657_v30 = vsel %vm656_vm2, %v812_v44, %v813_v6 }
 0x410   :  { %v3377_v27 = vadd.f32 %v13498_v38, %v3376_v39  ;;  %v13644_v35 = vpop.permute.xlu1 %1347  ;;  %v13646_v40 = vpop.permute.xlu0 %981  ;;  %v13660_v39 = vsel %vm495_vm3, %v652_v32, %v654_v28  ;;  %v15861_v32 = vmax.f32 %v13548_v31, %v13554_v17  ;;  %v815_v28 = vrot.slane %v392_v48, 2 }
 0x411   :  { %vm3548_vm4 = vcmp.gt.f32.partialorder %v3382_v26, 0.0  ;;  %v3609_v33 = vmul.f32 %v10926_v4, %v3382_v26 }
 0x412   :  { %vm3547_vm1 = vcmp.gt.f32.partialorder %v3377_v27, 0.0  ;;  %v3608_v58 = vmul.f32 %v10926_v4, %v3377_v27  ;;  %1565 = vrot.lane.b32.xlu1 %v13629_v29, %s9685_s0  ;;  %1375 = vrot.lane.b32.xlu0 %v13603_v8, %s9682_s17  ;;  %v9629_v8 = vld [vmem:[#allocation2 + $0x2a8] sm:$0xff] }
 0x413   :  { %v13654_v15 = vsel %vm3548_vm4, %v3382_v26, %v3609_v33  ;;  %v2458_v26 = vsel %vm52_vm0, %v9629_v8, %v13282_v56  ;;  %v9630_v33 = vld [vmem:[#allocation2 + $0x240] sm:$0xff]  ;;  %vm15864_vm4 = vcmask 1043456  }
 0x414   :  { %v3737_v41 = vmax.f32 %v15860_v52, %v13654_v15  ;;  %v13666_v42 = vsel %vm3547_vm1, %v3377_v27, %v3608_v58  ;;  %v13668_v11 = vpop.permute.xlu1 %1555  ;;  %v13670_v0 = vpop.permute.xlu0 %1537  ;;  %v2449_v45 = vsel %vm52_vm0, %v9630_v33, %v13284_v46  ;;  %v2523_v36 = vsel %vm2469_vm7, %v2458_v26, %v13374_v53 }
 0x415   :  { %v3736_v44 = vmax.f32 %v15861_v32, %v13666_v42  ;;  %v2514_v56 = vsel %vm2469_vm7, %v2449_v45, %v13360_v24  ;;  %v2588_v48 = vsel %vm2534_vm8, %v2523_v36, %v13403_v59  ;;  %v395_v36 = vld [vmem:[#allocation2 + $0x340] sm:$0x3]  ;;  %vm15865_vm1 = vcmask 1044480  }
 0x416   :  { %v3800_v52 = vrot.slane %v3737_v41, 1  ;;  %v3898_v27 = vrot.slane %v3737_v41, 2  ;;  %2329 = vrot.lane.b32.xlu1 %v13657_v30, %s9690_s2  ;;  %2139 = vrot.lane.b32.xlu0 %v13660_v39, %s9688_s14  ;;  %v2579_v46 = vsel %vm2534_vm8, %v2514_v56, %v13393_v12  ;;  %v2653_v53 = vsel %vm2599_vm9, %v2588_v48, %v13442_v55 }
 0x417   :  { %v3799_v31 = vrot.slane %v3736_v44, 1  ;;  %v3897_v17 = vrot.slane %v3736_v44, 2  ;;  %v2644_v26 = vsel %vm2599_vm9, %v2579_v46, %v13444_v47  ;;  %v2718_v33 = vsel %vm15740_vm10, %v2653_v53, %v13528_v21  ;;  %v13717_v21 = vld [vmem:[#allocation2 + $0x338] sm:$0xff] }
 0x418   :  { %v13694_v8 = vpop.permute.xlu1 %2111  ;;  %v13696_v58 = vpop.permute.xlu0 %1745  ;;  %v3863_v32 = vmax.f32 %v3737_v41, %v3800_v52  ;;  %v2709_v12 = vsel %vm15740_vm10, %v2644_v26, %v13530_v50  ;;  %v2783_v47 = vsel %vm2729_vm11, %v2718_v33, %v13587_v57  ;;  %v13715_v41 = vsel %vm656_vm2, %v813_v6, %v815_v28 }
 0x419   :  { %v3801_v24 = vsel %vm495_vm3, %v3799_v31, %v3800_v52  ;;  %v3899_v59 = vsel %vm656_vm2, %v3897_v17, %v3898_v27  ;;  %v2774_v55 = vsel %vm2729_vm11, %v2709_v12, %v13580_v13  ;;  %v13723_v31 = vld [vmem:[#allocation2 + $0x330] sm:$0xff]  ;;  %v839_v33 = vrot.slane %v13717_v21, 2 }
 0x41a   :  { %v3862_v45 = vmax.f32 %v3736_v44, %v3801_v24  ;;  %1757 = vrot.lane.b32.xlu1 %v13657_v30, %s9686_s22  ;;  %1567 = vrot.lane.b32.xlu0 %v13660_v39, %s9685_s0  ;;  %v2839_v50 = vsel %vm2794_vm12, %v2774_v55, %v13616_v1  ;;  %v2848_v44 = vsel %vm2794_vm12, %v2783_v47, %v13632_v3  ;;  %v829_v3 = vrot.slane %v13717_v21, 1 }
 0x41b   :  { %v3961_v13 = vmax.f32 %v3863_v32, %v3898_v27  ;;  %v831_v1 = vrot.slane %v395_v36, 1  ;;  %v828_v27 = vrot.slane %v13723_v31, 1  ;;  %v838_v55 = vrot.slane %v13723_v31, 2 }
 0x41c   :  { %v3960_v52 = vmax.f32 %v3862_v45, %v3899_v59  ;;  %v2320_v56 = vpop.permute.xlu1 %2319  ;;  %v2302_v48 = vpop.permute.xlu0 %2301 }
 0x41d   :  { %v2913_v57 = vsel %vm2859_vm13, %v2848_v44, %v2320_v56  ;;  %v2904_v6 = vsel %vm2859_vm13, %v2839_v50, %v2302_v48  ;;  %v4093_v24 = vrot.slane %v3961_v13, 4  ;;  %v4121_v12 = vrot.slane %v3961_v13, 5 }
 0x41e   :  { %v3995_v28 = vrot.slane %v3960_v52, 1  ;;  %v4023_v17 = vrot.slane %v3960_v52, 2  ;;  %1759 = vrot.lane.b32.xlu1 %v13715_v41, %s9686_s22  ;;  %2331 = vrot.lane.b32.xlu0 %v13715_v41, %s9690_s2  ;;  %v4051_v46 = vrot.slane %v3960_v52, 3  ;;  %v832_v47 = vsel %vm495_vm3, %v829_v3, %v831_v1 }
 0x41f   :  { %9363 = vmatprep.mubr.msk.f32.mxu0 %vm2935_vm14, %v2904_v6  ;;  %9376 = vmatmul.mubr.msk.f32.gmra.mrb[4].mxu1 %vm2935_vm14, %v2913_v57  ;;  %v4149_v50 = vrot.slane %v3961_v13, 6  ;;  %v841_v56 = vrot.slane %v395_v36, 2  ;;  %v840_v1 = vsel %vm656_vm2, %v838_v55, %v839_v33 }
 0x420   :  { %v4178_v53 = vsel %vm4170_vm6, %v3960_v52, %v3995_v28  ;;  %v13736_v26 = vpop.permute.xlu1 %1173  ;;  %v13738_v32 = vpop.permute.xlu0 %983  ;;  %v830_v52 = vsel %vm495_vm3, %v828_v27, %v829_v3 }
 0x421   :  { %v4193_v59 = vsel %vm15862_vm5, %v4178_v53, %v4023_v17  ;;  %v9631_v17 = vld [vmem:[#allocation2 + $0x248] sm:$0xff]  ;;  %v842_v3 = vsel %vm656_vm2, %v839_v33, %v841_v56 }
 0x422   :  { %v4207_v45 = vsel %vm15863_vm15, %v4193_v59, %v4051_v46  ;;  %1951 = vrot.lane.b32.xlu1 %v13717_v21, %s9687_s25  ;;  %1949 = vrot.lane.b32.xlu0 %v13723_v31, %s9687_s25  ;;  %v2450_v46 = vsel %vm52_vm0, %v9631_v17, %v13362_v43  ;;  %v15867_v17 = vld [vmem:[#allocation40_spill] sm:$0xff] }
 0x423   :  { %v4222_v44 = vsel %vm15864_vm4, %v4207_v45, %v4093_v24  ;;  %v2515_v13 = vsel %vm2469_vm7, %v2450_v46, %v13395_v51  ;;  %vm15884_vm4 = vmmov 1  }
 0x424   :  { %v13751_v48 = vpop.permute.xlu1 %1729  ;;  %v13753_v57 = vpop.permute.xlu0 %1539  ;;  %v4237_v6 = vsel %vm15865_vm1, %v4222_v44, %v4121_v12  ;;  %v2580_v27 = vsel %vm2534_vm8, %v2515_v13, %v13436_v60  ;;  %vm15885_vm1 = vcmask 1041408  }
 0x425   :  { %v13757_v28 = vsel %vm656_vm2, %v4237_v6, %v4149_v50  ;;  %v2645_v12 = vsel %vm2599_vm9, %v2580_v27, %v13506_v10 }
 0x426   :  { %2143 = vrot.lane.b32.xlu1 %v832_v47, %s9688_s14  ;;  %2141 = vrot.lane.b32.xlu0 %v830_v52, %s9688_s14  ;;  %v4470_v36 = vrot.slane %v13757_v28, %v11122_v9  ;;  %v2710_v51 = vsel %vm15740_vm10, %v2645_v12, %v13582_v62  ;;  %v15866_v62 = vld [vmem:[#allocation42_spill] sm:$0xff] }
 0x427   :  { %v2775_v33 = vsel %vm2729_vm11, %v2710_v51, %v13618_v14 }
 0x428   :  { %v13771_v53 = vpop.permute.xlu1 %1937  ;;  %v13773_v43 = vpop.permute.xlu0 %1747  ;;  %v4478_v24 = vcombine.high %v4470_v36, %v4470_v36  ;;  %v13776_v59 = vrot.slane %v4470_v36, %v11122_v9  ;;  %v2840_v55 = vsel %vm2794_vm12, %v2775_v33, %v13694_v8 }
 0x42a   :  { %2335 = vrot.lane.b32.xlu1 %v842_v3, %s9690_s2  ;;  %2333 = vrot.lane.b32.xlu0 %v840_v1, %s9690_s2  ;;  %v13785_v60 = vrot.slane %v4478_v24, %v11122_v9  ;;  %v4500_v45 = vcombine.high %v13776_v59, %v13776_v59  ;;  %v5091_v46 = vcombine.low %v15867_v17, %v13776_v59 }
 0x42c   :  { %v13793_v10 = vpop.permute.xlu1 %1175  ;;  %v2304_v50 = vpop.permute.xlu0 %2303  ;;  %v5407_v44 = vcombine.low %v15866_v62, %v13785_v60  ;;  %v9136_v56 = vcombine.high %v13776_v59, %v13785_v60  ;;  %v5092_v36 = vcombine.low %v13785_v60, %v4500_v45  ;;  %v13846_v62 = vld [vmem:[#allocation2 + $0x350] sm:$0xff] }
 0x42d   :  { %v2905_v6 = vsel %vm2859_vm13, %v2840_v55, %v2304_v50  ;;  %v13844_v50 = vld [vmem:[#allocation2 + $0x348] sm:$0xff] }
 0x42e   :  { %995 = vrot.lane.b32.xlu1 %v13660_v39, %s9684_s19  ;;  %993 = vrot.lane.b32.xlu0 %v13629_v29, %s9684_s19  ;;  %v13805_v14 = vrot.slane %v5407_v44, %v11122_v9  ;;  %v13808_v8 = vrot.slane %v9136_v56, %v11122_v9  ;;  %v5101_v39 = vrot.slane %v5091_v46, %v11122_v9  ;;  %v9632_v44 = vld [vmem:[#allocation2 + $0x2b8] sm:$0xff]  ;;  %v9692_v56 = vmov 0.0|0.0   ;;  %s9696_s19 = smov 40  }
 0x42f   :  { %9364 = vmatmul.mubr.msk.f32.gmra.mrb[44].mxu0 %vm2935_vm14, %v2905_v6  ;;  %v5108_v24 = vrot.slane %v5092_v36, %v11122_v9  ;;  %9465 = vmatprep.subr.bf16.mxu1 %v9692_v56  ;;  %v854_v46 = vrot.slane %v13844_v50, 1  ;;  %v855_v36 = vrot.slane %v13846_v62, 1 }
 0x430   :  { %v13814_v13 = vpop.permute.xlu1 %1731  ;;  %v13816_v27 = vpop.permute.xlu0 %1365 }
 0x431   :  { %v13830_v33 = vcombine.low %v5101_v39, %v5108_v24  ;;  %v13869_v24 = vld [vmem:[#allocation2 + $0x358] sm:$0x3] }
 0x432   :  { %1187 = vrot.lane.b32.xlu1 %v13715_v41, %s9683_s18  ;;  %1185 = vrot.lane.b32.xlu0 %v13657_v30, %s9683_s18 }
 0x434   :  { %v13826_v12 = vpop.permute.xlu1 %1939  ;;  %v13828_v51 = vpop.permute.xlu0 %1921 }
 0x436   :  { %1379 = vrot.lane.b32.xlu1 %v13717_v21, %s9682_s17  ;;  %1377 = vrot.lane.b32.xlu0 %v13723_v31, %s9682_s17  ;;  %v2459_v21 = vsel %vm52_vm0, %v9632_v44, %v13438_v5  ;;  %v7052_v31 = vld [vmem:[%s15665_s4] sm:$0xff] }
 0x438   :  { %v13836_v41 = vpop.permute.xlu1 %1367  ;;  %v2130_v45 = vpop.permute.xlu0 %2129 }
 0x43a   :  { %1571 = vrot.lane.b32.xlu1 %v832_v47, %s9685_s0  ;;  %1569 = vrot.lane.b32.xlu0 %v830_v52, %s9685_s0  ;;  %v7053_v47 = vld [vmem:[%s15665_s4 + $0x8] sm:$0xff]  ;;  %v2524_v52 = vsel %vm2469_vm7, %v2459_v21, %v13508_v20 }
 0x43b   :  { %v9466_v6 = vpack.c.bf16 %v7053_v47, %v7052_v31  ;;  %v2589_v5 = vsel %vm2534_vm8, %v2524_v52, %v13574_v49  ;;  %v15868_v49 = vld [vmem:[#allocation9_spill] sm:$0xff] }
 0x43c   :  { %v13840_v30 = vpop.permute.xlu1 %1923  ;;  %v13842_v55 = vpop.permute.xlu0 %1557  ;;  %v2654_v39 = vsel %vm2599_vm9, %v2589_v5, %v13599_v2  ;;  %v856_v5 = vsel %vm495_vm3, %v854_v46, %v855_v36 }
 0x43d   :  { %9467 = vmatpush3.bf16.msra.mxu1 %v9466_v6  ;;  %v2719_v20 = vsel %vm15740_vm10, %v2654_v39, %v13696_v58  ;;  %v857_v39 = vrot.slane %v13869_v24, 1 }
 0x43e   :  { %1763 = vrot.lane.b32.xlu1 %v842_v3, %s9686_s22  ;;  %1761 = vrot.lane.b32.xlu0 %v840_v1, %s9686_s22  ;;  %v2784_v21 = vsel %vm2729_vm11, %v2719_v20, %v13771_v53  ;;  %v9633_v20 = vld [vmem:[#allocation2 + $0x258] sm:$0xff] }
 0x43f   :  { %9468 = vmatprep.subr.bf16.mxu1 %v9692_v56  ;;  %v2849_v47 = vsel %vm2794_vm12, %v2784_v21, %v2130_v45 }
 0x440   :  { %v13863_v3 = vpop.permute.xlu1 %2131  ;;  %v2114_v1 = vpop.permute.xlu0 %2113 }
 0x442   :  { %v9356_v44 = vpop.f32.mrb[38].mxu0  ;;  %1953 = vrot.lane.b32.xlu0 %v13844_v50, %s9687_s25  ;;  %5569 = vrot.lane.b32.xlu1 %v15868_v49, %s9693_s15 }
 0x443   :  { %v3392_v31 = vadd.f32 %v13498_v38, %v9356_v44  ;;  %v3386_v2 = vpop.f32.mrb[39].mxu0  ;;  %v2451_v44 = vsel %vm52_vm0, %v9633_v20, %v13491_v61 }
 0x444   :  { %v3387_v58 = vadd.f32 %v13498_v38, %v3386_v2  ;;  %v13883_v52 = vpop.permute.xlu1 %985  ;;  %v2322_v6 = vpop.permute.xlu0 %2321  ;;  %v2516_v46 = vsel %vm2469_vm7, %v2451_v44, %v13565_v18  ;;  %v864_v2 = vrot.slane %v13844_v50, 2  ;;  %v858_v18 = vsel %vm495_vm3, %v855_v36, %v857_v39  ;;  %v15869_v39 = vld [vmem:[#allocation10_spill] sm:$0xff] }
 0x445   :  { %vm3550_vm5 = vcmp.gt.f32.partialorder %v3392_v31, 0.0  ;;  %v3611_v49 = vmul.f32 %v10926_v4, %v3392_v31  ;;  %v2914_v53 = vsel %vm2859_vm13, %v2849_v47, %v2322_v6  ;;  %v865_v47 = vrot.slane %v13846_v62, 2 }
 0x446   :  { %vm3549_vm15 = vcmp.gt.f32.partialorder %v3387_v58, 0.0  ;;  %v3610_v45 = vmul.f32 %v10926_v4, %v3387_v58  ;;  %1955 = vrot.lane.b32.xlu0 %v13846_v62, %s9687_s25  ;;  %9378 = vmatprep.mubr.msk.f32.mxu1 %vm2935_vm14, %v2914_v53  ;;  %v2581_v61 = vsel %vm2534_vm8, %v2516_v46, %v13591_v63  ;;  %v7054_v63 = vld [vmem:[%s15665_s4 + $0x10] sm:$0xff]  ;;  %v7057_v46 = vld [vmem:[%s15665_s4 + $0x28] sm:$0xff]  ;;  %s9702_s25 = smov 16  }
 0x447   :  { %v13897_v21 = vsel %vm3550_vm5, %v3392_v31, %v3611_v49  ;;  %2145 = vrot.lane.b32.xlu1 %v856_v5, %s9688_s14  ;;  %v2646_v50 = vsel %vm2599_vm9, %v2581_v61, %v13670_v0  ;;  %v7055_v31 = vld [vmem:[%s15665_s4 + $0x18] sm:$0xff]  ;;  %v9634_v5 = vld [vmem:[#allocation2 + $0x2c0] sm:$0xff]  ;;  %vm9482_vm5 = vmpackc.low %vm15885_vm1, %vm15884_vm4 }
 0x448   :  { %v3711_v6 = vmax.f32 %v13654_v15, %v13897_v21  ;;  %v13906_v20 = vsel %vm3549_vm15, %v3387_v58, %v3610_v45  ;;  %v13908_v53 = vpop.permute.xlu1 %1749  ;;  %v13910_v29 = vpop.permute.xlu0 %1559  ;;  %v7056_v58 = vld [vmem:[%s15665_s4 + $0x20] sm:$0xff]  ;;  %v2460_v36 = vsel %vm52_vm0, %v9634_v5, %v13489_v25  ;;  %v2711_v0 = vsel %vm15740_vm10, %v2646_v50, %v13751_v48  ;;  %v15870_v49 = vld [vmem:[#allocation11_spill] sm:$0xff] }
 0x449   :  { %v3710_v62 = vmax.f32 %v13666_v42, %v13906_v20  ;;  %v15871_v44 = vcombine.low %v15869_v39, %v15870_v49  ;;  %v9469_v45 = vpack.c.bf16 %v7055_v31, %v7054_v63  ;;  %v2525_v61 = vsel %vm2469_vm7, %v2460_v36, %v13576_v7 }
 0x44a   :  { %v2776_v25 = vsel %vm2729_vm11, %v2711_v0, %v13828_v51  ;;  %v866_v48 = vsel %vm656_vm2, %v864_v2, %v865_v47  ;;  %v867_v50 = vrot.slane %v13869_v24, 2  ;;  %v2590_v5 = vsel %vm2534_vm8, %v2525_v61, %v13601_v22  ;;  %v7058_v24 = vld [vmem:[%s15665_s4 + $0x30] sm:$0xff]  ;;  %v7059_v22 = vld [vmem:[%s15665_s4 + $0x38] sm:$0xff]  ;;  %v9635_v61 = vld [vmem:[#allocation2 + $0x260] sm:$0xff] }
 0x44b   :  { %5819 = vrot.lane.b32.xlu0 %v15871_v44, %s9694_s26  ;;  %2147 = vrot.lane.b32.xlu1 %v858_v18, %s9688_s14  ;;  %v2841_v63 = vsel %vm2794_vm12, %v2776_v25, %v2114_v1  ;;  %v9472_v49 = vpack.c.bf16 %v7057_v46, %v7056_v58  ;;  %v2655_v7 = vsel %vm2599_vm9, %v2590_v5, %v13668_v11  ;;  %v15872_v2 = vld [vmem:[#allocation14_spill] sm:$0xff]  ;;  %v15873_v18 = vld [vmem:[#allocation15_spill] sm:$0xff]  ;;  %s9704_s14 = smov 48  }
 0x44c   :  { %v2306_v31 = vpop.permute.xlu1 %2305  ;;  %v2116_v39 = vpop.permute.xlu0 %2115  ;;  %9470 = vmatpush3.bf16.msra.mxu1 %v9469_v45  ;;  %v2720_v1 = vsel %vm15740_vm10, %v2655_v7, %v13773_v43  ;;  %v15874_v58 = vcombine.low %v15872_v2, %v15873_v18  ;;  %v868_v36 = vsel %vm656_vm2, %v865_v47, %v867_v50  ;;  %v9475_v45 = vpack.c.bf16 %v7059_v22, %v7058_v24  ;;  %v7061_v47 = vld [vmem:[%s15665_s4 + $0x48] sm:$0xff]  ;;  %v15879_v22 = vld [vmem:[#allocation28_spill] sm:$0xff]  ;;  %v15882_v2 = vld [vmem:[#allocation19_spill] sm:$0xff] }
 0x44d   :  { %v2906_v51 = vsel %vm2859_vm13, %v2841_v63, %v2306_v31  ;;  %9471 = vmatprep.subr.bf16.mxu1 %v9692_v56  ;;  %v2785_v11 = vsel %vm2729_vm11, %v2720_v1, %v13826_v12  ;;  %v7060_v12 = vld [vmem:[%s15665_s4 + $0x40] sm:$0xff]  ;;  %v15878_v24 = vld [vmem:[#allocation26_spill] sm:$0xff] }
 0x44e   :  { %9366 = vmatprep.mubr.msk.f32.mxu0 %vm2935_vm14, %v2906_v51  ;;  %v2850_v0 = vsel %vm2794_vm12, %v2785_v11, %v13863_v3  ;;  %v2452_v3 = vsel %vm52_vm0, %v9635_v61, %v13567_v37  ;;  %v15876_v50 = vld [vmem:[#allocation17_spill] sm:$0xff]  ;;  %v9478_v37 = vpack.c.bf16 %v7061_v47, %v7060_v12  ;;  %v7063_v51 = vld [vmem:[%s15665_s4 + $0x58] sm:$0x3]  ;;  %v15880_v1 = vcombine.low %v15878_v24, %v15879_v22  ;;  %v15881_v11 = vld [vmem:[#allocation18_spill] sm:$0xff] }
 0x44f   :  { %2337 = vrot.lane.b32.xlu0 %v866_v48, %s9690_s2  ;;  %6037 = vrot.lane.b32.xlu1 %v15874_v58, %s9695_s12  ;;  %v2517_v25 = vsel %vm2469_vm7, %v2452_v3, %v13593_v19  ;;  %v15875_v48 = vld [vmem:[#allocation16_spill] sm:$0xff]  ;;  %v7062_v19 = vld [vmem:[%s15665_s4 + $0x50] sm:$0xff]  ;;  %v15883_v18 = vcombine.low %v15881_v11, %v15882_v2  ;;  %s9698_s4 = smov 60   ;;  %v15891_v3 = vld [vmem:[#allocation41_spill] sm:$0xff] }
 0x450   :  { %v13970_v44 = vpop.permute.xlu1 %987  ;;  %v2324_v43 = vpop.permute.xlu0 %2323  ;;  %9473 = vmatpush3.bf16.msra.mxu1 %v9472_v49  ;;  %v15877_v5 = vcombine.low %v15875_v48, %v15876_v50  ;;  %v2582_v63 = vsel %vm2534_vm8, %v2517_v25, %v13644_v35  ;;  %v15890_v61 = vld [vmem:[#allocation38_spill] sm:$0xff]  ;;  %v15893_v48 = vld [vmem:[#allocation27_spill] sm:$0xff]  ;;  %v15894_v50 = vld [vmem:[#allocation32_spill] sm:$0xff] }
 0x451   :  { %v2915_v46 = vsel %vm2859_vm13, %v2850_v0, %v2324_v43  ;;  %9474 = vmatprep.subr.bf16.mxu1 %v9692_v56  ;;  %v2647_v7 = vsel %vm2599_vm9, %v2582_v63, %v13753_v57  ;;  %v15892_v25 = vcombine.low %v15890_v61, %v15891_v3  ;;  %v15905_v61 = vld [vmem:[#allocation46_spill] sm:$0xff] }
 0x452   :  { %9379 = vmatmul.mubr.msk.f32.gmra.mrb[6].mxu1 %vm2935_vm14, %v2915_v46  ;;  %v2712_v35 = vsel %vm15740_vm10, %v2647_v7, %v13814_v13  ;;  %v9481_v13 = vpack.c.bf16 %v7063_v51, %v7062_v19  ;;  %v9636_v7 = vld [vmem:[#allocation2 + $0x2d0] sm:$0xff]  ;;  %v15906_v3 = vcombine.low %v15905_v61, %v12717_v16 }
 0x453   :  { %2339 = vrot.lane.b32.xlu0 %v868_v36, %s9690_s2  ;;  %6223 = vrot.lane.b32.xlu1 %v15877_v5, %s9696_s19  ;;  %v2777_v57 = vsel %vm2729_vm11, %v2712_v35, %v13840_v30  ;;  %v15886_v30 = vld [vmem:[#allocation30_spill] sm:$0xff]  ;;  %v15895_v5 = vcombine.low %v15893_v48, %v15894_v50  ;;  %v2461_v19 = vsel %vm52_vm0, %v9636_v7, %v13646_v40  ;;  %v15896_v51 = vld [vmem:[#allocation39_spill] sm:$0xff] }
 0x454   :  { %v13992_v31 = vpop.permute.xlu1 %1751  ;;  %v13994_v49 = vpop.permute.xlu0 %1177  ;;  %9476 = vmatpush3.bf16.msra.mxu1 %v9475_v45  ;;  %v2842_v58 = vsel %vm2794_vm12, %v2777_v57, %v2116_v39  ;;  %v15887_v45 = vld [vmem:[#allocation29_spill] sm:$0xff]  ;;  %v15888_v39 = vld [vmem:[#allocation31_spill] sm:$0xff]  ;;  %v2526_v22 = vsel %vm2469_vm7, %v2461_v19, %v13736_v26 }
 0x455   :  { %9477 = vmatprep.subr.bf16.mxu1 %v9692_v56  ;;  %v15889_v46 = vcombine.low %v15887_v45, %v15888_v39  ;;  %v15897_v35 = vld [vmem:[#allocation43_spill] sm:$0xff]  ;;  %v15900_v57 = vld [vmem:[#allocation37_spill] sm:$0xff]  ;;  %v2591_v2 = vsel %vm2534_vm8, %v2526_v22, %v13816_v27 }
 0x456   :  { %v15898_v24 = vcombine.low %v15896_v51, %v15897_v35  ;;  %v2656_v40 = vsel %vm2599_vm9, %v2591_v2, %v13842_v55  ;;  %v15902_v26 = vld [vmem:[#allocation45_spill] sm:$0xff]  ;;  %v9637_v55 = vld [vmem:[#allocation2 + $0x2d8] sm:$0xff] }
 0x457   :  { %5571 = vrot.lane.b32.xlu0 %v15880_v1, %s9693_s15  ;;  %6441 = vrot.lane.b32.xlu1 %v15883_v18, %s9697_s20  ;;  %v15899_v1 = vld [vmem:[#allocation36_spill] sm:$0xff]  ;;  %v15911_v51 = vld [vmem:[#allocation59_spill] sm:$0xff] }
 0x458   :  { %v2308_v36 = vpop.permute.xlu1 %2307  ;;  %v1942_v0 = vpop.permute.xlu0 %1941  ;;  %9479 = vmatpush3.bf16.msra.mxu1 %v9478_v37  ;;  %v15901_v11 = vcombine.low %v15899_v1, %v15900_v57 }
 0x459   :  { %v2907_v43 = vsel %vm2859_vm13, %v2842_v58, %v2308_v36  ;;  %9480 = vmatprep.subr.bf16.mxu1 %v9692_v56  ;;  %v2721_v36 = vsel %vm15740_vm10, %v2656_v40, %v13908_v53  ;;  %v2462_v53 = vsel %vm52_vm0, %v9637_v55, %v13738_v32 }
 0x45a   :  { %9367 = vmatmul.mubr.msk.f32.gmra.mrb[46].mxu0 %vm2935_vm14, %v2907_v43  ;;  %v2786_v43 = vsel %vm2729_vm11, %v2721_v36, %v1942_v0  ;;  %v2527_v0 = vsel %vm2469_vm7, %v2462_v53, %v13793_v10  ;;  %v15909_v10 = vld [vmem:[#allocation58_spill] sm:$0xff] }
 0x45b   :  { %5821 = vrot.lane.b32.xlu0 %v15886_v30, %s9694_s26  ;;  %6619 = vrot.lane.b32.xlu1 %v15889_v46, %s9698_s4  ;;  %v15904_v30 = vld [vmem:[#allocation44_spill] sm:$0xff]  ;;  %v2592_v50 = vsel %vm2534_vm8, %v2527_v0, %v13836_v41  ;;  %v15910_v19 = vcombine.low %v12698_v34, %v15909_v10  ;;  %v9638_v53 = vld [vmem:[#allocation2 + $0x2e8] sm:$0xff] }
 0x45c   :  { %v14029_v12 = vpop.permute.xlu1 %1369  ;;  %v14031_v47 = vpop.permute.xlu0 %1179  ;;  %9483 = vmatpush3.bf16.msk.msra.mxu1 %vm9482_vm5, %v9481_v13  ;;  %v15903_v13 = vcombine.low %v15902_v26, %v12698_v34  ;;  %v15912_v41 = vld [vmem:[#allocation60_spill] sm:$0xff]  ;;  %v15914_v34 = vcombine.low %v12717_v16, %v13075_v23  ;;  %v15919_v16 = vld [vmem:[#allocation49_spill] sm:$0xff]  ;;  %v2463_v61 = vsel %vm52_vm0, %v9638_v53, %v13883_v52  ;;  %vm15925_vm5 = vcmask 1042432  }
 0x45d   :  { %9484 = vmatprep.subr.bf16.mxu1 %v9692_v56  ;;  %v15913_v35 = vcombine.low %v15911_v51, %v15912_v41  ;;  %v15918_v26 = vld [vmem:[#allocation64_spill] sm:$0xff]  ;;  %v2528_v0 = vsel %vm2469_vm7, %v2463_v61, %v13994_v49 }
 0x45f   :  { %6039 = vrot.lane.b32.xlu0 %v15892_v25, %s9695_s12  ;;  %6789 = vrot.lane.b32.xlu1 %v15895_v5, %s9699_s21  ;;  %v15907_v25 = vld [vmem:[#allocation57_spill] sm:$0xff] }
 0x460   :  { %v2134_v63 = vpop.permute.xlu1 %2133  ;;  %v1944_v37 = vpop.permute.xlu0 %1943  ;;  %v15908_v48 = vcombine.low %v12975_v54, %v15907_v25 }
 0x461   :  { %v2851_v27 = vsel %vm2794_vm12, %v2786_v43, %v2134_v63  ;;  %v2657_v63 = vsel %vm2599_vm9, %v2592_v50, %v13910_v29  ;;  %v2593_v50 = vsel %vm2534_vm8, %v2528_v0, %v14029_v12 }
 0x462   :  { %v2722_v7 = vsel %vm15740_vm10, %v2657_v63, %v13992_v31 }
 0x463   :  { %6225 = vrot.lane.b32.xlu0 %v15898_v24, %s9696_s19  ;;  %6967 = vrot.lane.b32.xlu1 %v15901_v11, %s9700_s23  ;;  %v2787_v54 = vsel %vm2729_vm11, %v2722_v7, %v1944_v37  ;;  %v15915_v37 = vld [vmem:[#allocation61_spill] sm:$0xff]  ;;  %v15916_v11 = vld [vmem:[#allocation62_spill] sm:$0xff] }
 0x464   :  { %v1562_v18 = vpop.permute.xlu1 %1561  ;;  %v14056_v58 = vpop.permute.xlu0 %1371  ;;  %v15917_v2 = vcombine.low %v15915_v37, %v15916_v11 }
 0x465   :  { %v2658_v52 = vsel %vm2599_vm9, %v2593_v50, %v1562_v18 }
 0x467   :  { %5573 = vrot.lane.b32.xlu0 %v15903_v13, %s9693_s15  ;;  %6443 = vrot.lane.b32.xlu1 %v15904_v30, %s9697_s20  ;;  %v15920_v30 = vcombine.low %v13075_v23, %v15919_v16 }
 0x468   :  { %v2326_v45 = vpop.permute.xlu1 %2325  ;;  %v2136_v39 = vpop.permute.xlu0 %2135 }
 0x469   :  { %v2916_v46 = vsel %vm2859_vm13, %v2851_v27, %v2326_v45  ;;  %v2852_v24 = vsel %vm2794_vm12, %v2787_v54, %v2136_v39  ;;  %v15921_v39 = vld [vmem:[#allocation21_spill] sm:$0xff] }
 0x46a   :  { %9381 = vmatprep.mubr.msk.f32.mxu1 %vm2935_vm14, %v2916_v46 }
 0x46b   :  { %5823 = vrot.lane.b32.xlu0 %v15906_v3, %s9694_s26  ;;  %6621 = vrot.lane.b32.xlu1 %v15908_v48, %s9698_s4  ;;  %v15922_v48 = vld [vmem:[#allocation50_spill] sm:$0xff] }
 0x46c   :  { %v14086_v5 = vpop.permute.xlu1 %1563  ;;  %v14088_v32 = vpop.permute.xlu0 %989 }
 0x46f   :  { %6041 = vrot.lane.b32.xlu0 %v15910_v19, %s9695_s12  ;;  %6791 = vrot.lane.b32.xlu1 %v15913_v35, %s9699_s21 }
 0x470   :  { %v2328_v22 = vpop.permute.xlu1 %2327  ;;  %v1754_v1 = vpop.permute.xlu0 %1753 }
 0x471   :  { %v2917_v29 = vsel %vm2859_vm13, %v2852_v24, %v2328_v22  ;;  %v2723_v19 = vsel %vm15740_vm10, %v2658_v52, %v1754_v1  ;;  %v4463_v22 = vcombine.high %v13757_v28, %v13757_v28  ;;  %v15923_v52 = vld [vmem:[#allocation22_spill] sm:$0xff] }
 0x472   :  { %v14105_v57 = vpop.f32.mrb[0].mxu1  ;;  %9382 = vmatmul.mubr.msk.f32.gmra.mrb[8].mxu1 %vm2935_vm14, %v2917_v29 }
 0x473   :  { %6227 = vrot.lane.b32.xlu0 %v15914_v34, %s9696_s19  ;;  %v14112_v31 = vpop.f32.mrb[1].mxu1  ;;  %6969 = vrot.lane.b32.xlu1 %v15917_v2, %s9700_s23  ;;  %v9639_v34 = vld [vmem:[#allocation2 + $0x2f0] sm:$0xff] }
 0x474   :  { %v14118_v40 = vpop.permute.xlu1 %1181  ;;  %v14120_v36 = vpop.permute.xlu0 %991  ;;  %v2464_v37 = vsel %vm52_vm0, %v9639_v34, %v13970_v44 }
 0x477   :  { %6445 = vrot.lane.b32.xlu1 %v15918_v26, %s9697_s20 }
 0x478   :  { %v1946_v13 = vpop.permute.xlu1 %1945  ;;  %v1756_v43 = vpop.permute.xlu0 %1755 }
 0x479   :  { %v2788_v51 = vsel %vm2729_vm11, %v2723_v19, %v1946_v13 }
 0x47b   :  { %6623 = vrot.lane.b32.xlu1 %v15920_v30, %s9698_s4 }
 0x47c   :  { %v14128_v27 = vpop.permute.xlu1 %1373  ;;  %v14130_v45 = vpop.permute.xlu0 %1183 }
 0x47f   :  { %6793 = vrot.lane.b32.xlu1 %v15921_v39, %s9699_s21 }
 0x480   :  { %v2138_v46 = vpop.permute.xlu1 %2137  ;;  %v1948_v55 = vpop.permute.xlu0 %1947 }
 0x482   :  { %v9359_v3 = vpop.f32.mrb[40].mxu0 }
 0x483   :  { %v3402_v23 = vadd.f32 %v13498_v38, %v9359_v3  ;;  %v3396_v25 = vpop.f32.mrb[41].mxu0  ;;  %6971 = vrot.lane.b32.xlu1 %v15922_v48, %s9700_s23 }
 0x484   :  { %v3397_v63 = vadd.f32 %v13498_v38, %v3396_v25  ;;  %v14144_v7 = vpop.permute.xlu1 %1565  ;;  %v14146_v10 = vpop.permute.xlu0 %1375  ;;  %v2853_v38 = vsel %vm2794_vm12, %v2788_v51, %v2138_v46 }
 0x485   :  { %vm3552_vm15 = vcmp.gt.f32.partialorder %v3402_v23, 0.0  ;;  %v3613_v49 = vmul.f32 %v10926_v4, %v3402_v23 }
 0x486   :  { %vm3551_vm4 = vcmp.gt.f32.partialorder %v3397_v63, 0.0  ;;  %v3612_v54 = vmul.f32 %v10926_v4, %v3397_v63 }
 0x487   :  { %v14153_v41 = vsel %vm3552_vm15, %v3402_v23, %v3613_v49  ;;  %v2466_v49 = vsel %vm52_vm0, %v15923_v52, %v14120_v36  ;;  %vm15926_vm15 = vcmask 1043456  }
 0x488   :  { %v3739_v12 = vmax.f32 %v3711_v6, %v14153_v41  ;;  %v14160_v18 = vsel %vm3551_vm4, %v3397_v63, %v3612_v54  ;;  %v2330_v35 = vpop.permute.xlu1 %2329  ;;  %v2140_v24 = vpop.permute.xlu0 %2139  ;;  %v2529_v6 = vsel %vm2469_vm7, %v2464_v37, %v14031_v47  ;;  %vm15927_vm4 = vcmask 1044480  }
 0x489   :  { %v3738_v1 = vmax.f32 %v3710_v62, %v14160_v18  ;;  %v2918_v29 = vsel %vm2859_vm13, %v2853_v38, %v2330_v35  ;;  %v2594_v2 = vsel %vm2534_vm8, %v2529_v6, %v14056_v58  ;;  %v4477_v62 = vrot.slane %v4463_v22, %v11122_v9  ;;  %v15924_v38 = vld [vmem:[#allocation20_spill] sm:$0xff] }
 0x48a   :  { %v3803_v15 = vrot.slane %v3739_v12, 1  ;;  %v3901_v21 = vrot.slane %v3739_v12, 2  ;;  %9384 = vmatprep.mubr.msk.f32.mxu1 %vm2935_vm14, %v2918_v29  ;;  %v2659_v26 = vsel %vm2599_vm9, %v2594_v2, %v14086_v5  ;;  %v2531_v35 = vsel %vm2469_vm7, %v2466_v49, %v14130_v45 }
 0x48b   :  { %v3802_v11 = vrot.slane %v3738_v1, 1  ;;  %v3900_v28 = vrot.slane %v3738_v1, 2  ;;  %v2724_v30 = vsel %vm15740_vm10, %v2659_v26, %v1756_v43  ;;  %v4698_v23 = vcombine.high %v4477_v62, %v4477_v62 }
 0x48c   :  { %v1758_v42 = vpop.permute.xlu1 %1757  ;;  %v1568_v20 = vpop.permute.xlu0 %1567  ;;  %v3865_v44 = vmax.f32 %v3739_v12, %v3803_v15  ;;  %v2789_v39 = vsel %vm2729_vm11, %v2724_v30, %v1948_v55  ;;  %v4492_v55 = vrot.slane %v4477_v62, %v11122_v9  ;;  %v2465_v12 = vsel %vm52_vm0, %v15924_v38, %v14088_v32 }
 0x48d   :  { %v3804_v13 = vsel %vm495_vm3, %v3802_v11, %v3803_v15  ;;  %v3902_v16 = vsel %vm656_vm2, %v3900_v28, %v3901_v21  ;;  %v2854_v58 = vsel %vm2794_vm12, %v2789_v39, %v2140_v24  ;;  %v4705_v51 = vrot.slane %v4698_v23, %v11122_v9 }
 0x48e   :  { %v3864_v47 = vmax.f32 %v3738_v1, %v3804_v13  ;;  %v3963_v3 = vmax.f32 %v3865_v44, %v3901_v21  ;;  %v2530_v1 = vsel %vm2469_vm7, %v2465_v12, %v14118_v40  ;;  %v2596_v34 = vsel %vm2534_vm8, %v2531_v35, %v14146_v10 }
 0x48f   :  { %v2595_v37 = vsel %vm2534_vm8, %v2530_v1, %v14128_v27  ;;  %v2661_v15 = vsel %vm2599_vm9, %v2596_v34, %v1568_v20  ;;  %v4501_v6 = vcombine.high %v13785_v60, %v13785_v60  ;;  %v4743_v10 = vcombine.high %v4492_v55, %v4492_v55 }
 0x490   :  { %v3962_v46 = vmax.f32 %v3864_v47, %v3902_v16  ;;  %v1760_v53 = vpop.permute.xlu1 %1759  ;;  %v2332_v61 = vpop.permute.xlu0 %2331  ;;  %v4094_v19 = vrot.slane %v3963_v3, 4  ;;  %v4122_v24 = vrot.slane %v3963_v3, 5  ;;  %v4150_v29 = vrot.slane %v3963_v3, 6 }
 0x491   :  { %v2919_v0 = vsel %vm2859_vm13, %v2854_v58, %v2332_v61  ;;  %v2660_v11 = vsel %vm2599_vm9, %v2595_v37, %v14144_v7  ;;  %v2726_v28 = vsel %vm15740_vm10, %v2661_v15, %v1760_v53  ;;  %v5409_v60 = vcombine.low %v4492_v55, %v4705_v51 }
 0x492   :  { %v3996_v5 = vrot.slane %v3962_v46, 1  ;;  %v4024_v25 = vrot.slane %v3962_v46, 2  ;;  %9385 = vmatmul.mubr.msk.f32.gmra.mrb[10].mxu1 %vm2935_vm14, %v2919_v0  ;;  %v4052_v48 = vrot.slane %v3962_v46, 3  ;;  %v2725_v27 = vsel %vm15740_vm10, %v2660_v11, %v1758_v42 }
 0x493   :  { %v5093_v58 = vcombine.low %v4501_v6, %v4492_v55  ;;  %v5698_v53 = vcombine.low %v4705_v51, %v4743_v10  ;;  %v9141_v0 = vcombine.high %v15867_v17, %v13776_v59  ;;  %v5431_v59 = vrot.slane %v5409_v60, %v11122_v9 }
 0x494   :  { %v4179_v50 = vsel %vm4170_vm6, %v3962_v46, %v3996_v5  ;;  %v1952_v43 = vpop.permute.xlu1 %1951  ;;  %v1950_v63 = vpop.permute.xlu0 %1949  ;;  %v15928_v5 = vld [vmem:[#allocation56_spill] sm:$0xff]  ;;  %v15929_v15 = vcombine.low %v13805_v14, %v13808_v8  ;;  %v5131_v11 = vrot.slane %v13830_v33, %v11122_v9 }
 0x495   :  { %v4194_v54 = vsel %vm15885_vm1, %v4179_v50, %v4024_v25  ;;  %v2791_v62 = vsel %vm2729_vm11, %v2726_v28, %v1952_v43  ;;  %v2790_v26 = vsel %vm2729_vm11, %v2725_v27, %v1950_v63  ;;  %v5115_v17 = vrot.slane %v5093_v58, %v11122_v9 }
 0x496   :  { %v4208_v22 = vsel %vm15925_vm5, %v4194_v54, %v4052_v48  ;;  %v5705_v35 = vrot.slane %v9141_v0, %v11122_v9 }
 0x497   :  { %v4223_v36 = vsel %vm15926_vm15, %v4208_v22, %v4094_v19  ;;  %v5712_v19 = vrot.slane %v5698_v53, %v11122_v9 }
 0x498   :  { %v4238_v32 = vsel %vm15927_vm4, %v4223_v36, %v4122_v24  ;;  %v2144_v45 = vpop.permute.xlu1 %2143  ;;  %v2142_v21 = vpop.permute.xlu0 %2141  ;;  %vm7020_vm4 = vcmask 408576  }
 0x499   :  { %v4252_v40 = vsel %vm656_vm2, %v4238_v32, %v4150_v29  ;;  %v2856_v44 = vsel %vm2794_vm12, %v2791_v62, %v2144_v45  ;;  %v2855_v13 = vsel %vm2794_vm12, %v2790_v26, %v2142_v21  ;;  %v5447_v45 = vrot.slane %v15929_v15, %v11122_v9  ;;  %v15930_v26 = vld [vmem:[#allocation53_spill] sm:$0xff] }
 0x49a   :  { %v4502_v2 = vcombine.high %v4252_v40, %v4252_v40  ;;  %v4509_v20 = vrot.slane %v4252_v40, %v11122_v9  ;;  %v5713_v21 = vcombine.low %v5705_v35, %v5115_v17 }
 0x49c   :  { %v2336_v16 = vpop.permute.xlu1 %2335  ;;  %v2334_v30 = vpop.permute.xlu0 %2333  ;;  %v4517_v7 = vcombine.high %v4509_v20, %v4509_v20  ;;  %v4524_v47 = vrot.slane %v4509_v20, %v11122_v9  ;;  %v14222_v39 = vrot.slane %v4502_v2, %v11122_v9  ;;  %v5721_v20 = vrot.slane %v5713_v21, %v11122_v9 }
 0x49d   :  { %v2921_v42 = vsel %vm2859_vm13, %v2856_v44, %v2336_v16  ;;  %v2920_v46 = vsel %vm2859_vm13, %v2855_v13, %v2334_v30  ;;  %v14290_v16 = vld [vmem:[%s15664_s3] ss:$0 sm:$0xff] }
 0x49e   :  { %9387 = vmatprep.mubr.msk.f32.mxu1 %vm2935_vm14, %v2920_v46  ;;  %v14228_v61 = vrot.slane %v4517_v7, %v11122_v9  ;;  %v4539_v3 = vcombine.high %v4524_v47, %v4524_v47  ;;  %v14235_v23 = vrot.slane %v14222_v39, %v11122_v9  ;;  %v5931_v25 = vcombine.low %v15928_v5, %v4524_v47 }
 0x49f   :  { %9388 = vmatmul.mubr.msk.f32.gmra.mrb[12].mxu1 %vm2935_vm14, %v2921_v42  ;;  %v9148_v48 = vcombine.high %v15928_v5, %v4524_v47  ;;  %v3442_v30 = vadd.f32 %v14290_v16, %v14105_v57  ;;  %v15931_v42 = vld [vmem:[#allocation23_spill] sm:$0xff] }
 0x4a0   :  { %v996_v50 = vpop.permute.xlu1 %995  ;;  %v994_v43 = vpop.permute.xlu0 %993  ;;  %v5410_v63 = vcombine.low %v14228_v61, %v4539_v3  ;;  %v9132_v55 = vcombine.high %v4524_v47, %v14228_v61  ;;  %v5094_v52 = vcombine.low %v4524_v47, %v14228_v61  ;;  %v4540_v49 = vcombine.high %v14228_v61, %v14228_v61 }
 0x4a1   :  { %v14257_v24 = vrot.slane %v5931_v25, %v11122_v9  ;;  %v14260_v22 = vrot.slane %v9148_v48, %v11122_v9  ;;  %v2467_v44 = vsel %vm52_vm0, %v15930_v26, %v994_v43  ;;  %v3437_v47 = vadd.f32 %v14290_v16, %v14112_v31 }
 0x4a2   :  { %v14248_v54 = vrot.slane %v5410_v63, %v11122_v9  ;;  %v14251_v51 = vrot.slane %v9132_v55, %v11122_v9  ;;  %v5122_v38 = vrot.slane %v5094_v52, %v11122_v9  ;;  %v5456_v12 = vcombine.low %v4540_v49, %v14235_v23 }
 0x4a3   :  { %v2468_v46 = vsel %vm52_vm0, %v15931_v42, %v996_v50  ;;  %v3621_v5 = vmul.f32 %v10926_v4, %v3442_v30  ;;  %vm3560_vm1 = vcmp.gt.f32.partialorder %v3442_v30, 0.0  ;;  %v3620_v43 = vmul.f32 %v10926_v4, %v3437_v47 }
 0x4a4   :  { %v1188_v1 = vpop.permute.xlu1 %1187  ;;  %v1186_v29 = vpop.permute.xlu0 %1185  ;;  %v5440_v36 = vcombine.low %v5431_v59, %v14248_v54  ;;  %v5714_v34 = vcombine.low %v5712_v19, %v14251_v51  ;;  %v5124_v37 = vcombine.low %v5115_v17, %v5122_v38  ;;  %v14265_v32 = vrot.slane %v5456_v12, %v11122_v9 }
 0x4a5   :  { %v5947_v6 = vcombine.low %v14257_v24, %v14248_v54  ;;  %v2532_v7 = vsel %vm2469_vm7, %v2467_v44, %v1186_v29  ;;  %v2533_v25 = vsel %vm2469_vm7, %v2468_v46, %v1188_v1  ;;  %vm3559_vm0 = vcmp.gt.f32.partialorder %v3437_v47, 0.0 }
 0x4a6   :  { %v5454_v40 = vrot.slane %v5440_v36, %v11122_v9  ;;  %v5138_v28 = vrot.slane %v5124_v37, %v11122_v9  ;;  %v6351_v10 = vcombine.low %v14260_v22, %v14265_v32  ;;  %v5728_v14 = vrot.slane %v5714_v34, %v11122_v9 }
 0x4a7   :  { %v14309_v17 = vsel %vm3560_vm1, %v3442_v30, %v3621_v5  ;;  %v14313_v38 = vsel %vm3559_vm0, %v3437_v47, %v3620_v43  ;;  %v15932_v46 = vmov 0.0   ;;  %v15934_v43 = vld [vmem:[#allocation13_spill] sm:$0xff]  ;;  %vm7028_vm1 = vcmask 490496  }
 0x4a8   :  { %v1380_v2 = vpop.permute.xlu1 %1379  ;;  %v1378_v27 = vpop.permute.xlu0 %1377  ;;  %v5455_v62 = vcombine.low %v5447_v45, %v5454_v40  ;;  %v14280_v8 = vcombine.low %v5131_v11, %v5138_v28  ;;  %v5729_v13 = vcombine.low %v5721_v20, %v5728_v14  ;;  %vm7036_vm0 = vcmask 572416  }
 0x4a9   :  { %v2597_v3 = vsel %vm2534_vm8, %v2532_v7, %v1378_v27  ;;  %v2598_v49 = vsel %vm2534_vm8, %v2533_v25, %v1380_v2 }
 0x4aa   :  { %5575 = vrot.lane.b32.xlu0 %v5455_v62, %s9693_s15 }
 0x4ac   :  { %v1572_v33 = vpop.permute.xlu1 %1571  ;;  %v1570_v60 = vpop.permute.xlu0 %1569 }
 0x4ad   :  { %v2662_v50 = vsel %vm2599_vm9, %v2597_v3, %v1570_v60  ;;  %v2663_v36 = vsel %vm2599_vm9, %v2598_v49, %v1572_v33  ;;  %vm15741_vm9 = vmmov 0  }
 0x4ae   :  { %5825 = vrot.lane.b32.xlu0 %v5729_v13, %s9694_s26 }
 0x4b0   :  { %v1764_v58 = vpop.permute.xlu1 %1763  ;;  %v1762_v53 = vpop.permute.xlu0 %1761 }
 0x4b1   :  { %v2727_v12 = vsel %vm15740_vm10, %v2662_v50, %v1762_v53  ;;  %v2728_v45 = vsel %vm15740_vm10, %v2663_v36, %v1764_v58  ;;  %vm15943_vm10 = vcmask 1042432  }
 0x4b2   :  { %v9374_v0 = vpop.f32.mrb[2].mxu1 }
 0x4b3   :  { %v3452_v48 = vadd.f32 %v14290_v16, %v9374_v0  ;;  %v3446_v57 = vpop.f32.mrb[3].mxu1 }
 0x4b4   :  { %v3447_v31 = vadd.f32 %v14290_v16, %v3446_v57  ;;  %v1954_v63 = vpop.permute.xlu0 %1953  ;;  %v5570_v55 = vpop.permute.xlu1 %5569  ;;  %v15933_v57 = vld [vmem:[#allocation12_spill] sm:$0xff] }
 0x4b5   :  { %vm3562_vm5 = vcmp.gt.f32.partialorder %v3452_v48, 0.0  ;;  %v3623_v52 = vmul.f32 %v10926_v4, %v3452_v48  ;;  %v2792_v15 = vsel %vm2729_vm11, %v2727_v12, %v1954_v63 }
 0x4b6   :  { %vm3561_vm15 = vcmp.gt.f32.partialorder %v3447_v31, 0.0  ;;  %v3622_v59 = vmul.f32 %v10926_v4, %v3447_v31 }
 0x4b7   :  { %v14311_v19 = vsel %vm3562_vm5, %v3452_v48, %v3623_v52  ;;  %vm15744_vm5 = vcmask 654336  }
 0x4b8   :  { %v3717_v35 = vmax.f32 %v14309_v17, %v14311_v19  ;;  %v14318_v1 = vsel %vm3561_vm15, %v3447_v31, %v3622_v59  ;;  %v1956_v29 = vpop.permute.xlu0 %1955  ;;  %v15935_v31 = vcombine.low %v15933_v57, %v15934_v43  ;;  %vm15743_vm15 = vcmask 736256   ;;  %v15940_v57 = vld [vmem:[#allocation48_spill] sm:$0xff] }
 0x4b9   :  { %v3716_v34 = vmax.f32 %v14313_v38, %v14318_v1  ;;  %v2146_v37 = vpop.permute.xlu1 %2145  ;;  %v2793_v28 = vsel %vm2729_vm11, %v2728_v45, %v1956_v29  ;;  %vm6988_vm11 = vcmask 80896  }
 0x4ba   :  { %v2857_v11 = vsel %vm2794_vm12, %v2792_v15, %v2146_v37  ;;  %v6989_v63 = vsel %vm6988_vm11, %v15935_v31, %v5570_v55 }
 0x4bd   :  { %v5820_v21 = vpop.permute.xlu0 %5819  ;;  %v2148_v40 = vpop.permute.xlu1 %2147 }
 0x4be   :  { %v2858_v14 = vsel %vm2794_vm12, %v2793_v28, %v2148_v40  ;;  %vm6996_vm12 = vcmask 162816   ;;  %v15936_v28 = vld [vmem:[#allocation34_spill] sm:$0xff] }
 0x4bf   :  { %v6997_v50 = vsel %vm6996_vm12, %v6989_v63, %v5820_v21 }
 0x4c1   :  { %v2338_v2 = vpop.permute.xlu0 %2337  ;;  %v6038_v62 = vpop.permute.xlu1 %6037 }
 0x4c2   :  { %v2922_v27 = vsel %vm2859_vm13, %v2857_v11, %v2338_v2  ;;  %v9362_v20 = vpop.f32.mrb[42].mxu0  ;;  %v15937_v2 = vld [vmem:[#allocation35_spill] sm:$0xff] }
 0x4c3   :  { %9390 = vmatprep.mubr.msk.f32.mxu1 %vm2935_vm14, %v2922_v27  ;;  %v3412_v26 = vadd.f32 %v14290_v16, %v9362_v20  ;;  %v3406_v44 = vpop.f32.mrb[43].mxu0  ;;  %v15938_v27 = vcombine.low %v15936_v28, %v15937_v2 }
 0x4c4   :  { %v3407_v33 = vadd.f32 %v14290_v16, %v3406_v44 }
 0x4c5   :  { %v2340_v60 = vpop.permute.xlu0 %2339  ;;  %vm3554_vm7 = vcmp.gt.f32.partialorder %v3412_v26, 0.0  ;;  %v3615_v13 = vmul.f32 %v10926_v4, %v3412_v26  ;;  %v6224_v7 = vpop.permute.xlu1 %6223 }
 0x4c6   :  { %v2923_v30 = vsel %vm2859_vm13, %v2858_v14, %v2340_v60  ;;  %vm3553_vm8 = vcmp.gt.f32.partialorder %v3407_v33, 0.0  ;;  %v3614_v47 = vmul.f32 %v10926_v4, %v3407_v33  ;;  %vm7004_vm13 = vcmask 244736  }
 0x4c7   :  { %9391 = vmatmul.mubr.msk.f32.gmra.mrb[14].mxu1 %vm2935_vm14, %v2923_v30  ;;  %v14336_v42 = vsel %vm3554_vm7, %v3412_v26, %v3615_v13  ;;  %vm7012_vm14 = vcmask 326656   ;;  %v7005_v52 = vsel %vm7004_vm13, %v6997_v50, %v6038_v62 }
 0x4c8   :  { %9417 = vmatprep.mubr.msk.f32.mxu1 %vm15741_vm9, %v15932_v46  ;;  %v3713_v58 = vmax.f32 %v14153_v41, %v14336_v42  ;;  %v14342_v53 = vsel %vm3553_vm8, %v3407_v33, %v3614_v47  ;;  %v7013_v12 = vsel %vm7012_vm14, %v7005_v52, %v6224_v7 }
 0x4c9   :  { %v5572_v3 = vpop.permute.xlu0 %5571  ;;  %v3712_v0 = vmax.f32 %v14160_v18, %v14342_v53  ;;  %v6442_v5 = vpop.permute.xlu1 %6441  ;;  %v15946_v18 = vld [vmem:[#allocation63_spill] sm:$0xff] }
 0x4ca   :  { %v7021_v29 = vsel %vm7020_vm4, %v7013_v12, %v6442_v5  ;;  %v6990_v62 = vsel %vm6988_vm11, %v15938_v27, %v5572_v3  ;;  %v6133_v53 = vcombine.low %v15946_v18, %v14228_v61 }
 0x4cd   :  { %v5822_v25 = vpop.permute.xlu0 %5821  ;;  %v6620_v48 = vpop.permute.xlu1 %6619 }
 0x4ce   :  { %v7029_v36 = vsel %vm7028_vm1, %v7021_v29, %v6620_v48  ;;  %v6998_v14 = vsel %vm6996_vm12, %v6990_v62, %v5822_v25  ;;  %v15939_v48 = vld [vmem:[#allocation47_spill] sm:$0xff] }
 0x4cf   :  { %v15941_v43 = vcombine.low %v15939_v48, %v15940_v57 }
 0x4d1   :  { %v6040_v49 = vpop.permute.xlu0 %6039  ;;  %v6790_v59 = vpop.permute.xlu1 %6789 }
 0x4d2   :  { %v7037_v55 = vsel %vm7036_vm0, %v7029_v36, %v6790_v59  ;;  %v7006_v20 = vsel %vm7004_vm13, %v6998_v14, %v6040_v49 }
 0x4d5   :  { %v6968_v37 = vpop.permute.xlu1 %6967  ;;  %v6226_v45 = vpop.permute.xlu0 %6225 }
 0x4d6   :  { %v7045_v15 = vsel %vm15744_vm5, %v7037_v55, %v6968_v37  ;;  %v7014_v44 = vsel %vm7012_vm14, %v7006_v20, %v6226_v45 }
 0x4d7   :  { %9418 = vmatmul.mubr.msk.f32.vlgmr.msra.gmra.mrb[16].mxu1 %vm15743_vm15, %v7045_v15 }
 0x4d8   :  { %9420 = vmatprep.mubr.msk.f32.mxu1 %vm15741_vm9, %v15932_v46 }
 0x4d9   :  { %v6444_v21 = vpop.permute.xlu1 %6443  ;;  %v5574_v40 = vpop.permute.xlu0 %5573 }
 0x4da   :  { %v7022_v33 = vsel %vm7020_vm4, %v7014_v44, %v6444_v21  ;;  %v6991_v31 = vsel %vm6988_vm11, %v15941_v43, %v5574_v40 }
 0x4dd   :  { %v6622_v11 = vpop.permute.xlu1 %6621  ;;  %v5824_v60 = vpop.permute.xlu0 %5823 }
 0x4de   :  { %v7030_v13 = vsel %vm7028_vm1, %v7022_v33, %v6622_v11  ;;  %v6999_v50 = vsel %vm6996_vm12, %v6991_v31, %v5824_v60 }
 0x4e1   :  { %v6792_v26 = vpop.permute.xlu1 %6791  ;;  %v6042_v3 = vpop.permute.xlu0 %6041 }
 0x4e2   :  { %v7038_v30 = vsel %vm7036_vm0, %v7030_v13, %v6792_v26  ;;  %v7007_v52 = vsel %vm7004_vm13, %v6999_v50, %v6042_v3 }
 0x4e5   :  { %v6970_v7 = vpop.permute.xlu1 %6969  ;;  %v6228_v63 = vpop.permute.xlu0 %6227 }
 0x4e6   :  { %v7046_v47 = vsel %vm15744_vm5, %v7038_v30, %v6970_v7  ;;  %v7015_v59 = vsel %vm7012_vm14, %v7007_v52, %v6228_v63 }
 0x4e7   :  { %9421 = vmatmul.mubr.msk.f32.gmra.mrb[18].mxu1 %vm15743_vm15, %v7046_v47 }
 0x4e8   :  { %9423 = vmatprep.mubr.msk.f32.mxu1 %vm15741_vm9, %v15932_v46 }
 0x4e9   :  { %v6446_v5 = vpop.permute.xlu1 %6445 }
 0x4ea   :  { %v7023_v29 = vsel %vm7020_vm4, %v7015_v59, %v6446_v5 }
 0x4ed   :  { %v6624_v25 = vpop.permute.xlu1 %6623 }
 0x4ee   :  { %v7031_v37 = vsel %vm7028_vm1, %v7023_v29, %v6624_v25 }
 0x4f1   :  { %v6794_v49 = vpop.permute.xlu1 %6793 }
 0x4f2   :  { %v9377_v12 = vpop.f32.mrb[4].mxu1  ;;  %v7039_v45 = vsel %vm7036_vm0, %v7031_v37, %v6794_v49 }
 0x4f3   :  { %v3462_v36 = vadd.f32 %v14290_v16, %v9377_v12  ;;  %v3456_v55 = vpop.f32.mrb[5].mxu1 }
 0x4f4   :  { %v3457_v15 = vadd.f32 %v14290_v16, %v3456_v55 }
 0x4f5   :  { %vm3564_vm7 = vcmp.gt.f32.partialorder %v3462_v36, 0.0  ;;  %v3625_v21 = vmul.f32 %v10926_v4, %v3462_v36  ;;  %v6972_v40 = vpop.permute.xlu1 %6971 }
 0x4f6   :  { %vm3563_vm8 = vcmp.gt.f32.partialorder %v3457_v15, 0.0  ;;  %v3624_v11 = vmul.f32 %v10926_v4, %v3457_v15  ;;  %v7047_v28 = vsel %vm15744_vm5, %v7039_v45, %v6972_v40  ;;  %vm15945_vm5 = vcmask 1044480  }
 0x4f7   :  { %v14389_v2 = vsel %vm3564_vm7, %v3462_v36, %v3625_v21  ;;  %9424 = vmatmul.mubr.msk.f32.gmra.mrb[20].mxu1 %vm15743_vm15, %v7047_v28  ;;  %vm15942_vm7 = vcmask 1041408   ;;  %vm15944_vm15 = vcmask 1043456  }
 0x4f8   :  { %v3745_v27 = vmax.f32 %v3717_v35, %v14389_v2  ;;  %v14396_v62 = vsel %vm3563_vm8, %v3457_v15, %v3624_v11  ;;  %9426 = vmatprep.mubr.msk.f32.mxu1 %vm15741_vm9, %v15932_v46 }
 0x4f9   :  { %v3744_v14 = vmax.f32 %v3716_v34, %v14396_v62 }
 0x4fa   :  { %v3812_v20 = vrot.slane %v3745_v27, 1  ;;  %v3910_v26 = vrot.slane %v3745_v27, 2 }
 0x4fb   :  { %v3811_v44 = vrot.slane %v3744_v14, 1  ;;  %v3909_v33 = vrot.slane %v3744_v14, 2 }
 0x4fc   :  { %v3871_v60 = vmax.f32 %v3745_v27, %v3812_v20 }
 0x4fd   :  { %v3813_v13 = vsel %vm495_vm3, %v3811_v44, %v3812_v20  ;;  %v3911_v19 = vsel %vm656_vm2, %v3909_v33, %v3910_v26 }
 0x4fe   :  { %v3870_v35 = vmax.f32 %v3744_v14, %v3813_v13  ;;  %v3969_v7 = vmax.f32 %v3871_v60, %v3910_v26  ;;  %v4706_v26 = vcombine.high %v14222_v39, %v14222_v39 }
 0x500   :  { %v3968_v30 = vmax.f32 %v3870_v35, %v3911_v19  ;;  %v4097_v43 = vrot.slane %v3969_v7, 4  ;;  %v4125_v50 = vrot.slane %v3969_v7, 5  ;;  %v4153_v59 = vrot.slane %v3969_v7, 6 }
 0x501   :  { %v4713_v35 = vrot.slane %v4706_v26, %v11122_v9 }
 0x502   :  { %v3999_v47 = vrot.slane %v3968_v30, 1  ;;  %v4027_v3 = vrot.slane %v3968_v30, 2  ;;  %v9365_v5 = vpop.f32.mrb[44].mxu0  ;;  %v4055_v1 = vrot.slane %v3968_v30, 3 }
 0x503   :  { %v3422_v25 = vadd.f32 %v14290_v16, %v9365_v5  ;;  %v3416_v48 = vpop.f32.mrb[45].mxu0  ;;  %v6140_v5 = vrot.slane %v6133_v53, %v11122_v9 }
 0x504   :  { %v4182_v34 = vsel %vm4170_vm6, %v3968_v30, %v3999_v47  ;;  %v3417_v57 = vadd.f32 %v14290_v16, %v3416_v48  ;;  %v4744_v30 = vcombine.high %v14235_v23, %v14235_v23 }
 0x505   :  { %v4197_v31 = vsel %vm15942_vm7, %v4182_v34, %v4027_v3  ;;  %vm3556_vm8 = vcmp.gt.f32.partialorder %v3422_v25, 0.0  ;;  %v3617_v63 = vmul.f32 %v10926_v4, %v3422_v25 }
 0x506   :  { %v4211_v52 = vsel %vm15943_vm10, %v4197_v31, %v4055_v1  ;;  %vm3555_vm9 = vcmp.gt.f32.partialorder %v3417_v57, 0.0  ;;  %v3616_v49 = vmul.f32 %v10926_v4, %v3417_v57  ;;  %vm15947_vm10 = vmmov %vm15942_vm7  ;;  %v6336_v48 = vcombine.low %v4713_v35, %v4744_v30 }
 0x507   :  { %v4226_v12 = vsel %vm15944_vm15, %v4211_v52, %v4097_v43  ;;  %v14414_v29 = vsel %vm3556_vm8, %v3422_v25, %v3617_v63  ;;  %v5730_v1 = vcombine.low %v14235_v23, %v4713_v35  ;;  %v6141_v43 = vcombine.low %v6140_v5, %v14251_v51 }
 0x508   :  { %v4241_v36 = vsel %vm15945_vm5, %v4226_v12, %v4125_v50  ;;  %v3741_v55 = vmax.f32 %v3713_v58, %v14414_v29  ;;  %v14421_v37 = vsel %vm3555_vm9, %v3417_v57, %v3616_v49  ;;  %vm15948_vm9 = vcmask 1042432   ;;  %vm15949_vm5 = vmmov %vm15944_vm15 }
 0x509   :  { %v14424_v15 = vsel %vm656_vm2, %v4241_v36, %v4153_v59  ;;  %v3740_v45 = vmax.f32 %v3712_v0, %v14421_v37  ;;  %vm15950_vm15 = vcmask 1044480   ;;  %v5955_v52 = vrot.slane %v5947_v6, %v11122_v9 }
 0x50a   :  { %v3806_v21 = vrot.slane %v3741_v55, 1  ;;  %v3904_v40 = vrot.slane %v3741_v55, 2  ;;  %v6350_v49 = vrot.slane %v6336_v48, %v11122_v9  ;;  %v6359_v59 = vrot.slane %v6351_v10, %v11122_v9 }
 0x50b   :  { %v3805_v11 = vrot.slane %v3740_v45, 1  ;;  %v3903_v28 = vrot.slane %v3740_v45, 2  ;;  %v5739_v12 = vrot.slane %v5730_v1, %v11122_v9  ;;  %v4619_v24 = vcombine.high %v14424_v15, %v14424_v15 }
 0x50c   :  { %v3867_v27 = vmax.f32 %v3741_v55, %v3806_v21  ;;  %v6149_v6 = vrot.slane %v6141_v43, %v11122_v9  ;;  %v14478_v10 = vrot.slane %v14424_v15, %v11122_v9 }
 0x50d   :  { %v3807_v14 = vsel %vm495_vm3, %v3805_v11, %v3806_v21  ;;  %v3905_v41 = vsel %vm656_vm2, %v3903_v28, %v3904_v40 }
 0x50e   :  { %v3866_v42 = vmax.f32 %v3740_v45, %v3807_v14  ;;  %v3965_v20 = vmax.f32 %v3867_v27, %v3904_v40 }
 0x510   :  { %v3964_v58 = vmax.f32 %v3866_v42, %v3905_v41  ;;  %v4095_v13 = vrot.slane %v3965_v20, 4  ;;  %v4123_v7 = vrot.slane %v3965_v20, 5  ;;  %v4151_v39 = vrot.slane %v3965_v20, 6 }
 0x512   :  { %v3997_v44 = vrot.slane %v3964_v58, 1  ;;  %v4025_v33 = vrot.slane %v3964_v58, 2  ;;  %v4053_v0 = vrot.slane %v3964_v58, 3 }
 0x514   :  { %v4180_v60 = vsel %vm4170_vm6, %v3964_v58, %v3997_v44 }
 0x515   :  { %v4195_v19 = vsel %vm15947_vm10, %v4180_v60, %v4025_v33 }
 0x516   :  { %v4209_v47 = vsel %vm15948_vm9, %v4195_v19, %v4053_v0 }
 0x517   :  { %v4224_v3 = vsel %vm15949_vm5, %v4209_v47, %v4095_v13  ;;  %vm15953_vm5 = vcmask 1041408  }
 0x518   :  { %v4239_v61 = vsel %vm15950_vm15, %v4224_v3, %v4123_v7  ;;  %vm15954_vm15 = vcmask 1042432  }
 0x519   :  { %v4253_v25 = vsel %vm656_vm2, %v4239_v61, %v4151_v39 }
 0x51a   :  { %v4548_v34 = vrot.slane %v4253_v25, %v11122_v9  ;;  %v4541_v57 = vcombine.high %v4253_v25, %v4253_v25 }
 0x51c   :  { %v4556_v31 = vcombine.high %v4548_v34, %v4548_v34  ;;  %v14450_v63 = vrot.slane %v4548_v34, %v11122_v9  ;;  %v4555_v50 = vrot.slane %v4541_v57, %v11122_v9 }
 0x51e   :  { %v14464_v36 = vrot.slane %v4556_v31, %v11122_v9  ;;  %v4578_v55 = vcombine.high %v14450_v63, %v14450_v63  ;;  %v14469_v45 = vrot.slane %v4555_v50, %v11122_v9  ;;  %v4714_v54 = vcombine.high %v4555_v50, %v4555_v50 }
 0x51f   :  { %v9142_v22 = vcombine.high %v14235_v23, %v14450_v63  ;;  %v5141_v41 = vcombine.low %v14235_v23, %v14450_v63 }
 0x520   :  { %v5932_v21 = vcombine.low %v14450_v63, %v14464_v36  ;;  %v9137_v40 = vcombine.high %v14450_v63, %v14464_v36  ;;  %v5142_v11 = vcombine.low %v14464_v36, %v4578_v55  ;;  %v14486_v28 = vrot.slane %v4714_v54, %v11122_v9 }
 0x521   :  { %v5457_v27 = vcombine.low %v4713_v35, %v14464_v36  ;;  %v4579_v14 = vcombine.high %v14464_v36, %v14464_v36  ;;  %v4745_v15 = vcombine.high %v14469_v45, %v14469_v45  ;;  %v5746_v53 = vrot.slane %v9142_v22, %v11122_v9 }
 0x522   :  { %v5946_v42 = vrot.slane %v5932_v21, %v11122_v9  ;;  %v14497_v58 = vrot.slane %v9137_v40, %v11122_v9  ;;  %v14500_v20 = vrot.slane %v5142_v11, %v11122_v9  ;;  %v5459_v26 = vcombine.low %v14469_v45, %v14486_v28 }
 0x523   :  { %v5473_v44 = vrot.slane %v5457_v27, %v11122_v9  ;;  %v5143_v33 = vcombine.low %v4579_v14, %v14469_v45  ;;  %v5732_v18 = vcombine.low %v14486_v28, %v4745_v15  ;;  %v5754_v47 = vcombine.low %v5739_v12, %v5746_v53 }
 0x524   :  { %v5948_v23 = vcombine.low %v14265_v32, %v5946_v42  ;;  %v6352_v0 = vcombine.low %v6350_v49, %v14497_v58  ;;  %v6142_v60 = vcombine.low %v5739_v12, %v14500_v20  ;;  %v14512_v13 = vrot.slane %v5459_v26, %v11122_v9 }
 0x525   :  { %v9380_v19 = vpop.f32.mrb[6].mxu1  ;;  %v5488_v35 = vcombine.low %v14265_v32, %v5473_v44  ;;  %v14516_v30 = vrot.slane %v5143_v33, %v11122_v9  ;;  %v14519_v7 = vrot.slane %v5732_v18, %v11122_v9  ;;  %v5762_v54 = vrot.slane %v5754_v47, %v11122_v9 }
 0x526   :  { %v3472_v39 = vadd.f32 %v14290_v16, %v9380_v19  ;;  %v3466_v3 = vpop.f32.mrb[7].mxu1  ;;  %v5962_v5 = vrot.slane %v5948_v23, %v11122_v9  ;;  %v6366_v61 = vrot.slane %v6352_v0, %v11122_v9  ;;  %v6156_v25 = vrot.slane %v6142_v60, %v11122_v9 }
 0x527   :  { %v3467_v48 = vadd.f32 %v14290_v16, %v3466_v3  ;;  %v5489_v32 = vcombine.low %v14497_v58, %v14512_v13  ;;  %v5496_v1 = vrot.slane %v5488_v35, %v11122_v9  ;;  %v5755_v34 = vcombine.low %v14516_v30, %v14519_v7 }
 0x528   :  { %vm3566_vm7 = vcmp.gt.f32.partialorder %v3472_v39, 0.0  ;;  %v3627_v57 = vmul.f32 %v10926_v4, %v3472_v39  ;;  %v5963_v43 = vcombine.low %v5955_v52, %v5962_v5  ;;  %v6367_v31 = vcombine.low %v6359_v59, %v6366_v61 }
 0x529   :  { %vm3565_vm8 = vcmp.gt.f32.partialorder %v3467_v48, 0.0  ;;  %v3626_v50 = vmul.f32 %v10926_v4, %v3467_v48  ;;  %v6157_v49 = vcombine.low %v6149_v6, %v6156_v25  ;;  %v5503_v12 = vrot.slane %v5489_v32, %v11122_v9 }
 0x52a   :  { %v14534_v55 = vsel %vm3566_vm7, %v3472_v39, %v3627_v57  ;;  %6043 = vrot.lane.b32.xlu0 %v5963_v43, %s9695_s12  ;;  %6447 = vrot.lane.b32.xlu1 %v6367_v31, %s9697_s20  ;;  %v5769_v22 = vrot.slane %v5755_v34, %v11122_v9  ;;  %v5157_v27 = vrot.slane %v5141_v41, %v11122_v9  ;;  %vm15955_vm7 = vcmask 1043456  }
 0x52b   :  { %v3719_v52 = vmax.f32 %v14389_v2, %v14534_v55  ;;  %v14542_v59 = vsel %vm3565_vm8, %v3467_v48, %v3626_v50  ;;  %v5504_v21 = vcombine.low %v5496_v1, %v5503_v12  ;;  %v5173_v14 = vcombine.low %v14500_v20, %v14516_v30 }
 0x52c   :  { %v3718_v6 = vmax.f32 %v14396_v62, %v14542_v59  ;;  %v5770_v40 = vcombine.low %v5762_v54, %v5769_v22  ;;  %v4633_v15 = vrot.slane %v4619_v24, %v11122_v9  ;;  %v4634_v44 = vcombine.high %v14478_v10, %v14478_v10 }
 0x52d   :  { %v9368_v11 = vpop.f32.mrb[46].mxu0  ;;  %v5172_v18 = vcombine.low %v14251_v51, %v5157_v27  ;;  %v14557_v53 = vrot.slane %v5173_v14, %v11122_v9  ;;  %v14578_v61 = vrot.slane %v14478_v10, %v11122_v9  ;;  %v15952_v14 = vld [vmem:[#allocation52_spill] sm:$0xff]  ;;  %vm15956_vm8 = vcmask 1044480  }
 0x52e   :  { %v3432_v42 = vadd.f32 %v14290_v16, %v9368_v11  ;;  %6229 = vrot.lane.b32.xlu0 %v6157_v49, %s9696_s19  ;;  %v3426_v26 = vpop.f32.mrb[47].mxu0  ;;  %v14566_v60 = vrot.slane %v4634_v44, %v11122_v9  ;;  %v14569_v51 = vrot.slane %v4633_v15, %v11122_v9  ;;  %v4730_v47 = vcombine.high %v4633_v15, %v4633_v15  ;;  %v15951_v11 = vld [vmem:[#allocation51_spill] sm:$0xff] }
 0x52f   :  { %v3427_v33 = vadd.f32 %v14290_v16, %v3426_v26  ;;  %v14562_v23 = vrot.slane %v5172_v18, %v11122_v9  ;;  %v4656_v10 = vcombine.high %v14578_v61, %v14578_v61  ;;  %v6529_v27 = vcombine.low %v15951_v11, %v14450_v63 }
 0x530   :  { %vm3558_vm10 = vcmp.gt.f32.partialorder %v3432_v42, 0.0  ;;  %v3619_v41 = vmul.f32 %v10926_v4, %v3432_v42  ;;  %v14585_v1 = vrot.slane %v4730_v47, %v11122_v9  ;;  %v9138_v22 = vcombine.high %v14578_v61, %v14566_v60 }
 0x531   :  { %vm3557_vm9 = vcmp.gt.f32.partialorder %v3427_v33, 0.0  ;;  %v3618_v24 = vmul.f32 %v10926_v4, %v3427_v33  ;;  %v5188_v39 = vcombine.low %v14562_v23, %v14557_v53  ;;  %v6707_v15 = vcombine.low %v15952_v14, %v14464_v36 }
 0x532   :  { %v3679_v0 = vsel %vm3558_vm10, %v3432_v42, %v3619_v41  ;;  %5577 = vrot.lane.b32.xlu0 %v5504_v21, %s9693_s15  ;;  %v5554_v49 = vcombine.low %v14569_v51, %v14585_v1  ;;  %v5192_v21 = vcombine.low %v14566_v60, %v4656_v10  ;;  %v9154_v41 = vcombine.high %v15951_v11, %v14450_v63 }
 0x533   :  { %v3715_v19 = vmax.f32 %v14414_v29, %v3679_v0  ;;  %v3678_v35 = vsel %vm3557_vm9, %v3427_v33, %v3618_v24  ;;  %v4657_v29 = vcombine.high %v14566_v60, %v14566_v60  ;;  %v5981_v24 = vcombine.low %v14578_v61, %v14566_v60 }
 0x534   :  { %v3714_v3 = vmax.f32 %v14421_v37, %v3678_v35  ;;  %v4747_v37 = vcombine.high %v14569_v51, %v14569_v51  ;;  %v14608_v33 = vrot.slane %v5554_v49, %v11122_v9  ;;  %v14622_v35 = vrot.slane %v5192_v21, %v11122_v9 }
 0x535   :  { %v3743_v5 = vmax.f32 %v3715_v19, %v14309_v17  ;;  %v5238_v31 = vcombine.low %v4657_v29, %v14569_v51  ;;  %v14619_v19 = vrot.slane %v9138_v22, %v11122_v9  ;;  %v6892_v10 = vrot.slane %v9154_v41, %v11122_v9 }
 0x536   :  { %v3742_v25 = vmax.f32 %v3714_v3, %v14313_v38  ;;  %5827 = vrot.lane.b32.xlu0 %v5770_v40, %s9694_s26  ;;  %v5804_v12 = vcombine.low %v14585_v1, %v4747_v37 }
 0x537   :  { %v3809_v48 = vrot.slane %v3743_v5, 1  ;;  %v3907_v32 = vrot.slane %v3743_v5, 2  ;;  %v14605_v42 = vrot.slane %v5238_v31, %v11122_v9  ;;  %v14639_v31 = vrot.slane %v5981_v24, %v11122_v9 }
 0x538   :  { %v3808_v17 = vrot.slane %v3742_v25, 1  ;;  %v3906_v34 = vrot.slane %v3742_v25, 2  ;;  %v14611_v18 = vrot.slane %v5804_v12, %v11122_v9 }
 0x539   :  { %v3869_v57 = vmax.f32 %v3743_v5, %v3809_v48  ;;  %v6536_v5 = vrot.slane %v6529_v27, %v11122_v9 }
 0x53a   :  { %v3810_v38 = vsel %vm495_vm3, %v3808_v17, %v3809_v48  ;;  %v3908_v43 = vsel %vm656_vm2, %v3906_v34, %v3907_v32  ;;  %v6409_v48 = vcombine.low %v14619_v19, %v14608_v33 }
 0x53b   :  { %v3868_v50 = vmax.f32 %v3742_v25, %v3810_v38  ;;  %v3967_v40 = vmax.f32 %v3869_v57, %v3907_v32  ;;  %v6714_v25 = vrot.slane %v6707_v15, %v11122_v9  ;;  %v6911_v32 = vcombine.low %v14605_v42, %v14611_v18 }
 0x53c   :  { %v6537_v34 = vcombine.low %v6536_v5, %v14500_v20  ;;  %v6893_v20 = vcombine.low %v6892_v10, %v14516_v30  ;;  %v14648_v11 = vrot.slane %v6409_v48, %v11122_v9 }
 0x53d   :  { %v3966_v54 = vmax.f32 %v3868_v50, %v3908_v43  ;;  %v4096_v47 = vrot.slane %v3967_v40, 4  ;;  %v4124_v63 = vrot.slane %v3967_v40, 5  ;;  %v4152_v37 = vrot.slane %v3967_v40, 6 }
 0x53e   :  { %v6191_v43 = vcombine.low %v14622_v35, %v14605_v42  ;;  %v14652_v14 = vrot.slane %v6537_v34, %v11122_v9  ;;  %v14655_v15 = vrot.slane %v6911_v32, %v11122_v9 }
 0x53f   :  { %v3998_v26 = vrot.slane %v3966_v54, 1  ;;  %v4026_v44 = vrot.slane %v3966_v54, 2  ;;  %v4054_v0 = vrot.slane %v3966_v54, 3 }
 0x541   :  { %v4181_v36 = vsel %vm4170_vm6, %v3966_v54, %v3998_v26  ;;  %v6715_v54 = vcombine.low %v6714_v25, %v14497_v58 }
 0x542   :  { %v4196_v3 = vsel %vm15953_vm5, %v4181_v36, %v4026_v44 }
 0x543   :  { %v4210_v29 = vsel %vm15954_vm15, %v4196_v3, %v4054_v0  ;;  %v14665_v36 = vrot.slane %v6715_v54, %v11122_v9 }
 0x544   :  { %v4225_v17 = vsel %vm15955_vm7, %v4210_v29, %v4096_v47  ;;  %v14668_v47 = vrot.slane %v6893_v20, %v11122_v9 }
 0x545   :  { %v4240_v57 = vsel %vm15956_vm8, %v4225_v17, %v4124_v63  ;;  %v9383_v38 = vpop.f32.mrb[8].mxu1 }
 0x546   :  { %v3482_v50 = vadd.f32 %v14290_v16, %v9383_v38  ;;  %v3476_v49 = vpop.f32.mrb[9].mxu1  ;;  %v4254_v12 = vsel %vm656_vm2, %v4240_v57, %v4152_v37 }
 0x547   :  { %v3477_v22 = vadd.f32 %v14290_v16, %v3476_v49  ;;  %v4580_v21 = vcombine.high %v4254_v12, %v4254_v12  ;;  %v4587_v40 = vrot.slane %v4254_v12, %v11122_v9 }
 0x548   :  { %vm3568_vm10 = vcmp.gt.f32.partialorder %v3482_v50, 0.0  ;;  %v3629_v27 = vmul.f32 %v10926_v4, %v3482_v50 }
 0x549   :  { %vm3567_vm9 = vcmp.gt.f32.partialorder %v3477_v22, 0.0  ;;  %v3628_v26 = vmul.f32 %v10926_v4, %v3477_v22  ;;  %v4595_v44 = vcombine.high %v4587_v40, %v4587_v40  ;;  %v14659_v41 = vrot.slane %v4587_v40, %v11122_v9 }
 0x54a   :  { %v14661_v24 = vsel %vm3568_vm10, %v3482_v50, %v3629_v27  ;;  %v4594_v0 = vrot.slane %v4580_v21, %v11122_v9 }
 0x54b   :  { %v3747_v3 = vmax.f32 %v3719_v52, %v14661_v24  ;;  %v14674_v5 = vsel %vm3567_vm9, %v3477_v22, %v3628_v26  ;;  %v4616_v25 = vrot.slane %v4595_v44, %v11122_v9  ;;  %v4617_v63 = vcombine.high %v14659_v41, %v14659_v41 }
 0x54c   :  { %v3746_v29 = vmax.f32 %v3718_v6, %v14674_v5  ;;  %v14684_v48 = vrot.slane %v4594_v0, %v11122_v9  ;;  %v5964_v32 = vcombine.low %v14469_v45, %v14659_v41  ;;  %v4722_v2 = vcombine.high %v4594_v0, %v4594_v0 }
 0x54d   :  { %v3815_v55 = vrot.slane %v3747_v3, 1  ;;  %v3913_v52 = vrot.slane %v3747_v3, 2  ;;  %v5189_v37 = vcombine.low %v14659_v41, %v4616_v25  ;;  %v4618_v17 = vcombine.high %v4616_v25, %v4616_v25 }
 0x54e   :  { %v3814_v34 = vrot.slane %v3746_v29, 1  ;;  %v3912_v10 = vrot.slane %v3746_v29, 2  ;;  %v5505_v57 = vcombine.low %v4616_v25, %v4617_v63  ;;  %v5971_v38 = vrot.slane %v5964_v32, %v11122_v9 }
 0x54f   :  { %v3873_v50 = vmax.f32 %v3747_v3, %v3815_v55  ;;  %v14691_v62 = vrot.slane %v5189_v37, %v11122_v9  ;;  %v5506_v59 = vcombine.low %v4618_v17, %v14684_v48  ;;  %v4729_v6 = vrot.slane %v4722_v2, %v11122_v9 }
 0x550   :  { %v3816_v49 = vsel %vm495_vm3, %v3814_v34, %v3815_v55  ;;  %v3914_v12 = vsel %vm656_vm2, %v3912_v10, %v3913_v52  ;;  %v5515_v54 = vrot.slane %v5505_v57, %v11122_v9  ;;  %v5972_v20 = vcombine.low %v14497_v58, %v5971_v38 }
 0x551   :  { %v3971_v22 = vmax.f32 %v3873_v50, %v3913_v52  ;;  %v3872_v21 = vmax.f32 %v3746_v29, %v3816_v49  ;;  %v6538_v40 = vcombine.low %v14516_v30, %v14691_v62  ;;  %v5522_v27 = vrot.slane %v5506_v59, %v11122_v9 }
 0x552   :  { %v5979_v26 = vrot.slane %v5972_v20, %v11122_v9  ;;  %v6716_v44 = vcombine.low %v14512_v13, %v5515_v54  ;;  %v9133_v0 = vcombine.high %v14659_v41, %v4616_v25  ;;  %v5771_v3 = vcombine.low %v14684_v48, %v4729_v6 }
 0x553   :  { %v4098_v63 = vrot.slane %v3971_v22, 4  ;;  %v4126_v32 = vrot.slane %v3971_v22, 5  ;;  %v4154_v2 = vrot.slane %v3971_v22, 6  ;;  %v3970_v55 = vmax.f32 %v3872_v21, %v3914_v12 }
 0x554   :  { %v6552_v58 = vrot.slane %v6538_v40, %v11122_v9  ;;  %v5537_v29 = vcombine.low %v5515_v54, %v5522_v27  ;;  %v6730_v52 = vrot.slane %v6716_v44, %v11122_v9  ;;  %v14709_v37 = vrot.slane %v9133_v0, %v11122_v9 }
 0x555   :  { %v4000_v17 = vrot.slane %v3970_v55, 1  ;;  %v4028_v34 = vrot.slane %v3970_v55, 2  ;;  %v4056_v10 = vrot.slane %v3970_v55, 3  ;;  %v5779_v57 = vrot.slane %v5771_v3, %v11122_v9 }
 0x556   :  { %v6553_v38 = vcombine.low %v14652_v14, %v6552_v58  ;;  %v5545_v50 = vrot.slane %v5537_v29, %v11122_v9  ;;  %v6731_v59 = vcombine.low %v14665_v36, %v6730_v52  ;;  %v6158_v49 = vcombine.low %v14486_v28, %v4616_v25 }
 0x557   :  { %v4183_v12 = vsel %vm4170_vm6, %v3970_v55, %v4000_v17  ;;  %v5787_v54 = vcombine.low %v14709_v37, %v5779_v57  ;;  %v6894_v20 = vcombine.low %v14519_v7, %v14709_v37  ;;  %v5507_v22 = vcombine.low %v4729_v6, %v14566_v60 }
 0x558   :  { %v4198_v21 = vsel %vm15953_vm5, %v4183_v12, %v4028_v34  ;;  %6625 = vrot.lane.b32.xlu1 %v6553_v38, %s9698_s4  ;;  %v5980_v14 = vcombine.low %v5979_v26, %v5545_v50  ;;  %v6165_v40 = vrot.slane %v6158_v49, %v11122_v9  ;;  %v4746_v36 = vcombine.high %v14684_v48, %v14684_v48 }
 0x559   :  { %v4212_v28 = vsel %vm15954_vm15, %v4198_v21, %v4056_v10  ;;  %v14728_v25 = vrot.slane %v5787_v54, %v11122_v9  ;;  %v6908_v44 = vrot.slane %v6894_v20, %v11122_v9  ;;  %v5529_v7 = vrot.slane %v5507_v22, %v11122_v9 }
 0x55a   :  { %v4227_v60 = vsel %vm15955_vm7, %v4212_v28, %v4098_v63  ;;  %6045 = vrot.lane.b32.xlu0 %v5980_v14, %s9695_s12  ;;  %v6166_v26 = vcombine.low %v14516_v30, %v6165_v40  ;;  %v9149_v0 = vcombine.high %v14469_v45, %v14659_v41  ;;  %v6369_v3 = vcombine.low %v4729_v6, %v4746_v36 }
 0x55b   :  { %v4242_v55 = vsel %vm15956_vm8, %v4227_v60, %v4126_v32  ;;  %v6909_v58 = vcombine.low %v14668_v47, %v6908_v44  ;;  %v5538_v29 = vcombine.low %v5529_v7, %v14619_v19  ;;  %v9143_v52 = vcombine.high %v14684_v48, %v14578_v61 }
 0x55c   :  { %6795 = vrot.lane.b32.xlu1 %v6731_v59, %s9699_s21  ;;  %v6173_v63 = vrot.slane %v6166_v26, %v11122_v9  ;;  %v6376_v17 = vrot.slane %v9149_v0, %v11122_v9  ;;  %v6383_v30 = vrot.slane %v6369_v3, %v11122_v9  ;;  %v5191_v45 = vcombine.low %v14684_v48, %v14578_v61 }
 0x55d   :  { %v5552_v41 = vrot.slane %v5538_v29, %v11122_v9  ;;  %v5786_v47 = vrot.slane %v9143_v52, %v11122_v9  ;;  %v6732_v6 = vcombine.low %v5522_v27, %v5529_v7  ;;  %v4256_v32 = vsel %vm656_vm2, %v4242_v55, %v4154_v2 }
 0x55e   :  { %v6174_v34 = vcombine.low %v6173_v63, %v14728_v25  ;;  %v6384_v10 = vcombine.low %v14512_v13, %v6376_v17  ;;  %v6385_v38 = vcombine.low %v5522_v27, %v6383_v30  ;;  %v14754_v59 = vrot.slane %v5191_v45, %v11122_v9 }
 0x55f   :  { %v5553_v49 = vcombine.low %v5545_v50, %v5552_v41  ;;  %v5788_v12 = vcombine.low %v5786_v47, %v14605_v42  ;;  %v6739_v61 = vrot.slane %v6732_v6, %v11122_v9  ;;  %v4789_v48 = vcombine.high %v4256_v32, %v4256_v32 }
 0x560   :  { %6231 = vrot.lane.b32.xlu0 %v6174_v34, %s9696_s19  ;;  %6973 = vrot.lane.b32.xlu1 %v6909_v58, %s9700_s23  ;;  %v6392_v2 = vrot.slane %v6384_v10, %v11122_v9  ;;  %v6399_v54 = vrot.slane %v6385_v38, %v11122_v9  ;;  %v6554_v13 = vcombine.low %v14709_v37, %v14754_v59  ;;  %vm15957_vm7 = vcmask 1041408  }
 0x561   :  { %v5802_v27 = vrot.slane %v5788_v12, %v11122_v9  ;;  %v6740_v50 = vcombine.low %v6739_v61, %v14648_v11  ;;  %v4796_v20 = vrot.slane %v4256_v32, %v11122_v9  ;;  %v6910_v22 = vcombine.low %v5779_v57, %v5786_v47 }
 0x562   :  { %v6400_v21 = vcombine.low %v6392_v2, %v6399_v54  ;;  %v6561_v14 = vrot.slane %v6554_v13, %v11122_v9  ;;  %v14769_v40 = vrot.slane %v4789_v48, %v11122_v9  ;;  %v5221_v36 = vcombine.low %v14691_v62, %v14709_v37 }
 0x563   :  { %v5803_v28 = vcombine.low %v14728_v25, %v5802_v27  ;;  %v4804_v44 = vcombine.high %v4796_v20, %v4796_v20  ;;  %v14775_v7 = vrot.slane %v4796_v20, %v11122_v9  ;;  %v6918_v60 = vrot.slane %v6910_v22, %v11122_v9 }
 0x564   :  { %5579 = vrot.lane.b32.xlu0 %v5553_v49, %s9693_s15  ;;  %6449 = vrot.lane.b32.xlu1 %v6400_v21, %s9697_s20  ;;  %v6199_v57 = vrot.slane %v6191_v43, %v11122_v9  ;;  %v6005_v62 = vcombine.low %v14639_v31, %v14619_v19  ;;  %v14797_v43 = vrot.slane %v14769_v40, %v11122_v9  ;;  %vm15958_vm8 = vcmask 1042432  }
 0x565   :  { %v9386_v37 = vpop.f32.mrb[10].mxu1  ;;  %v14787_v25 = vrot.slane %v4804_v44, %v11122_v9  ;;  %v4826_v26 = vcombine.high %v14775_v7, %v14775_v7  ;;  %v5982_v0 = vcombine.low %v14569_v51, %v14775_v7  ;;  %v6926_v3 = vcombine.low %v6918_v60, %v14655_v15 }
 0x566   :  { %v3492_v55 = vadd.f32 %v14290_v16, %v9386_v37  ;;  %v3486_v58 = vpop.f32.mrb[11].mxu1  ;;  %v6562_v29 = vcombine.low %v6561_v14, %v6199_v57  ;;  %v9150_v19 = vcombine.high %v14569_v51, %v14775_v7  ;;  %v6013_v48 = vrot.slane %v6005_v62, %v11122_v9 }
 0x567   :  { %v3487_v31 = vadd.f32 %v14290_v16, %v3486_v58  ;;  %v5983_v52 = vcombine.low %v14787_v25, %v4826_v26  ;;  %v5997_v63 = vrot.slane %v5982_v0, %v11122_v9  ;;  %v6175_v15 = vcombine.low %v14585_v1, %v14787_v25 }
 0x568   :  { %vm3570_vm10 = vcmp.gt.f32.partialorder %v3492_v55, 0.0  ;;  %v3631_v17 = vmul.f32 %v10926_v4, %v3492_v55  ;;  %5829 = vrot.lane.b32.xlu0 %v5803_v28, %s9694_s26  ;;  %6627 = vrot.lane.b32.xlu1 %v6562_v29, %s9698_s4  ;;  %v9145_v30 = vcombine.high %v14775_v7, %v14787_v25  ;;  %v4827_v16 = vcombine.high %v14787_v25, %v14787_v25 }
 0x569   :  { %vm3569_vm9 = vcmp.gt.f32.partialorder %v3487_v31, 0.0  ;;  %v3630_v51 = vmul.f32 %v10926_v4, %v3487_v31  ;;  %v14815_v45 = vrot.slane %v5983_v52, %v11122_v9  ;;  %v6183_v1 = vrot.slane %v6175_v15, %v11122_v9 }
 0x56a   :  { %v3691_v41 = vsel %vm3570_vm10, %v3492_v55, %v3631_v17  ;;  %v14819_v47 = vrot.slane %v9145_v30, %v11122_v9  ;;  %v6022_v6 = vcombine.low %v4827_v16, %v14797_v43  ;;  %v6408_v61 = vrot.slane %v9150_v19, %v11122_v9 }
 0x56b   :  { %v3721_v32 = vmax.f32 %v14661_v24, %v3691_v41  ;;  %v3690_v34 = vsel %vm3569_vm9, %v3487_v31, %v3630_v51  ;;  %v6006_v10 = vcombine.low %v5997_v63, %v14815_v45  ;;  %v5222_v54 = vcombine.low %v14754_v59, %v14622_v35  ;;  %v9641_v35 = vld [vmem:[%s15664_s3] ss:$0 sm:$0xff]  ;;  %s9061_s3 = sld [smem:[#allocation3 + $0x1]] }
 0x56c   :  { %v3720_v38 = vmax.f32 %v14674_v5, %v3690_v34  ;;  %6797 = vrot.lane.b32.xlu1 %v6740_v50, %s9699_s21  ;;  %v6192_v49 = vcombine.low %v6183_v1, %v14819_v47  ;;  %v14828_v12 = vrot.slane %v6022_v6, %v11122_v9  ;;  %v14841_v50 = vrot.slane %v5221_v36, %v11122_v9 }
 0x56d   :  { %v6020_v2 = vrot.slane %v6006_v10, %v11122_v9  ;;  %v14845_v21 = vrot.slane %v5222_v54, %v11122_v9  ;;  %v4836_v41 = vcombine.high %v14769_v40, %v14769_v40  ;;  %vm15960_vm10 = vcmask 1044480  }
 0x56e   :  { %v6410_v24 = vcombine.low %v6408_v61, %v14828_v12  ;;  %v6206_v5 = vrot.slane %v6192_v49, %v11122_v9 }
 0x56f   :  { %v6021_v13 = vcombine.low %v6013_v48, %v6020_v2  ;;  %v5237_v60 = vcombine.low %v14841_v50, %v14845_v21  ;;  %v4843_v61 = vrot.slane %v4836_v41, %v11122_v9  ;;  %v6563_v48 = vcombine.low %v14775_v7, %v14787_v25 }
 0x570   :  { %6975 = vrot.lane.b32.xlu1 %v6926_v3, %s9700_s23  ;;  %v6424_v27 = vrot.slane %v6410_v24, %v11122_v9  ;;  %v6207_v14 = vcombine.low %v6199_v57, %v6206_v5 }
 0x571   :  { %6047 = vrot.lane.b32.xlu0 %v6021_v13, %s9695_s12  ;;  %v6572_v13 = vrot.slane %v6563_v48, %v11122_v9 }
 0x572   :  { %v9389_v20 = vpop.f32.mrb[12].mxu1  ;;  %v6425_v22 = vcombine.low %v14648_v11, %v6424_v27  ;;  %v6208_v27 = vcombine.low %v14797_v43, %v4843_v61 }
 0x573   :  { %v3502_v59 = vadd.f32 %v9641_v35, %v9389_v20  ;;  %v3496_v28 = vpop.f32.mrb[13].mxu1 }
 0x574   :  { %v3497_v44 = vadd.f32 %v9641_v35, %v3496_v28 }
 0x575   :  { %6233 = vrot.lane.b32.xlu0 %v6207_v14, %s9696_s19  ;;  %vm3572_vm5 = vcmp.gt.f32.partialorder %v3502_v59, 0.0  ;;  %v3633_v36 = vmul.f32 %v10926_v4, %v3502_v59 }
 0x576   :  { %vm3571_vm15 = vcmp.gt.f32.partialorder %v3497_v44, 0.0  ;;  %v3632_v11 = vmul.f32 %v10926_v4, %v3497_v44 }
 0x577   :  { %v3693_v62 = vsel %vm3572_vm5, %v3502_v59, %v3633_v36  ;;  %v6757_v59 = vcombine.low %v14815_v45, %v14828_v12  ;;  %vm15961_vm5 = vcmask 654336  }
 0x578   :  { %v3749_v57 = vmax.f32 %v3721_v32, %v3693_v62  ;;  %v3692_v37 = vsel %vm3571_vm15, %v3497_v44, %v3632_v11  ;;  %v6587_v44 = vcombine.low %v6572_v13, %v14819_v47  ;;  %v6215_v62 = vrot.slane %v6208_v27, %v11122_v9 }
 0x579   :  { %v3748_v26 = vmax.f32 %v3720_v38, %v3692_v37  ;;  %6451 = vrot.lane.b32.xlu0 %v6425_v22, %s9697_s20  ;;  %vm15962_vm15 = vcmask 736256  }
 0x57a   :  { %v3818_v0 = vrot.slane %v3749_v57, 1  ;;  %v3916_v3 = vrot.slane %v3749_v57, 2 }
 0x57b   :  { %v3817_v55 = vrot.slane %v3748_v26, 1  ;;  %v3915_v58 = vrot.slane %v3748_v26, 2 }
 0x57c   :  { %v3875_v29 = vmax.f32 %v3749_v57, %v3818_v0 }
 0x57d   :  { %v3819_v19 = vsel %vm495_vm3, %v3817_v55, %v3818_v0  ;;  %v3917_v31 = vsel %vm656_vm2, %v3915_v58, %v3916_v3  ;;  %vm15959_vm3 = vcmask 1043456  }
 0x57e   :  { %v3874_v52 = vmax.f32 %v3748_v26, %v3819_v19  ;;  %v3973_v15 = vmax.f32 %v3875_v29, %v3916_v3  ;;  %v6935_v19 = vcombine.low %v14819_v47, %v6215_v62 }
 0x580   :  { %v3972_v63 = vmax.f32 %v3874_v52, %v3917_v31  ;;  %v4099_v51 = vrot.slane %v3973_v15, 4  ;;  %v4127_v6 = vrot.slane %v3973_v15, 5  ;;  %v4155_v34 = vrot.slane %v3973_v15, 6 }
 0x581   :  { %v6765_v31 = vrot.slane %v6757_v59, %v11122_v9 }
 0x582   :  { %v4001_v17 = vrot.slane %v3972_v63, 1  ;;  %v4029_v4 = vrot.slane %v3972_v63, 2  ;;  %v4057_v30 = vrot.slane %v3972_v63, 3 }
 0x584   :  { %v4184_v16 = vsel %vm4170_vm6, %v3972_v63, %v4001_v17  ;;  %v6595_v63 = vrot.slane %v6587_v44, %v11122_v9 }
 0x585   :  { %v4199_v1 = vsel %vm15957_vm7, %v4184_v16, %v4029_v4  ;;  %v4845_v16 = vcombine.high %v14797_v43, %v14797_v43  ;;  %vm15963_vm7 = vmmov 0  }
 0x586   :  { %v4213_v32 = vsel %vm15958_vm8, %v4199_v1, %v4057_v30  ;;  %v6943_v1 = vrot.slane %v6935_v19, %v11122_v9  ;;  %vm15964_vm8 = vmmov %vm15961_vm5 }
 0x587   :  { %v4228_v10 = vsel %vm15959_vm3, %v4213_v32, %v4099_v51  ;;  %vm15965_vm3 = vmmov %vm15962_vm15 }
 0x588   :  { %v4243_v38 = vsel %vm15960_vm10, %v4228_v10, %v4127_v6  ;;  %v6426_v10 = vcombine.low %v4843_v61, %v4845_v16  ;;  %vm15966_vm10 = vmmov %vm15961_vm5 }
 0x589   :  { %v4257_v49 = vsel %vm656_vm2, %v4243_v38, %v4155_v34  ;;  %v5568_v34 = vrot.slane %v14608_v33, %v11122_v9 }
 0x58a   :  { %v4894_v2 = vrot.slane %v4257_v49, %v11122_v9  ;;  %v4887_v24 = vcombine.high %v4257_v49, %v4257_v49  ;;  %v6036_v49 = vrot.slane %v14828_v12, %v11122_v9  ;;  %v6433_v48 = vrot.slane %v6426_v10, %v11122_v9 }
 0x58c   :  { %v4902_v54 = vcombine.high %v4894_v2, %v4894_v2  ;;  %v4909_v40 = vrot.slane %v4894_v2, %v11122_v9  ;;  %v4901_v5 = vrot.slane %v4887_v24, %v11122_v9  ;;  %v6440_v33 = vrot.slane %v6433_v48, %v11122_v9 }
 0x58e   :  { %v4923_v20 = vrot.slane %v4902_v54, %v11122_v9  ;;  %v4924_v22 = vcombine.high %v4909_v40, %v4909_v40  ;;  %v6564_v14 = vcombine.low %v14797_v43, %v4909_v40  ;;  %v9155_v35 = vcombine.high %v14797_v43, %v4909_v40 }
 0x58f   :  { %v4916_v36 = vrot.slane %v4901_v5, %v11122_v9  ;;  %v4934_v51 = vcombine.high %v4901_v5, %v4901_v5  ;;  %v5818_v43 = vrot.slane %v14611_v18, %v11122_v9  ;;  %v14919_v18 = vld [vmem:[%s15666_s5] ss:$0 sm:$0xff] }
 0x590   :  { %v6741_v7 = vcombine.low %v4843_v61, %v4923_v20  ;;  %v9152_v25 = vcombine.high %v4909_v40, %v4923_v20  ;;  %v6565_v28 = vcombine.low %v4923_v20, %v4924_v22  ;;  %v4925_v11 = vcombine.high %v4923_v20, %v4923_v20 }
 0x591   :  { %v6579_v26 = vrot.slane %v6564_v14, %v11122_v9  ;;  %v6934_v29 = vrot.slane %v9155_v35, %v11122_v9  ;;  %v4941_v38 = vrot.slane %v4934_v51, %v11122_v9  ;;  %v4943_v24 = vcombine.high %v4916_v36, %v4916_v36 }
 0x592   :  { %v6749_v57 = vrot.slane %v6741_v7, %v11122_v9  ;;  %v6756_v37 = vrot.slane %v9152_v25, %v11122_v9  ;;  %v6586_v0 = vrot.slane %v6565_v28, %v11122_v9  ;;  %v6604_v3 = vcombine.low %v4925_v11, %v4916_v36 }
 0x593   :  { %v6774_v2 = vcombine.low %v4916_v36, %v4941_v38  ;;  %v6222_v61 = vrot.slane %v6215_v62, %v11122_v9  ;;  %v6952_v40 = vcombine.low %v4941_v38, %v4943_v24  ;;  %v14924_v20 = vstv %s9061_s3  ;;  %s9705_s3 = smov 64  }
 0x594   :  { %v6758_v55 = vcombine.low %v6749_v57, %v6756_v37  ;;  %v6588_v58 = vcombine.low %v6579_v26, %v6586_v0  ;;  %v6611_v45 = vrot.slane %v6604_v3, %v11122_v9  ;;  %v5576_v37 = vpop.permute.xlu0 %5575 }
 0x595   :  { %v6781_v54 = vrot.slane %v6774_v2, %v11122_v9  ;;  %v6959_v5 = vrot.slane %v6952_v40, %v11122_v9 }
 0x596   :  { %v6772_v52 = vrot.slane %v6758_v55, %v11122_v9  ;;  %v6602_v15 = vrot.slane %v6588_v58, %v11122_v9  ;;  %v6936_v17 = vcombine.low %v6934_v29, %v6611_v45  ;;  %v6618_v13 = vrot.slane %v6611_v45, %v11122_v9 }
 0x597   :  { %v6788_v12 = vrot.slane %v6781_v54, %v11122_v9  ;;  %v6966_v35 = vrot.slane %v6959_v5, %v11122_v9 }
 0x598   :  { %v6773_v4 = vcombine.low %v6765_v31, %v6772_v52  ;;  %v6603_v30 = vcombine.low %v6595_v63, %v6602_v15  ;;  %v6950_v41 = vrot.slane %v6936_v17, %v11122_v9  ;;  %v5826_v63 = vpop.permute.xlu0 %5825 }
 0x59a   :  { %v9392_v47 = vpop.f32.mrb[14].mxu1  ;;  %6799 = vrot.lane.b32.xlu0 %v6773_v4, %s9699_s21  ;;  %6629 = vrot.lane.b32.xlu1 %v6603_v30, %s9698_s4  ;;  %v6951_v32 = vcombine.low %v6943_v1, %v6950_v41  ;;  %v6992_v41 = vsel %vm6988_vm11, %v14280_v8, %v5576_v37 }
 0x59b   :  { %v3506_v6 = vpop.f32.mrb[15].mxu1 }
 0x59c   :  { %v6044_v47 = vpop.permute.xlu0 %6043 }
 0x59e   :  { %5581 = vrot.lane.b32.xlu0 %v5568_v34, %s9693_s15  ;;  %6977 = vrot.lane.b32.xlu1 %v6951_v32, %s9700_s23 }
 0x5a2   :  { %6049 = vrot.lane.b32.xlu0 %v6036_v49, %s9695_s12  ;;  %5831 = vrot.lane.b32.xlu1 %v5818_v43, %s9694_s26 }
 0x5a6   :  { %6453 = vrot.lane.b32.xlu0 %v6440_v33, %s9697_s20  ;;  %6235 = vrot.lane.b32.xlu1 %v6222_v61, %s9696_s19  ;;  %v7000_v33 = vsel %vm6996_vm12, %v6992_v41, %v5826_v63 }
 0x5aa   :  { %v7162_v27 = vpop.f32.mrb[16].mxu1  ;;  %6801 = vrot.lane.b32.xlu0 %v6788_v12, %s9699_s21  ;;  %6631 = vrot.lane.b32.xlu1 %v6618_v13, %s9698_s4  ;;  %v7008_v13 = vsel %vm7004_vm13, %v7000_v33, %v6044_v47  ;;  %s9710_s21 = smov 35  }
 0x5ab   :  { %v7163_v22 = vadd.f32 %v14919_v18, %v7162_v27  ;;  %v9419_v14 = vpop.f32.mrb[17].mxu1 }
 0x5ac   :  { %v6448_v14 = vpop.permute.xlu1 %6447 }
 0x5ad   :  { %vm7196_vm2 = vcmp.gt.f32.partialorder %v7163_v22, 0.0  ;;  %v7204_v7 = vmul.f32 %v14924_v20, %v7163_v22 }
 0x5ae   :  { %6979 = vrot.lane.b32.xlu1 %v6966_v35, %s9700_s23  ;;  %v6230_v35 = vpop.permute.xlu0 %6229 }
 0x5af   :  { %v7211_v25 = vsel %vm7196_vm2, %v7163_v22, %v7204_v7  ;;  %vm15967_vm2 = vmmov %vm15965_vm3 }
 0x5b0   :  { %v7225_v59 = vcombine.high %v7211_v25, %v7211_v25  ;;  %v7232_v28 = vrot.slane %v7211_v25, %v11122_v9 }
 0x5b2   :  { %v7239_v44 = vrot.slane %v7225_v59, %v11122_v9  ;;  %v7240_v36 = vcombine.high %v7232_v28, %v7232_v28  ;;  %v7248_v11 = vrot.slane %v7232_v28, %v11122_v9  ;;  %v5578_v47 = vpop.permute.xlu0 %5577 }
 0x5b4   :  { %v7241_v62 = vcombine.high %v7239_v44, %v7239_v44  ;;  %v7262_v57 = vrot.slane %v7240_v36, %v11122_v9  ;;  %v7270_v0 = vcombine.high %v7248_v11, %v7248_v11  ;;  %v7255_v58 = vrot.slane %v7239_v44, %v11122_v9 }
 0x5b6   :  { %v7269_v26 = vrot.slane %v7241_v62, %v11122_v9  ;;  %v7541_v3 = vcombine.low %v7248_v11, %v7262_v57  ;;  %v7657_v15 = vcombine.low %v7262_v57, %v7270_v0  ;;  %v9169_v16 = vcombine.high %v7262_v57, %v7255_v58 }
 0x5b7   :  { %v7271_v51 = vcombine.high %v7255_v58, %v7255_v58  ;;  %v9170_v34 = vcombine.high %v7248_v11, %v7262_v57 }
 0x5b8   :  { %v7542_v55 = vcombine.low %v7270_v0, %v7269_v26  ;;  %v14939_v45 = vrot.slane %v7541_v3, %v11122_v9  ;;  %v7273_v30 = vcombine.high %v7269_v26, %v7269_v26  ;;  %v7667_v10 = vrot.slane %v7657_v15, %v11122_v9 }
 0x5b9   :  { %v7674_v38 = vrot.slane %v9169_v16, %v11122_v9  ;;  %v7901_v24 = vcombine.low %v7269_v26, %v7271_v51  ;;  %v9165_v61 = vcombine.high %v7255_v58, %v7269_v26  ;;  %v7789_v5 = vrot.slane %v9170_v34, %v11122_v9 }
 0x5ba   :  { %v14942_v29 = vrot.slane %v7542_v55, %v11122_v9  ;;  %v7167_v19 = vpop.f32.mrb[18].mxu1  ;;  %v7780_v43 = vcombine.low %v7255_v58, %v7273_v30  ;;  %v7016_v16 = vsel %vm7012_vm14, %v7008_v13, %v6230_v35 }
 0x5bb   :  { %v7168_v31 = vadd.f32 %v14919_v18, %v7167_v19  ;;  %v9422_v52 = vpop.f32.mrb[19].mxu1  ;;  %v7689_v59 = vcombine.low %v7667_v10, %v7674_v38  ;;  %v7910_v28 = vrot.slane %v7901_v24, %v11122_v9  ;;  %v7024_v33 = vsel %vm7020_vm4, %v7016_v16, %v6448_v14 }
 0x5bc   :  { %v7573_v17 = vcombine.low %v14939_v45, %v14942_v29  ;;  %v7796_v27 = vrot.slane %v7780_v43, %v11122_v9 }
 0x5bd   :  { %vm7197_vm6 = vcmp.gt.f32.partialorder %v7168_v31, 0.0  ;;  %v7205_v4 = vmul.f32 %v14924_v20, %v7168_v31 }
 0x5be   :  { %v7811_v55 = vcombine.low %v7789_v5, %v7796_v27  ;;  %v15033_v14 = vrot.slane %v7573_v17, %v11122_v9 }
 0x5bf   :  { %v7212_v1 = vsel %vm7197_vm6, %v7168_v31, %v7205_v4  ;;  %vm8480_vm6 = vcmask 130048  }
 0x5c0   :  { %v7274_v6 = vcombine.high %v7212_v1, %v7212_v1  ;;  %v7281_v32 = vrot.slane %v7212_v1, %v11122_v9 }
 0x5c2   :  { %v7288_v49 = vrot.slane %v7274_v6, %v11122_v9  ;;  %v7289_v48 = vcombine.high %v7281_v32, %v7281_v32  ;;  %v7297_v2 = vrot.slane %v7281_v32, %v11122_v9 }
 0x5c4   :  { %v7290_v8 = vcombine.high %v7288_v49, %v7288_v49  ;;  %v14957_v54 = vrot.slane %v7288_v49, %v11122_v9  ;;  %v7311_v40 = vrot.slane %v7289_v48, %v11122_v9  ;;  %v7659_v12 = vcombine.low %v7273_v30, %v7297_v2 }
 0x5c5   :  { %v9173_v22 = vcombine.high %v7269_v26, %v7297_v2  ;;  %v14973_v26 = vrot.slane %v9165_v61, %v11122_v9  ;;  %v15007_v49 = vrot.slane %v7689_v59, %v11122_v9 }
 0x5c6   :  { %v14964_v7 = vrot.slane %v7290_v8, %v11122_v9  ;;  %v7321_v25 = vcombine.high %v7311_v40, %v7311_v40  ;;  %v7781_v44 = vcombine.low %v7297_v2, %v7311_v40  ;;  %v8097_v11 = vcombine.low %v7311_v40, %v14957_v54 }
 0x5c7   :  { %v7917_v36 = vrot.slane %v9173_v22, %v11122_v9  ;;  %v9166_v62 = vcombine.high %v7297_v2, %v7311_v40  ;;  %v14976_v3 = vrot.slane %v7659_v12, %v11122_v9  ;;  %v15046_v45 = vcombine.high %v14957_v54, %v14957_v54 }
 0x5c8   :  { %v7782_v57 = vcombine.low %v14957_v54, %v14964_v7  ;;  %v7660_v37 = vcombine.low %v7321_v25, %v14957_v54  ;;  %v8007_v0 = vcombine.low %v7297_v2, %v7321_v25  ;;  %v14981_v19 = vrot.slane %v8097_v11, %v11122_v9  ;;  %v5828_v25 = vpop.permute.xlu0 %5827 }
 0x5c9   :  { %v14978_v58 = vcombine.low %v7910_v28, %v7917_v36  ;;  %v7803_v4 = vrot.slane %v7781_v44, %v11122_v9  ;;  %v14996_v41 = vrot.slane %v9166_v62, %v11122_v9  ;;  %v15013_v2 = vrot.slane %v7811_v55, %v11122_v9 }
 0x5ca   :  { %v6626_v31 = vpop.permute.xlu1 %6625  ;;  %v7172_v52 = vpop.f32.mrb[20].mxu1  ;;  %v14984_v63 = vrot.slane %v7782_v57, %v11122_v9  ;;  %v14987_v15 = vrot.slane %v7660_v37, %v11122_v9  ;;  %v14991_v30 = vrot.slane %v8007_v0, %v11122_v9  ;;  %v8121_v10 = vcombine.low %v14976_v3, %v14981_v19 }
 0x5cb   :  { %v7173_v51 = vadd.f32 %v14919_v18, %v7172_v52  ;;  %v9425_v1 = vpop.f32.mrb[21].mxu1  ;;  %v7322_v8 = vcombine.high %v14964_v7, %v14964_v7  ;;  %v7574_v40 = vcombine.low %v14973_v26, %v14996_v41  ;;  %v7032_v22 = vsel %vm7028_vm1, %v7024_v33, %v6626_v31 }
 0x5cc   :  { %v7690_v6 = vcombine.low %v14976_v3, %v14987_v15  ;;  %v7812_v32 = vcombine.low %v7803_v4, %v14984_v63  ;;  %v8023_v34 = vcombine.low %v14973_v26, %v14991_v30  ;;  %v6046_v4 = vpop.permute.xlu0 %6045  ;;  %v8098_v1 = vcombine.low %v14964_v7, %v15046_v45 }
 0x5cd   :  { %vm7198_vm9 = vcmp.gt.f32.partialorder %v7173_v51, 0.0  ;;  %v7206_v38 = vmul.f32 %v14924_v20, %v7173_v51  ;;  %v15036_v35 = vrot.slane %v7574_v40, %v11122_v9  ;;  %v8203_v29 = vcombine.low %v14957_v54, %v7322_v8 }
 0x5ce   :  { %v6796_v43 = vpop.permute.xlu1 %6795  ;;  %v15010_v48 = vrot.slane %v7690_v6, %v11122_v9  ;;  %v15016_v24 = vrot.slane %v7812_v32, %v11122_v9  ;;  %v6993_v6 = vsel %vm6988_vm11, %v5188_v39, %v5578_v47  ;;  %v7933_v23 = vrot.slane %v14978_v58, %v11122_v9 }
 0x5cf   :  { %v7213_v61 = vsel %vm7198_vm9, %v7173_v51, %v7206_v38  ;;  %v7040_v36 = vsel %vm7036_vm0, %v7032_v22, %v6796_v43  ;;  %v7589_v17 = vcombine.low %v15033_v14, %v15036_v35  ;;  %v8211_v32 = vrot.slane %v8203_v29, %v11122_v9  ;;  %vm15968_vm9 = vmmov %vm15961_vm5 }
 0x5d0   :  { %v7323_v12 = vcombine.high %v7213_v61, %v7213_v61  ;;  %v7330_v13 = vrot.slane %v7213_v61, %v11122_v9  ;;  %v7705_v5 = vcombine.low %v15007_v49, %v15010_v48  ;;  %v7827_v27 = vcombine.low %v15013_v2, %v15016_v24 }
 0x5d1   :  { %v7001_v40 = vsel %vm6996_vm12, %v6993_v6, %v5828_v25 }
 0x5d2   :  { %v7337_v59 = vrot.slane %v7323_v12, %v11122_v9  ;;  %v7338_v28 = vcombine.high %v7330_v13, %v7330_v13  ;;  %v15040_v44 = vrot.slane %v7330_v13, %v11122_v9  ;;  %v6974_v11 = vpop.permute.xlu1 %6973  ;;  %v8113_v13 = vrot.slane %v8098_v1, %v11122_v9  ;;  %v6232_v22 = vpop.permute.xlu0 %6231 }
 0x5d3   :  { %v7048_v62 = vsel %vm15961_vm5, %v7040_v36, %v6974_v11  ;;  %v8219_v36 = vcombine.low %v14996_v41, %v8211_v32  ;;  %vm15969_vm5 = vmmov %vm15967_vm2 }
 0x5d4   :  { %v7339_v57 = vcombine.high %v7337_v59, %v7337_v59  ;;  %v15052_v37 = vrot.slane %v7337_v59, %v11122_v9  ;;  %v15055_v26 = vrot.slane %v7338_v28, %v11122_v9  ;;  %9427 = vmatmul.mubr.msk.f32.gmra.mrb[22].mxu1 %vm15962_vm15, %v7048_v62  ;;  %v7903_v0 = vcombine.low %v7322_v8, %v15040_v44 }
 0x5d5   :  { %9429 = vmatprep.mubr.msk.f32.mxu1 %vm15963_vm7, %v15932_v46  ;;  %v7368_v55 = vcombine.high %v15040_v44, %v15040_v44  ;;  %v8301_v38 = vcombine.low %v14964_v7, %v15040_v44  ;;  %v15093_v59 = vrot.slane %v8023_v34, %v11122_v9  ;;  %v15121_v32 = vrot.slane %v8219_v36, %v11122_v9 }
 0x5d6   :  { %v15064_v31 = vrot.slane %v7339_v57, %v11122_v9  ;;  %v7369_v52 = vcombine.high %v15052_v37, %v15052_v37  ;;  %v6450_v30 = vpop.permute.xlu1 %6449  ;;  %v7924_v16 = vrot.slane %v7903_v0, %v11122_v9  ;;  %v8008_v51 = vcombine.low %v15040_v44, %v15055_v26 }
 0x5d7   :  { %v8099_v61 = vcombine.low %v15055_v26, %v7368_v55  ;;  %v8309_v62 = vrot.slane %v8301_v38, %v11122_v9  ;;  %v7009_v57 = vsel %vm7004_vm13, %v7001_v40, %v6046_v4  ;;  %v15110_v55 = vrot.slane %v8121_v10, %v11122_v9  ;;  %v5580_v40 = vpop.permute.xlu0 %5579 }
 0x5d8   :  { %v7926_v43 = vcombine.low %v14987_v15, %v7924_v16  ;;  %v8022_v33 = vrot.slane %v8008_v51, %v11122_v9  ;;  %v8204_v8 = vcombine.low %v15052_v37, %v15064_v31  ;;  %v8302_v53 = vcombine.low %v15064_v31, %v7369_v52 }
 0x5d9   :  { %v8120_v28 = vrot.slane %v8099_v61, %v11122_v9  ;;  %v7017_v52 = vsel %vm7012_vm14, %v7009_v57, %v6232_v22  ;;  %v8317_v51 = vcombine.low %v14987_v15, %v8309_v62  ;;  %v9181_v21 = vcombine.high %v15052_v37, %v15064_v31 }
 0x5da   :  { %v6628_v12 = vpop.permute.xlu1 %6627  ;;  %v7940_v39 = vrot.slane %v7926_v43, %v11122_v9  ;;  %v8024_v47 = vcombine.low %v14984_v63, %v8022_v33  ;;  %v8218_v25 = vrot.slane %v8204_v8, %v11122_v9  ;;  %v8316_v29 = vrot.slane %v8302_v53, %v11122_v9 }
 0x5db   :  { %v8122_v34 = vcombine.low %v8113_v13, %v8120_v28  ;;  %v7025_v6 = vsel %vm7020_vm4, %v7017_v52, %v6450_v30  ;;  %v8325_v10 = vrot.slane %v8317_v51, %v11122_v9  ;;  %v9180_v52 = vcombine.high %v15040_v44, %v15055_v26 }
 0x5dc   :  { %v15098_v11 = vcombine.low %v7933_v23, %v7940_v39  ;;  %v15101_v58 = vrot.slane %v8024_v47, %v11122_v9  ;;  %v8220_v41 = vcombine.low %v8022_v33, %v8218_v25  ;;  %v8318_v1 = vcombine.low %v8120_v28, %v8316_v29 }
 0x5dd   :  { %v15118_v4 = vrot.slane %v8122_v34, %v11122_v9  ;;  %v7033_v19 = vsel %vm7028_vm1, %v7025_v6, %v6628_v12  ;;  %v5830_v12 = vpop.permute.xlu0 %5829  ;;  %v6994_v39 = vsel %vm6988_vm11, %v5237_v60, %v5580_v40  ;;  %v5252_v60 = vrot.slane %v14605_v42, %v11122_v9 }
 0x5de   :  { %v6798_v0 = vpop.permute.xlu1 %6797  ;;  %v8039_v16 = vcombine.low %v15093_v59, %v15101_v58  ;;  %v15124_v3 = vrot.slane %v8220_v41, %v11122_v9  ;;  %v8332_v38 = vrot.slane %v8318_v1, %v11122_v9  ;;  %v7002_v13 = vsel %vm6996_vm12, %v6994_v39, %v5830_v12 }
 0x5df   :  { %v7041_v15 = vsel %vm7036_vm0, %v7033_v19, %v6798_v0  ;;  %v8137_v30 = vcombine.low %v15110_v55, %v15118_v4  ;;  %v8391_v41 = vcombine.low %v15046_v45, %v15055_v26 }
 0x5e0   :  { %v8235_v33 = vcombine.low %v15121_v32, %v15124_v3  ;;  %v15135_v8 = vcombine.low %v8325_v10, %v8332_v38  ;;  %v8414_v10 = vrot.slane %v9181_v21, %v11122_v9  ;;  %v8407_v38 = vrot.slane %v9180_v52, %v11122_v9  ;;  %v8523_v32 = vld [vmem:[%s15667_s6 + $0x80] sm:$0xff]  ;;  %v8524_v3 = vld [vmem:[%s15667_s6 + $0x88] sm:$0xff] }
 0x5e1   :  { %v8400_v42 = vrot.slane %v8391_v41, %v11122_v9 }
 0x5e2   :  { %v6976_v43 = vpop.permute.xlu1 %6975  ;;  %v8416_v40 = vcombine.low %v8407_v38, %v8414_v10 }
 0x5e3   :  { %v7049_v61 = vsel %vm15964_vm8, %v7041_v15, %v6976_v43  ;;  %v6048_v53 = vpop.permute.xlu0 %6047  ;;  %v8415_v12 = vcombine.low %v14984_v63, %v8400_v42  ;;  %vm8484_vm8 = vcmask 261120  }
 0x5e4   :  { %9430 = vmatmul.mubr.msk.f32.gmra.mrb[24].mxu1 %vm15965_vm3, %v7049_v61  ;;  %v7010_v22 = vsel %vm7004_vm13, %v7002_v13, %v6048_v53  ;;  %v8430_v13 = vrot.slane %v8416_v40, %v11122_v9  ;;  %vm8488_vm3 = vcmask 392192  }
 0x5e5   :  { %9432 = vmatprep.mubr.msk.f32.mxu1 %vm15963_vm7, %v15932_v46 }
 0x5e7   :  { %v6234_v23 = vpop.permute.xlu0 %6233 }
 0x5e8   :  { %v7018_v28 = vsel %vm7012_vm14, %v7010_v22, %v6234_v23  ;;  %v8423_v22 = vrot.slane %v8415_v12, %v11122_v9 }
 0x5eb   :  { %v6452_v47 = vpop.permute.xlu0 %6451 }
 0x5ec   :  { %v7026_v25 = vsel %vm7020_vm4, %v7018_v28, %v6452_v47 }
 0x60c   :  { %v6800_v36 = vpop.permute.xlu0 %6799  ;;  %v6630_v62 = vpop.permute.xlu1 %6629 }
 0x60d   :  { %v7034_v29 = vsel %vm7028_vm1, %v7026_v25, %v6630_v62  ;;  %v8431_v62 = vcombine.low %v8423_v22, %v8430_v13 }
 0x60e   :  { %v7042_v0 = vsel %vm7036_vm0, %v7034_v29, %v6800_v36 }
 0x610   :  { %v5582_v57 = vpop.permute.xlu0 %5581  ;;  %v6978_v34 = vpop.permute.xlu1 %6977 }
 0x611   :  { %v7050_v50 = vsel %vm15966_vm10, %v7042_v0, %v6978_v34  ;;  %v6995_v51 = vsel %vm6988_vm11, %v5252_v60, %v5582_v57  ;;  %vm8492_vm10 = vcmask 523264  }
 0x612   :  { %9433 = vmatmul.mubr.msk.f32.gmra.mrb[26].mxu1 %vm15967_vm2, %v7050_v50  ;;  %vm8499_vm2 = vcmask 785408  }
 0x613   :  { %9435 = vmatprep.mubr.msk.f32.mxu1 %vm15963_vm7, %v15932_v46 }
 0x614   :  { %v6050_v1 = vpop.permute.xlu0 %6049  ;;  %v5832_v6 = vpop.permute.xlu1 %5831 }
 0x615   :  { %v7003_v19 = vsel %vm6996_vm12, %v6995_v51, %v5832_v6 }
 0x616   :  { %v7011_v43 = vsel %vm7004_vm13, %v7003_v19, %v6050_v1 }
 0x618   :  { %v6454_v15 = vpop.permute.xlu0 %6453  ;;  %v6236_v61 = vpop.permute.xlu1 %6235 }
 0x619   :  { %v7019_v45 = vsel %vm7012_vm14, %v7011_v43, %v6236_v61 }
 0x61a   :  { %v7027_v53 = vsel %vm7020_vm4, %v7019_v45, %v6454_v15 }
 0x61c   :  { %v6632_v23 = vpop.permute.xlu1 %6631  ;;  %v6802_v39 = vpop.permute.xlu0 %6801 }
 0x61d   :  { %v7035_v47 = vsel %vm7028_vm1, %v7027_v53, %v6632_v23 }
 0x61e   :  { %v7043_v28 = vsel %vm7036_vm0, %v7035_v47, %v6802_v39 }
 0x620   :  { %v6980_v25 = vpop.permute.xlu1 %6979 }
 0x621   :  { %v7051_v36 = vsel %vm15968_vm9, %v7043_v28, %v6980_v25 }
 0x622   :  { %9436 = vmatmul.mubr.msk.f32.gmra.mrb[28].mxu1 %vm15969_vm5, %v7051_v36  ;;  %vm8503_vm5 = vcmask 916480  }
 0x623   :  { %9183 = vmatprep.mubr.msk.f32.mxu1 %vm8480_vm6, %v8431_v62 }
 0x6a7   :  { %v7177_v63 = vpop.f32.mrb[22].mxu1 }
 0x6a8   :  { %v7178_v29 = vadd.f32 %v14919_v18, %v7177_v63  ;;  %v9428_v57 = vpop.f32.mrb[23].mxu1 }
 0x6aa   :  { %vm7199_vm4 = vcmp.gt.f32.partialorder %v7178_v29, 0.0  ;;  %v7207_v0 = vmul.f32 %v14924_v20, %v7178_v29 }
 0x6ac   :  { %v7214_v34 = vsel %vm7199_vm4, %v7178_v29, %v7207_v0  ;;  %vm15970_vm4 = vmmov %vm15968_vm9 }
 0x6ad   :  { %v7372_v50 = vcombine.high %v7214_v34, %v7214_v34  ;;  %v7379_v21 = vrot.slane %v7214_v34, %v11122_v9 }
 0x6af   :  { %v7386_v60 = vrot.slane %v7372_v50, %v11122_v9  ;;  %v7387_v41 = vcombine.high %v7379_v21, %v7379_v21  ;;  %v15184_v1 = vrot.slane %v7379_v21, %v11122_v9 }
 0x6b1   :  { %v7388_v52 = vcombine.high %v7386_v60, %v7386_v60  ;;  %v7409_v51 = vrot.slane %v7387_v41, %v11122_v9  ;;  %v15187_v6 = vrot.slane %v7386_v60, %v11122_v9  ;;  %v7417_v23 = vcombine.high %v15184_v1, %v15184_v1 }
 0x6b3   :  { %v15190_v19 = vrot.slane %v7388_v52, %v11122_v9  ;;  %v7590_v10 = vcombine.low %v14957_v54, %v7409_v51  ;;  %v9167_v42 = vcombine.high %v15184_v1, %v7409_v51  ;;  %v7419_v45 = vcombine.high %v7409_v51, %v7409_v51 }
 0x6b4   :  { %v7418_v39 = vcombine.high %v15187_v6, %v15187_v6  ;;  %v7706_v36 = vcombine.low %v14964_v7, %v7417_v23  ;;  %v9171_v21 = vcombine.high %v14957_v54, %v7409_v51 }
 0x6b5   :  { %v9168_v38 = vcombine.high %v15187_v6, %v15190_v19  ;;  %v15197_v15 = vrot.slane %v9167_v42, %v11122_v9  ;;  %v15200_v61 = vrot.slane %v7590_v10, %v11122_v9  ;;  %v7707_v22 = vcombine.low %v7419_v45, %v15187_v6 }
 0x6b6   :  { %v7829_v62 = vcombine.low %v15187_v6, %v15190_v19  ;;  %v7942_v63 = vcombine.low %v15055_v26, %v7418_v39  ;;  %v7420_v34 = vcombine.high %v15190_v19, %v15190_v19  ;;  %v9174_v7 = vcombine.high %v15040_v44, %v15190_v19  ;;  %v8512_v6 = vld [vmem:[%s15667_s6 + $0x28] sm:$0xff] }
 0x6b7   :  { %v7182_v43 = vpop.f32.mrb[24].mxu1  ;;  %v7622_v53 = vcombine.low %v15200_v61, %v15197_v15  ;;  %v7723_v50 = vrot.slane %v7707_v22, %v11122_v9  ;;  %v7716_v42 = vrot.slane %v7706_v36, %v11122_v9  ;;  %v7838_v39 = vrot.slane %v9171_v21, %v11122_v9  ;;  %v8514_v15 = vld [vmem:[%s15667_s6 + $0x38] sm:$0xff] }
 0x6b8   :  { %v7183_v40 = vadd.f32 %v14919_v18, %v7182_v43  ;;  %v9431_v12 = vpop.f32.mrb[25].mxu1  ;;  %v7845_v54 = vrot.slane %v7829_v62, %v11122_v9  ;;  %v7951_v51 = vrot.slane %v7942_v63, %v11122_v9  ;;  %v7371_v21 = vcombine.high %v15064_v31, %v15064_v31 }
 0x6b9   :  { %v7738_v23 = vcombine.low %v7716_v42, %v7723_v50  ;;  %v8507_v42 = vld [vmem:[%s15667_s6] sm:$0xff]  ;;  %v15331_v2 = vrot.slane %v7622_v53, %v11122_v9 }
 0x6ba   :  { %vm7200_vm1 = vcmp.gt.f32.partialorder %v7183_v40, 0.0  ;;  %v7208_v47 = vmul.f32 %v14924_v20, %v7183_v40  ;;  %v7860_v62 = vcombine.low %v7838_v39, %v7845_v54  ;;  %v8508_v54 = vld [vmem:[%s15667_s6 + $0x8] sm:$0xff] }
 0x6bc   :  { %v7215_v13 = vsel %vm7200_vm1, %v7183_v40, %v7208_v47  ;;  %vm15971_vm1 = vmmov %vm15970_vm4 }
 0x6bd   :  { %v7421_v28 = vcombine.high %v7215_v13, %v7215_v13  ;;  %v7428_v25 = vrot.slane %v7215_v13, %v11122_v9  ;;  %v15254_v13 = vrot.slane %v9174_v7, %v11122_v9  ;;  %v7746_v7 = vrot.slane %v7738_v23, %v11122_v9 }
 0x6bf   :  { %v7435_v29 = vrot.slane %v7421_v28, %v11122_v9  ;;  %v7436_v57 = vcombine.high %v7428_v25, %v7428_v25  ;;  %v15218_v0 = vrot.slane %v7428_v25, %v11122_v9 }
 0x6c1   :  { %v7437_v60 = vcombine.high %v7435_v29, %v7435_v29  ;;  %v15227_v41 = vrot.slane %v7435_v29, %v11122_v9  ;;  %v15230_v52 = vrot.slane %v7436_v57, %v11122_v9  ;;  %v7708_v10 = vcombine.low %v7420_v34, %v15218_v0 }
 0x6c2   :  { %v15236_v43 = vcombine.high %v15218_v0, %v15218_v0 }
 0x6c3   :  { %v15241_v44 = vrot.slane %v7437_v60, %v11122_v9  ;;  %v7709_v45 = vcombine.low %v15230_v52, %v15227_v41  ;;  %v7730_v40 = vrot.slane %v7708_v10, %v11122_v9  ;;  %v7830_v12 = vcombine.low %v15218_v0, %v15230_v52 }
 0x6c4   :  { %v15251_v47 = vcombine.high %v15227_v41, %v15227_v41  ;;  %v15269_v34 = vcombine.high %v15230_v52, %v15230_v52 }
 0x6c5   :  { %v7737_v22 = vrot.slane %v7709_v45, %v11122_v9  ;;  %v7831_v28 = vcombine.low %v15236_v43, %v15241_v44  ;;  %v15260_v25 = vrot.slane %v7830_v12, %v11122_v9  ;;  %v15262_v36 = vcombine.low %v7951_v51, %v7730_v40 }
 0x6c6   :  { %v7755_v63 = vcombine.low %v15241_v44, %v15251_v47  ;;  %v8334_v45 = vcombine.low %v7371_v21, %v15227_v41  ;;  %v9172_v31 = vcombine.high %v15227_v41, %v15241_v44  ;;  %v7868_v12 = vrot.slane %v7860_v62, %v11122_v9 }
 0x6c7   :  { %v7739_v29 = vcombine.low %v7730_v40, %v7737_v22  ;;  %v7859_v57 = vrot.slane %v7831_v28, %v11122_v9  ;;  %v8056_v50 = vcombine.low %v15254_v13, %v15260_v25  ;;  %v7593_v39 = vcombine.low %v15218_v0, %v15269_v34  ;;  %v8509_v22 = vld [vmem:[%s15667_s6 + $0x10] sm:$0xff]  ;;  %v8510_v28 = vld [vmem:[%s15667_s6 + $0x18] sm:$0xff]  ;;  %v8519_v13 = vld [vmem:[%s15667_s6 + $0x60] sm:$0xff] }
 0x6c8   :  { %v15285_v51 = vrot.slane %v7755_v63, %v11122_v9  ;;  %v8342_v63 = vrot.slane %v8334_v45, %v11122_v9  ;;  %v7614_v21 = vrot.slane %v9168_v38, %v11122_v9  ;;  %v15325_v19 = vrot.slane %v9172_v31, %v11122_v9  ;;  %v8515_v45 = vld [vmem:[%s15667_s6 + $0x40] sm:$0xff]  ;;  %v8516_v31 = vld [vmem:[%s15667_s6 + $0x48] sm:$0xff] }
 0x6c9   :  { %v7753_v60 = vrot.slane %v7739_v29, %v11122_v9  ;;  %v7861_v10 = vcombine.low %v15260_v25, %v7859_v57  ;;  %v9485_v29 = vpack.c.bf16 %v8508_v54, %v8507_v42  ;;  %v8513_v54 = vld [vmem:[%s15667_s6 + $0x30] sm:$0xff]  ;;  %v8520_v25 = vld [vmem:[%s15667_s6 + $0x68] sm:$0xff] }
 0x6ca   :  { %v9494_v53 = vpack.c.bf16 %v8514_v15, %v8513_v54  ;;  %v7974_v54 = vrot.slane %v15262_v36, %v11122_v9  ;;  %v9503_v4 = vpack.c.bf16 %v8520_v25, %v8519_v13 }
 0x6cb   :  { %v7754_v40 = vcombine.low %v7746_v7, %v7753_v60  ;;  %v7875_v23 = vrot.slane %v7861_v10, %v11122_v9  ;;  %v7621_v7 = vrot.slane %v7593_v39, %v11122_v9  ;;  %v15310_v60 = vcombine.low %v8342_v63, %v15285_v51  ;;  %9486 = vmatpush1.bf16.msra.mxu1 %v9485_v29 }
 0x6cc   :  { %v9488_v10 = vpack.c.bf16 %v8510_v28, %v8509_v22  ;;  %9487 = vmatprep.subr.bf16.mxu1 %v9692_v56  ;;  %v7370_v29 = vcombine.high %v15055_v26, %v15055_v26  ;;  %v7943_v26 = vcombine.low %v15269_v34, %v15227_v41 }
 0x6cd   :  { %v9553_v62 = vpack.i.bf16 %v7754_v40, %v7705_v5  ;;  %v7876_v57 = vcombine.low %v7868_v12, %v7875_v23  ;;  %v7623_v48 = vcombine.low %v7614_v21, %v7621_v7  ;;  %v8511_v5 = vld [vmem:[%s15667_s6 + $0x20] sm:$0xff]  ;;  %v9497_v40 = vpack.c.bf16 %v8516_v31, %v8515_v45  ;;  %v8517_v12 = vld [vmem:[%s15667_s6 + $0x50] sm:$0xff]  ;;  %v8518_v23 = vld [vmem:[%s15667_s6 + $0x58] sm:$0xff] }
 0x6ce   :  { %v9491_v38 = vpack.c.bf16 %v8512_v6, %v8511_v5  ;;  %v9500_v39 = vpack.c.bf16 %v8518_v23, %v8517_v12  ;;  %v8138_v21 = vcombine.low %v7370_v29, %v15218_v0  ;;  %v7958_v31 = vrot.slane %v7943_v26, %v11122_v9 }
 0x6cf   :  { %9554 = vrot.lane.b32.xlu0 %v9553_v62, %s9702_s25  ;;  %v9558_v49 = vpack.i.bf16 %v7876_v57, %v7827_v27  ;;  %v15334_v24 = vrot.slane %v7623_v48, %v11122_v9  ;;  %v8432_v27 = vcombine.low %v15184_v1, %v15241_v44  ;;  %9489 = vmatpush1.bf16.msra.mxu1 %v9488_v10 }
 0x6d0   :  { %9490 = vmatprep.subr.bf16.mxu1 %v9692_v56  ;;  %v8139_v62 = vcombine.low %v15230_v52, %v15236_v43  ;;  %v7639_v10 = vcombine.low %v15227_v41, %v15241_v44  ;;  %v8147_v6 = vrot.slane %v8138_v21, %v11122_v9  ;;  %v9177_v43 = vcombine.high %v15052_v37, %v15230_v52 }
 0x6d1   :  { %9559 = vrot.lane.b32.xlu1 %v9558_v49, %s9703_s24  ;;  %v7638_v42 = vcombine.low %v15331_v2, %v15334_v24  ;;  %v15348_v61 = vrot.slane %v8432_v27, %v11122_v9 }
 0x6d2   :  { %v8154_v49 = vrot.slane %v8139_v62, %v11122_v9  ;;  %v15391_v15 = vrot.slane %v7639_v10, %v11122_v9 }
 0x6d3   :  { %v8448_v1 = vcombine.low %v15348_v61, %v15325_v19  ;;  %9492 = vmatpush1.bf16.msra.mxu1 %v9491_v38 }
 0x6d4   :  { %9493 = vmatprep.subr.bf16.mxu1 %v9692_v56 }
 0x6d7   :  { %9495 = vmatpush1.bf16.msra.mxu1 %v9494_v53  ;;  %v8162_v53 = vcombine.low %v8147_v6, %v8154_v49 }
 0x6d8   :  { %9496 = vmatprep.subr.bf16.mxu1 %v9692_v56 }
 0x6d9   :  { %v8170_v29 = vrot.slane %v8162_v53, %v11122_v9 }
 0x6db   :  { %9498 = vmatpush1.bf16.msra.mxu1 %v9497_v40  ;;  %v8245_v40 = vrot.slane %v9177_v43, %v11122_v9 }
 0x6dc   :  { %9499 = vmatprep.subr.bf16.mxu1 %v9692_v56 }
 0x6dd   :  { %v8260_v21 = vcombine.low %v8245_v40, %v15391_v15 }
 0x6df   :  { %9501 = vmatpush1.bf16.msra.mxu1 %v9500_v39 }
 0x6e0   :  { %9502 = vmatprep.subr.bf16.mxu1 %v9692_v56 }
 0x6e3   :  { %9504 = vmatpush1.bf16.msra.mxu1 %v9503_v4 }
 0x6e4   :  { %9505 = vmatprep.subr.bf16.mxu1 %v9692_v56 }
 0x6e5   :  { %v7187_v22 = vpop.f32.mrb[26].mxu1 }
 0x6e6   :  { %v7188_v28 = vadd.f32 %v14919_v18, %v7187_v22  ;;  %v9434_v63 = vpop.f32.mrb[27].mxu1 }
 0x6e8   :  { %vm7201_vm0 = vcmp.gt.f32.partialorder %v7188_v28, 0.0  ;;  %v7209_v57 = vmul.f32 %v14924_v20, %v7188_v28 }
 0x6ea   :  { %v7216_v7 = vsel %vm7201_vm0, %v7188_v28, %v7209_v57 }
 0x6eb   :  { %v7470_v48 = vcombine.high %v7216_v7, %v7216_v7  ;;  %v7477_v5 = vrot.slane %v7216_v7, %v11122_v9 }
 0x6ed   :  { %v7484_v27 = vrot.slane %v7470_v48, %v11122_v9  ;;  %v7485_v0 = vcombine.high %v7477_v5, %v7477_v5  ;;  %v15386_v38 = vrot.slane %v7477_v5, %v11122_v9 }
 0x6ef   :  { %v7486_v45 = vcombine.high %v7484_v27, %v7484_v27  ;;  %v15394_v41 = vrot.slane %v7484_v27, %v11122_v9  ;;  %v15397_v34 = vrot.slane %v7485_v0, %v11122_v9  ;;  %v7515_v37 = vcombine.high %v15386_v38, %v15386_v38 }
 0x6f0   :  { %v7944_v52 = vcombine.low %v15241_v44, %v15386_v38  ;;  %v9176_v36 = vcombine.high %v15241_v44, %v15386_v38 }
 0x6f1   :  { %v15408_v12 = vrot.slane %v7486_v45, %v11122_v9  ;;  %v8041_v23 = vcombine.low %v15251_v47, %v15397_v34  ;;  %v8237_v39 = vcombine.low %v15386_v38, %v15397_v34  ;;  %v7983_v22 = vcombine.low %v15397_v34, %v7515_v37 }
 0x6f2   :  { %v7965_v28 = vrot.slane %v7944_v52, %v11122_v9  ;;  %v8161_v63 = vrot.slane %v9176_v36, %v11122_v9  ;;  %v9179_v44 = vcombine.high %v15397_v34, %v15394_v41  ;;  %v9175_v55 = vcombine.high %v15386_v38, %v15397_v34 }
 0x6f3   :  { %v8238_v62 = vcombine.low %v7515_v37, %v15408_v12  ;;  %v15423_v57 = vcombine.high %v15408_v12, %v15408_v12  ;;  %v8055_v47 = vrot.slane %v8041_v23, %v11122_v9  ;;  %v15429_v49 = vrot.slane %v7983_v22, %v11122_v9 }
 0x6f4   :  { %v7967_v7 = vcombine.low %v7958_v31, %v7965_v28  ;;  %v8163_v10 = vcombine.low %v15285_v51, %v8161_v63  ;;  %v8349_v48 = vrot.slane %v9179_v44, %v11122_v9  ;;  %v8252_v43 = vrot.slane %v8237_v39, %v11122_v9 }
 0x6f5   :  { %v7192_v5 = vpop.f32.mrb[28].mxu1  ;;  %v8433_v26 = vcombine.low %v15394_v41, %v15423_v57  ;;  %v8057_v6 = vcombine.low %v15391_v15, %v8055_v47  ;;  %v8259_v27 = vrot.slane %v8238_v62, %v11122_v9  ;;  %v8064_v31 = vrot.slane %v8056_v50, %v11122_v9 }
 0x6f6   :  { %v7193_v0 = vadd.f32 %v14919_v18, %v7192_v5  ;;  %v9437_v53 = vpop.f32.mrb[29].mxu1  ;;  %v7981_v45 = vrot.slane %v7967_v7, %v11122_v9  ;;  %v8177_v37 = vrot.slane %v8163_v10, %v11122_v9  ;;  %v8351_v52 = vcombine.low %v15429_v49, %v8349_v48  ;;  %v8521_v7 = vld [vmem:[%s15667_s6 + $0x70] sm:$0xff] }
 0x6f7   :  { %v8071_v36 = vrot.slane %v8057_v6, %v11122_v9  ;;  %v8261_v40 = vcombine.low %v8252_v43, %v8259_v27  ;;  %v8268_v23 = vrot.slane %v8260_v21, %v11122_v9  ;;  %v8358_v44 = vrot.slane %v15310_v60, %v11122_v9 }
 0x6f8   :  { %vm7202_vm15 = vcmp.gt.f32.partialorder %v7193_v0, 0.0  ;;  %v7210_v18 = vmul.f32 %v14924_v20, %v7193_v0  ;;  %v7982_v39 = vcombine.low %v7974_v54, %v7981_v45  ;;  %v8178_v22 = vcombine.low %v8170_v29, %v8177_v37 }
 0x6f9   :  { %v8072_v28 = vcombine.low %v8064_v31, %v8071_v36  ;;  %v8275_v63 = vrot.slane %v8261_v40, %v11122_v9  ;;  %v8365_v62 = vrot.slane %v8351_v52, %v11122_v9  ;;  %v7517_v5 = vcombine.high %v15397_v34, %v15397_v34 }
 0x6fa   :  { %v7217_v50 = vsel %vm7202_vm15, %v7193_v0, %v7210_v18  ;;  %v9563_v20 = vpack.i.bf16 %v7982_v39, %v15098_v11  ;;  %v9573_v54 = vpack.i.bf16 %v8178_v22, %v8137_v30  ;;  %v8522_v11 = vld [vmem:[%s15667_s6 + $0x78] sm:$0xff]  ;;  %v9509_v34 = vpack.c.bf16 %v8524_v3, %v8523_v32  ;;  %s9707_s6 = smov 112  }
 0x6fb   :  { %v7525_v29 = vrot.slane %v7217_v50, %v11122_v9  ;;  %v9568_v60 = vpack.i.bf16 %v8072_v28, %v8039_v16  ;;  %v8276_v47 = vcombine.low %v8268_v23, %v8275_v63  ;;  %v8366_v21 = vcombine.low %v8358_v44, %v8365_v62 }
 0x6fc   :  { %9564 = vrot.lane.b32.xlu0 %v9563_v20, %s9704_s14  ;;  %v9506_v10 = vpack.c.bf16 %v8522_v11, %v8521_v7  ;;  %v7769_v43 = vrot.slane %v15285_v51, %v11122_v9  ;;  %v8179_v27 = vcombine.low %v7517_v5, %v15394_v41  ;;  %v7891_v51 = vrot.slane %v15325_v19, %v11122_v9  ;;  %v8629_v7 = vld [vmem:[%s15669_s8 + $0x8] sm:$0xff] }
 0x6fd   :  { %v7526_v30 = vcombine.high %v7525_v29, %v7525_v29  ;;  %v15476_v59 = vrot.slane %v7525_v29, %v11122_v9  ;;  %9569 = vrot.lane.b32.xlu1 %v9568_v60, %s9705_s3  ;;  %v9578_v58 = vpack.i.bf16 %v8276_v47, %v8235_v33  ;;  %v9583_v16 = vpack.i.bf16 %v8366_v21, %v15135_v8  ;;  %v8628_v21 = vld [vmem:[%s15669_s8] sm:$0xff] }
 0x6fe   :  { %v8080_v33 = vrot.slane %v9175_v55, %v11122_v9  ;;  %v8447_v8 = vrot.slane %v8433_v26, %v11122_v9  ;;  %9507 = vmatpush1.bf16.msra.mxu1 %v9506_v10  ;;  %v15510_v26 = vrot.slane %v8448_v1, %v11122_v9  ;;  %v9178_v53 = vcombine.high %v15394_v41, %v15408_v12 }
 0x6ff   :  { %v15484_v48 = vrot.slane %v7526_v30, %v11122_v9  ;;  %v8367_v38 = vcombine.low %v15423_v57, %v15476_v59  ;;  %9508 = vmatprep.subr.bf16.mxu1 %v9692_v56  ;;  %v7997_v61 = vrot.slane %v15429_v49, %v11122_v9  ;;  %v8186_v1 = vrot.slane %v8179_v27, %v11122_v9 }
 0x700   :  { %9574 = vrot.lane.b32.xlu0 %v9573_v54, %s9700_s23  ;;  %v8449_v6 = vcombine.low %v8080_v33, %v8447_v8  ;;  %v8087_v19 = vrot.slane %v8080_v33, %v11122_v9  ;;  %v8284_v37 = vrot.slane %v9178_v53, %v11122_v9  ;;  %v9512_v5 = vpack.c.bf16 %v8629_v7, %v8628_v21 }
 0x701   :  { %v8465_v57 = vcombine.low %v15476_v59, %v15484_v48  ;;  %9579 = vrot.lane.b32.xlu1 %v9578_v58, %s9706_s1  ;;  %v8193_v41 = vrot.slane %v8186_v1, %v11122_v9  ;;  %v8374_v12 = vrot.slane %v8367_v38, %v11122_v9  ;;  %v7653_v58 = vrot.slane %v15391_v15, %v11122_v9 }
 0x702   :  { %v15513_v0 = vrot.slane %v8449_v6, %v11122_v9  ;;  %9510 = vmatpush1.bf16.msra.mxu1 %v9509_v34  ;;  %v8291_v49 = vrot.slane %v8284_v37, %v11122_v9 }
 0x703   :  { %9511 = vmatprep.subr.bf16.mxu1 %v9692_v56  ;;  %v8381_v52 = vrot.slane %v8374_v12, %v11122_v9  ;;  %v8472_v8 = vrot.slane %v8465_v57, %v11122_v9 }
 0x704   :  { %9584 = vrot.lane.b32.xlu0 %v9583_v16, %s9707_s6  ;;  %v8464_v45 = vcombine.low %v15510_v26, %v15513_v0 }
 0x705   :  { %7774 = vrot.lane.b32.xlu1 %v7769_v43, %s9702_s25  ;;  %v8479_v48 = vrot.slane %v8472_v8, %v11122_v9 }
 0x708   :  { %7896 = vrot.lane.b32.xlu0 %v7891_v51, %s9703_s24 }
 0x709   :  { %8002 = vrot.lane.b32.xlu1 %v7997_v61, %s9704_s14 }
 0x70c   :  { %8092 = vrot.lane.b32.xlu0 %v8087_v19, %s9705_s3  ;;  %v8631_v19 = vld [vmem:[%s15669_s8 + $0x18] sm:$0xff] }
 0x70d   :  { %8198 = vrot.lane.b32.xlu1 %v8193_v41, %s9700_s23  ;;  %v9182_v41 = vld [vmem:[%s15668_s7] ss:$0 sm:$0xff] }
 0x710   :  { %8296 = vrot.lane.b32.xlu0 %v8291_v49, %s9706_s1  ;;  %v8621_v49 = vstv %s9062_s16 }
 0x711   :  { %8386 = vrot.lane.b32.xlu1 %v8381_v52, %s9707_s6 }
 0x741   :  { %v9555_v31 = vpop.permute.xlu0 %9554 }
 0x742   :  { %v9557_v36 = vunpack.i.h.bf16 %v9555_v31  ;;  %v9556_v40 = vunpack.i.l.bf16 %v9555_v31 }
 0x743   :  { %v9560_v23 = vpop.permute.xlu1 %9559 }
 0x744   :  { %v9562_v18 = vunpack.i.h.bf16 %v9560_v23  ;;  %v9561_v39 = vunpack.i.l.bf16 %v9560_v23  ;;  %v8482_v22 = vsel %vm8480_vm6, %v7638_v42, %v9557_v36  ;;  %v8481_v28 = vsel %vm8480_vm6, %v7589_v17, %v9556_v40 }
 0x746   :  { %v8486_v25 = vsel %vm8484_vm8, %v8482_v22, %v9562_v18  ;;  %v8485_v50 = vsel %vm8484_vm8, %v8481_v28, %v9561_v39 }
 0x76e   :  { %v9565_v63 = vpop.permute.xlu0 %9564 }
 0x76f   :  { %v9567_v44 = vunpack.i.h.bf16 %v9565_v63  ;;  %v9566_v62 = vunpack.i.l.bf16 %v9565_v63  ;;  %v9570_v13 = vpop.permute.xlu1 %9569 }
 0x770   :  { %v9572_v20 = vunpack.i.h.bf16 %v9570_v13  ;;  %v9571_v2 = vunpack.i.l.bf16 %v9570_v13 }
 0x771   :  { %v8490_v24 = vsel %vm8488_vm3, %v8486_v25, %v9567_v44  ;;  %v8489_v42 = vsel %vm8488_vm3, %v8485_v50, %v9566_v62  ;;  %v9186_v50 = vld [vmem:[%s15670_s9] ss:$0 sm:$0xff]  ;;  %s9708_s9 = smov 5  }
 0x772   :  { %v8493_v14 = vsel %vm8492_vm10, %v8489_v42, %v9571_v2  ;;  %v9575_v35 = vpop.permute.xlu0 %9574  ;;  %v8494_v60 = vsel %vm8492_vm10, %v8490_v24, %v9572_v20 }
 0x773   :  { %v9577_v17 = vunpack.i.h.bf16 %v9575_v35  ;;  %v9576_v54 = vunpack.i.l.bf16 %v9575_v35  ;;  %v9580_v29 = vpop.permute.xlu1 %9579 }
 0x774   :  { %v9581_v47 = vunpack.i.l.bf16 %v9580_v29  ;;  %v9582_v55 = vunpack.i.h.bf16 %v9580_v29 }
 0x775   :  { %v8496_v11 = vsel %vm15968_vm9, %v8493_v14, %v9576_v54  ;;  %v8497_v38 = vsel %vm15970_vm4, %v8494_v60, %v9577_v17  ;;  %vm9044_vm9 = vcmask 361472  }
 0x776   :  { %v8500_v4 = vsel %vm8499_vm2, %v8496_v11, %v9581_v47  ;;  %v9585_v30 = vpop.permute.xlu0 %9584  ;;  %v8501_v15 = vsel %vm8499_vm2, %v8497_v38, %v9582_v55 }
 0x777   :  { %v9586_v16 = vunpack.i.l.bf16 %v9585_v30  ;;  %v7775_v10 = vpop.permute.xlu1 %7774  ;;  %v9587_v3 = vunpack.i.h.bf16 %v9585_v30 }
 0x778   :  { %v8483_v32 = vsel %vm8480_vm6, %v7653_v58, %v7775_v10 }
 0x779   :  { %v8504_v33 = vsel %vm8503_vm5, %v8500_v4, %v9586_v16  ;;  %v8505_v59 = vsel %vm8503_vm5, %v8501_v15, %v9587_v3 }
 0x77a   :  { %v7897_v34 = vpop.permute.xlu0 %7896  ;;  %8603 = vmatmul.mubr.f32.vlgmr.msra.gmra.mrb[30].mxu1 %v8504_v33 }
 0x77b   :  { %v8487_v6 = vsel %vm8484_vm8, %v8483_v32, %v7897_v34  ;;  %9184 = vmatprep.mubr.msk.f32.mxu1 %vm8480_vm6, %v8464_v45  ;;  %v8003_v43 = vpop.permute.xlu1 %8002  ;;  %9513 = vmatpush3.bf16.msra.mxu1 %v9512_v5 }
 0x77c   :  { %v8491_v27 = vsel %vm8488_vm3, %v8487_v6, %v8003_v43  ;;  %9514 = vmatprep.subr.bf16.mxu1 %v9692_v56  ;;  %v8630_v56 = vld [vmem:[%s15669_s8 + $0x10] sm:$0xff]  ;;  %vm15972_vm3 = vcmask 121856  }
 0x77d   :  { %v9515_v37 = vpack.c.bf16 %v8631_v19, %v8630_v56 }
 0x77e   :  { %v8093_v57 = vpop.permute.xlu0 %8092  ;;  %8608 = vmatmul.mubr.f32.gmra.mrb[32].mxu1 %v8505_v59 }
 0x77f   :  { %v8495_v51 = vsel %vm8492_vm10, %v8491_v27, %v8093_v57  ;;  %9185 = vmatprep.mubr.msk.f32.mxu1 %vm8480_vm6, %v8479_v48  ;;  %v8199_v53 = vpop.permute.xlu1 %8198  ;;  %9516 = vmatpush3.bf16.msra.mxu1 %v9515_v37  ;;  %vm9038_vm10 = vcmask 203776  }
 0x780   :  { %v8498_v26 = vsel %vm15971_vm1, %v8495_v51, %v8199_v53 }
 0x782   :  { %v8297_v0 = vpop.permute.xlu0 %8296 }
 0x783   :  { %v8502_v45 = vsel %vm8499_vm2, %v8498_v26, %v8297_v0  ;;  %v8387_v61 = vpop.permute.xlu1 %8386  ;;  %vm9041_vm2 = vcmask 285696  }
 0x784   :  { %v8506_v1 = vsel %vm8503_vm5, %v8502_v45, %v8387_v61 }
 0x785   :  { %8613 = vmatmul.mubr.f32.gmra.mrb[34].mxu1 %v8506_v1 }
 0x786   :  { %9446 = vmatprep.mubr.msk.f32.mxu1 %vm15963_vm7, %v15932_v46 }
 0x84d   :  { %v8604_v12 = vpop.f32.mrb[30].mxu1 }
 0x84e   :  { %v8605_v52 = vadd.f32 %v9182_v41, %v8604_v12  ;;  %v8606_v31 = vpop.f32.mrb[31].mxu1 }
 0x850   :  { %vm8618_vm6 = vcmp.gt.f32.partialorder %v8605_v52, 0.0  ;;  %v8622_v36 = vmul.f32 %v8621_v49, %v8605_v52 }
 0x851   :  { %v8609_v40 = vpop.f32.mrb[32].mxu1 }
 0x852   :  { %v8625_v23 = vsel %vm8618_vm6, %v8605_v52, %v8622_v36  ;;  %v8610_v18 = vadd.f32 %v9182_v41, %v8609_v40  ;;  %v8611_v39 = vpop.f32.mrb[33].mxu1 }
 0x853   :  { %9447 = vmatmul.mubr.msk.f32.vlgmr.msra.gmra.mrb[36].mxu1 %vm8484_vm8, %v8625_v23 }
 0x854   :  { %vm8619_vm0 = vcmp.gt.f32.partialorder %v8610_v18, 0.0  ;;  %v8623_v22 = vmul.f32 %v8621_v49, %v8610_v18  ;;  %9449 = vmatprep.mubr.msk.f32.mxu1 %vm15963_vm7, %v15932_v46 }
 0x856   :  { %v8626_v28 = vsel %vm8619_vm0, %v8610_v18, %v8623_v22 }
 0x857   :  { %9450 = vmatmul.mubr.msk.f32.gmra.mrb[38].mxu1 %vm8484_vm8, %v8626_v28 }
 0x858   :  { %v8614_v63 = vpop.f32.mrb[34].mxu1  ;;  %9452 = vmatprep.mubr.msk.f32.mxu1 %vm15963_vm7, %v15932_v46  ;;  %vm8746_vm7 = vcmask 7168  }
 0x859   :  { %v8615_v44 = vadd.f32 %v9182_v41, %v8614_v63  ;;  %v8616_v62 = vpop.f32.mrb[35].mxu1 }
 0x85b   :  { %vm8620_vm15 = vcmp.gt.f32.partialorder %v8615_v44, 0.0  ;;  %v8624_v13 = vmul.f32 %v8621_v49, %v8615_v44 }
 0x85d   :  { %v8627_v25 = vsel %vm8620_vm15, %v8615_v44, %v8624_v13 }
 0x85e   :  { %9453 = vmatmul.mubr.msk.f32.gmra.mrb[40].mxu1 %vm8484_vm8, %v8627_v25  ;;  %vm9033_vm8 = vcmask 39936  }
 0x926   :  { %v8714_v20 = vpop.f32.mrb[36].mxu1 }
 0x927   :  { %v8715_v2 = vadd.f32 %v9186_v50, %v8714_v20  ;;  %v9448_v24 = vpop.f32.mrb[37].mxu1 }
 0x929   :  { %v9190_v42 = vmul.f32 -1.442695, %v8715_v2 }
 0x92a   :  { %v8719_v14 = vpop.f32.mrb[38].mxu1 }
 0x92b   :  { %9588 = vpow2.f32 %v9190_v42  ;;  %v8720_v35 = vadd.f32 %v9186_v50, %v8719_v14  ;;  %v9451_v17 = vpop.f32.mrb[39].mxu1 }
 0x92d   :  { %v9191_v46 = vmul.f32 -1.442695, %v8720_v35 }
 0x92f   :  { %9590 = vpow2.f32 %v9191_v46 }
 0x931   :  { %v8724_v54 = vpop.f32.mrb[40].mxu1 }
 0x932   :  { %v8725_v29 = vadd.f32 %v9186_v50, %v8724_v54  ;;  %v9454_v60 = vpop.f32.mrb[41].mxu1 }
 0x934   :  { %v9192_v47 = vmul.f32 -1.442695, %v8725_v29 }
 0x935   :  { %v9589_v21 = vpop.eup %9588 }
 0x936   :  { %v8737_v7 = vadd.f32 1.0, %v9589_v21  ;;  %9592 = vpow2.f32 %v9192_v47 }
 0x938   :  { %9594 = vrcp.f32 %v8737_v7 }
 0x939   :  { %v9591_v11 = vpop.eup %9590 }
 0x93a   :  { %v8738_v55 = vadd.f32 1.0, %v9591_v11 }
 0x93c   :  { %9596 = vrcp.f32 %v8738_v55 }
 0x940   :  { %v9593_v4 = vpop.eup %9592 }
 0x941   :  { %v8739_v30 = vadd.f32 1.0, %v9593_v4 }
 0x942   :  { %v9595_v58 = vpop.eup %9594 }
 0x943   :  { %v8747_v16 = vsel %vm8746_vm7, %v9595_v58, %v8715_v2  ;;  %9598 = vrcp.f32 %v8739_v30 }
 0x944   :  { %v8753_v10 = vcombine.high %v8747_v16, %v8747_v16  ;;  %v8760_v38 = vrot.slane %v8747_v16, %v11122_v9 }
 0x946   :  { %v9597_v5 = vpop.eup %9596  ;;  %v8767_v32 = vrot.slane %v8753_v10, %v11122_v9  ;;  %v8768_v3 = vcombine.high %v8760_v38, %v8760_v38  ;;  %v8776_v0 = vrot.slane %v8760_v38, %v11122_v9 }
 0x947   :  { %v8748_v33 = vsel %vm8746_vm7, %v9597_v5, %v8720_v35 }
 0x948   :  { %v8769_v8 = vcombine.high %v8767_v32, %v8767_v32  ;;  %v8790_v34 = vrot.slane %v8768_v3, %v11122_v9  ;;  %v8802_v15 = vcombine.high %v8748_v33, %v8748_v33  ;;  %v8809_v6 = vrot.slane %v8748_v33, %v11122_v9 }
 0x949   :  { %v8783_v45 = vrot.slane %v8767_v32, %v11122_v9 }
 0x94a   :  { %v8816_v43 = vrot.slane %v8802_v15, %v11122_v9  ;;  %v8817_v27 = vcombine.high %v8809_v6, %v8809_v6  ;;  %v8825_v59 = vrot.slane %v8809_v6, %v11122_v9  ;;  %v8797_v48 = vrot.slane %v8769_v8, %v11122_v9 }
 0x94b   :  { %v8800_v57 = vcombine.high %v8790_v34, %v8790_v34 }
 0x94c   :  { %v8818_v51 = vcombine.high %v8816_v43, %v8816_v43  ;;  %v8832_v53 = vrot.slane %v8816_v43, %v11122_v9  ;;  %v8839_v61 = vrot.slane %v8817_v27, %v11122_v9  ;;  %v8847_v1 = vcombine.high %v8825_v59, %v8825_v59 }
 0x94d   :  { %v9599_v26 = vpop.eup %9598  ;;  %v8801_v36 = vcombine.high %v8797_v48, %v8797_v48 }
 0x94e   :  { %v8846_v56 = vrot.slane %v8818_v51, %v11122_v9  ;;  %v8848_v19 = vcombine.high %v8832_v53, %v8832_v53  ;;  %v8749_v37 = vsel %vm8746_vm7, %v9599_v26, %v8725_v29  ;;  %v8925_v41 = vcombine.low %v8800_v57, %v8832_v53 }
 0x94f   :  { %v8857_v12 = vrot.slane %v8749_v37, %v11122_v9  ;;  %v8889_v49 = vcombine.low %v8790_v34, %v8847_v1  ;;  %v9193_v52 = vcombine.high %v8776_v0, %v8839_v61  ;;  %v8873_v31 = vcombine.low %v8776_v0, %v8839_v61 }
 0x950   :  { %v8943_v40 = vcombine.low %v8783_v45, %v8846_v56  ;;  %v8961_v23 = vcombine.low %v8797_v48, %v8848_v19  ;;  %v9194_v18 = vcombine.high %v8783_v45, %v8846_v56  ;;  %v8932_v44 = vrot.slane %v8925_v41, %v11122_v9 }
 0x951   :  { %v8858_v39 = vcombine.high %v8857_v12, %v8857_v12  ;;  %v8865_v22 = vrot.slane %v8857_v12, %v11122_v9  ;;  %v8896_v28 = vrot.slane %v8889_v49, %v11122_v9  ;;  %v8914_v63 = vrot.slane %v9193_v52, %v11122_v9 }
 0x952   :  { %v8950_v62 = vrot.slane %v8943_v40, %v11122_v9  ;;  %v8939_v24 = vrot.slane %v8932_v44, %v11122_v9  ;;  %v8968_v14 = vrot.slane %v8961_v23, %v11122_v9  ;;  %v8986_v35 = vrot.slane %v9194_v18, %v11122_v9 }
 0x953   :  { %v8872_v13 = vrot.slane %v8858_v39, %v11122_v9  ;;  %v8997_v25 = vcombine.low %v8801_v36, %v8865_v22  ;;  %v8903_v50 = vrot.slane %v8896_v28, %v11122_v9  ;;  %v8921_v20 = vrot.slane %v8914_v63, %v11122_v9 }
 0x954   :  { %v8957_v42 = vrot.slane %v8950_v62, %v11122_v9  ;;  %v8975_v17 = vrot.slane %v8968_v14, %v11122_v9  ;;  %v8993_v46 = vrot.slane %v8986_v35, %v11122_v9  ;;  %v8880_v21 = vrot.slane %v8873_v31, %v11122_v9 }
 0x955   :  { %8904 = vrot.lane.b32.xlu0 %v8903_v50, %s9708_s9  ;;  %8922 = vrot.lane.b32.xlu1 %v8921_v20, %s9693_s15  ;;  %v9015_v2 = vcombine.low %v8825_v59, %v8872_v13  ;;  %v9004_v54 = vrot.slane %v8997_v25, %v11122_v9  ;;  %s9709_s15 = smov 25  }
 0x956   :  { %v8887_v7 = vrot.slane %v8880_v21, %v11122_v9 }
 0x957   :  { %v9022_v29 = vrot.slane %v9015_v2, %v11122_v9  ;;  %v9011_v60 = vrot.slane %v9004_v54, %v11122_v9 }
 0x959   :  { %8940 = vrot.lane.b32.xlu0 %v8939_v24, %s9686_s22  ;;  %8958 = vrot.lane.b32.xlu1 %v8957_v42, %s9694_s26  ;;  %v9029_v47 = vrot.slane %v9022_v29, %v11122_v9  ;;  %s9711_s22 = smov [#allocation6]  }
 0x95a   :  { %s9052_s26 = sshll.u32 %s9711_s22, 4  ;;  %s9053_s26 = int_to_ptr.vmem [resolvable:$true] %s9052_s26 }
 0x95b   :  { %p9659_p6 = scmp.lt.s32.totalorder %s9053_s26, %s9053_s26 }
 0x95d   :  { %8976 = vrot.lane.b32.xlu0 %v8975_v17, %s9709_s15  ;;  %8994 = vrot.lane.b32.xlu1 %v8993_v46, %s9695_s12  ;;  %s9654_s12 = scalar_lea.vmem %s9053_s26, 32 }
 0x95e   :  { %p9655_p5 = scmp.ne.s32.totalorder %s9053_s26, %s9654_s12  ;;  %p9660_p7 = scmp.lt.s32.totalorder %s9654_s12, %s9654_s12 }
 0x960   :  { %p9661_p8 = por %p9660_p7, %p9659_p6 }
 0x961   :  { %9012 = vrot.lane.b32.xlu0 %v9011_v60, %s9710_s21  ;;  %9030 = vrot.lane.b32.xlu1 %v9029_v47, %s9696_s19 }
 0x962   :  { %p9662_p9 = pnand %p9661_p8, %p9655_p5 }
 0x9c7   :  { %v8905_v11 = vpop.permute.xlu0 %8904  ;;  %v8923_v55 = vpop.permute.xlu1 %8922 }
 0x9c8   :  { %v9034_v4 = vsel %vm9033_vm8, %v8887_v7, %v8905_v11 }
 0x9c9   :  { %v9035_v30 = vsel %vm6988_vm11, %v9034_v4, %v8923_v55 }
 0x9cb   :  { %v8941_v58 = vpop.permute.xlu0 %8940  ;;  %v8959_v16 = vpop.permute.xlu1 %8958 }
 0x9cc   :  { %v9036_v10 = vsel %vm15972_vm3, %v9035_v30, %v8941_v58 }
 0x9cd   :  { %v9037_v38 = vsel %vm6996_vm12, %v9036_v10, %v8959_v16 }
 0x9cf   :  { %v8977_v5 = vpop.permute.xlu0 %8976  ;;  %v8995_v32 = vpop.permute.xlu1 %8994 }
 0x9d0   :  { %v9039_v3 = vsel %vm9038_vm10, %v9037_v38, %v8977_v5 }
 0x9d1   :  { %v9040_v9 = vsel %vm7004_vm13, %v9039_v3, %v8995_v32 }
 0x9d3   :  { %v9013_v33 = vpop.permute.xlu0 %9012  ;;  %v9031_v8 = vpop.permute.xlu1 %9030 }
 0x9d4   :  { %v9042_v34 = vsel %vm9041_vm2, %v9040_v9, %v9013_v33 }
 0x9d5   :  { %v9043_v15 = vsel %vm7012_vm14, %v9042_v34, %v9031_v8 }
 0x9d6   :  { %9045 = vst.msk [vmem:[#allocation6] sm:$0x3] %vm9044_vm9, %v9043_v15 }
 0x9d7   :  { %9665 = shalt.err (!%p9662_p9)
}
 0x9d8   :  { %s9666_s28 = scalar_lea.hbm %s15671_s10, 32 }
 0x9d9   :  { %p9667_p10 = scmp.ne.s32.totalorder %s15671_s10, %s9666_s28  ;;  %p9670_p11 = scmp.lt.u32.totalorder %s9666_s28, %s15671_s10 }
 0x9db   :  { %p9672_p12 = pnand %p9670_p11, %p9667_p10 }
 0x9dd   :  { %9675 = shalt.err (!%p9672_p12)
}
 0x9de   :  { %9055 = dma.vmem_to_hbm [thread:$0]  %s9053_s26, 32, %s15671_s10, [#allocation4]  }
 0x9df   :  { %9678 = dma.done.wait [#allocation4], 32  }
 0x9e0   :  { %9679 = vsyncadd [#allocation4], 4294967264 }
 0x9e1   :  { %9059 = vsyncpa [#allocation4], 1 }
 0x9e2   :  { %9060 = vsyncpa [#allocation5], 1 }

</bundles_post_ra>
